<compile_context>
chip_gen: v5e
topology: v5e:2x2
jax: 0.10.0
libtpu: 0.0.40
codegen_flags: <defaults>
</compile_context>

<pallas_src>
import jax
import jax.numpy as jnp
from jax.experimental import pallas as pl
from jax.experimental.pallas import tpu as pltpu

NEG_SLOPE = 0.05   # LeakyReLU slope used by IMDModule
_PADL = 8          # left offset of the conv interior inside the halo scratch (sublane-aligned)


def _leaky_relu(x, slope=NEG_SLOPE):
    return jnp.where(x >= 0, x, x * slope)


# ---------------------------------------------------------------------------
# Fused ResidualGroup kernel: n_blocks * (c1..c4 + CALayer + c5 + skip) + tail conv
# ---------------------------------------------------------------------------
def _make_group_kernel(n_blocks, dc, mm_dtype):
    def kernel(x_ref,
               w1_ref, b1_ref, w2_ref, b2_ref, w3_ref, b3_ref, w4_ref, b4_ref,
               caw1_ref, cab1_ref, caw2_ref, cab2_ref, w5_ref, b5_ref,
               tw_ref, tb_ref,
               o_ref, pad_ref):
        _, H, W, C = x_ref.shape
        Wp = pad_ref.shape[1]
        f32 = jnp.float32

        # Zero only the halo cells (top/bottom rows, left/right column bands).
        # The interior is fully rewritten before every read, so re-zeroing the whole
        # buffer each step (previous version) was pure wasted vst traffic.  The halo
        # is re-zeroed per grid step because each megacore TC has its own scratch.
        pad_ref[0:1] = jnp.zeros((1, Wp, C), mm_dtype)
        pad_ref[H + 1:H + 2] = jnp.zeros((1, Wp, C), mm_dtype)
        pad_ref[:, 0:_PADL, :] = jnp.zeros((H + 2, _PADL, C), mm_dtype)
        pad_ref[:, _PADL + W:, :] = jnp.zeros((H + 2, Wp - _PADL - W, C), mm_dtype)

        def conv3x3(t_hwc, w_tap, b_row):
            """3x3 conv, stride 1, pad 1 (im2col, per-ky accumulation).

            t_hwc: (H, W, cin) f32 activation.
            w_tap: (3, 3*cin, cout) mm_dtype weight; within a ky chunk rows are
                   kx-major, cin-minor.
            b_row: (1, cout) f32 bias.
            """
            cin = t_hwc.shape[-1]
            # Store only the channels actually read by this conv (feedback item).
            pad_ref[1:H + 1, _PADL:_PADL + W, :cin] = t_hwc.astype(mm_dtype)
            xp = pad_ref[...][..., :cin]                     # (H+2, Wp, cin)
            acc = None
            # TODO(synk): generate the kx = 0/2 windows with pltpu.roll (XLU slot)
            # instead of unaligned sublane slices once packed-bf16 sublane rotate is
            # verified on all target generations.
            for ky in range(3):
                rows = xp[ky:ky + H]                         # (H, Wp, cin)
                wins = [rows[:, _PADL - 1 + kx:_PADL - 1 + kx + W, :]
                        for kx in range(3)]
                patch = jnp.concatenate(wins, axis=-1)       # (H, W, 3*cin)
                part = jax.lax.dot_general(
                    patch, w_tap[ky], (((2,), (0,)), ((), ())),
                    preferred_element_type=f32)              # (H, W, cout)
                acc = part if acc is None else acc + part
            return acc + b_row[0][None, None, :].astype(f32)

        x0 = x_ref[0].astype(f32)                            # (H, W, C)
        res = x0
        inv_hw = 1.0 / float(H * W)

        for blk in range(n_blocks):
            o1 = _leaky_relu(conv3x3(res, w1_ref[blk], b1_ref[blk]))
            d1, r1 = o1[..., :dc], o1[..., dc:]
            o2 = _leaky_relu(conv3x3(r1, w2_ref[blk], b2_ref[blk]))
            d2, r2 = o2[..., :dc], o2[..., dc:]
            o3 = _leaky_relu(conv3x3(r2, w3_ref[blk], b3_ref[blk]))
            d3, r3 = o3[..., :dc], o3[..., dc:]
            o4 = _leaky_relu(conv3x3(r3, w4_ref[blk], b4_ref[blk]))
            chunks = (d1, d2, d3, o4)                        # == channel-split of `out`

            # CALayer global average pool, computed per chunk (concat only at (1, C)).
            pooled = []
            for c in chunks:
                s = jnp.sum(c, axis=0)                                   # (W, dc)
                pooled.append(jnp.sum(s, axis=0, keepdims=True) * inv_hw)  # (1, dc)
            y = jnp.concatenate(pooled, axis=-1)                         # (1, C)
            y = jnp.maximum(
                jnp.dot(y.astype(mm_dtype), caw1_ref[blk],
                        preferred_element_type=f32) + cab1_ref[blk], 0.0)
            y = jax.nn.sigmoid(
                jnp.dot(y.astype(mm_dtype), caw2_ref[blk],
                        preferred_element_type=f32) + cab2_ref[blk])     # (1, C)

            # Gate each chunk by its y slice and accumulate c5 (1x1 conv) per chunk:
            # never materialises the (H, W, C) concat of [d1, d2, d3, o4].
            w5 = w5_ref[blk]                                             # (C, C)
            acc = None
            for i, c in enumerate(chunks):
                gate = y[:, i * dc:(i + 1) * dc].reshape(1, 1, dc)
                g = (c * gate).astype(mm_dtype)
                part = jax.lax.dot_general(
                    g, w5[i * dc:(i + 1) * dc, :], (((2,), (0,)), ((), ())),
                    preferred_element_type=f32)
                acc = part if acc is None else acc + part
            res = acc + b5_ref[blk][0][None, None, :] + res              # IMD skip-add

        # Tail 3x3 conv (no activation) + group residual, fused into the same kernel.
        out = conv3x3(res, tw_ref[...], tb_ref[...]) + x0
        o_ref[0] = out.astype(o_ref.dtype)

    return kernel


# ---------------------------------------------------------------------------
# Wrapper
# ---------------------------------------------------------------------------
def _const_spec(a):
    zeros = (0,) * a.ndim
    return pl.BlockSpec(a.shape, lambda n, _z=zeros: _z)


def residual_group_forward(x_nhwc, params, mm_dtype=jnp.bfloat16):
    """ResidualGroup forward in NHWC.  The whole group runs in one pallas_call;
    mm_dtype (default bf16) is the dtype fed to the MXU, everything else is f32."""
    N, H, W, C = x_nhwc.shape
    blocks = params["blocks"]
    nb = len(blocks)
    dc = int(blocks[0]["c4_w"].shape[-1])
    rc = C - dc
    assert 4 * dc == C and blocks[0]["c2_w"].shape[1] == rc, \
        "IMD channel split must tile n_feat"

    f32 = jnp.float32

    # NOTE: synthetic weights are (taps, cin, cout) with tap index ky*3 + kx.  Real
    # PyTorch Conv2d weights are (cout, cin, kh, kw) and must be permuted to
    # (kh, kw, cin, cout) before this reshape.
    def stack_w(key, cin):
        a = jnp.stack([b[key] for b in blocks], axis=0)      # (nb, 9, cin, cout)
        return a.reshape(nb, 3, 3 * cin, a.shape[-1]).astype(mm_dtype)

    def stack_m(key):                                        # 1x1-conv style weights
        return jnp.stack([b[key] for b in blocks], axis=0).astype(mm_dtype)

    def stack_b(key):
        return jnp.stack([b[key][None, :] for b in blocks], axis=0).astype(f32)

    w1, w2, w3, w4 = (stack_w("c1_w", C), stack_w("c2_w", rc),
                      stack_w("c3_w", rc), stack_w("c4_w", rc))
    b1, b2, b3, b4 = (stack_b("c1_b"), stack_b("c2_b"),
                      stack_b("c3_b"), stack_b("c4_b"))
    caw1, caw2, w5 = stack_m("ca_w1"), stack_m("ca_w2"), stack_m("c5_w")
    cab1, cab2, b5 = stack_b("ca_b1"), stack_b("ca_b2"), stack_b("c5_b")
    tw = params["tail_w"].reshape(3, 3 * C, C).astype(mm_dtype)
    tb = params["tail_b"][None, :].astype(f32)

    pargs = (w1, b1, w2, b2, w3, b3, w4, b4,
             caw1, cab1, caw2, cab2, w5, b5, tw, tb)

    wp = _PADL + ((W + 1 + 7) // 8) * 8          # halo'd scratch width (sublane aligned)
    io_spec = pl.BlockSpec((1, H, W, C), lambda n: (n, 0, 0, 0))

    return pl.pallas_call(
        _make_group_kernel(nb, dc, mm_dtype),
        out_shape=jax.ShapeDtypeStruct((N, H, W, C), x_nhwc.dtype),
        grid=(N,),
        in_specs=[io_spec] + [_const_spec(a) for a in pargs],
        out_specs=io_spec,
        scratch_shapes=[pltpu.VMEM((H + 2, wp, C), mm_dtype)],
        compiler_params=pltpu.CompilerParams(
            dimension_semantics=("parallel",),   # batch axis feeds both TCs on megacore
            # Explicit scoped-VMEM budget (safe on v5e/v6e/v7x for these working sets);
            # re-derive together with the row-tile size once spatial tiling lands.
            vmem_limit_bytes=32 * 1024 * 1024),
    )(x_nhwc, *pargs)


# ---------------------------------------------------------------------------
# Pure-JAX f32 reference (mirrors the PyTorch module, NHWC)
# ---------------------------------------------------------------------------
def _conv3x3_ref(x, w9, b):
    w = w9.reshape(3, 3, w9.shape[1], w9.shape[2])
    y = jax.lax.conv_general_dilated(
        x, w, window_strides=(1, 1), padding="SAME",
        dimension_numbers=("NHWC", "HWIO", "NHWC"))
    return y + b


def _imd_ref(x, p):
    dc = p["c4_w"].shape[-1]
    o1 = _leaky_relu(_conv3x3_ref(x, p["c1_w"], p["c1_b"]))
    d1, r1 = o1[..., :dc], o1[..., dc:]
    o2 = _leaky_relu(_conv3x3_ref(r1, p["c2_w"], p["c2_b"]))
    d2, r2 = o2[..., :dc], o2[..., dc:]
    o3 = _leaky_relu(_conv3x3_ref(r2, p["c3_w"], p["c3_b"]))
    d3, r3 = o3[..., :dc], o3[..., dc:]
    o4 = _leaky_relu(_conv3x3_ref(r3, p["c4_w"], p["c4_b"]))
    out = jnp.concatenate([d1, d2, d3, o4], axis=-1)
    y = jnp.mean(out, axis=(1, 2), keepdims=True)
    y = jnp.maximum(jnp.einsum("nhwc,cr->nhwr", y, p["ca_w1"]) + p["ca_b1"], 0.0)
    y = jax.nn.sigmoid(jnp.einsum("nhwr,rc->nhwc", y, p["ca_w2"]) + p["ca_b2"])
    res = jnp.einsum("nhwc,cd->nhwd", out * y, p["c5_w"]) + p["c5_b"]
    return res + x


def _residual_group_ref(x, params):
    r = x
    for p in params["blocks"]:
        r = _imd_ref(r, p)
    return _conv3x3_ref(r, params["tail_w"], params["tail_b"]) + x


# ---------------------------------------------------------------------------
# Deterministic synthetic parameter init (matching PyTorch module shapes)
# ---------------------------------------------------------------------------
def _conv_weights(key, taps, cin, cout, w_scale=0.1, b_scale=0.01):
    kw, kb = jax.random.split(key)
    w = jax.random.normal(kw, (taps, cin, cout), jnp.float32) * w_scale
    b = jax.random.normal(kb, (cout,), jnp.float32) * b_scale
    return (w if taps > 1 else w[0]), b


def init_params(key, n_feat, n_resblocks, reduction=8, distillation_rate=0.25):
    dc = int(n_feat * distillation_rate)
    rc = n_feat - dc
    cr = n_feat // reduction
    blocks = []
    keys = jax.random.split(key, n_resblocks + 1)
    for bk in keys[:-1]:
        k = jax.random.split(bk, 7)
        c1_w, c1_b = _conv_weights(k[0], 9, n_feat, n_feat)
        c2_w, c2_b = _conv_weights(k[1], 9, rc, n_feat)
        c3_w, c3_b = _conv_weights(k[2], 9, rc, n_feat)
        c4_w, c4_b = _conv_weights(k[3], 9, rc, dc)
        c5_w, c5_b = _conv_weights(k[4], 1, n_feat, n_feat)
        ca_w1, ca_b1 = _conv_weights(k[5], 1, n_feat, cr)
        ca_w2, ca_b2 = _conv_weights(k[6], 1, cr, n_feat)
        blocks.append(dict(c1_w=c1_w, c1_b=c1_b, c2_w=c2_w, c2_b=c2_b,
                           c3_w=c3_w, c3_b=c3_b, c4_w=c4_w, c4_b=c4_b,
                           c5_w=c5_w, c5_b=c5_b,
                           ca_w1=ca_w1, ca_b1=ca_b1,
                           ca_w2=ca_w2, ca_b2=ca_b2))
    tail_w, tail_b = _conv_weights(keys[-1], 9, n_feat, n_feat)
    return dict(blocks=blocks, tail_w=tail_w, tail_b=tail_b)


if __name__ == "__main__":
    # Small shapes consistent with the module: n_feat=16 (divisible by reduction=8
    # and by 4 for the distillation split), n_resblocks=2, batch=2, spatial 8x8.
    N, C, H, W = 2, 16, 8, 8
    n_resblocks = 2

    key = jax.random.PRNGKey(0)
    kx, kp = jax.random.split(key)
    x_nchw = jax.random.normal(kx, (N, C, H, W), jnp.float32)
    params = init_params(kp, C, n_resblocks)

    @jax.jit
    def fwd(x, p):
        x_nhwc = jnp.transpose(x, (0, 2, 3, 1))          # NCHW -> NHWC
        y_nhwc = residual_group_forward(x_nhwc, p)       # default bf16 MXU path
        return jnp.transpose(y_nhwc, (0, 3, 1, 2))       # back to NCHW

    y_nchw = fwd(x_nchw, params)
    jax.block_until_ready(y_nchw)
    assert y_nchw.shape == (N, C, H, W)

    # Sanity check against the pure-JAX f32 reference (bf16 MXU => loose tolerance).
    y_ref = jnp.transpose(
        _residual_group_ref(jnp.transpose(x_nchw, (0, 2, 3, 1)), params),
        (0, 3, 1, 2))
    rel = float(jnp.mean(jnp.abs(y_nchw - y_ref))) / (float(jnp.mean(jnp.abs(y_ref))) + 1e-6)
    assert rel < 0.1, f"kernel deviates from f32 reference: mean rel err {rel:.4f}"

    print("KERNEL_OK")
</pallas_src>

<mosaic_0001>
module attributes {stable_mosaic.version = 11 : i64} {
  func.func @kernel(%arg0: i32, %arg1: memref<1x8x8x16xf32, #tpu.memory_space<vmem>>, %arg2: memref<2x3x48x16xbf16, #tpu.memory_space<vmem>>, %arg3: memref<2x1x16xf32, #tpu.memory_space<vmem>>, %arg4: memref<2x3x36x16xbf16, #tpu.memory_space<vmem>>, %arg5: memref<2x1x16xf32, #tpu.memory_space<vmem>>, %arg6: memref<2x3x36x16xbf16, #tpu.memory_space<vmem>>, %arg7: memref<2x1x16xf32, #tpu.memory_space<vmem>>, %arg8: memref<2x3x36x4xbf16, #tpu.memory_space<vmem>>, %arg9: memref<2x1x4xf32, #tpu.memory_space<vmem>>, %arg10: memref<2x16x2xbf16, #tpu.memory_space<vmem>>, %arg11: memref<2x1x2xf32, #tpu.memory_space<vmem>>, %arg12: memref<2x2x16xbf16, #tpu.memory_space<vmem>>, %arg13: memref<2x1x16xf32, #tpu.memory_space<vmem>>, %arg14: memref<2x16x16xbf16, #tpu.memory_space<vmem>>, %arg15: memref<2x1x16xf32, #tpu.memory_space<vmem>>, %arg16: memref<3x48x16xbf16, #tpu.memory_space<vmem>>, %arg17: memref<1x16xf32, #tpu.memory_space<vmem>>, %arg18: memref<1x8x8x16xf32, #tpu.memory_space<vmem>>, %arg19: memref<10x24x16xbf16, #tpu.memory_space<vmem>>) attributes {dimension_semantics = [#tpu.dimension_semantics<parallel>], iteration_bounds = array<i64: 2>, scalar_prefetch = 0 : i64, scratch_operands = 1 : i64, tpu.core_type = #tpu.core_type<tc>, window_params = [{transform_indices = @transform_0, window_bounds = array<i64: 1, 8, 8, 16>}, {pipeline_mode = #tpu.pipeline_mode<synchronous>, transform_indices = @transform_1, window_bounds = array<i64: 2, 3, 48, 16>}, {pipeline_mode = #tpu.pipeline_mode<synchronous>, transform_indices = @transform_2, window_bounds = array<i64: 2, 1, 16>}, {pipeline_mode = #tpu.pipeline_mode<synchronous>, transform_indices = @transform_3, window_bounds = array<i64: 2, 3, 36, 16>}, {pipeline_mode = #tpu.pipeline_mode<synchronous>, transform_indices = @transform_4, window_bounds = array<i64: 2, 1, 16>}, {pipeline_mode = #tpu.pipeline_mode<synchronous>, transform_indices = @transform_5, window_bounds = array<i64: 2, 3, 36, 16>}, {pipeline_mode = #tpu.pipeline_mode<synchronous>, transform_indices = @transform_6, window_bounds = array<i64: 2, 1, 16>}, {pipeline_mode = #tpu.pipeline_mode<synchronous>, transform_indices = @transform_7, window_bounds = array<i64: 2, 3, 36, 4>}, {pipeline_mode = #tpu.pipeline_mode<synchronous>, transform_indices = @transform_8, window_bounds = array<i64: 2, 1, 4>}, {pipeline_mode = #tpu.pipeline_mode<synchronous>, transform_indices = @transform_9, window_bounds = array<i64: 2, 16, 2>}, {pipeline_mode = #tpu.pipeline_mode<synchronous>, transform_indices = @transform_10, window_bounds = array<i64: 2, 1, 2>}, {pipeline_mode = #tpu.pipeline_mode<synchronous>, transform_indices = @transform_11, window_bounds = array<i64: 2, 2, 16>}, {pipeline_mode = #tpu.pipeline_mode<synchronous>, transform_indices = @transform_12, window_bounds = array<i64: 2, 1, 16>}, {pipeline_mode = #tpu.pipeline_mode<synchronous>, transform_indices = @transform_13, window_bounds = array<i64: 2, 16, 16>}, {pipeline_mode = #tpu.pipeline_mode<synchronous>, transform_indices = @transform_14, window_bounds = array<i64: 2, 1, 16>}, {pipeline_mode = #tpu.pipeline_mode<synchronous>, transform_indices = @transform_15, window_bounds = array<i64: 3, 48, 16>}, {pipeline_mode = #tpu.pipeline_mode<synchronous>, transform_indices = @transform_16, window_bounds = array<i64: 1, 16>}, {transform_indices = @transform_17, window_bounds = array<i64: 1, 8, 8, 16>}]} {
    %cst = arith.constant 0.000000e+00 : bf16
    %0 = vector.broadcast %cst : bf16 to vector<1x24x16xbf16>
    %c0 = arith.constant 0 : index
    %c0_0 = arith.constant 0 : index
    %c0_1 = arith.constant 0 : index
    %1 = vector.load %arg19[%c0, %c0_0, %c0_1] : memref<10x24x16xbf16, #tpu.memory_space<vmem>>, vector<1x24x16xbf16>
    tpu.vector_store %arg19[%c0, %c0_0, %c0_1], %0 {strides = array<i32>} : memref<10x24x16xbf16, #tpu.memory_space<vmem>>, vector<1x24x16xbf16>,
    %cst_2 = arith.constant 0.000000e+00 : bf16
    %2 = vector.broadcast %cst_2 : bf16 to vector<1x24x16xbf16>
    %c9 = arith.constant 9 : index
    %c0_3 = arith.constant 0 : index
    %c0_4 = arith.constant 0 : index
    %3 = vector.load %arg19[%c9, %c0_3, %c0_4] : memref<10x24x16xbf16, #tpu.memory_space<vmem>>, vector<1x24x16xbf16>
    tpu.vector_store %arg19[%c9, %c0_3, %c0_4], %2 {strides = array<i32>} : memref<10x24x16xbf16, #tpu.memory_space<vmem>>, vector<1x24x16xbf16>,
    %cst_5 = arith.constant 0.000000e+00 : bf16
    %4 = vector.broadcast %cst_5 : bf16 to vector<10x8x16xbf16>
    %c0_6 = arith.constant 0 : index
    %c0_7 = arith.constant 0 : index
    %c0_8 = arith.constant 0 : index
    %5 = vector.load %arg19[%c0_6, %c0_7, %c0_8] : memref<10x24x16xbf16, #tpu.memory_space<vmem>>, vector<10x8x16xbf16>
    tpu.vector_store %arg19[%c0_6, %c0_7, %c0_8], %4 {strides = array<i32>} : memref<10x24x16xbf16, #tpu.memory_space<vmem>>, vector<10x8x16xbf16>,
    %cst_9 = arith.constant 0.000000e+00 : bf16
    %6 = vector.broadcast %cst_9 : bf16 to vector<10x8x16xbf16>
    %c0_10 = arith.constant 0 : index
    %c16 = arith.constant 16 : index
    %c0_11 = arith.constant 0 : index
    %7 = vector.load %arg19[%c0_10, %c16, %c0_11] : memref<10x24x16xbf16, #tpu.memory_space<vmem>>, vector<10x8x16xbf16>
    tpu.vector_store %arg19[%c0_10, %c16, %c0_11], %6 {strides = array<i32>} : memref<10x24x16xbf16, #tpu.memory_space<vmem>>, vector<10x8x16xbf16>,
    %c0_12 = arith.constant 0 : index
    %c0_13 = arith.constant 0 : index
    %c0_14 = arith.constant 0 : index
    %c0_15 = arith.constant 0 : index
    %8 = vector.load %arg1[%c0_12, %c0_13, %c0_14, %c0_15] : memref<1x8x8x16xf32, #tpu.memory_space<vmem>>, vector<1x8x8x16xf32>
    %9 = vector.shape_cast %8 : vector<1x8x8x16xf32> to vector<8x8x16xf32>
    %c0_16 = arith.constant 0 : index
    %c0_17 = arith.constant 0 : index
    %c0_18 = arith.constant 0 : index
    %c0_19 = arith.constant 0 : index
    %10 = vector.load %arg2[%c0_16, %c0_17, %c0_18, %c0_19] : memref<2x3x48x16xbf16, #tpu.memory_space<vmem>>, vector<1x3x48x16xbf16>
    %11 = vector.shape_cast %10 : vector<1x3x48x16xbf16> to vector<3x48x16xbf16>
    %c0_20 = arith.constant 0 : index
    %c0_21 = arith.constant 0 : index
    %c0_22 = arith.constant 0 : index
    %12 = vector.load %arg3[%c0_20, %c0_21, %c0_22] : memref<2x1x16xf32, #tpu.memory_space<vmem>>, vector<1x1x16xf32>
    %13 = vector.shape_cast %12 : vector<1x1x16xf32> to vector<1x16xf32>
    %14 = arith.truncf %9 : vector<8x8x16xf32> to vector<8x8x16xbf16>
    %c1 = arith.constant 1 : index
    %c8 = arith.constant 8 : index
    %c0_23 = arith.constant 0 : index
    %15 = vector.load %arg19[%c1, %c8, %c0_23] : memref<10x24x16xbf16, #tpu.memory_space<vmem>>, vector<8x8x16xbf16>
    tpu.vector_store %arg19[%c1, %c8, %c0_23], %14 {strides = array<i32>} : memref<10x24x16xbf16, #tpu.memory_space<vmem>>, vector<8x8x16xbf16>,
    %c0_24 = arith.constant 0 : index
    %c0_25 = arith.constant 0 : index
    %c0_26 = arith.constant 0 : index
    %16 = vector.load %arg19[%c0_24, %c0_25, %c0_26] : memref<10x24x16xbf16, #tpu.memory_space<vmem>>, vector<10x24x16xbf16>
    %17 = vector.extract_strided_slice %16 {offsets = [0, 0, 0], sizes = [8, 24, 16], strides = [1, 1, 1]} : vector<10x24x16xbf16> to vector<8x24x16xbf16>
    %18 = vector.extract_strided_slice %17 {offsets = [0, 7, 0], sizes = [8, 8, 16], strides = [1, 1, 1]} : vector<8x24x16xbf16> to vector<8x8x16xbf16>
    %19 = vector.extract_strided_slice %17 {offsets = [0, 8, 0], sizes = [8, 8, 16], strides = [1, 1, 1]} : vector<8x24x16xbf16> to vector<8x8x16xbf16>
    %20 = vector.extract_strided_slice %17 {offsets = [0, 9, 0], sizes = [8, 8, 16], strides = [1, 1, 1]} : vector<8x24x16xbf16> to vector<8x8x16xbf16>
    %21 = tpu.concatenate %18, %19, %20 in 2 : vector<8x8x16xbf16>, vector<8x8x16xbf16>, vector<8x8x16xbf16> -> vector<8x8x48xbf16>
    %22 = vector.extract_strided_slice %11 {offsets = [0, 0, 0], sizes = [1, 48, 16], strides = [1, 1, 1]} : vector<3x48x16xbf16> to vector<1x48x16xbf16>
    %23 = vector.shape_cast %22 : vector<1x48x16xbf16> to vector<48x16xbf16>
    %cst_27 = arith.constant dense<0.000000e+00> : vector<8x8x16xf32>
    %24 = tpu.matmul %21, %23, %cst_27 {dimension_numbers = #tpu.dot_dimension_numbers<[2], [0], [0, 1], [1], [0, 0, 0, 1, 1, 1], [], []>} : vector<8x8x48xbf16>, vector<48x16xbf16>, vector<8x8x16xf32> -> vector<8x8x16xf32>
    %25 = vector.extract_strided_slice %16 {offsets = [1, 0, 0], sizes = [8, 24, 16], strides = [1, 1, 1]} : vector<10x24x16xbf16> to vector<8x24x16xbf16>
    %26 = vector.extract_strided_slice %25 {offsets = [0, 7, 0], sizes = [8, 8, 16], strides = [1, 1, 1]} : vector<8x24x16xbf16> to vector<8x8x16xbf16>
    %27 = vector.extract_strided_slice %25 {offsets = [0, 8, 0], sizes = [8, 8, 16], strides = [1, 1, 1]} : vector<8x24x16xbf16> to vector<8x8x16xbf16>
    %28 = vector.extract_strided_slice %25 {offsets = [0, 9, 0], sizes = [8, 8, 16], strides = [1, 1, 1]} : vector<8x24x16xbf16> to vector<8x8x16xbf16>
    %29 = tpu.concatenate %26, %27, %28 in 2 : vector<8x8x16xbf16>, vector<8x8x16xbf16>, vector<8x8x16xbf16> -> vector<8x8x48xbf16>
    %30 = vector.extract_strided_slice %11 {offsets = [1, 0, 0], sizes = [1, 48, 16], strides = [1, 1, 1]} : vector<3x48x16xbf16> to vector<1x48x16xbf16>
    %31 = vector.shape_cast %30 : vector<1x48x16xbf16> to vector<48x16xbf16>
    %cst_28 = arith.constant dense<0.000000e+00> : vector<8x8x16xf32>
    %32 = tpu.matmul %29, %31, %cst_28 {dimension_numbers = #tpu.dot_dimension_numbers<[2], [0], [0, 1], [1], [0, 0, 0, 1, 1, 1], [], []>} : vector<8x8x48xbf16>, vector<48x16xbf16>, vector<8x8x16xf32> -> vector<8x8x16xf32>
    %33 = arith.addf %24, %32 : vector<8x8x16xf32>
    %34 = vector.extract_strided_slice %16 {offsets = [2, 0, 0], sizes = [8, 24, 16], strides = [1, 1, 1]} : vector<10x24x16xbf16> to vector<8x24x16xbf16>
    %35 = vector.extract_strided_slice %34 {offsets = [0, 7, 0], sizes = [8, 8, 16], strides = [1, 1, 1]} : vector<8x24x16xbf16> to vector<8x8x16xbf16>
    %36 = vector.extract_strided_slice %34 {offsets = [0, 8, 0], sizes = [8, 8, 16], strides = [1, 1, 1]} : vector<8x24x16xbf16> to vector<8x8x16xbf16>
    %37 = vector.extract_strided_slice %34 {offsets = [0, 9, 0], sizes = [8, 8, 16], strides = [1, 1, 1]} : vector<8x24x16xbf16> to vector<8x8x16xbf16>
    %38 = tpu.concatenate %35, %36, %37 in 2 : vector<8x8x16xbf16>, vector<8x8x16xbf16>, vector<8x8x16xbf16> -> vector<8x8x48xbf16>
    %39 = vector.extract_strided_slice %11 {offsets = [2, 0, 0], sizes = [1, 48, 16], strides = [1, 1, 1]} : vector<3x48x16xbf16> to vector<1x48x16xbf16>
    %40 = vector.shape_cast %39 : vector<1x48x16xbf16> to vector<48x16xbf16>
    %cst_29 = arith.constant dense<0.000000e+00> : vector<8x8x16xf32>
    %41 = tpu.matmul %38, %40, %cst_29 {dimension_numbers = #tpu.dot_dimension_numbers<[2], [0], [0, 1], [1], [0, 0, 0, 1, 1, 1], [], []>} : vector<8x8x48xbf16>, vector<48x16xbf16>, vector<8x8x16xf32> -> vector<8x8x16xf32>
    %42 = arith.addf %33, %41 : vector<8x8x16xf32>
    %43 = vector.shape_cast %13 : vector<1x16xf32> to vector<16xf32>
    %44 = vector.shape_cast %43 : vector<16xf32> to vector<1x1x16xf32>
    %45 = vector.broadcast %44 : vector<1x1x16xf32> to vector<8x8x16xf32>
    %46 = arith.addf %42, %45 : vector<8x8x16xf32>
    %cst_30 = arith.constant 0.000000e+00 : f32
    %47 = vector.broadcast %cst_30 : f32 to vector<8x8x16xf32>
    %48 = arith.cmpf oge, %46, %47 : vector<8x8x16xf32>
    %cst_31 = arith.constant 5.000000e-02 : f32
    %49 = vector.broadcast %cst_31 : f32 to vector<8x8x16xf32>
    %50 = arith.mulf %46, %49 : vector<8x8x16xf32>
    %51 = arith.select %48, %46, %50 : vector<8x8x16xi1>, vector<8x8x16xf32>
    %52 = vector.extract_strided_slice %51 {offsets = [0, 0, 0], sizes = [8, 8, 4], strides = [1, 1, 1]} : vector<8x8x16xf32> to vector<8x8x4xf32>
    %53 = vector.extract_strided_slice %51 {offsets = [0, 0, 4], sizes = [8, 8, 12], strides = [1, 1, 1]} : vector<8x8x16xf32> to vector<8x8x12xf32>
    %c0_32 = arith.constant 0 : index
    %c0_33 = arith.constant 0 : index
    %c0_34 = arith.constant 0 : index
    %c0_35 = arith.constant 0 : index
    %54 = vector.load %arg4[%c0_32, %c0_33, %c0_34, %c0_35] : memref<2x3x36x16xbf16, #tpu.memory_space<vmem>>, vector<1x3x36x16xbf16>
    %55 = vector.shape_cast %54 : vector<1x3x36x16xbf16> to vector<3x36x16xbf16>
    %c0_36 = arith.constant 0 : index
    %c0_37 = arith.constant 0 : index
    %c0_38 = arith.constant 0 : index
    %56 = vector.load %arg5[%c0_36, %c0_37, %c0_38] : memref<2x1x16xf32, #tpu.memory_space<vmem>>, vector<1x1x16xf32>
    %57 = vector.shape_cast %56 : vector<1x1x16xf32> to vector<1x16xf32>
    %58 = arith.truncf %53 : vector<8x8x12xf32> to vector<8x8x12xbf16>
    %c1_39 = arith.constant 1 : index
    %c8_40 = arith.constant 8 : index
    %c0_41 = arith.constant 0 : index
    %59 = vector.load %arg19[%c1_39, %c8_40, %c0_41] : memref<10x24x16xbf16, #tpu.memory_space<vmem>>, vector<8x8x12xbf16>
    tpu.vector_store %arg19[%c1_39, %c8_40, %c0_41], %58 {strides = array<i32>} : memref<10x24x16xbf16, #tpu.memory_space<vmem>>, vector<8x8x12xbf16>,
    %c0_42 = arith.constant 0 : index
    %c0_43 = arith.constant 0 : index
    %c0_44 = arith.constant 0 : index
    %60 = vector.load %arg19[%c0_42, %c0_43, %c0_44] : memref<10x24x16xbf16, #tpu.memory_space<vmem>>, vector<10x24x16xbf16>
    %61 = vector.extract_strided_slice %60 {offsets = [0, 0, 0], sizes = [10, 24, 12], strides = [1, 1, 1]} : vector<10x24x16xbf16> to vector<10x24x12xbf16>
    %62 = vector.extract_strided_slice %61 {offsets = [0, 0, 0], sizes = [8, 24, 12], strides = [1, 1, 1]} : vector<10x24x12xbf16> to vector<8x24x12xbf16>
    %63 = vector.extract_strided_slice %62 {offsets = [0, 7, 0], sizes = [8, 8, 12], strides = [1, 1, 1]} : vector<8x24x12xbf16> to vector<8x8x12xbf16>
    %64 = vector.extract_strided_slice %62 {offsets = [0, 8, 0], sizes = [8, 8, 12], strides = [1, 1, 1]} : vector<8x24x12xbf16> to vector<8x8x12xbf16>
    %65 = vector.extract_strided_slice %62 {offsets = [0, 9, 0], sizes = [8, 8, 12], strides = [1, 1, 1]} : vector<8x24x12xbf16> to vector<8x8x12xbf16>
    %66 = tpu.concatenate %63, %64, %65 in 2 : vector<8x8x12xbf16>, vector<8x8x12xbf16>, vector<8x8x12xbf16> -> vector<8x8x36xbf16>
    %67 = vector.extract_strided_slice %55 {offsets = [0, 0, 0], sizes = [1, 36, 16], strides = [1, 1, 1]} : vector<3x36x16xbf16> to vector<1x36x16xbf16>
    %68 = vector.shape_cast %67 : vector<1x36x16xbf16> to vector<36x16xbf16>
    %cst_45 = arith.constant dense<0.000000e+00> : vector<8x8x16xf32>
    %69 = tpu.matmul %66, %68, %cst_45 {dimension_numbers = #tpu.dot_dimension_numbers<[2], [0], [0, 1], [1], [0, 0, 0, 1, 1, 1], [], []>} : vector<8x8x36xbf16>, vector<36x16xbf16>, vector<8x8x16xf32> -> vector<8x8x16xf32>
    %70 = vector.extract_strided_slice %61 {offsets = [1, 0, 0], sizes = [8, 24, 12], strides = [1, 1, 1]} : vector<10x24x12xbf16> to vector<8x24x12xbf16>
    %71 = vector.extract_strided_slice %70 {offsets = [0, 7, 0], sizes = [8, 8, 12], strides = [1, 1, 1]} : vector<8x24x12xbf16> to vector<8x8x12xbf16>
    %72 = vector.extract_strided_slice %70 {offsets = [0, 8, 0], sizes = [8, 8, 12], strides = [1, 1, 1]} : vector<8x24x12xbf16> to vector<8x8x12xbf16>
    %73 = vector.extract_strided_slice %70 {offsets = [0, 9, 0], sizes = [8, 8, 12], strides = [1, 1, 1]} : vector<8x24x12xbf16> to vector<8x8x12xbf16>
    %74 = tpu.concatenate %71, %72, %73 in 2 : vector<8x8x12xbf16>, vector<8x8x12xbf16>, vector<8x8x12xbf16> -> vector<8x8x36xbf16>
    %75 = vector.extract_strided_slice %55 {offsets = [1, 0, 0], sizes = [1, 36, 16], strides = [1, 1, 1]} : vector<3x36x16xbf16> to vector<1x36x16xbf16>
    %76 = vector.shape_cast %75 : vector<1x36x16xbf16> to vector<36x16xbf16>
    %cst_46 = arith.constant dense<0.000000e+00> : vector<8x8x16xf32>
    %77 = tpu.matmul %74, %76, %cst_46 {dimension_numbers = #tpu.dot_dimension_numbers<[2], [0], [0, 1], [1], [0, 0, 0, 1, 1, 1], [], []>} : vector<8x8x36xbf16>, vector<36x16xbf16>, vector<8x8x16xf32> -> vector<8x8x16xf32>
    %78 = arith.addf %69, %77 : vector<8x8x16xf32>
    %79 = vector.extract_strided_slice %61 {offsets = [2, 0, 0], sizes = [8, 24, 12], strides = [1, 1, 1]} : vector<10x24x12xbf16> to vector<8x24x12xbf16>
    %80 = vector.extract_strided_slice %79 {offsets = [0, 7, 0], sizes = [8, 8, 12], strides = [1, 1, 1]} : vector<8x24x12xbf16> to vector<8x8x12xbf16>
    %81 = vector.extract_strided_slice %79 {offsets = [0, 8, 0], sizes = [8, 8, 12], strides = [1, 1, 1]} : vector<8x24x12xbf16> to vector<8x8x12xbf16>
    %82 = vector.extract_strided_slice %79 {offsets = [0, 9, 0], sizes = [8, 8, 12], strides = [1, 1, 1]} : vector<8x24x12xbf16> to vector<8x8x12xbf16>
    %83 = tpu.concatenate %80, %81, %82 in 2 : vector<8x8x12xbf16>, vector<8x8x12xbf16>, vector<8x8x12xbf16> -> vector<8x8x36xbf16>
    %84 = vector.extract_strided_slice %55 {offsets = [2, 0, 0], sizes = [1, 36, 16], strides = [1, 1, 1]} : vector<3x36x16xbf16> to vector<1x36x16xbf16>
    %85 = vector.shape_cast %84 : vector<1x36x16xbf16> to vector<36x16xbf16>
    %cst_47 = arith.constant dense<0.000000e+00> : vector<8x8x16xf32>
    %86 = tpu.matmul %83, %85, %cst_47 {dimension_numbers = #tpu.dot_dimension_numbers<[2], [0], [0, 1], [1], [0, 0, 0, 1, 1, 1], [], []>} : vector<8x8x36xbf16>, vector<36x16xbf16>, vector<8x8x16xf32> -> vector<8x8x16xf32>
    %87 = arith.addf %78, %86 : vector<8x8x16xf32>
    %88 = vector.shape_cast %57 : vector<1x16xf32> to vector<16xf32>
    %89 = vector.shape_cast %88 : vector<16xf32> to vector<1x1x16xf32>
    %90 = vector.broadcast %89 : vector<1x1x16xf32> to vector<8x8x16xf32>
    %91 = arith.addf %87, %90 : vector<8x8x16xf32>
    %cst_48 = arith.constant 0.000000e+00 : f32
    %92 = vector.broadcast %cst_48 : f32 to vector<8x8x16xf32>
    %93 = arith.cmpf oge, %91, %92 : vector<8x8x16xf32>
    %cst_49 = arith.constant 5.000000e-02 : f32
    %94 = vector.broadcast %cst_49 : f32 to vector<8x8x16xf32>
    %95 = arith.mulf %91, %94 : vector<8x8x16xf32>
    %96 = arith.select %93, %91, %95 : vector<8x8x16xi1>, vector<8x8x16xf32>
    %97 = vector.extract_strided_slice %96 {offsets = [0, 0, 0], sizes = [8, 8, 4], strides = [1, 1, 1]} : vector<8x8x16xf32> to vector<8x8x4xf32>
    %98 = vector.extract_strided_slice %96 {offsets = [0, 0, 4], sizes = [8, 8, 12], strides = [1, 1, 1]} : vector<8x8x16xf32> to vector<8x8x12xf32>
    %c0_50 = arith.constant 0 : index
    %c0_51 = arith.constant 0 : index
    %c0_52 = arith.constant 0 : index
    %c0_53 = arith.constant 0 : index
    %99 = vector.load %arg6[%c0_50, %c0_51, %c0_52, %c0_53] : memref<2x3x36x16xbf16, #tpu.memory_space<vmem>>, vector<1x3x36x16xbf16>
    %100 = vector.shape_cast %99 : vector<1x3x36x16xbf16> to vector<3x36x16xbf16>
    %c0_54 = arith.constant 0 : index
    %c0_55 = arith.constant 0 : index
    %c0_56 = arith.constant 0 : index
    %101 = vector.load %arg7[%c0_54, %c0_55, %c0_56] : memref<2x1x16xf32, #tpu.memory_space<vmem>>, vector<1x1x16xf32>
    %102 = vector.shape_cast %101 : vector<1x1x16xf32> to vector<1x16xf32>
    %103 = arith.truncf %98 : vector<8x8x12xf32> to vector<8x8x12xbf16>
    %c1_57 = arith.constant 1 : index
    %c8_58 = arith.constant 8 : index
    %c0_59 = arith.constant 0 : index
    %104 = vector.load %arg19[%c1_57, %c8_58, %c0_59] : memref<10x24x16xbf16, #tpu.memory_space<vmem>>, vector<8x8x12xbf16>
    tpu.vector_store %arg19[%c1_57, %c8_58, %c0_59], %103 {strides = array<i32>} : memref<10x24x16xbf16, #tpu.memory_space<vmem>>, vector<8x8x12xbf16>,
    %c0_60 = arith.constant 0 : index
    %c0_61 = arith.constant 0 : index
    %c0_62 = arith.constant 0 : index
    %105 = vector.load %arg19[%c0_60, %c0_61, %c0_62] : memref<10x24x16xbf16, #tpu.memory_space<vmem>>, vector<10x24x16xbf16>
    %106 = vector.extract_strided_slice %105 {offsets = [0, 0, 0], sizes = [10, 24, 12], strides = [1, 1, 1]} : vector<10x24x16xbf16> to vector<10x24x12xbf16>
    %107 = vector.extract_strided_slice %106 {offsets = [0, 0, 0], sizes = [8, 24, 12], strides = [1, 1, 1]} : vector<10x24x12xbf16> to vector<8x24x12xbf16>
    %108 = vector.extract_strided_slice %107 {offsets = [0, 7, 0], sizes = [8, 8, 12], strides = [1, 1, 1]} : vector<8x24x12xbf16> to vector<8x8x12xbf16>
    %109 = vector.extract_strided_slice %107 {offsets = [0, 8, 0], sizes = [8, 8, 12], strides = [1, 1, 1]} : vector<8x24x12xbf16> to vector<8x8x12xbf16>
    %110 = vector.extract_strided_slice %107 {offsets = [0, 9, 0], sizes = [8, 8, 12], strides = [1, 1, 1]} : vector<8x24x12xbf16> to vector<8x8x12xbf16>
    %111 = tpu.concatenate %108, %109, %110 in 2 : vector<8x8x12xbf16>, vector<8x8x12xbf16>, vector<8x8x12xbf16> -> vector<8x8x36xbf16>
    %112 = vector.extract_strided_slice %100 {offsets = [0, 0, 0], sizes = [1, 36, 16], strides = [1, 1, 1]} : vector<3x36x16xbf16> to vector<1x36x16xbf16>
    %113 = vector.shape_cast %112 : vector<1x36x16xbf16> to vector<36x16xbf16>
    %cst_63 = arith.constant dense<0.000000e+00> : vector<8x8x16xf32>
    %114 = tpu.matmul %111, %113, %cst_63 {dimension_numbers = #tpu.dot_dimension_numbers<[2], [0], [0, 1], [1], [0, 0, 0, 1, 1, 1], [], []>} : vector<8x8x36xbf16>, vector<36x16xbf16>, vector<8x8x16xf32> -> vector<8x8x16xf32>
    %115 = vector.extract_strided_slice %106 {offsets = [1, 0, 0], sizes = [8, 24, 12], strides = [1, 1, 1]} : vector<10x24x12xbf16> to vector<8x24x12xbf16>
    %116 = vector.extract_strided_slice %115 {offsets = [0, 7, 0], sizes = [8, 8, 12], strides = [1, 1, 1]} : vector<8x24x12xbf16> to vector<8x8x12xbf16>
    %117 = vector.extract_strided_slice %115 {offsets = [0, 8, 0], sizes = [8, 8, 12], strides = [1, 1, 1]} : vector<8x24x12xbf16> to vector<8x8x12xbf16>
    %118 = vector.extract_strided_slice %115 {offsets = [0, 9, 0], sizes = [8, 8, 12], strides = [1, 1, 1]} : vector<8x24x12xbf16> to vector<8x8x12xbf16>
    %119 = tpu.concatenate %116, %117, %118 in 2 : vector<8x8x12xbf16>, vector<8x8x12xbf16>, vector<8x8x12xbf16> -> vector<8x8x36xbf16>
    %120 = vector.extract_strided_slice %100 {offsets = [1, 0, 0], sizes = [1, 36, 16], strides = [1, 1, 1]} : vector<3x36x16xbf16> to vector<1x36x16xbf16>
    %121 = vector.shape_cast %120 : vector<1x36x16xbf16> to vector<36x16xbf16>
    %cst_64 = arith.constant dense<0.000000e+00> : vector<8x8x16xf32>
    %122 = tpu.matmul %119, %121, %cst_64 {dimension_numbers = #tpu.dot_dimension_numbers<[2], [0], [0, 1], [1], [0, 0, 0, 1, 1, 1], [], []>} : vector<8x8x36xbf16>, vector<36x16xbf16>, vector<8x8x16xf32> -> vector<8x8x16xf32>
    %123 = arith.addf %114, %122 : vector<8x8x16xf32>
    %124 = vector.extract_strided_slice %106 {offsets = [2, 0, 0], sizes = [8, 24, 12], strides = [1, 1, 1]} : vector<10x24x12xbf16> to vector<8x24x12xbf16>
    %125 = vector.extract_strided_slice %124 {offsets = [0, 7, 0], sizes = [8, 8, 12], strides = [1, 1, 1]} : vector<8x24x12xbf16> to vector<8x8x12xbf16>
    %126 = vector.extract_strided_slice %124 {offsets = [0, 8, 0], sizes = [8, 8, 12], strides = [1, 1, 1]} : vector<8x24x12xbf16> to vector<8x8x12xbf16>
    %127 = vector.extract_strided_slice %124 {offsets = [0, 9, 0], sizes = [8, 8, 12], strides = [1, 1, 1]} : vector<8x24x12xbf16> to vector<8x8x12xbf16>
    %128 = tpu.concatenate %125, %126, %127 in 2 : vector<8x8x12xbf16>, vector<8x8x12xbf16>, vector<8x8x12xbf16> -> vector<8x8x36xbf16>
    %129 = vector.extract_strided_slice %100 {offsets = [2, 0, 0], sizes = [1, 36, 16], strides = [1, 1, 1]} : vector<3x36x16xbf16> to vector<1x36x16xbf16>
    %130 = vector.shape_cast %129 : vector<1x36x16xbf16> to vector<36x16xbf16>
    %cst_65 = arith.constant dense<0.000000e+00> : vector<8x8x16xf32>
    %131 = tpu.matmul %128, %130, %cst_65 {dimension_numbers = #tpu.dot_dimension_numbers<[2], [0], [0, 1], [1], [0, 0, 0, 1, 1, 1], [], []>} : vector<8x8x36xbf16>, vector<36x16xbf16>, vector<8x8x16xf32> -> vector<8x8x16xf32>
    %132 = arith.addf %123, %131 : vector<8x8x16xf32>
    %133 = vector.shape_cast %102 : vector<1x16xf32> to vector<16xf32>
    %134 = vector.shape_cast %133 : vector<16xf32> to vector<1x1x16xf32>
    %135 = vector.broadcast %134 : vector<1x1x16xf32> to vector<8x8x16xf32>
    %136 = arith.addf %132, %135 : vector<8x8x16xf32>
    %cst_66 = arith.constant 0.000000e+00 : f32
    %137 = vector.broadcast %cst_66 : f32 to vector<8x8x16xf32>
    %138 = arith.cmpf oge, %136, %137 : vector<8x8x16xf32>
    %cst_67 = arith.constant 5.000000e-02 : f32
    %139 = vector.broadcast %cst_67 : f32 to vector<8x8x16xf32>
    %140 = arith.mulf %136, %139 : vector<8x8x16xf32>
    %141 = arith.select %138, %136, %140 : vector<8x8x16xi1>, vector<8x8x16xf32>
    %142 = vector.extract_strided_slice %141 {offsets = [0, 0, 0], sizes = [8, 8, 4], strides = [1, 1, 1]} : vector<8x8x16xf32> to vector<8x8x4xf32>
    %143 = vector.extract_strided_slice %141 {offsets = [0, 0, 4], sizes = [8, 8, 12], strides = [1, 1, 1]} : vector<8x8x16xf32> to vector<8x8x12xf32>
    %c0_68 = arith.constant 0 : index
    %c0_69 = arith.constant 0 : index
    %c0_70 = arith.constant 0 : index
    %c0_71 = arith.constant 0 : index
    %144 = vector.load %arg8[%c0_68, %c0_69, %c0_70, %c0_71] : memref<2x3x36x4xbf16, #tpu.memory_space<vmem>>, vector<1x3x36x4xbf16>
    %145 = vector.shape_cast %144 : vector<1x3x36x4xbf16> to vector<3x36x4xbf16>
    %c0_72 = arith.constant 0 : index
    %c0_73 = arith.constant 0 : index
    %c0_74 = arith.constant 0 : index
    %146 = vector.load %arg9[%c0_72, %c0_73, %c0_74] : memref<2x1x4xf32, #tpu.memory_space<vmem>>, vector<1x1x4xf32>
    %147 = vector.shape_cast %146 : vector<1x1x4xf32> to vector<1x4xf32>
    %148 = arith.truncf %143 : vector<8x8x12xf32> to vector<8x8x12xbf16>
    %c1_75 = arith.constant 1 : index
    %c8_76 = arith.constant 8 : index
    %c0_77 = arith.constant 0 : index
    %149 = vector.load %arg19[%c1_75, %c8_76, %c0_77] : memref<10x24x16xbf16, #tpu.memory_space<vmem>>, vector<8x8x12xbf16>
    tpu.vector_store %arg19[%c1_75, %c8_76, %c0_77], %148 {strides = array<i32>} : memref<10x24x16xbf16, #tpu.memory_space<vmem>>, vector<8x8x12xbf16>,
    %c0_78 = arith.constant 0 : index
    %c0_79 = arith.constant 0 : index
    %c0_80 = arith.constant 0 : index
    %150 = vector.load %arg19[%c0_78, %c0_79, %c0_80] : memref<10x24x16xbf16, #tpu.memory_space<vmem>>, vector<10x24x16xbf16>
    %151 = vector.extract_strided_slice %150 {offsets = [0, 0, 0], sizes = [10, 24, 12], strides = [1, 1, 1]} : vector<10x24x16xbf16> to vector<10x24x12xbf16>
    %152 = vector.extract_strided_slice %151 {offsets = [0, 0, 0], sizes = [8, 24, 12], strides = [1, 1, 1]} : vector<10x24x12xbf16> to vector<8x24x12xbf16>
    %153 = vector.extract_strided_slice %152 {offsets = [0, 7, 0], sizes = [8, 8, 12], strides = [1, 1, 1]} : vector<8x24x12xbf16> to vector<8x8x12xbf16>
    %154 = vector.extract_strided_slice %152 {offsets = [0, 8, 0], sizes = [8, 8, 12], strides = [1, 1, 1]} : vector<8x24x12xbf16> to vector<8x8x12xbf16>
    %155 = vector.extract_strided_slice %152 {offsets = [0, 9, 0], sizes = [8, 8, 12], strides = [1, 1, 1]} : vector<8x24x12xbf16> to vector<8x8x12xbf16>
    %156 = tpu.concatenate %153, %154, %155 in 2 : vector<8x8x12xbf16>, vector<8x8x12xbf16>, vector<8x8x12xbf16> -> vector<8x8x36xbf16>
    %157 = vector.extract_strided_slice %145 {offsets = [0, 0, 0], sizes = [1, 36, 4], strides = [1, 1, 1]} : vector<3x36x4xbf16> to vector<1x36x4xbf16>
    %158 = vector.shape_cast %157 : vector<1x36x4xbf16> to vector<36x4xbf16>
    %cst_81 = arith.constant dense<0.000000e+00> : vector<8x8x4xf32>
    %159 = tpu.matmul %156, %158, %cst_81 {dimension_numbers = #tpu.dot_dimension_numbers<[2], [0], [0, 1], [1], [0, 0, 0, 1, 1, 1], [], []>} : vector<8x8x36xbf16>, vector<36x4xbf16>, vector<8x8x4xf32> -> vector<8x8x4xf32>
    %160 = vector.extract_strided_slice %151 {offsets = [1, 0, 0], sizes = [8, 24, 12], strides = [1, 1, 1]} : vector<10x24x12xbf16> to vector<8x24x12xbf16>
    %161 = vector.extract_strided_slice %160 {offsets = [0, 7, 0], sizes = [8, 8, 12], strides = [1, 1, 1]} : vector<8x24x12xbf16> to vector<8x8x12xbf16>
    %162 = vector.extract_strided_slice %160 {offsets = [0, 8, 0], sizes = [8, 8, 12], strides = [1, 1, 1]} : vector<8x24x12xbf16> to vector<8x8x12xbf16>
    %163 = vector.extract_strided_slice %160 {offsets = [0, 9, 0], sizes = [8, 8, 12], strides = [1, 1, 1]} : vector<8x24x12xbf16> to vector<8x8x12xbf16>
    %164 = tpu.concatenate %161, %162, %163 in 2 : vector<8x8x12xbf16>, vector<8x8x12xbf16>, vector<8x8x12xbf16> -> vector<8x8x36xbf16>
    %165 = vector.extract_strided_slice %145 {offsets = [1, 0, 0], sizes = [1, 36, 4], strides = [1, 1, 1]} : vector<3x36x4xbf16> to vector<1x36x4xbf16>
    %166 = vector.shape_cast %165 : vector<1x36x4xbf16> to vector<36x4xbf16>
    %cst_82 = arith.constant dense<0.000000e+00> : vector<8x8x4xf32>
    %167 = tpu.matmul %164, %166, %cst_82 {dimension_numbers = #tpu.dot_dimension_numbers<[2], [0], [0, 1], [1], [0, 0, 0, 1, 1, 1], [], []>} : vector<8x8x36xbf16>, vector<36x4xbf16>, vector<8x8x4xf32> -> vector<8x8x4xf32>
    %168 = arith.addf %159, %167 : vector<8x8x4xf32>
    %169 = vector.extract_strided_slice %151 {offsets = [2, 0, 0], sizes = [8, 24, 12], strides = [1, 1, 1]} : vector<10x24x12xbf16> to vector<8x24x12xbf16>
    %170 = vector.extract_strided_slice %169 {offsets = [0, 7, 0], sizes = [8, 8, 12], strides = [1, 1, 1]} : vector<8x24x12xbf16> to vector<8x8x12xbf16>
    %171 = vector.extract_strided_slice %169 {offsets = [0, 8, 0], sizes = [8, 8, 12], strides = [1, 1, 1]} : vector<8x24x12xbf16> to vector<8x8x12xbf16>
    %172 = vector.extract_strided_slice %169 {offsets = [0, 9, 0], sizes = [8, 8, 12], strides = [1, 1, 1]} : vector<8x24x12xbf16> to vector<8x8x12xbf16>
    %173 = tpu.concatenate %170, %171, %172 in 2 : vector<8x8x12xbf16>, vector<8x8x12xbf16>, vector<8x8x12xbf16> -> vector<8x8x36xbf16>
    %174 = vector.extract_strided_slice %145 {offsets = [2, 0, 0], sizes = [1, 36, 4], strides = [1, 1, 1]} : vector<3x36x4xbf16> to vector<1x36x4xbf16>
    %175 = vector.shape_cast %174 : vector<1x36x4xbf16> to vector<36x4xbf16>
    %cst_83 = arith.constant dense<0.000000e+00> : vector<8x8x4xf32>
    %176 = tpu.matmul %173, %175, %cst_83 {dimension_numbers = #tpu.dot_dimension_numbers<[2], [0], [0, 1], [1], [0, 0, 0, 1, 1, 1], [], []>} : vector<8x8x36xbf16>, vector<36x4xbf16>, vector<8x8x4xf32> -> vector<8x8x4xf32>
    %177 = arith.addf %168, %176 : vector<8x8x4xf32>
    %178 = vector.shape_cast %147 : vector<1x4xf32> to vector<4xf32>
    %179 = vector.shape_cast %178 : vector<4xf32> to vector<1x1x4xf32>
    %180 = vector.broadcast %179 : vector<1x1x4xf32> to vector<8x8x4xf32>
    %181 = arith.addf %177, %180 : vector<8x8x4xf32>
    %cst_84 = arith.constant 0.000000e+00 : f32
    %182 = vector.broadcast %cst_84 : f32 to vector<8x8x4xf32>
    %183 = arith.cmpf oge, %181, %182 : vector<8x8x4xf32>
    %cst_85 = arith.constant 5.000000e-02 : f32
    %184 = vector.broadcast %cst_85 : f32 to vector<8x8x4xf32>
    %185 = arith.mulf %181, %184 : vector<8x8x4xf32>
    %186 = arith.select %183, %181, %185 : vector<8x8x4xi1>, vector<8x8x4xf32>
    %cst_86 = arith.constant dense<0.000000e+00> : vector<8x4xf32>
    %187 = vector.multi_reduction <add>, %52, %cst_86 [0] : vector<8x8x4xf32> to vector<8x4xf32>
    %cst_87 = arith.constant dense<0.000000e+00> : vector<4xf32>
    %188 = vector.multi_reduction <add>, %187, %cst_87 [0] : vector<8x4xf32> to vector<4xf32>
    %189 = vector.shape_cast %188 : vector<4xf32> to vector<1x4xf32>
    %cst_88 = arith.constant 1.562500e-02 : f32
    %190 = vector.broadcast %cst_88 : f32 to vector<1x4xf32>
    %191 = arith.mulf %189, %190 : vector<1x4xf32>
    %cst_89 = arith.constant dense<0.000000e+00> : vector<8x4xf32>
    %192 = vector.multi_reduction <add>, %97, %cst_89 [0] : vector<8x8x4xf32> to vector<8x4xf32>
    %cst_90 = arith.constant dense<0.000000e+00> : vector<4xf32>
    %193 = vector.multi_reduction <add>, %192, %cst_90 [0] : vector<8x4xf32> to vector<4xf32>
    %194 = vector.shape_cast %193 : vector<4xf32> to vector<1x4xf32>
    %cst_91 = arith.constant 1.562500e-02 : f32
    %195 = vector.broadcast %cst_91 : f32 to vector<1x4xf32>
    %196 = arith.mulf %194, %195 : vector<1x4xf32>
    %cst_92 = arith.constant dense<0.000000e+00> : vector<8x4xf32>
    %197 = vector.multi_reduction <add>, %142, %cst_92 [0] : vector<8x8x4xf32> to vector<8x4xf32>
    %cst_93 = arith.constant dense<0.000000e+00> : vector<4xf32>
    %198 = vector.multi_reduction <add>, %197, %cst_93 [0] : vector<8x4xf32> to vector<4xf32>
    %199 = vector.shape_cast %198 : vector<4xf32> to vector<1x4xf32>
    %cst_94 = arith.constant 1.562500e-02 : f32
    %200 = vector.broadcast %cst_94 : f32 to vector<1x4xf32>
    %201 = arith.mulf %199, %200 : vector<1x4xf32>
    %cst_95 = arith.constant dense<0.000000e+00> : vector<8x4xf32>
    %202 = vector.multi_reduction <add>, %186, %cst_95 [0] : vector<8x8x4xf32> to vector<8x4xf32>
    %cst_96 = arith.constant dense<0.000000e+00> : vector<4xf32>
    %203 = vector.multi_reduction <add>, %202, %cst_96 [0] : vector<8x4xf32> to vector<4xf32>
    %204 = vector.shape_cast %203 : vector<4xf32> to vector<1x4xf32>
    %cst_97 = arith.constant 1.562500e-02 : f32
    %205 = vector.broadcast %cst_97 : f32 to vector<1x4xf32>
    %206 = arith.mulf %204, %205 : vector<1x4xf32>
    %207 = tpu.concatenate %191, %196, %201, %206 in 1 : vector<1x4xf32>, vector<1x4xf32>, vector<1x4xf32>, vector<1x4xf32> -> vector<1x16xf32>
    %208 = arith.truncf %207 : vector<1x16xf32> to vector<1x16xbf16>
    %c0_98 = arith.constant 0 : index
    %c0_99 = arith.constant 0 : index
    %c0_100 = arith.constant 0 : index
    %209 = vector.load %arg10[%c0_98, %c0_99, %c0_100] : memref<2x16x2xbf16, #tpu.memory_space<vmem>>, vector<1x16x2xbf16>
    %210 = vector.shape_cast %209 : vector<1x16x2xbf16> to vector<16x2xbf16>
    %cst_101 = arith.constant dense<0.000000e+00> : vector<1x2xf32>
    %211 = tpu.matmul %208, %210, %cst_101 {dimension_numbers = #tpu.dot_dimension_numbers<[1], [0], [0], [1], [0, 0, 1, 1], [], []>} : vector<1x16xbf16>, vector<16x2xbf16>, vector<1x2xf32> -> vector<1x2xf32>
    %c0_102 = arith.constant 0 : index
    %c0_103 = arith.constant 0 : index
    %c0_104 = arith.constant 0 : index
    %212 = vector.load %arg11[%c0_102, %c0_103, %c0_104] : memref<2x1x2xf32, #tpu.memory_space<vmem>>, vector<1x1x2xf32>
    %213 = vector.shape_cast %212 : vector<1x1x2xf32> to vector<1x2xf32>
    %214 = arith.addf %211, %213 : vector<1x2xf32>
    %cst_105 = arith.constant 0.000000e+00 : f32
    %215 = vector.broadcast %cst_105 : f32 to vector<1x2xf32>
    %216 = arith.maximumf %214, %215 : vector<1x2xf32>
    %217 = arith.truncf %216 : vector<1x2xf32> to vector<1x2xbf16>
    %c0_106 = arith.constant 0 : index
    %c0_107 = arith.constant 0 : index
    %c0_108 = arith.constant 0 : index
    %218 = vector.load %arg12[%c0_106, %c0_107, %c0_108] : memref<2x2x16xbf16, #tpu.memory_space<vmem>>, vector<1x2x16xbf16>
    %219 = vector.shape_cast %218 : vector<1x2x16xbf16> to vector<2x16xbf16>
    %cst_109 = arith.constant dense<0.000000e+00> : vector<1x16xf32>
    %220 = tpu.matmul %217, %219, %cst_109 {dimension_numbers = #tpu.dot_dimension_numbers<[1], [0], [0], [1], [0, 0, 1, 1], [], []>} : vector<1x2xbf16>, vector<2x16xbf16>, vector<1x16xf32> -> vector<1x16xf32>
    %c0_110 = arith.constant 0 : index
    %c0_111 = arith.constant 0 : index
    %c0_112 = arith.constant 0 : index
    %221 = vector.load %arg13[%c0_110, %c0_111, %c0_112] : memref<2x1x16xf32, #tpu.memory_space<vmem>>, vector<1x1x16xf32>
    %222 = vector.shape_cast %221 : vector<1x1x16xf32> to vector<1x16xf32>
    %223 = arith.addf %220, %222 : vector<1x16xf32>
    %224 = arith.negf %223 : vector<1x16xf32>
    %225 = math.exp %224 : vector<1x16xf32>
    %cst_113 = arith.constant 1.000000e+00 : f32
    %226 = vector.broadcast %cst_113 : f32 to vector<1x16xf32>
    %227 = arith.addf %226, %225 : vector<1x16xf32>
    %228 = arith.divf %226, %227 : vector<1x16xf32>
    %c0_114 = arith.constant 0 : index
    %c0_115 = arith.constant 0 : index
    %c0_116 = arith.constant 0 : index
    %229 = vector.load %arg14[%c0_114, %c0_115, %c0_116] : memref<2x16x16xbf16, #tpu.memory_space<vmem>>, vector<1x16x16xbf16>
    %230 = vector.shape_cast %229 : vector<1x16x16xbf16> to vector<16x16xbf16>
    %231 = vector.extract_strided_slice %228 {offsets = [0, 0], sizes = [1, 4], strides = [1, 1]} : vector<1x16xf32> to vector<1x4xf32>
    %232 = vector.shape_cast %231 : vector<1x4xf32> to vector<1x1x4xf32>
    %233 = vector.broadcast %232 : vector<1x1x4xf32> to vector<8x8x4xf32>
    %234 = arith.mulf %52, %233 : vector<8x8x4xf32>
    %235 = arith.truncf %234 : vector<8x8x4xf32> to vector<8x8x4xbf16>
    %236 = vector.extract_strided_slice %230 {offsets = [0, 0], sizes = [4, 16], strides = [1, 1]} : vector<16x16xbf16> to vector<4x16xbf16>
    %cst_117 = arith.constant dense<0.000000e+00> : vector<8x8x16xf32>
    %237 = tpu.matmul %235, %236, %cst_117 {dimension_numbers = #tpu.dot_dimension_numbers<[2], [0], [0, 1], [1], [0, 0, 0, 1, 1, 1], [], []>} : vector<8x8x4xbf16>, vector<4x16xbf16>, vector<8x8x16xf32> -> vector<8x8x16xf32>
    %238 = vector.extract_strided_slice %228 {offsets = [0, 4], sizes = [1, 4], strides = [1, 1]} : vector<1x16xf32> to vector<1x4xf32>
    %239 = vector.shape_cast %238 : vector<1x4xf32> to vector<1x1x4xf32>
    %240 = vector.broadcast %239 : vector<1x1x4xf32> to vector<8x8x4xf32>
    %241 = arith.mulf %97, %240 : vector<8x8x4xf32>
    %242 = arith.truncf %241 : vector<8x8x4xf32> to vector<8x8x4xbf16>
    %243 = vector.extract_strided_slice %230 {offsets = [4, 0], sizes = [4, 16], strides = [1, 1]} : vector<16x16xbf16> to vector<4x16xbf16>
    %cst_118 = arith.constant dense<0.000000e+00> : vector<8x8x16xf32>
    %244 = tpu.matmul %242, %243, %cst_118 {dimension_numbers = #tpu.dot_dimension_numbers<[2], [0], [0, 1], [1], [0, 0, 0, 1, 1, 1], [], []>} : vector<8x8x4xbf16>, vector<4x16xbf16>, vector<8x8x16xf32> -> vector<8x8x16xf32>
    %245 = arith.addf %237, %244 : vector<8x8x16xf32>
    %246 = vector.extract_strided_slice %228 {offsets = [0, 8], sizes = [1, 4], strides = [1, 1]} : vector<1x16xf32> to vector<1x4xf32>
    %247 = vector.shape_cast %246 : vector<1x4xf32> to vector<1x1x4xf32>
    %248 = vector.broadcast %247 : vector<1x1x4xf32> to vector<8x8x4xf32>
    %249 = arith.mulf %142, %248 : vector<8x8x4xf32>
    %250 = arith.truncf %249 : vector<8x8x4xf32> to vector<8x8x4xbf16>
    %251 = vector.extract_strided_slice %230 {offsets = [8, 0], sizes = [4, 16], strides = [1, 1]} : vector<16x16xbf16> to vector<4x16xbf16>
    %cst_119 = arith.constant dense<0.000000e+00> : vector<8x8x16xf32>
    %252 = tpu.matmul %250, %251, %cst_119 {dimension_numbers = #tpu.dot_dimension_numbers<[2], [0], [0, 1], [1], [0, 0, 0, 1, 1, 1], [], []>} : vector<8x8x4xbf16>, vector<4x16xbf16>, vector<8x8x16xf32> -> vector<8x8x16xf32>
    %253 = arith.addf %245, %252 : vector<8x8x16xf32>
    %254 = vector.extract_strided_slice %228 {offsets = [0, 12], sizes = [1, 4], strides = [1, 1]} : vector<1x16xf32> to vector<1x4xf32>
    %255 = vector.shape_cast %254 : vector<1x4xf32> to vector<1x1x4xf32>
    %256 = vector.broadcast %255 : vector<1x1x4xf32> to vector<8x8x4xf32>
    %257 = arith.mulf %186, %256 : vector<8x8x4xf32>
    %258 = arith.truncf %257 : vector<8x8x4xf32> to vector<8x8x4xbf16>
    %259 = vector.extract_strided_slice %230 {offsets = [12, 0], sizes = [4, 16], strides = [1, 1]} : vector<16x16xbf16> to vector<4x16xbf16>
    %cst_120 = arith.constant dense<0.000000e+00> : vector<8x8x16xf32>
    %260 = tpu.matmul %258, %259, %cst_120 {dimension_numbers = #tpu.dot_dimension_numbers<[2], [0], [0, 1], [1], [0, 0, 0, 1, 1, 1], [], []>} : vector<8x8x4xbf16>, vector<4x16xbf16>, vector<8x8x16xf32> -> vector<8x8x16xf32>
    %261 = arith.addf %253, %260 : vector<8x8x16xf32>
    %c0_121 = arith.constant 0 : index
    %c0_122 = arith.constant 0 : index
    %c0_123 = arith.constant 0 : index
    %262 = vector.load %arg15[%c0_121, %c0_122, %c0_123] : memref<2x1x16xf32, #tpu.memory_space<vmem>>, vector<1x1x16xf32>
    %263 = vector.shape_cast %262 : vector<1x1x16xf32> to vector<1x16xf32>
    %264 = vector.shape_cast %263 : vector<1x16xf32> to vector<16xf32>
    %265 = vector.shape_cast %264 : vector<16xf32> to vector<1x1x16xf32>
    %266 = vector.broadcast %265 : vector<1x1x16xf32> to vector<8x8x16xf32>
    %267 = arith.addf %261, %266 : vector<8x8x16xf32>
    %268 = arith.addf %267, %9 : vector<8x8x16xf32>
    %c1_124 = arith.constant 1 : index
    %c0_125 = arith.constant 0 : index
    %c0_126 = arith.constant 0 : index
    %c0_127 = arith.constant 0 : index
    %269 = vector.load %arg2[%c1_124, %c0_125, %c0_126, %c0_127] : memref<2x3x48x16xbf16, #tpu.memory_space<vmem>>, vector<1x3x48x16xbf16>
    %270 = vector.shape_cast %269 : vector<1x3x48x16xbf16> to vector<3x48x16xbf16>
    %c1_128 = arith.constant 1 : index
    %c0_129 = arith.constant 0 : index
    %c0_130 = arith.constant 0 : index
    %271 = vector.load %arg3[%c1_128, %c0_129, %c0_130] : memref<2x1x16xf32, #tpu.memory_space<vmem>>, vector<1x1x16xf32>
    %272 = vector.shape_cast %271 : vector<1x1x16xf32> to vector<1x16xf32>
    %273 = arith.truncf %268 : vector<8x8x16xf32> to vector<8x8x16xbf16>
    %c1_131 = arith.constant 1 : index
    %c8_132 = arith.constant 8 : index
    %c0_133 = arith.constant 0 : index
    %274 = vector.load %arg19[%c1_131, %c8_132, %c0_133] : memref<10x24x16xbf16, #tpu.memory_space<vmem>>, vector<8x8x16xbf16>
    tpu.vector_store %arg19[%c1_131, %c8_132, %c0_133], %273 {strides = array<i32>} : memref<10x24x16xbf16, #tpu.memory_space<vmem>>, vector<8x8x16xbf16>,
    %c0_134 = arith.constant 0 : index
    %c0_135 = arith.constant 0 : index
    %c0_136 = arith.constant 0 : index
    %275 = vector.load %arg19[%c0_134, %c0_135, %c0_136] : memref<10x24x16xbf16, #tpu.memory_space<vmem>>, vector<10x24x16xbf16>
    %276 = vector.extract_strided_slice %275 {offsets = [0, 0, 0], sizes = [8, 24, 16], strides = [1, 1, 1]} : vector<10x24x16xbf16> to vector<8x24x16xbf16>
    %277 = vector.extract_strided_slice %276 {offsets = [0, 7, 0], sizes = [8, 8, 16], strides = [1, 1, 1]} : vector<8x24x16xbf16> to vector<8x8x16xbf16>
    %278 = vector.extract_strided_slice %276 {offsets = [0, 8, 0], sizes = [8, 8, 16], strides = [1, 1, 1]} : vector<8x24x16xbf16> to vector<8x8x16xbf16>
    %279 = vector.extract_strided_slice %276 {offsets = [0, 9, 0], sizes = [8, 8, 16], strides = [1, 1, 1]} : vector<8x24x16xbf16> to vector<8x8x16xbf16>
    %280 = tpu.concatenate %277, %278, %279 in 2 : vector<8x8x16xbf16>, vector<8x8x16xbf16>, vector<8x8x16xbf16> -> vector<8x8x48xbf16>
    %281 = vector.extract_strided_slice %270 {offsets = [0, 0, 0], sizes = [1, 48, 16], strides = [1, 1, 1]} : vector<3x48x16xbf16> to vector<1x48x16xbf16>
    %282 = vector.shape_cast %281 : vector<1x48x16xbf16> to vector<48x16xbf16>
    %cst_137 = arith.constant dense<0.000000e+00> : vector<8x8x16xf32>
    %283 = tpu.matmul %280, %282, %cst_137 {dimension_numbers = #tpu.dot_dimension_numbers<[2], [0], [0, 1], [1], [0, 0, 0, 1, 1, 1], [], []>} : vector<8x8x48xbf16>, vector<48x16xbf16>, vector<8x8x16xf32> -> vector<8x8x16xf32>
    %284 = vector.extract_strided_slice %275 {offsets = [1, 0, 0], sizes = [8, 24, 16], strides = [1, 1, 1]} : vector<10x24x16xbf16> to vector<8x24x16xbf16>
    %285 = vector.extract_strided_slice %284 {offsets = [0, 7, 0], sizes = [8, 8, 16], strides = [1, 1, 1]} : vector<8x24x16xbf16> to vector<8x8x16xbf16>
    %286 = vector.extract_strided_slice %284 {offsets = [0, 8, 0], sizes = [8, 8, 16], strides = [1, 1, 1]} : vector<8x24x16xbf16> to vector<8x8x16xbf16>
    %287 = vector.extract_strided_slice %284 {offsets = [0, 9, 0], sizes = [8, 8, 16], strides = [1, 1, 1]} : vector<8x24x16xbf16> to vector<8x8x16xbf16>
    %288 = tpu.concatenate %285, %286, %287 in 2 : vector<8x8x16xbf16>, vector<8x8x16xbf16>, vector<8x8x16xbf16> -> vector<8x8x48xbf16>
    %289 = vector.extract_strided_slice %270 {offsets = [1, 0, 0], sizes = [1, 48, 16], strides = [1, 1, 1]} : vector<3x48x16xbf16> to vector<1x48x16xbf16>
    %290 = vector.shape_cast %289 : vector<1x48x16xbf16> to vector<48x16xbf16>
    %cst_138 = arith.constant dense<0.000000e+00> : vector<8x8x16xf32>
    %291 = tpu.matmul %288, %290, %cst_138 {dimension_numbers = #tpu.dot_dimension_numbers<[2], [0], [0, 1], [1], [0, 0, 0, 1, 1, 1], [], []>} : vector<8x8x48xbf16>, vector<48x16xbf16>, vector<8x8x16xf32> -> vector<8x8x16xf32>
    %292 = arith.addf %283, %291 : vector<8x8x16xf32>
    %293 = vector.extract_strided_slice %275 {offsets = [2, 0, 0], sizes = [8, 24, 16], strides = [1, 1, 1]} : vector<10x24x16xbf16> to vector<8x24x16xbf16>
    %294 = vector.extract_strided_slice %293 {offsets = [0, 7, 0], sizes = [8, 8, 16], strides = [1, 1, 1]} : vector<8x24x16xbf16> to vector<8x8x16xbf16>
    %295 = vector.extract_strided_slice %293 {offsets = [0, 8, 0], sizes = [8, 8, 16], strides = [1, 1, 1]} : vector<8x24x16xbf16> to vector<8x8x16xbf16>
    %296 = vector.extract_strided_slice %293 {offsets = [0, 9, 0], sizes = [8, 8, 16], strides = [1, 1, 1]} : vector<8x24x16xbf16> to vector<8x8x16xbf16>
    %297 = tpu.concatenate %294, %295, %296 in 2 : vector<8x8x16xbf16>, vector<8x8x16xbf16>, vector<8x8x16xbf16> -> vector<8x8x48xbf16>
    %298 = vector.extract_strided_slice %270 {offsets = [2, 0, 0], sizes = [1, 48, 16], strides = [1, 1, 1]} : vector<3x48x16xbf16> to vector<1x48x16xbf16>
    %299 = vector.shape_cast %298 : vector<1x48x16xbf16> to vector<48x16xbf16>
    %cst_139 = arith.constant dense<0.000000e+00> : vector<8x8x16xf32>
    %300 = tpu.matmul %297, %299, %cst_139 {dimension_numbers = #tpu.dot_dimension_numbers<[2], [0], [0, 1], [1], [0, 0, 0, 1, 1, 1], [], []>} : vector<8x8x48xbf16>, vector<48x16xbf16>, vector<8x8x16xf32> -> vector<8x8x16xf32>
    %301 = arith.addf %292, %300 : vector<8x8x16xf32>
    %302 = vector.shape_cast %272 : vector<1x16xf32> to vector<16xf32>
    %303 = vector.shape_cast %302 : vector<16xf32> to vector<1x1x16xf32>
    %304 = vector.broadcast %303 : vector<1x1x16xf32> to vector<8x8x16xf32>
    %305 = arith.addf %301, %304 : vector<8x8x16xf32>
    %cst_140 = arith.constant 0.000000e+00 : f32
    %306 = vector.broadcast %cst_140 : f32 to vector<8x8x16xf32>
    %307 = arith.cmpf oge, %305, %306 : vector<8x8x16xf32>
    %cst_141 = arith.constant 5.000000e-02 : f32
    %308 = vector.broadcast %cst_141 : f32 to vector<8x8x16xf32>
    %309 = arith.mulf %305, %308 : vector<8x8x16xf32>
    %310 = arith.select %307, %305, %309 : vector<8x8x16xi1>, vector<8x8x16xf32>
    %311 = vector.extract_strided_slice %310 {offsets = [0, 0, 0], sizes = [8, 8, 4], strides = [1, 1, 1]} : vector<8x8x16xf32> to vector<8x8x4xf32>
    %312 = vector.extract_strided_slice %310 {offsets = [0, 0, 4], sizes = [8, 8, 12], strides = [1, 1, 1]} : vector<8x8x16xf32> to vector<8x8x12xf32>
    %c1_142 = arith.constant 1 : index
    %c0_143 = arith.constant 0 : index
    %c0_144 = arith.constant 0 : index
    %c0_145 = arith.constant 0 : index
    %313 = vector.load %arg4[%c1_142, %c0_143, %c0_144, %c0_145] : memref<2x3x36x16xbf16, #tpu.memory_space<vmem>>, vector<1x3x36x16xbf16>
    %314 = vector.shape_cast %313 : vector<1x3x36x16xbf16> to vector<3x36x16xbf16>
    %c1_146 = arith.constant 1 : index
    %c0_147 = arith.constant 0 : index
    %c0_148 = arith.constant 0 : index
    %315 = vector.load %arg5[%c1_146, %c0_147, %c0_148] : memref<2x1x16xf32, #tpu.memory_space<vmem>>, vector<1x1x16xf32>
    %316 = vector.shape_cast %315 : vector<1x1x16xf32> to vector<1x16xf32>
    %317 = arith.truncf %312 : vector<8x8x12xf32> to vector<8x8x12xbf16>
    %c1_149 = arith.constant 1 : index
    %c8_150 = arith.constant 8 : index
    %c0_151 = arith.constant 0 : index
    %318 = vector.load %arg19[%c1_149, %c8_150, %c0_151] : memref<10x24x16xbf16, #tpu.memory_space<vmem>>, vector<8x8x12xbf16>
    tpu.vector_store %arg19[%c1_149, %c8_150, %c0_151], %317 {strides = array<i32>} : memref<10x24x16xbf16, #tpu.memory_space<vmem>>, vector<8x8x12xbf16>,
    %c0_152 = arith.constant 0 : index
    %c0_153 = arith.constant 0 : index
    %c0_154 = arith.constant 0 : index
    %319 = vector.load %arg19[%c0_152, %c0_153, %c0_154] : memref<10x24x16xbf16, #tpu.memory_space<vmem>>, vector<10x24x16xbf16>
    %320 = vector.extract_strided_slice %319 {offsets = [0, 0, 0], sizes = [10, 24, 12], strides = [1, 1, 1]} : vector<10x24x16xbf16> to vector<10x24x12xbf16>
    %321 = vector.extract_strided_slice %320 {offsets = [0, 0, 0], sizes = [8, 24, 12], strides = [1, 1, 1]} : vector<10x24x12xbf16> to vector<8x24x12xbf16>
    %322 = vector.extract_strided_slice %321 {offsets = [0, 7, 0], sizes = [8, 8, 12], strides = [1, 1, 1]} : vector<8x24x12xbf16> to vector<8x8x12xbf16>
    %323 = vector.extract_strided_slice %321 {offsets = [0, 8, 0], sizes = [8, 8, 12], strides = [1, 1, 1]} : vector<8x24x12xbf16> to vector<8x8x12xbf16>
    %324 = vector.extract_strided_slice %321 {offsets = [0, 9, 0], sizes = [8, 8, 12], strides = [1, 1, 1]} : vector<8x24x12xbf16> to vector<8x8x12xbf16>
    %325 = tpu.concatenate %322, %323, %324 in 2 : vector<8x8x12xbf16>, vector<8x8x12xbf16>, vector<8x8x12xbf16> -> vector<8x8x36xbf16>
    %326 = vector.extract_strided_slice %314 {offsets = [0, 0, 0], sizes = [1, 36, 16], strides = [1, 1, 1]} : vector<3x36x16xbf16> to vector<1x36x16xbf16>
    %327 = vector.shape_cast %326 : vector<1x36x16xbf16> to vector<36x16xbf16>
    %cst_155 = arith.constant dense<0.000000e+00> : vector<8x8x16xf32>
    %328 = tpu.matmul %325, %327, %cst_155 {dimension_numbers = #tpu.dot_dimension_numbers<[2], [0], [0, 1], [1], [0, 0, 0, 1, 1, 1], [], []>} : vector<8x8x36xbf16>, vector<36x16xbf16>, vector<8x8x16xf32> -> vector<8x8x16xf32>
    %329 = vector.extract_strided_slice %320 {offsets = [1, 0, 0], sizes = [8, 24, 12], strides = [1, 1, 1]} : vector<10x24x12xbf16> to vector<8x24x12xbf16>
    %330 = vector.extract_strided_slice %329 {offsets = [0, 7, 0], sizes = [8, 8, 12], strides = [1, 1, 1]} : vector<8x24x12xbf16> to vector<8x8x12xbf16>
    %331 = vector.extract_strided_slice %329 {offsets = [0, 8, 0], sizes = [8, 8, 12], strides = [1, 1, 1]} : vector<8x24x12xbf16> to vector<8x8x12xbf16>
    %332 = vector.extract_strided_slice %329 {offsets = [0, 9, 0], sizes = [8, 8, 12], strides = [1, 1, 1]} : vector<8x24x12xbf16> to vector<8x8x12xbf16>
    %333 = tpu.concatenate %330, %331, %332 in 2 : vector<8x8x12xbf16>, vector<8x8x12xbf16>, vector<8x8x12xbf16> -> vector<8x8x36xbf16>
    %334 = vector.extract_strided_slice %314 {offsets = [1, 0, 0], sizes = [1, 36, 16], strides = [1, 1, 1]} : vector<3x36x16xbf16> to vector<1x36x16xbf16>
    %335 = vector.shape_cast %334 : vector<1x36x16xbf16> to vector<36x16xbf16>
    %cst_156 = arith.constant dense<0.000000e+00> : vector<8x8x16xf32>
    %336 = tpu.matmul %333, %335, %cst_156 {dimension_numbers = #tpu.dot_dimension_numbers<[2], [0], [0, 1], [1], [0, 0, 0, 1, 1, 1], [], []>} : vector<8x8x36xbf16>, vector<36x16xbf16>, vector<8x8x16xf32> -> vector<8x8x16xf32>
    %337 = arith.addf %328, %336 : vector<8x8x16xf32>
    %338 = vector.extract_strided_slice %320 {offsets = [2, 0, 0], sizes = [8, 24, 12], strides = [1, 1, 1]} : vector<10x24x12xbf16> to vector<8x24x12xbf16>
    %339 = vector.extract_strided_slice %338 {offsets = [0, 7, 0], sizes = [8, 8, 12], strides = [1, 1, 1]} : vector<8x24x12xbf16> to vector<8x8x12xbf16>
    %340 = vector.extract_strided_slice %338 {offsets = [0, 8, 0], sizes = [8, 8, 12], strides = [1, 1, 1]} : vector<8x24x12xbf16> to vector<8x8x12xbf16>
    %341 = vector.extract_strided_slice %338 {offsets = [0, 9, 0], sizes = [8, 8, 12], strides = [1, 1, 1]} : vector<8x24x12xbf16> to vector<8x8x12xbf16>
    %342 = tpu.concatenate %339, %340, %341 in 2 : vector<8x8x12xbf16>, vector<8x8x12xbf16>, vector<8x8x12xbf16> -> vector<8x8x36xbf16>
    %343 = vector.extract_strided_slice %314 {offsets = [2, 0, 0], sizes = [1, 36, 16], strides = [1, 1, 1]} : vector<3x36x16xbf16> to vector<1x36x16xbf16>
    %344 = vector.shape_cast %343 : vector<1x36x16xbf16> to vector<36x16xbf16>
    %cst_157 = arith.constant dense<0.000000e+00> : vector<8x8x16xf32>
    %345 = tpu.matmul %342, %344, %cst_157 {dimension_numbers = #tpu.dot_dimension_numbers<[2], [0], [0, 1], [1], [0, 0, 0, 1, 1, 1], [], []>} : vector<8x8x36xbf16>, vector<36x16xbf16>, vector<8x8x16xf32> -> vector<8x8x16xf32>
    %346 = arith.addf %337, %345 : vector<8x8x16xf32>
    %347 = vector.shape_cast %316 : vector<1x16xf32> to vector<16xf32>
    %348 = vector.shape_cast %347 : vector<16xf32> to vector<1x1x16xf32>
    %349 = vector.broadcast %348 : vector<1x1x16xf32> to vector<8x8x16xf32>
    %350 = arith.addf %346, %349 : vector<8x8x16xf32>
    %cst_158 = arith.constant 0.000000e+00 : f32
    %351 = vector.broadcast %cst_158 : f32 to vector<8x8x16xf32>
    %352 = arith.cmpf oge, %350, %351 : vector<8x8x16xf32>
    %cst_159 = arith.constant 5.000000e-02 : f32
    %353 = vector.broadcast %cst_159 : f32 to vector<8x8x16xf32>
    %354 = arith.mulf %350, %353 : vector<8x8x16xf32>
    %355 = arith.select %352, %350, %354 : vector<8x8x16xi1>, vector<8x8x16xf32>
    %356 = vector.extract_strided_slice %355 {offsets = [0, 0, 0], sizes = [8, 8, 4], strides = [1, 1, 1]} : vector<8x8x16xf32> to vector<8x8x4xf32>
    %357 = vector.extract_strided_slice %355 {offsets = [0, 0, 4], sizes = [8, 8, 12], strides = [1, 1, 1]} : vector<8x8x16xf32> to vector<8x8x12xf32>
    %c1_160 = arith.constant 1 : index
    %c0_161 = arith.constant 0 : index
    %c0_162 = arith.constant 0 : index
    %c0_163 = arith.constant 0 : index
    %358 = vector.load %arg6[%c1_160, %c0_161, %c0_162, %c0_163] : memref<2x3x36x16xbf16, #tpu.memory_space<vmem>>, vector<1x3x36x16xbf16>
    %359 = vector.shape_cast %358 : vector<1x3x36x16xbf16> to vector<3x36x16xbf16>
    %c1_164 = arith.constant 1 : index
    %c0_165 = arith.constant 0 : index
    %c0_166 = arith.constant 0 : index
    %360 = vector.load %arg7[%c1_164, %c0_165, %c0_166] : memref<2x1x16xf32, #tpu.memory_space<vmem>>, vector<1x1x16xf32>
    %361 = vector.shape_cast %360 : vector<1x1x16xf32> to vector<1x16xf32>
    %362 = arith.truncf %357 : vector<8x8x12xf32> to vector<8x8x12xbf16>
    %c1_167 = arith.constant 1 : index
    %c8_168 = arith.constant 8 : index
    %c0_169 = arith.constant 0 : index
    %363 = vector.load %arg19[%c1_167, %c8_168, %c0_169] : memref<10x24x16xbf16, #tpu.memory_space<vmem>>, vector<8x8x12xbf16>
    tpu.vector_store %arg19[%c1_167, %c8_168, %c0_169], %362 {strides = array<i32>} : memref<10x24x16xbf16, #tpu.memory_space<vmem>>, vector<8x8x12xbf16>,
    %c0_170 = arith.constant 0 : index
    %c0_171 = arith.constant 0 : index
    %c0_172 = arith.constant 0 : index
    %364 = vector.load %arg19[%c0_170, %c0_171, %c0_172] : memref<10x24x16xbf16, #tpu.memory_space<vmem>>, vector<10x24x16xbf16>
    %365 = vector.extract_strided_slice %364 {offsets = [0, 0, 0], sizes = [10, 24, 12], strides = [1, 1, 1]} : vector<10x24x16xbf16> to vector<10x24x12xbf16>
    %366 = vector.extract_strided_slice %365 {offsets = [0, 0, 0], sizes = [8, 24, 12], strides = [1, 1, 1]} : vector<10x24x12xbf16> to vector<8x24x12xbf16>
    %367 = vector.extract_strided_slice %366 {offsets = [0, 7, 0], sizes = [8, 8, 12], strides = [1, 1, 1]} : vector<8x24x12xbf16> to vector<8x8x12xbf16>
    %368 = vector.extract_strided_slice %366 {offsets = [0, 8, 0], sizes = [8, 8, 12], strides = [1, 1, 1]} : vector<8x24x12xbf16> to vector<8x8x12xbf16>
    %369 = vector.extract_strided_slice %366 {offsets = [0, 9, 0], sizes = [8, 8, 12], strides = [1, 1, 1]} : vector<8x24x12xbf16> to vector<8x8x12xbf16>
    %370 = tpu.concatenate %367, %368, %369 in 2 : vector<8x8x12xbf16>, vector<8x8x12xbf16>, vector<8x8x12xbf16> -> vector<8x8x36xbf16>
    %371 = vector.extract_strided_slice %359 {offsets = [0, 0, 0], sizes = [1, 36, 16], strides = [1, 1, 1]} : vector<3x36x16xbf16> to vector<1x36x16xbf16>
    %372 = vector.shape_cast %371 : vector<1x36x16xbf16> to vector<36x16xbf16>
    %cst_173 = arith.constant dense<0.000000e+00> : vector<8x8x16xf32>
    %373 = tpu.matmul %370, %372, %cst_173 {dimension_numbers = #tpu.dot_dimension_numbers<[2], [0], [0, 1], [1], [0, 0, 0, 1, 1, 1], [], []>} : vector<8x8x36xbf16>, vector<36x16xbf16>, vector<8x8x16xf32> -> vector<8x8x16xf32>
    %374 = vector.extract_strided_slice %365 {offsets = [1, 0, 0], sizes = [8, 24, 12], strides = [1, 1, 1]} : vector<10x24x12xbf16> to vector<8x24x12xbf16>
    %375 = vector.extract_strided_slice %374 {offsets = [0, 7, 0], sizes = [8, 8, 12], strides = [1, 1, 1]} : vector<8x24x12xbf16> to vector<8x8x12xbf16>
    %376 = vector.extract_strided_slice %374 {offsets = [0, 8, 0], sizes = [8, 8, 12], strides = [1, 1, 1]} : vector<8x24x12xbf16> to vector<8x8x12xbf16>
    %377 = vector.extract_strided_slice %374 {offsets = [0, 9, 0], sizes = [8, 8, 12], strides = [1, 1, 1]} : vector<8x24x12xbf16> to vector<8x8x12xbf16>
    %378 = tpu.concatenate %375, %376, %377 in 2 : vector<8x8x12xbf16>, vector<8x8x12xbf16>, vector<8x8x12xbf16> -> vector<8x8x36xbf16>
    %379 = vector.extract_strided_slice %359 {offsets = [1, 0, 0], sizes = [1, 36, 16], strides = [1, 1, 1]} : vector<3x36x16xbf16> to vector<1x36x16xbf16>
    %380 = vector.shape_cast %379 : vector<1x36x16xbf16> to vector<36x16xbf16>
    %cst_174 = arith.constant dense<0.000000e+00> : vector<8x8x16xf32>
    %381 = tpu.matmul %378, %380, %cst_174 {dimension_numbers = #tpu.dot_dimension_numbers<[2], [0], [0, 1], [1], [0, 0, 0, 1, 1, 1], [], []>} : vector<8x8x36xbf16>, vector<36x16xbf16>, vector<8x8x16xf32> -> vector<8x8x16xf32>
    %382 = arith.addf %373, %381 : vector<8x8x16xf32>
    %383 = vector.extract_strided_slice %365 {offsets = [2, 0, 0], sizes = [8, 24, 12], strides = [1, 1, 1]} : vector<10x24x12xbf16> to vector<8x24x12xbf16>
    %384 = vector.extract_strided_slice %383 {offsets = [0, 7, 0], sizes = [8, 8, 12], strides = [1, 1, 1]} : vector<8x24x12xbf16> to vector<8x8x12xbf16>
    %385 = vector.extract_strided_slice %383 {offsets = [0, 8, 0], sizes = [8, 8, 12], strides = [1, 1, 1]} : vector<8x24x12xbf16> to vector<8x8x12xbf16>
    %386 = vector.extract_strided_slice %383 {offsets = [0, 9, 0], sizes = [8, 8, 12], strides = [1, 1, 1]} : vector<8x24x12xbf16> to vector<8x8x12xbf16>
    %387 = tpu.concatenate %384, %385, %386 in 2 : vector<8x8x12xbf16>, vector<8x8x12xbf16>, vector<8x8x12xbf16> -> vector<8x8x36xbf16>
    %388 = vector.extract_strided_slice %359 {offsets = [2, 0, 0], sizes = [1, 36, 16], strides = [1, 1, 1]} : vector<3x36x16xbf16> to vector<1x36x16xbf16>
    %389 = vector.shape_cast %388 : vector<1x36x16xbf16> to vector<36x16xbf16>
    %cst_175 = arith.constant dense<0.000000e+00> : vector<8x8x16xf32>
    %390 = tpu.matmul %387, %389, %cst_175 {dimension_numbers = #tpu.dot_dimension_numbers<[2], [0], [0, 1], [1], [0, 0, 0, 1, 1, 1], [], []>} : vector<8x8x36xbf16>, vector<36x16xbf16>, vector<8x8x16xf32> -> vector<8x8x16xf32>
    %391 = arith.addf %382, %390 : vector<8x8x16xf32>
    %392 = vector.shape_cast %361 : vector<1x16xf32> to vector<16xf32>
    %393 = vector.shape_cast %392 : vector<16xf32> to vector<1x1x16xf32>
    %394 = vector.broadcast %393 : vector<1x1x16xf32> to vector<8x8x16xf32>
    %395 = arith.addf %391, %394 : vector<8x8x16xf32>
    %cst_176 = arith.constant 0.000000e+00 : f32
    %396 = vector.broadcast %cst_176 : f32 to vector<8x8x16xf32>
    %397 = arith.cmpf oge, %395, %396 : vector<8x8x16xf32>
    %cst_177 = arith.constant 5.000000e-02 : f32
    %398 = vector.broadcast %cst_177 : f32 to vector<8x8x16xf32>
    %399 = arith.mulf %395, %398 : vector<8x8x16xf32>
    %400 = arith.select %397, %395, %399 : vector<8x8x16xi1>, vector<8x8x16xf32>
    %401 = vector.extract_strided_slice %400 {offsets = [0, 0, 0], sizes = [8, 8, 4], strides = [1, 1, 1]} : vector<8x8x16xf32> to vector<8x8x4xf32>
    %402 = vector.extract_strided_slice %400 {offsets = [0, 0, 4], sizes = [8, 8, 12], strides = [1, 1, 1]} : vector<8x8x16xf32> to vector<8x8x12xf32>
    %c1_178 = arith.constant 1 : index
    %c0_179 = arith.constant 0 : index
    %c0_180 = arith.constant 0 : index
    %c0_181 = arith.constant 0 : index
    %403 = vector.load %arg8[%c1_178, %c0_179, %c0_180, %c0_181] : memref<2x3x36x4xbf16, #tpu.memory_space<vmem>>, vector<1x3x36x4xbf16>
    %404 = vector.shape_cast %403 : vector<1x3x36x4xbf16> to vector<3x36x4xbf16>
    %c1_182 = arith.constant 1 : index
    %c0_183 = arith.constant 0 : index
    %c0_184 = arith.constant 0 : index
    %405 = vector.load %arg9[%c1_182, %c0_183, %c0_184] : memref<2x1x4xf32, #tpu.memory_space<vmem>>, vector<1x1x4xf32>
    %406 = vector.shape_cast %405 : vector<1x1x4xf32> to vector<1x4xf32>
    %407 = arith.truncf %402 : vector<8x8x12xf32> to vector<8x8x12xbf16>
    %c1_185 = arith.constant 1 : index
    %c8_186 = arith.constant 8 : index
    %c0_187 = arith.constant 0 : index
    %408 = vector.load %arg19[%c1_185, %c8_186, %c0_187] : memref<10x24x16xbf16, #tpu.memory_space<vmem>>, vector<8x8x12xbf16>
    tpu.vector_store %arg19[%c1_185, %c8_186, %c0_187], %407 {strides = array<i32>} : memref<10x24x16xbf16, #tpu.memory_space<vmem>>, vector<8x8x12xbf16>,
    %c0_188 = arith.constant 0 : index
    %c0_189 = arith.constant 0 : index
    %c0_190 = arith.constant 0 : index
    %409 = vector.load %arg19[%c0_188, %c0_189, %c0_190] : memref<10x24x16xbf16, #tpu.memory_space<vmem>>, vector<10x24x16xbf16>
    %410 = vector.extract_strided_slice %409 {offsets = [0, 0, 0], sizes = [10, 24, 12], strides = [1, 1, 1]} : vector<10x24x16xbf16> to vector<10x24x12xbf16>
    %411 = vector.extract_strided_slice %410 {offsets = [0, 0, 0], sizes = [8, 24, 12], strides = [1, 1, 1]} : vector<10x24x12xbf16> to vector<8x24x12xbf16>
    %412 = vector.extract_strided_slice %411 {offsets = [0, 7, 0], sizes = [8, 8, 12], strides = [1, 1, 1]} : vector<8x24x12xbf16> to vector<8x8x12xbf16>
    %413 = vector.extract_strided_slice %411 {offsets = [0, 8, 0], sizes = [8, 8, 12], strides = [1, 1, 1]} : vector<8x24x12xbf16> to vector<8x8x12xbf16>
    %414 = vector.extract_strided_slice %411 {offsets = [0, 9, 0], sizes = [8, 8, 12], strides = [1, 1, 1]} : vector<8x24x12xbf16> to vector<8x8x12xbf16>
    %415 = tpu.concatenate %412, %413, %414 in 2 : vector<8x8x12xbf16>, vector<8x8x12xbf16>, vector<8x8x12xbf16> -> vector<8x8x36xbf16>
    %416 = vector.extract_strided_slice %404 {offsets = [0, 0, 0], sizes = [1, 36, 4], strides = [1, 1, 1]} : vector<3x36x4xbf16> to vector<1x36x4xbf16>
    %417 = vector.shape_cast %416 : vector<1x36x4xbf16> to vector<36x4xbf16>
    %cst_191 = arith.constant dense<0.000000e+00> : vector<8x8x4xf32>
    %418 = tpu.matmul %415, %417, %cst_191 {dimension_numbers = #tpu.dot_dimension_numbers<[2], [0], [0, 1], [1], [0, 0, 0, 1, 1, 1], [], []>} : vector<8x8x36xbf16>, vector<36x4xbf16>, vector<8x8x4xf32> -> vector<8x8x4xf32>
    %419 = vector.extract_strided_slice %410 {offsets = [1, 0, 0], sizes = [8, 24, 12], strides = [1, 1, 1]} : vector<10x24x12xbf16> to vector<8x24x12xbf16>
    %420 = vector.extract_strided_slice %419 {offsets = [0, 7, 0], sizes = [8, 8, 12], strides = [1, 1, 1]} : vector<8x24x12xbf16> to vector<8x8x12xbf16>
    %421 = vector.extract_strided_slice %419 {offsets = [0, 8, 0], sizes = [8, 8, 12], strides = [1, 1, 1]} : vector<8x24x12xbf16> to vector<8x8x12xbf16>
    %422 = vector.extract_strided_slice %419 {offsets = [0, 9, 0], sizes = [8, 8, 12], strides = [1, 1, 1]} : vector<8x24x12xbf16> to vector<8x8x12xbf16>
    %423 = tpu.concatenate %420, %421, %422 in 2 : vector<8x8x12xbf16>, vector<8x8x12xbf16>, vector<8x8x12xbf16> -> vector<8x8x36xbf16>
    %424 = vector.extract_strided_slice %404 {offsets = [1, 0, 0], sizes = [1, 36, 4], strides = [1, 1, 1]} : vector<3x36x4xbf16> to vector<1x36x4xbf16>
    %425 = vector.shape_cast %424 : vector<1x36x4xbf16> to vector<36x4xbf16>
    %cst_192 = arith.constant dense<0.000000e+00> : vector<8x8x4xf32>
    %426 = tpu.matmul %423, %425, %cst_192 {dimension_numbers = #tpu.dot_dimension_numbers<[2], [0], [0, 1], [1], [0, 0, 0, 1, 1, 1], [], []>} : vector<8x8x36xbf16>, vector<36x4xbf16>, vector<8x8x4xf32> -> vector<8x8x4xf32>
    %427 = arith.addf %418, %426 : vector<8x8x4xf32>
    %428 = vector.extract_strided_slice %410 {offsets = [2, 0, 0], sizes = [8, 24, 12], strides = [1, 1, 1]} : vector<10x24x12xbf16> to vector<8x24x12xbf16>
    %429 = vector.extract_strided_slice %428 {offsets = [0, 7, 0], sizes = [8, 8, 12], strides = [1, 1, 1]} : vector<8x24x12xbf16> to vector<8x8x12xbf16>
    %430 = vector.extract_strided_slice %428 {offsets = [0, 8, 0], sizes = [8, 8, 12], strides = [1, 1, 1]} : vector<8x24x12xbf16> to vector<8x8x12xbf16>
    %431 = vector.extract_strided_slice %428 {offsets = [0, 9, 0], sizes = [8, 8, 12], strides = [1, 1, 1]} : vector<8x24x12xbf16> to vector<8x8x12xbf16>
    %432 = tpu.concatenate %429, %430, %431 in 2 : vector<8x8x12xbf16>, vector<8x8x12xbf16>, vector<8x8x12xbf16> -> vector<8x8x36xbf16>
    %433 = vector.extract_strided_slice %404 {offsets = [2, 0, 0], sizes = [1, 36, 4], strides = [1, 1, 1]} : vector<3x36x4xbf16> to vector<1x36x4xbf16>
    %434 = vector.shape_cast %433 : vector<1x36x4xbf16> to vector<36x4xbf16>
    %cst_193 = arith.constant dense<0.000000e+00> : vector<8x8x4xf32>
    %435 = tpu.matmul %432, %434, %cst_193 {dimension_numbers = #tpu.dot_dimension_numbers<[2], [0], [0, 1], [1], [0, 0, 0, 1, 1, 1], [], []>} : vector<8x8x36xbf16>, vector<36x4xbf16>, vector<8x8x4xf32> -> vector<8x8x4xf32>
    %436 = arith.addf %427, %435 : vector<8x8x4xf32>
    %437 = vector.shape_cast %406 : vector<1x4xf32> to vector<4xf32>
    %438 = vector.shape_cast %437 : vector<4xf32> to vector<1x1x4xf32>
    %439 = vector.broadcast %438 : vector<1x1x4xf32> to vector<8x8x4xf32>
    %440 = arith.addf %436, %439 : vector<8x8x4xf32>
    %cst_194 = arith.constant 0.000000e+00 : f32
    %441 = vector.broadcast %cst_194 : f32 to vector<8x8x4xf32>
    %442 = arith.cmpf oge, %440, %441 : vector<8x8x4xf32>
    %cst_195 = arith.constant 5.000000e-02 : f32
    %443 = vector.broadcast %cst_195 : f32 to vector<8x8x4xf32>
    %444 = arith.mulf %440, %443 : vector<8x8x4xf32>
    %445 = arith.select %442, %440, %444 : vector<8x8x4xi1>, vector<8x8x4xf32>
    %cst_196 = arith.constant dense<0.000000e+00> : vector<8x4xf32>
    %446 = vector.multi_reduction <add>, %311, %cst_196 [0] : vector<8x8x4xf32> to vector<8x4xf32>
    %cst_197 = arith.constant dense<0.000000e+00> : vector<4xf32>
    %447 = vector.multi_reduction <add>, %446, %cst_197 [0] : vector<8x4xf32> to vector<4xf32>
    %448 = vector.shape_cast %447 : vector<4xf32> to vector<1x4xf32>
    %cst_198 = arith.constant 1.562500e-02 : f32
    %449 = vector.broadcast %cst_198 : f32 to vector<1x4xf32>
    %450 = arith.mulf %448, %449 : vector<1x4xf32>
    %cst_199 = arith.constant dense<0.000000e+00> : vector<8x4xf32>
    %451 = vector.multi_reduction <add>, %356, %cst_199 [0] : vector<8x8x4xf32> to vector<8x4xf32>
    %cst_200 = arith.constant dense<0.000000e+00> : vector<4xf32>
    %452 = vector.multi_reduction <add>, %451, %cst_200 [0] : vector<8x4xf32> to vector<4xf32>
    %453 = vector.shape_cast %452 : vector<4xf32> to vector<1x4xf32>
    %cst_201 = arith.constant 1.562500e-02 : f32
    %454 = vector.broadcast %cst_201 : f32 to vector<1x4xf32>
    %455 = arith.mulf %453, %454 : vector<1x4xf32>
    %cst_202 = arith.constant dense<0.000000e+00> : vector<8x4xf32>
    %456 = vector.multi_reduction <add>, %401, %cst_202 [0] : vector<8x8x4xf32> to vector<8x4xf32>
    %cst_203 = arith.constant dense<0.000000e+00> : vector<4xf32>
    %457 = vector.multi_reduction <add>, %456, %cst_203 [0] : vector<8x4xf32> to vector<4xf32>
    %458 = vector.shape_cast %457 : vector<4xf32> to vector<1x4xf32>
    %cst_204 = arith.constant 1.562500e-02 : f32
    %459 = vector.broadcast %cst_204 : f32 to vector<1x4xf32>
    %460 = arith.mulf %458, %459 : vector<1x4xf32>
    %cst_205 = arith.constant dense<0.000000e+00> : vector<8x4xf32>
    %461 = vector.multi_reduction <add>, %445, %cst_205 [0] : vector<8x8x4xf32> to vector<8x4xf32>
    %cst_206 = arith.constant dense<0.000000e+00> : vector<4xf32>
    %462 = vector.multi_reduction <add>, %461, %cst_206 [0] : vector<8x4xf32> to vector<4xf32>
    %463 = vector.shape_cast %462 : vector<4xf32> to vector<1x4xf32>
    %cst_207 = arith.constant 1.562500e-02 : f32
    %464 = vector.broadcast %cst_207 : f32 to vector<1x4xf32>
    %465 = arith.mulf %463, %464 : vector<1x4xf32>
    %466 = tpu.concatenate %450, %455, %460, %465 in 1 : vector<1x4xf32>, vector<1x4xf32>, vector<1x4xf32>, vector<1x4xf32> -> vector<1x16xf32>
    %467 = arith.truncf %466 : vector<1x16xf32> to vector<1x16xbf16>
    %c1_208 = arith.constant 1 : index
    %c0_209 = arith.constant 0 : index
    %c0_210 = arith.constant 0 : index
    %468 = vector.load %arg10[%c1_208, %c0_209, %c0_210] : memref<2x16x2xbf16, #tpu.memory_space<vmem>>, vector<1x16x2xbf16>
    %469 = vector.shape_cast %468 : vector<1x16x2xbf16> to vector<16x2xbf16>
    %cst_211 = arith.constant dense<0.000000e+00> : vector<1x2xf32>
    %470 = tpu.matmul %467, %469, %cst_211 {dimension_numbers = #tpu.dot_dimension_numbers<[1], [0], [0], [1], [0, 0, 1, 1], [], []>} : vector<1x16xbf16>, vector<16x2xbf16>, vector<1x2xf32> -> vector<1x2xf32>
    %c1_212 = arith.constant 1 : index
    %c0_213 = arith.constant 0 : index
    %c0_214 = arith.constant 0 : index
    %471 = vector.load %arg11[%c1_212, %c0_213, %c0_214] : memref<2x1x2xf32, #tpu.memory_space<vmem>>, vector<1x1x2xf32>
    %472 = vector.shape_cast %471 : vector<1x1x2xf32> to vector<1x2xf32>
    %473 = arith.addf %470, %472 : vector<1x2xf32>
    %cst_215 = arith.constant 0.000000e+00 : f32
    %474 = vector.broadcast %cst_215 : f32 to vector<1x2xf32>
    %475 = arith.maximumf %473, %474 : vector<1x2xf32>
    %476 = arith.truncf %475 : vector<1x2xf32> to vector<1x2xbf16>
    %c1_216 = arith.constant 1 : index
    %c0_217 = arith.constant 0 : index
    %c0_218 = arith.constant 0 : index
    %477 = vector.load %arg12[%c1_216, %c0_217, %c0_218] : memref<2x2x16xbf16, #tpu.memory_space<vmem>>, vector<1x2x16xbf16>
    %478 = vector.shape_cast %477 : vector<1x2x16xbf16> to vector<2x16xbf16>
    %cst_219 = arith.constant dense<0.000000e+00> : vector<1x16xf32>
    %479 = tpu.matmul %476, %478, %cst_219 {dimension_numbers = #tpu.dot_dimension_numbers<[1], [0], [0], [1], [0, 0, 1, 1], [], []>} : vector<1x2xbf16>, vector<2x16xbf16>, vector<1x16xf32> -> vector<1x16xf32>
    %c1_220 = arith.constant 1 : index
    %c0_221 = arith.constant 0 : index
    %c0_222 = arith.constant 0 : index
    %480 = vector.load %arg13[%c1_220, %c0_221, %c0_222] : memref<2x1x16xf32, #tpu.memory_space<vmem>>, vector<1x1x16xf32>
    %481 = vector.shape_cast %480 : vector<1x1x16xf32> to vector<1x16xf32>
    %482 = arith.addf %479, %481 : vector<1x16xf32>
    %483 = arith.negf %482 : vector<1x16xf32>
    %484 = math.exp %483 : vector<1x16xf32>
    %cst_223 = arith.constant 1.000000e+00 : f32
    %485 = vector.broadcast %cst_223 : f32 to vector<1x16xf32>
    %486 = arith.addf %485, %484 : vector<1x16xf32>
    %487 = arith.divf %485, %486 : vector<1x16xf32>
    %c1_224 = arith.constant 1 : index
    %c0_225 = arith.constant 0 : index
    %c0_226 = arith.constant 0 : index
    %488 = vector.load %arg14[%c1_224, %c0_225, %c0_226] : memref<2x16x16xbf16, #tpu.memory_space<vmem>>, vector<1x16x16xbf16>
    %489 = vector.shape_cast %488 : vector<1x16x16xbf16> to vector<16x16xbf16>
    %490 = vector.extract_strided_slice %487 {offsets = [0, 0], sizes = [1, 4], strides = [1, 1]} : vector<1x16xf32> to vector<1x4xf32>
    %491 = vector.shape_cast %490 : vector<1x4xf32> to vector<1x1x4xf32>
    %492 = vector.broadcast %491 : vector<1x1x4xf32> to vector<8x8x4xf32>
    %493 = arith.mulf %311, %492 : vector<8x8x4xf32>
    %494 = arith.truncf %493 : vector<8x8x4xf32> to vector<8x8x4xbf16>
    %495 = vector.extract_strided_slice %489 {offsets = [0, 0], sizes = [4, 16], strides = [1, 1]} : vector<16x16xbf16> to vector<4x16xbf16>
    %cst_227 = arith.constant dense<0.000000e+00> : vector<8x8x16xf32>
    %496 = tpu.matmul %494, %495, %cst_227 {dimension_numbers = #tpu.dot_dimension_numbers<[2], [0], [0, 1], [1], [0, 0, 0, 1, 1, 1], [], []>} : vector<8x8x4xbf16>, vector<4x16xbf16>, vector<8x8x16xf32> -> vector<8x8x16xf32>
    %497 = vector.extract_strided_slice %487 {offsets = [0, 4], sizes = [1, 4], strides = [1, 1]} : vector<1x16xf32> to vector<1x4xf32>
    %498 = vector.shape_cast %497 : vector<1x4xf32> to vector<1x1x4xf32>
    %499 = vector.broadcast %498 : vector<1x1x4xf32> to vector<8x8x4xf32>
    %500 = arith.mulf %356, %499 : vector<8x8x4xf32>
    %501 = arith.truncf %500 : vector<8x8x4xf32> to vector<8x8x4xbf16>
    %502 = vector.extract_strided_slice %489 {offsets = [4, 0], sizes = [4, 16], strides = [1, 1]} : vector<16x16xbf16> to vector<4x16xbf16>
    %cst_228 = arith.constant dense<0.000000e+00> : vector<8x8x16xf32>
    %503 = tpu.matmul %501, %502, %cst_228 {dimension_numbers = #tpu.dot_dimension_numbers<[2], [0], [0, 1], [1], [0, 0, 0, 1, 1, 1], [], []>} : vector<8x8x4xbf16>, vector<4x16xbf16>, vector<8x8x16xf32> -> vector<8x8x16xf32>
    %504 = arith.addf %496, %503 : vector<8x8x16xf32>
    %505 = vector.extract_strided_slice %487 {offsets = [0, 8], sizes = [1, 4], strides = [1, 1]} : vector<1x16xf32> to vector<1x4xf32>
    %506 = vector.shape_cast %505 : vector<1x4xf32> to vector<1x1x4xf32>
    %507 = vector.broadcast %506 : vector<1x1x4xf32> to vector<8x8x4xf32>
    %508 = arith.mulf %401, %507 : vector<8x8x4xf32>
    %509 = arith.truncf %508 : vector<8x8x4xf32> to vector<8x8x4xbf16>
    %510 = vector.extract_strided_slice %489 {offsets = [8, 0], sizes = [4, 16], strides = [1, 1]} : vector<16x16xbf16> to vector<4x16xbf16>
    %cst_229 = arith.constant dense<0.000000e+00> : vector<8x8x16xf32>
    %511 = tpu.matmul %509, %510, %cst_229 {dimension_numbers = #tpu.dot_dimension_numbers<[2], [0], [0, 1], [1], [0, 0, 0, 1, 1, 1], [], []>} : vector<8x8x4xbf16>, vector<4x16xbf16>, vector<8x8x16xf32> -> vector<8x8x16xf32>
    %512 = arith.addf %504, %511 : vector<8x8x16xf32>
    %513 = vector.extract_strided_slice %487 {offsets = [0, 12], sizes = [1, 4], strides = [1, 1]} : vector<1x16xf32> to vector<1x4xf32>
    %514 = vector.shape_cast %513 : vector<1x4xf32> to vector<1x1x4xf32>
    %515 = vector.broadcast %514 : vector<1x1x4xf32> to vector<8x8x4xf32>
    %516 = arith.mulf %445, %515 : vector<8x8x4xf32>
    %517 = arith.truncf %516 : vector<8x8x4xf32> to vector<8x8x4xbf16>
    %518 = vector.extract_strided_slice %489 {offsets = [12, 0], sizes = [4, 16], strides = [1, 1]} : vector<16x16xbf16> to vector<4x16xbf16>
    %cst_230 = arith.constant dense<0.000000e+00> : vector<8x8x16xf32>
    %519 = tpu.matmul %517, %518, %cst_230 {dimension_numbers = #tpu.dot_dimension_numbers<[2], [0], [0, 1], [1], [0, 0, 0, 1, 1, 1], [], []>} : vector<8x8x4xbf16>, vector<4x16xbf16>, vector<8x8x16xf32> -> vector<8x8x16xf32>
    %520 = arith.addf %512, %519 : vector<8x8x16xf32>
    %c1_231 = arith.constant 1 : index
    %c0_232 = arith.constant 0 : index
    %c0_233 = arith.constant 0 : index
    %521 = vector.load %arg15[%c1_231, %c0_232, %c0_233] : memref<2x1x16xf32, #tpu.memory_space<vmem>>, vector<1x1x16xf32>
    %522 = vector.shape_cast %521 : vector<1x1x16xf32> to vector<1x16xf32>
    %523 = vector.shape_cast %522 : vector<1x16xf32> to vector<16xf32>
    %524 = vector.shape_cast %523 : vector<16xf32> to vector<1x1x16xf32>
    %525 = vector.broadcast %524 : vector<1x1x16xf32> to vector<8x8x16xf32>
    %526 = arith.addf %520, %525 : vector<8x8x16xf32>
    %527 = arith.addf %526, %268 : vector<8x8x16xf32>
    %c0_234 = arith.constant 0 : index
    %c0_235 = arith.constant 0 : index
    %c0_236 = arith.constant 0 : index
    %528 = vector.load %arg16[%c0_234, %c0_235, %c0_236] : memref<3x48x16xbf16, #tpu.memory_space<vmem>>, vector<3x48x16xbf16>
    %c0_237 = arith.constant 0 : index
    %c0_238 = arith.constant 0 : index
    %529 = vector.load %arg17[%c0_237, %c0_238] : memref<1x16xf32, #tpu.memory_space<vmem>>, vector<1x16xf32>
    %530 = arith.truncf %527 : vector<8x8x16xf32> to vector<8x8x16xbf16>
    %c1_239 = arith.constant 1 : index
    %c8_240 = arith.constant 8 : index
    %c0_241 = arith.constant 0 : index
    %531 = vector.load %arg19[%c1_239, %c8_240, %c0_241] : memref<10x24x16xbf16, #tpu.memory_space<vmem>>, vector<8x8x16xbf16>
    tpu.vector_store %arg19[%c1_239, %c8_240, %c0_241], %530 {strides = array<i32>} : memref<10x24x16xbf16, #tpu.memory_space<vmem>>, vector<8x8x16xbf16>,
    %c0_242 = arith.constant 0 : index
    %c0_243 = arith.constant 0 : index
    %c0_244 = arith.constant 0 : index
    %532 = vector.load %arg19[%c0_242, %c0_243, %c0_244] : memref<10x24x16xbf16, #tpu.memory_space<vmem>>, vector<10x24x16xbf16>
    %533 = vector.extract_strided_slice %532 {offsets = [0, 0, 0], sizes = [8, 24, 16], strides = [1, 1, 1]} : vector<10x24x16xbf16> to vector<8x24x16xbf16>
    %534 = vector.extract_strided_slice %533 {offsets = [0, 7, 0], sizes = [8, 8, 16], strides = [1, 1, 1]} : vector<8x24x16xbf16> to vector<8x8x16xbf16>
    %535 = vector.extract_strided_slice %533 {offsets = [0, 8, 0], sizes = [8, 8, 16], strides = [1, 1, 1]} : vector<8x24x16xbf16> to vector<8x8x16xbf16>
    %536 = vector.extract_strided_slice %533 {offsets = [0, 9, 0], sizes = [8, 8, 16], strides = [1, 1, 1]} : vector<8x24x16xbf16> to vector<8x8x16xbf16>
    %537 = tpu.concatenate %534, %535, %536 in 2 : vector<8x8x16xbf16>, vector<8x8x16xbf16>, vector<8x8x16xbf16> -> vector<8x8x48xbf16>
    %538 = vector.extract_strided_slice %528 {offsets = [0, 0, 0], sizes = [1, 48, 16], strides = [1, 1, 1]} : vector<3x48x16xbf16> to vector<1x48x16xbf16>
    %539 = vector.shape_cast %538 : vector<1x48x16xbf16> to vector<48x16xbf16>
    %cst_245 = arith.constant dense<0.000000e+00> : vector<8x8x16xf32>
    %540 = tpu.matmul %537, %539, %cst_245 {dimension_numbers = #tpu.dot_dimension_numbers<[2], [0], [0, 1], [1], [0, 0, 0, 1, 1, 1], [], []>} : vector<8x8x48xbf16>, vector<48x16xbf16>, vector<8x8x16xf32> -> vector<8x8x16xf32>
    %541 = vector.extract_strided_slice %532 {offsets = [1, 0, 0], sizes = [8, 24, 16], strides = [1, 1, 1]} : vector<10x24x16xbf16> to vector<8x24x16xbf16>
    %542 = vector.extract_strided_slice %541 {offsets = [0, 7, 0], sizes = [8, 8, 16], strides = [1, 1, 1]} : vector<8x24x16xbf16> to vector<8x8x16xbf16>
    %543 = vector.extract_strided_slice %541 {offsets = [0, 8, 0], sizes = [8, 8, 16], strides = [1, 1, 1]} : vector<8x24x16xbf16> to vector<8x8x16xbf16>
    %544 = vector.extract_strided_slice %541 {offsets = [0, 9, 0], sizes = [8, 8, 16], strides = [1, 1, 1]} : vector<8x24x16xbf16> to vector<8x8x16xbf16>
    %545 = tpu.concatenate %542, %543, %544 in 2 : vector<8x8x16xbf16>, vector<8x8x16xbf16>, vector<8x8x16xbf16> -> vector<8x8x48xbf16>
    %546 = vector.extract_strided_slice %528 {offsets = [1, 0, 0], sizes = [1, 48, 16], strides = [1, 1, 1]} : vector<3x48x16xbf16> to vector<1x48x16xbf16>
    %547 = vector.shape_cast %546 : vector<1x48x16xbf16> to vector<48x16xbf16>
    %cst_246 = arith.constant dense<0.000000e+00> : vector<8x8x16xf32>
    %548 = tpu.matmul %545, %547, %cst_246 {dimension_numbers = #tpu.dot_dimension_numbers<[2], [0], [0, 1], [1], [0, 0, 0, 1, 1, 1], [], []>} : vector<8x8x48xbf16>, vector<48x16xbf16>, vector<8x8x16xf32> -> vector<8x8x16xf32>
    %549 = arith.addf %540, %548 : vector<8x8x16xf32>
    %550 = vector.extract_strided_slice %532 {offsets = [2, 0, 0], sizes = [8, 24, 16], strides = [1, 1, 1]} : vector<10x24x16xbf16> to vector<8x24x16xbf16>
    %551 = vector.extract_strided_slice %550 {offsets = [0, 7, 0], sizes = [8, 8, 16], strides = [1, 1, 1]} : vector<8x24x16xbf16> to vector<8x8x16xbf16>
    %552 = vector.extract_strided_slice %550 {offsets = [0, 8, 0], sizes = [8, 8, 16], strides = [1, 1, 1]} : vector<8x24x16xbf16> to vector<8x8x16xbf16>
    %553 = vector.extract_strided_slice %550 {offsets = [0, 9, 0], sizes = [8, 8, 16], strides = [1, 1, 1]} : vector<8x24x16xbf16> to vector<8x8x16xbf16>
    %554 = tpu.concatenate %551, %552, %553 in 2 : vector<8x8x16xbf16>, vector<8x8x16xbf16>, vector<8x8x16xbf16> -> vector<8x8x48xbf16>
    %555 = vector.extract_strided_slice %528 {offsets = [2, 0, 0], sizes = [1, 48, 16], strides = [1, 1, 1]} : vector<3x48x16xbf16> to vector<1x48x16xbf16>
    %556 = vector.shape_cast %555 : vector<1x48x16xbf16> to vector<48x16xbf16>
    %cst_247 = arith.constant dense<0.000000e+00> : vector<8x8x16xf32>
    %557 = tpu.matmul %554, %556, %cst_247 {dimension_numbers = #tpu.dot_dimension_numbers<[2], [0], [0, 1], [1], [0, 0, 0, 1, 1, 1], [], []>} : vector<8x8x48xbf16>, vector<48x16xbf16>, vector<8x8x16xf32> -> vector<8x8x16xf32>
    %558 = arith.addf %549, %557 : vector<8x8x16xf32>
    %559 = vector.shape_cast %529 : vector<1x16xf32> to vector<16xf32>
    %560 = vector.shape_cast %559 : vector<16xf32> to vector<1x1x16xf32>
    %561 = vector.broadcast %560 : vector<1x1x16xf32> to vector<8x8x16xf32>
    %562 = arith.addf %558, %561 : vector<8x8x16xf32>
    %563 = arith.addf %562, %9 : vector<8x8x16xf32>
    %c0_248 = arith.constant 0 : index
    %c0_249 = arith.constant 0 : index
    %c0_250 = arith.constant 0 : index
    %c0_251 = arith.constant 0 : index
    %564 = vector.load %arg18[%c0_248, %c0_249, %c0_250, %c0_251] : memref<1x8x8x16xf32, #tpu.memory_space<vmem>>, vector<1x8x8x16xf32>
    %565 = vector.shape_cast %564 : vector<1x8x8x16xf32> to vector<8x8x16xf32>
    %566 = vector.shape_cast %563 : vector<8x8x16xf32> to vector<1x8x8x16xf32>
    tpu.vector_store %arg18[%c0_248, %c0_249, %c0_250, %c0_251], %566 {strides = array<i32>} : memref<1x8x8x16xf32, #tpu.memory_space<vmem>>, vector<1x8x8x16xf32>,
    return
  }
  func.func @transform_0(%arg0: i32) -> (i32, i32, i32, i32) {
    %c0_i32 = arith.constant 0 : i32
    %c0_i32_0 = arith.constant 0 : i32
    %c0_i32_1 = arith.constant 0 : i32
    %c0_i32_2 = arith.constant 0 : i32
    return %arg0, %c0_i32, %c0_i32_0, %c0_i32_1 : i32, i32, i32, i32
  }
  func.func @transform_1(%arg0: i32) -> (i32, i32, i32, i32) {
    %c0_i32 = arith.constant 0 : i32
    %c0_i32_0 = arith.constant 0 : i32
    %c0_i32_1 = arith.constant 0 : i32
    %c0_i32_2 = arith.constant 0 : i32
    %c0_i32_3 = arith.constant 0 : i32
    return %c0_i32, %c0_i32_0, %c0_i32_1, %c0_i32_2 : i32, i32, i32, i32
  }
  func.func @transform_2(%arg0: i32) -> (i32, i32, i32) {
    %c0_i32 = arith.constant 0 : i32
    %c0_i32_0 = arith.constant 0 : i32
    %c0_i32_1 = arith.constant 0 : i32
    %c0_i32_2 = arith.constant 0 : i32
    return %c0_i32, %c0_i32_0, %c0_i32_1 : i32, i32, i32
  }
  func.func @transform_3(%arg0: i32) -> (i32, i32, i32, i32) {
    %c0_i32 = arith.constant 0 : i32
    %c0_i32_0 = arith.constant 0 : i32
    %c0_i32_1 = arith.constant 0 : i32
    %c0_i32_2 = arith.constant 0 : i32
    %c0_i32_3 = arith.constant 0 : i32
    return %c0_i32, %c0_i32_0, %c0_i32_1, %c0_i32_2 : i32, i32, i32, i32
  }
  func.func @transform_4(%arg0: i32) -> (i32, i32, i32) {
    %c0_i32 = arith.constant 0 : i32
    %c0_i32_0 = arith.constant 0 : i32
    %c0_i32_1 = arith.constant 0 : i32
    %c0_i32_2 = arith.constant 0 : i32
    return %c0_i32, %c0_i32_0, %c0_i32_1 : i32, i32, i32
  }
  func.func @transform_5(%arg0: i32) -> (i32, i32, i32, i32) {
    %c0_i32 = arith.constant 0 : i32
    %c0_i32_0 = arith.constant 0 : i32
    %c0_i32_1 = arith.constant 0 : i32
    %c0_i32_2 = arith.constant 0 : i32
    %c0_i32_3 = arith.constant 0 : i32
    return %c0_i32, %c0_i32_0, %c0_i32_1, %c0_i32_2 : i32, i32, i32, i32
  }
  func.func @transform_6(%arg0: i32) -> (i32, i32, i32) {
    %c0_i32 = arith.constant 0 : i32
    %c0_i32_0 = arith.constant 0 : i32
    %c0_i32_1 = arith.constant 0 : i32
    %c0_i32_2 = arith.constant 0 : i32
    return %c0_i32, %c0_i32_0, %c0_i32_1 : i32, i32, i32
  }
  func.func @transform_7(%arg0: i32) -> (i32, i32, i32, i32) {
    %c0_i32 = arith.constant 0 : i32
    %c0_i32_0 = arith.constant 0 : i32
    %c0_i32_1 = arith.constant 0 : i32
    %c0_i32_2 = arith.constant 0 : i32
    %c0_i32_3 = arith.constant 0 : i32
    return %c0_i32, %c0_i32_0, %c0_i32_1, %c0_i32_2 : i32, i32, i32, i32
  }
  func.func @transform_8(%arg0: i32) -> (i32, i32, i32) {
    %c0_i32 = arith.constant 0 : i32
    %c0_i32_0 = arith.constant 0 : i32
    %c0_i32_1 = arith.constant 0 : i32
    %c0_i32_2 = arith.constant 0 : i32
    return %c0_i32, %c0_i32_0, %c0_i32_1 : i32, i32, i32
  }
  func.func @transform_9(%arg0: i32) -> (i32, i32, i32) {
    %c0_i32 = arith.constant 0 : i32
    %c0_i32_0 = arith.constant 0 : i32
    %c0_i32_1 = arith.constant 0 : i32
    %c0_i32_2 = arith.constant 0 : i32
    return %c0_i32, %c0_i32_0, %c0_i32_1 : i32, i32, i32
  }
  func.func @transform_10(%arg0: i32) -> (i32, i32, i32) {
    %c0_i32 = arith.constant 0 : i32
    %c0_i32_0 = arith.constant 0 : i32
    %c0_i32_1 = arith.constant 0 : i32
    %c0_i32_2 = arith.constant 0 : i32
    return %c0_i32, %c0_i32_0, %c0_i32_1 : i32, i32, i32
  }
  func.func @transform_11(%arg0: i32) -> (i32, i32, i32) {
    %c0_i32 = arith.constant 0 : i32
    %c0_i32_0 = arith.constant 0 : i32
    %c0_i32_1 = arith.constant 0 : i32
    %c0_i32_2 = arith.constant 0 : i32
    return %c0_i32, %c0_i32_0, %c0_i32_1 : i32, i32, i32
  }
  func.func @transform_12(%arg0: i32) -> (i32, i32, i32) {
    %c0_i32 = arith.constant 0 : i32
    %c0_i32_0 = arith.constant 0 : i32
    %c0_i32_1 = arith.constant 0 : i32
    %c0_i32_2 = arith.constant 0 : i32
    return %c0_i32, %c0_i32_0, %c0_i32_1 : i32, i32, i32
  }
  func.func @transform_13(%arg0: i32) -> (i32, i32, i32) {
    %c0_i32 = arith.constant 0 : i32
    %c0_i32_0 = arith.constant 0 : i32
    %c0_i32_1 = arith.constant 0 : i32
    %c0_i32_2 = arith.constant 0 : i32
    return %c0_i32, %c0_i32_0, %c0_i32_1 : i32, i32, i32
  }
  func.func @transform_14(%arg0: i32) -> (i32, i32, i32) {
    %c0_i32 = arith.constant 0 : i32
    %c0_i32_0 = arith.constant 0 : i32
    %c0_i32_1 = arith.constant 0 : i32
    %c0_i32_2 = arith.constant 0 : i32
    return %c0_i32, %c0_i32_0, %c0_i32_1 : i32, i32, i32
  }
  func.func @transform_15(%arg0: i32) -> (i32, i32, i32) {
    %c0_i32 = arith.constant 0 : i32
    %c0_i32_0 = arith.constant 0 : i32
    %c0_i32_1 = arith.constant 0 : i32
    %c0_i32_2 = arith.constant 0 : i32
    return %c0_i32, %c0_i32_0, %c0_i32_1 : i32, i32, i32
  }
  func.func @transform_16(%arg0: i32) -> (i32, i32) {
    %c0_i32 = arith.constant 0 : i32
    %c0_i32_0 = arith.constant 0 : i32
    %c0_i32_1 = arith.constant 0 : i32
    return %c0_i32, %c0_i32_0 : i32, i32
  }
  func.func @transform_17(%arg0: i32) -> (i32, i32, i32, i32) {
    %c0_i32 = arith.constant 0 : i32
    %c0_i32_0 = arith.constant 0 : i32
    %c0_i32_1 = arith.constant 0 : i32
    %c0_i32_2 = arith.constant 0 : i32
    return %arg0, %c0_i32, %c0_i32_0, %c0_i32_1 : i32, i32, i32, i32
  }
}

</mosaic_0001>

<bundles_post_ra>
// kernel: fwd.1
= control target key start
LH: loop header
LB: loop body
LE: loop exit
PB: predicated region body
PF: predicated region fallthrough
CT: control target
= control target key end

     0   :  { %s12872_s0 = inlined_call_operand.vmem [shape: f32[2,8,8,16], index: 0, kind: input, shape index: {}]   ;;  %s12873_s1 = inlined_call_operand.vmem [shape: bf16[2,3,48,16], index: 1, kind: input, shape index: {}]   ;;  %s12874_s2 = inlined_call_operand.vmem [shape: f32[2,1,16], index: 2, kind: input, shape index: {}]   ;;  %s12875_s3 = inlined_call_operand.vmem [shape: bf16[2,3,36,16], index: 3, kind: input, shape index: {}]   ;;  %s12876_s4 = inlined_call_operand.vmem [shape: f32[2,1,16], index: 4, kind: input, shape index: {}]   ;;  %s12877_s5 = inlined_call_operand.vmem [shape: bf16[2,3,36,16], index: 5, kind: input, shape index: {}]   ;;  %s12878_s6 = inlined_call_operand.vmem [shape: f32[2,1,16], index: 6, kind: input, shape index: {}]   ;;  %s12879_s7 = inlined_call_operand.vmem [shape: bf16[2,3,36,4], index: 7, kind: input, shape index: {}]   ;;  %s12880_s8 = inlined_call_operand.vmem [shape: f32[2,1,4], index: 8, kind: input, shape index: {}]   ;;  %s12881_s9 = inlined_call_operand.vmem [shape: bf16[2,16,2], index: 9, kind: input, shape index: {}]   ;;  %s12882_s10 = inlined_call_operand.vmem [shape: f32[2,1,2], index: 10, kind: input, shape index: {}]   ;;  %s12883_s11 = inlined_call_operand.vmem [shape: bf16[2,2,16], index: 11, kind: input, shape index: {}]   ;;  %s12884_s12 = inlined_call_operand.vmem [shape: f32[2,1,16], index: 12, kind: input, shape index: {}]   ;;  %s12885_s13 = inlined_call_operand.vmem [shape: bf16[2,16,16], index: 13, kind: input, shape index: {}]   ;;  %s12886_s14 = inlined_call_operand.vmem [shape: f32[2,1,16], index: 14, kind: input, shape index: {}]   ;;  %s12887_s15 = inlined_call_operand.vmem [shape: bf16[3,48,16], index: 15, kind: input, shape index: {}]   ;;  %s12888_s16 = inlined_call_operand.vmem [shape: f32[1,16], index: 16, kind: input, shape index: {}]   ;;  %s12889_s17 = inlined_call_operand.hbm [shape: f32[2,8,8,16], index: 17, kind: output, shape index: {}]  }
   0x1   :  { %12931 = sst [smem:[#allocation18_spill]] %s12872_s0 }
   0x2   :  { %12932 = sst [smem:[#allocation19_spill]] %s12873_s1 }
   0x3   :  { %12933 = sst [smem:[#allocation20_spill]] %s12874_s2 }
   0x4   :  { %12934 = sst [smem:[#allocation21_spill]] %s12875_s3 }
   0x5   :  { %12935 = sst [smem:[#allocation22_spill]] %s12876_s4 }
   0x6   :  { %22 = vsyncpa [#allocation4], 0 }
   0x7   :  { %24 = vsyncpa [#allocation4 + $0x1], 0  ;;  %s10248_s24 = smov 0   ;;  %s10250_s25 = smov 0  }
   0x8   :  { %s10252_s26 = smov 0   ;;  %s10254_s27 = smov 0  }
   0x9 LB: > { %12936 = sst [smem:[#allocation6_spill]] %s10133_s24  ;;  %s10269_s28 = sadd.s32 4294967295, %s10145_s27   ;;  %s10145_s27 = sphi %s10254_s27, %s12987_s27   ;;  %s10141_s26 = sphi %s10252_s26, %s12989_s26   ;;  %s10137_s25 = sphi %s10250_s25, %s12991_s25   ;;  %s10133_s24 = sphi %s10248_s24, %s12990_s24  }
   0xa   : > { %12937 = sst [smem:[#allocation7_spill]] %s10141_s26  ;;  %s8667_s29 = sadd.s32 4294967294, %s10145_s27  }
   0xb   : > { %12938 = sst [smem:[#allocation8_spill]] %s10145_s27  ;;  %s10273_s0 = sadd.s32 1, %s10145_s27  }
   0xc   : > { %12939 = sst [smem:[#allocation9_spill]] %s10273_s0  ;;  %s399_s30 = sadd.s32 1, %s10141_s26 }
   0xd   : > { %s396_s18 = ssub.s32 %s10145_s27, %s10273_s0  ;;  %p409_p0 = scmp.ne.s32.totalorder %s10141_s26, %s10137_s25 }
   0xe   : > { %p397_p1 = scmp.eq.s32.totalorder %s396_s18, 0  ;;  %p410_p2 = scmp.eq.s32.totalorder %s10269_s28, 1 }
   0xf   : > { %p415_p3 = scmp.ne.s32.totalorder %s10137_s25, %s10133_s24  ;;  %p416_p4 = scmp.eq.s32.totalorder %s8667_s29, 1 }
  0x10   : > { %s10284_s19 = scalar_select %p397_p1, %s10141_s26, %s399_s30  }
  0x11   : > { %p10286_p5 = por %p410_p2, %p409_p0  ;;  %p10290_p6 = por %p416_p4, %p415_p3 }
  0x12   : > { %12940 = sst [smem:[#allocation10_spill]] %s10284_s19  ;;  %p8670_p7 = scmp.ge.s32.totalorder %s10145_s27, 1 }
  0x13   : > { %s12941_s1 = scalar_select %p10286_p5, 1, 0 }
  0x14   : > { %s12943_s20 = scalar_select %p10290_p6, 1, 0 }
  0x15   : > { %12942 = sst [smem:[#allocation11_spill]] %s12941_s1  ;;  %p490_p8 = scmp.lt.s32.totalorder %s10145_s27, 3 }
  0x16   : > { %12944 = sst [smem:[#allocation12_spill]] %s12943_s20 }
  0x17   : > { %p491_p9 = pnand %p8670_p7, %p490_p8 }
  0x19   : > { %494 = sbr.rel (%p491_p9) target bundleno = 5065 (0x13c9), region = 88 }
  0x1e   : > { %p542_p10 = scmp.lt.s32.totalorder %s10269_s28, 1  ;;  %vm548_vm0 = vcmask 125952   ;;  %v10147_v0 = vmov 0   ;;  %s12945_s30 = sld [smem:[#allocation18_spill]]  ;;  %vm826_vm1 = vcmask 130048   ;;  %vm851_vm2 = vcmask 261120  }
  0x1f   : > { %567 = vst.msk [vmem:[#allocation2 + $0x14] sm:$0xf] %vm548_vm0, %v10147_v0  ;;  %vm935_vm3 = vsmask.f32 256  ;;  %vm936_vm4 = vsmask.f32 4368 }
  0x20   : > { %s543_s21 = scalar_select %p542_p10, %s10269_s28, 1  ;;  %549 = vst.msk [vmem:[#allocation2] sm:$0xf] %vm548_vm0, %v10147_v0  ;;  %vm10489_vm5 = vmor %vm935_vm3, %vm936_vm4  ;;  %vm1072_vm6 = vcmask 392192   ;;  %vm1392_vm15 = vcmask 93184   ;;  %vm1860_vm3 = vcmask 1041408  }
  0x21   : > { %550 = vst.msk [vmem:[#allocation2 + $0x4] sm:$0xf] %vm548_vm0, %v10147_v0  ;;  %s12949_s2 = sld [smem:[#allocation20_spill]]  ;;  %s12896_s26 = smov 124   ;;  %vm1607_vm4 = vcmask 97280  }
  0x22   : > { %s9250_s22 = sshll.u32 %s543_s21, 6  ;;  %551 = vst.msk [vmem:[#allocation2 + $0x8] sm:$0xf] %vm548_vm0, %v10147_v0  ;;  %s12892_s21 = smov 32  }
  0x23   : > { %553 = vst.msk [vmem:[#allocation2 + $0x6c] sm:$0xf] %vm548_vm0, %v10147_v0  ;;  %s12902_s19 = smov 24   ;;  %s12950_s3 = sld [smem:[#allocation21_spill]] }
  0x24   : > { %s10305_s18 = scalar_lea.vmem %s12945_s30, %s9250_s22  ;;  %554 = vst.msk [vmem:[#allocation2 + $0x70] sm:$0xf] %vm548_vm0, %v10147_v0  ;;  %s12894_s22 = smov 16  }
  0x25   : > { %v576_v1 = vld [vmem:[%s10305_s18] sm:$0xff]  ;;  %555 = vst.msk [vmem:[#allocation2 + $0x74] sm:$0xf] %vm548_vm0, %v10147_v0  ;;  %v577_v9 = vld [vmem:[%s10305_s18 + $0x8] sm:$0xff]  ;;  %v578_v10 = vld [vmem:[%s10305_s18 + $0x10] sm:$0xff]  ;;  %s12946_s30 = sld [smem:[#allocation19_spill]] }
  0x26   : > { %v603_v2 = vpack.c.bf16 %v576_v1, %v576_v1  ;;  %557 = vst.msk [vmem:[#allocation2 + $0xc] sm:$0xf] %vm548_vm0, %v10147_v0  ;;  %v579_v13 = vld [vmem:[%s10305_s18 + $0x18] sm:$0xff]  ;;  %v604_v14 = vpack.c.bf16 %v577_v9, %v577_v9  ;;  %v580_v15 = vld [vmem:[%s10305_s18 + $0x20] sm:$0xff]  ;;  %v605_v17 = vpack.c.bf16 %v578_v10, %v578_v10  ;;  %v581_v18 = vld [vmem:[%s10305_s18 + $0x28] sm:$0xff]  ;;  %s12951_s4 = sld [smem:[#allocation22_spill]] }
  0x27   : > { %558 = vst.msk [vmem:[#allocation2 + $0x18] sm:$0xf] %vm548_vm0, %v10147_v0  ;;  %v606_v19 = vpack.c.bf16 %v579_v13, %v579_v13  ;;  %v607_v20 = vpack.c.bf16 %v580_v15, %v580_v15  ;;  %v608_v21 = vpack.c.bf16 %v581_v18, %v581_v18  ;;  %v582_v29 = vld [vmem:[%s10305_s18 + $0x30] sm:$0xff]  ;;  %v583_v30 = vld [vmem:[%s10305_s18 + $0x38] sm:$0xff]  ;;  %s12953_s29 = smov 12   ;;  %s12954_s0 = smov 24  }
  0x28   : > { %612 = vst.msk [vmem:[#allocation2 + $0x10] sm:$0xf] %vm548_vm0, %v603_v2  ;;  %v609_v37 = vpack.c.bf16 %v582_v29, %v582_v29  ;;  %v610_v38 = vpack.c.bf16 %v583_v30, %v583_v30  ;;  %s12908_s20 = smov 4   ;;  %s12957_s24 = smov 16  }
  0x29   : > { %559 = vst.msk [vmem:[#allocation2 + $0x24] sm:$0xf] %vm548_vm0, %v10147_v0  ;;  %s12958_s23 = smov 32  }
  0x2a   : > { %560 = vst.msk [vmem:[#allocation2 + $0x30] sm:$0xf] %vm548_vm0, %v10147_v0 }
  0x2b   : > { %561 = vst.msk [vmem:[#allocation2 + $0x3c] sm:$0xf] %vm548_vm0, %v10147_v0 }
  0x2c   : > { %562 = vst.msk [vmem:[#allocation2 + $0x48] sm:$0xf] %vm548_vm0, %v10147_v0 }
  0x2d   : > { %563 = vst.msk [vmem:[#allocation2 + $0x54] sm:$0xf] %vm548_vm0, %v10147_v0 }
  0x2e   : > { %564 = vst.msk [vmem:[#allocation2 + $0x60] sm:$0xf] %vm548_vm0, %v10147_v0 }
  0x2f   : > { %v9858_v3 = vld [vmem:[#allocation2 + $0x10] sm:$0xff]   ;;  %568 = vst.msk [vmem:[#allocation2 + $0x20] sm:$0xf] %vm548_vm0, %v10147_v0 }
  0x30   : > { %v10320_v4 = vunpack.c.l.b16 %v9858_v3  ;;  %v803_v5 = vrot.slane %v9858_v3, 5  ;;  %569 = vst.msk [vmem:[#allocation2 + $0x2c] sm:$0xf] %vm548_vm0, %v10147_v0 }
  0x31   : > { %570 = vst.msk [vmem:[#allocation2 + $0x38] sm:$0xf] %vm548_vm0, %v10147_v0 }
  0x32   : > { %v691_v6 = vpack.c.b16 %v10320_v4, %v10320_v4  ;;  %812 = vrot.lane.b32.xlu1 %v803_v5, %s12892_s21  ;;  %571 = vst.msk [vmem:[#allocation2 + $0x44] sm:$0xf] %vm548_vm0, %v10147_v0 }
  0x33   : > { %572 = vst.msk [vmem:[#allocation2 + $0x50] sm:$0xf] %vm548_vm0, %v10147_v0 }
  0x34   : > { %v707_v7 = vshrl.u32 %v691_v6, 16  ;;  %v710_v8 = vshll.u32 %v691_v6, 16  ;;  %573 = vst.msk [vmem:[#allocation2 + $0x5c] sm:$0xf] %vm548_vm0, %v10147_v0 }
  0x35   : > { %574 = vst.msk [vmem:[#allocation2 + $0x68] sm:$0xf] %vm548_vm0, %v10147_v0 }
  0x36   : > { %v709_v11 = vrot.slane %v707_v7, 4  ;;  %v712_v12 = vrot.slane %v710_v8, 5  ;;  %556 = vst.msk [vmem:[#allocation2] sm:$0xf] %vm548_vm0, %v10147_v0  ;;  %v10345_v22 = vld [vmem:[#allocation2 + $0x20] sm:$0xff]  }
  0x37   : > { %565 = vst.msk [vmem:[#allocation2 + $0x6c] sm:$0xf] %vm548_vm0, %v10147_v0  ;;  %v9335_v25 = vunpack.c.l.b16 %v10345_v22 }
  0x38   : > { %v713_v16 = vor.u32 %v712_v12, %v709_v11  ;;  %566 = vst.msk [vmem:[#allocation2 + $0x8] sm:$0xf] %vm548_vm0, %v10147_v0  ;;  %v10385_v63 = vld [vmem:[#allocation2 + $0x38] sm:$0xff]  }
  0x39   : > { %575 = vst.msk [vmem:[#allocation2 + $0x74] sm:$0xf] %vm548_vm0, %v10147_v0  ;;  %v9347_v8 = vunpack.c.l.b16 %v10385_v63 }
  0x3a   : > { %764 = vrot.lane.b32.xlu0 %v713_v16, %s12894_s22  ;;  %613 = vst.msk [vmem:[#allocation2 + $0x1c] sm:$0xf] %vm548_vm0, %v604_v14  ;;  %v10396_v12 = vld [vmem:[#allocation2 + $0x50] sm:$0xff]  }
  0x3b   : > { %614 = vst.msk [vmem:[#allocation2 + $0x28] sm:$0xf] %vm548_vm0, %v605_v17  ;;  %v9359_v18 = vunpack.c.l.b16 %v10396_v12 }
  0x3c   : > { %615 = vst.msk [vmem:[#allocation2 + $0x34] sm:$0xf] %vm548_vm0, %v606_v19 }
  0x3d   : > { %v10347_v23 = vld [vmem:[#allocation2] sm:$0xff]   ;;  %616 = vst.msk [vmem:[#allocation2 + $0x40] sm:$0xf] %vm548_vm0, %v607_v20 }
  0x3e   : > { %v9320_v24 = vunpack.c.h.b16 %v10347_v23  ;;  %617 = vst.msk [vmem:[#allocation2 + $0x4c] sm:$0xf] %vm548_vm0, %v608_v21 }
  0x3f   : > { %v10353_v27 = vld [vmem:[#allocation2 + $0x8] sm:$0xff]   ;;  %618 = vst.msk [vmem:[#allocation2 + $0x58] sm:$0xf] %vm548_vm0, %v609_v37 }
  0x40   : > { %v690_v26 = vpack.c.b16 %v9320_v24, %v9320_v24  ;;  %v9323_v36 = vunpack.c.l.b16 %v10353_v27  ;;  %619 = vst.msk [vmem:[#allocation2 + $0x64] sm:$0xf] %vm548_vm0, %v610_v38 }
  0x41   : > { %v10355_v28 = vld [vmem:[#allocation2 + $0x18] sm:$0xff]  }
  0x42   : > { %v9332_v31 = vunpack.c.h.b16 %v10355_v28  ;;  %v9861_v32 = vld [vmem:[#allocation2 + $0x28] sm:$0xff]   ;;  %v699_v33 = vshrl.u32 %v690_v26, 16  ;;  %v702_v34 = vshll.u32 %v690_v26, 16  ;;  %v10379_v55 = vpack.c.b16 %v9323_v36, %v9320_v24 }
  0x43   : > { %v10360_v35 = vunpack.c.l.b16 %v9861_v32  ;;  %v10373_v50 = vld [vmem:[#allocation2 + $0x30] sm:$0xff]   ;;  %v805_v62 = vrot.slane %v9861_v32, 5 }
  0x44   : > { %v692_v39 = vpack.c.b16 %v9332_v31, %v9332_v31  ;;  %v796_v40 = vpack.c.b16 %v9335_v25, %v9332_v31  ;;  %v701_v41 = vrot.slane %v699_v33, 4  ;;  %v704_v42 = vrot.slane %v702_v34, 5  ;;  %v10363_v43 = vld [vmem:[#allocation2 + $0x40] sm:$0xff]  }
  0x45   : > { %v693_v44 = vpack.c.b16 %v10360_v35, %v10360_v35  ;;  %v10368_v45 = vunpack.c.l.b16 %v10363_v43  ;;  %v9344_v57 = vunpack.c.h.b16 %v10373_v50  ;;  %v802_v0 = vrot.slane %v10379_v55, 5  ;;  %v10388_v3 = vld [vmem:[#allocation2 + $0x48] sm:$0xff]  }
  0x46   : > { %v715_v46 = vshrl.u32 %v692_v39, 16  ;;  %v718_v47 = vshll.u32 %v692_v39, 16  ;;  %v804_v48 = vrot.slane %v796_v40, 5  ;;  %v10371_v49 = vor.u32 %v704_v42, %v701_v41  ;;  %v9867_v19 = vld [vmem:[#allocation2 + $0x58] sm:$0xff]   ;;  %v10411_v41 = vld [vmem:[#allocation2 + $0x70] sm:$0xff]  }
  0x47   : > { %v723_v51 = vshrl.u32 %v693_v44, 16  ;;  %v726_v52 = vshll.u32 %v693_v44, 16  ;;  %v695_v56 = vpack.c.b16 %v10368_v45, %v10368_v45  ;;  %v694_v61 = vpack.c.b16 %v9344_v57, %v9344_v57  ;;  %v10398_v15 = vld [vmem:[#allocation2 + $0x60] sm:$0xff]  }
  0x48   : > { %v717_v53 = vrot.slane %v715_v46, 4  ;;  %v720_v54 = vrot.slane %v718_v47, 5  ;;  %814 = vrot.lane.b32.xlu1 %v804_v48, %s12892_s21  ;;  %762 = vrot.lane.b32.xlu2 %v10371_v49, %s12894_s22  ;;  %v9356_v9 = vunpack.c.h.b16 %v10388_v3  ;;  %v798_v16 = vpack.c.b16 %v9347_v8, %v9344_v57  ;;  %v9256_v8 = vld [vmem:[%s12946_s30 + $0x28] sm:$0xff] }
  0x49   : > { %v725_v59 = vrot.slane %v723_v51, 4  ;;  %v728_v60 = vrot.slane %v726_v52, 5  ;;  %v739_v1 = vshrl.u32 %v695_v56, 16  ;;  %v742_v2 = vshll.u32 %v695_v56, 16  ;;  %1090 = vmatpush.bf16.msra.mxu0 %v9256_v8  ;;  %9983 = vmatpush.bf16.msra.mxu3 %v9256_v8 }
  0x4a   : > { %v721_v58 = vor.u32 %v720_v54, %v717_v53  ;;  %v731_v5 = vshrl.u32 %v694_v61, 16  ;;  %v734_v6 = vshll.u32 %v694_v61, 16  ;;  %v696_v17 = vpack.c.b16 %v9356_v9, %v9356_v9  ;;  %v10418_v53 = vld [vmem:[#allocation2 + $0x68] sm:$0xff]  }
  0x4b   : > { %v729_v7 = vor.u32 %v728_v60, %v725_v59  ;;  %v741_v10 = vrot.slane %v739_v1, 4  ;;  %v744_v11 = vrot.slane %v742_v2, 5  ;;  %v9368_v24 = vunpack.c.h.b16 %v10398_v15 }
  0x4c   : > { %766 = vrot.lane.b32.xlu0 %v721_v58, %s12894_s22  ;;  %v733_v13 = vrot.slane %v731_v5, 4  ;;  %v736_v14 = vrot.slane %v734_v6, 5  ;;  %v10403_v25 = vunpack.c.l.b16 %v9867_v19  ;;  %v747_v26 = vshrl.u32 %v696_v17, 16 }
  0x4d   : > { %v745_v20 = vor.u32 %v744_v11, %v741_v10  ;;  %v750_v29 = vshll.u32 %v696_v17, 16  ;;  %v800_v30 = vpack.c.b16 %v9359_v18, %v9356_v9  ;;  %v806_v31 = vrot.slane %v798_v16, 5  ;;  %v9255_v10 = vld [vmem:[%s12946_s30 + $0x20] sm:$0xff]  ;;  %v9253_v16 = vld [vmem:[%s12946_s30 + $0x10] sm:$0xff] }
  0x4e   : > { %v737_v21 = vor.u32 %v736_v14, %v733_v13  ;;  %v873_v32 = vpack.c.b16 %v9368_v24, %v9368_v24  ;;  %v697_v33 = vpack.c.b16 %v10403_v25, %v10403_v25  ;;  %v749_v34 = vrot.slane %v747_v26, 4  ;;  %1091 = vmatpush.bf16.msra.mxu0 %v9255_v10  ;;  %9984 = vmatpush.bf16.msra.mxu3 %v9255_v10  ;;  %v9254_v14 = vld [vmem:[%s12946_s30 + $0x18] sm:$0xff]  ;;  %v10465_v26 = vld [vmem:[%s12946_s30 + $0x40] sm:$0xff] }
  0x4f   : > { %v752_v36 = vrot.slane %v750_v29, 5  ;;  %v808_v37 = vrot.slane %v800_v30, 5  ;;  %v807_v38 = vrot.slane %v10363_v43, 5  ;;  %v10414_v47 = vunpack.c.l.b16 %v10411_v41  ;;  %9986 = vmatpush.bf16.msra.mxu1 %v9253_v16  ;;  %9989 = vmatpush.bf16.msra.mxu2 %v10465_v26 }
  0x50   : > { %816 = vrot.lane.b32.xlu1 %v805_v62, %s12892_s21  ;;  %810 = vrot.lane.b32.xlu2 %v802_v0, %s12892_s21  ;;  %v875_v39 = vshrl.u32 %v873_v32, 16  ;;  %v878_v40 = vshll.u32 %v873_v32, 16  ;;  %v755_v42 = vshrl.u32 %v697_v33, 16  ;;  %v758_v44 = vshll.u32 %v697_v33, 16 }
  0x51   : > { %v753_v46 = vor.u32 %v752_v36, %v749_v34  ;;  %v1201_v56 = vpack.c.b16 %v10414_v47, %v10414_v47  ;;  %v9371_v58 = vunpack.c.l.b16 %v10418_v53  ;;  %v809_v59 = vrot.slane %v9867_v19, 5  ;;  %v10477_v34 = vld [vmem:[%s12946_s30 + $0x30] sm:$0xff] }
  0x52   : > { %v877_v48 = vrot.slane %v875_v39, 4  ;;  %v880_v51 = vrot.slane %v878_v40, 5  ;;  %v757_v52 = vrot.slane %v755_v42, 4  ;;  %v760_v43 = vrot.slane %v758_v44, 5  ;;  %1092 = vmatpush.bf16.msra.mxu0 %v9254_v14  ;;  %9985 = vmatpush.bf16.msra.mxu3 %v9254_v14 }
  0x53   : > { %v1203_v60 = vshrl.u32 %v1201_v56, 16  ;;  %v1206_v61 = vshll.u32 %v1201_v56, 16  ;;  %v886_v62 = vpack.c.b16 %v9371_v58, %v9368_v24  ;;  %v1215_v5 = vrot.slane %v10411_v41, 5 }
  0x54   : > { %768 = vrot.lane.b32.xlu0 %v729_v7, %s12894_s22  ;;  %v881_v54 = vor.u32 %v880_v51, %v877_v48  ;;  %v761_v57 = vor.u32 %v760_v43, %v757_v52  ;;  %v9324_v9 = vunpack.c.h.b16 %v10353_v27  ;;  %v9336_v44 = vunpack.c.h.b16 %v10345_v22 }
  0x55   : > { %v1205_v1 = vrot.slane %v1203_v60, 4  ;;  %v1208_v2 = vrot.slane %v1206_v61, 5  ;;  %v887_v6 = vrot.slane %v886_v62, 5  ;;  %v9348_v22 = vunpack.c.h.b16 %v10385_v63 }
  0x56   : > { %v683_v11 = vpack.c.b16 %v10320_v4, %v9324_v9  ;;  %1172 = vmatpush.bf16.msrb.mxu0 %v9253_v16  ;;  %v9252_v4 = vld [vmem:[%s12946_s30 + $0x8] sm:$0xff] }
  0x57   : > { %v10430_v7 = vor.u32 %v1208_v2, %v1205_v1  ;;  %9987 = vmatpush.bf16.msra.mxu1 %v9252_v4 }
  0x58   : > { %772 = vrot.lane.b32.xlu1 %v745_v20, %s12894_s22  ;;  %770 = vrot.lane.b32.xlu2 %v737_v21, %s12894_s22  ;;  %v9251_v21 = vld [vmem:[%s12946_s30] sm:$0xff] }
  0x5a   : > { %1173 = vmatpush.bf16.msrb.mxu0 %v9252_v4 }
  0x5b   : > { %9988 = vmatpush.bf16.msra.mxu1 %v9251_v21 }
  0x5c   : > { %818 = vrot.lane.b32.xlu0 %v806_v31, %s12892_s21  ;;  %v10471_v31 = vld [vmem:[%s12946_s30 + $0x38] sm:$0xff] }
  0x5d   : > { %9990 = vmatpush.bf16.msra.mxu2 %v10471_v31 }
  0x5e   : > { %1174 = vmatpush.bf16.msrb.mxu0 %v9251_v21 }
  0x60   : > { %822 = vrot.lane.b32.xlu1 %v808_v37, %s12892_s21  ;;  %820 = vrot.lane.b32.xlu2 %v807_v38, %s12892_s21 }
  0x61   : > { %9991 = vmatpush.bf16.msra.mxu2 %v10477_v34 }
  0x64   : > { %774 = vrot.lane.b32.xlu0 %v753_v46, %s12894_s22 }
  0x68   : > { %882 = vrot.lane.b32.xlu1 %v881_v54, %s12894_s22  ;;  %776 = vrot.lane.b32.xlu2 %v761_v57, %s12894_s22 }
  0x6c   : > { %824 = vrot.lane.b32.xlu0 %v809_v59, %s12892_s21 }
  0x70   : > { %1216 = vrot.lane.b32.xlu1 %v1215_v5, %s12892_s21  ;;  %888 = vrot.lane.b32.xlu2 %v887_v6, %s12892_s21  ;;  %s12900_s21 = smov 12  }
  0x74   : > { %1210 = vrot.lane.b32.xlu0 %v10430_v7, %s12894_s22 }
  0xa2   : > { %v763_v17 = vpop.permute.xlu2 %762 }
  0xa3   : > { %v829_v36 = vsel %vm826_vm1, %v10347_v23, %v763_v17 }
  0xa4   : > { %v813_v19 = vpop.permute.xlu1 %812 }
  0xaa   : > { %v811_v29 = vpop.permute.xlu2 %810 }
  0xab   : > { %v853_v40 = vsel %vm851_vm2, %v829_v36, %v811_v29 }
  0xac   : > { %v765_v13 = vpop.permute.xlu0 %764  ;;  %v1115_v43 = vunpack.c.l.b16 %v853_v40  ;;  %v1116_v54 = vunpack.c.h.b16 %v853_v40 }
  0xad   : > { %v832_v18 = vsel %vm826_vm1, %v683_v11, %v765_v13 }
  0xae   : > { %v855_v20 = vsel %vm851_vm2, %v832_v18, %v813_v19  ;;  %v1117_v8 = vpack.c.b16 %v1115_v43, %v1115_v43  ;;  %v1118_v10 = vpack.c.b16 %v1116_v54, %v1116_v54  ;;  %v687_v18 = vpack.c.b16 %v10368_v45, %v9348_v22 }
  0xaf   : > { %v904_v24 = vunpack.c.h.b16 %v855_v20  ;;  %v903_v32 = vunpack.c.l.b16 %v855_v20 }
  0xb0   : > { %v1120_v29 = vshrl.u32 %v1117_v8, 16  ;;  %v1128_v43 = vshll.u32 %v1118_v10, 16 }
  0xb1   : > { %v920_v30 = vpack.c.b16 %v904_v24, %v904_v24  ;;  %v919_v38 = vpack.c.b16 %v903_v32, %v903_v32 }
  0xb2   : > { %v771_v46 = vpop.permute.xlu2 %770 }
  0xb3   : > { %v944_v37 = vshrl.u32 %v920_v30, 16  ;;  %v939_v56 = vshrl.u32 %v919_v38, 16  ;;  %v947_v57 = vshll.u32 %v920_v30, 16  ;;  %v1125_v30 = vshrl.u32 %v1118_v10, 16 }
  0xb4   : > { %v841_v38 = vsel %vm826_vm1, %v10373_v50, %v771_v46 }
  0xb5   : > { %v946_v48 = vrot.slane %v944_v37, 7  ;;  %v8674_v11 = vrot.slane %v939_v56, 11 }
  0xb7   : > { %v949_v62 = vor.u32 %v947_v57, %v946_v48 }
  0xb9   : > { %v950_v63 = vsel %vm10489_vm5, %v8674_v11, %v949_v62  ;;  %v8698_v62 = vrot.slane %v1120_v29, 11 }
  0xba   : > { %v815_v33 = vpop.permute.xlu1 %814  ;;  %v821_v24 = vpop.permute.xlu2 %820  ;;  %v10504_v40 = vunpack.c.l.b16 %v950_v63  ;;  %v9360_v63 = vunpack.c.h.b16 %v10396_v12 }
  0xbe   : > { %v767_v39 = vpop.permute.xlu0 %766 }
  0xbf   : > { %v835_v42 = vsel %vm826_vm1, %v10355_v28, %v767_v39  ;;  %v685_v28 = vpack.c.b16 %v10360_v35, %v9336_v44 }
  0xc0   : > { %v857_v51 = vsel %vm851_vm2, %v835_v42, %v815_v33 }
  0xc1   : > { %v905_v52 = vunpack.c.l.b16 %v857_v51  ;;  %v906_v23 = vunpack.c.h.b16 %v857_v51 }
  0xc2   : > { %v817_v59 = vpop.permute.xlu1 %816  ;;  %v777_v8 = vpop.permute.xlu2 %776 }
  0xc3   : > { %v921_v60 = vpack.c.b16 %v905_v52, %v905_v52  ;;  %v922_v61 = vpack.c.b16 %v906_v23, %v906_v23  ;;  %v1127_v23 = vrot.slane %v1125_v30, 7 }
  0xc5   : > { %v952_v2 = vshrl.u32 %v921_v60, 16  ;;  %v957_v6 = vshrl.u32 %v922_v61, 16  ;;  %v960_v16 = vshll.u32 %v922_v61, 16 }
  0xc6   : > { %v769_v13 = vpop.permute.xlu0 %768 }
  0xc7   : > { %v959_v14 = vrot.slane %v957_v6, 7  ;;  %v838_v17 = vsel %vm826_vm1, %v685_v28, %v769_v13  ;;  %v8675_v19 = vrot.slane %v952_v2, 11 }
  0xc8   : > { %v859_v35 = vsel %vm851_vm2, %v838_v17, %v817_v59  ;;  %v1130_v17 = vor.u32 %v1128_v43, %v1127_v23 }
  0xc9   : > { %v962_v4 = vor.u32 %v960_v16, %v959_v14  ;;  %v907_v20 = vunpack.c.l.b16 %v859_v35  ;;  %v908_v21 = vunpack.c.h.b16 %v859_v35 }
  0xca   : > { %v773_v32 = vpop.permute.xlu1 %772 }
  0xcb   : > { %v923_v33 = vpack.c.b16 %v907_v20, %v907_v20  ;;  %v924_v36 = vpack.c.b16 %v908_v21, %v908_v21  ;;  %v844_v37 = vsel %vm826_vm1, %v687_v18, %v773_v32  ;;  %v963_v45 = vsel %vm10489_vm5, %v8675_v19, %v962_v4 }
  0xcc   : > { %v863_v39 = vsel %vm851_vm2, %v844_v37, %v821_v24  ;;  %v1043_v42 = vunpack.c.l.b16 %v963_v45 }
  0xcd   : > { %v965_v44 = vshrl.u32 %v923_v33, 16  ;;  %v970_v48 = vshrl.u32 %v924_v36, 16  ;;  %v973_v51 = vshll.u32 %v924_v36, 16  ;;  %v911_v52 = vunpack.c.l.b16 %v863_v39 }
  0xce   : > { %v819_v54 = vpop.permute.xlu0 %818  ;;  %v912_v56 = vunpack.c.h.b16 %v863_v39  ;;  %v1050_v57 = vpack.c.b16 %v1043_v42, %v10504_v40  ;;  %v1131_v33 = vsel %vm10489_vm5, %v8698_v62, %v1130_v17 }
  0xcf   : > { %v8676_v59 = vrot.slane %v965_v44, 11  ;;  %v972_v60 = vrot.slane %v970_v48, 7  ;;  %v861_v61 = vsel %vm851_vm2, %v841_v38, %v819_v54  ;;  %v927_v50 = vpack.c.b16 %v911_v52, %v911_v52 }
  0xd0   : > { %v909_v46 = vunpack.c.l.b16 %v861_v61  ;;  %v910_v28 = vunpack.c.h.b16 %v861_v61  ;;  %v928_v22 = vpack.c.b16 %v912_v56, %v912_v56  ;;  %8694 = vmatmul.msk.bf16.vlgmr.msra.gmra.mxu0 %vm1072_vm6, %v1050_v57  ;;  %v689_v38 = vpack.c.b16 %v10403_v25, %v9360_v63 }
  0xd1   : > { %v975_v2 = vor.u32 %v973_v51, %v972_v60  ;;  %v991_v6 = vshrl.u32 %v927_v50, 16  ;;  %1269 = vmatpush.bf16.msra.mxu0 %v10465_v26  ;;  %v1132_v48 = vunpack.c.l.b16 %v1131_v33 }
  0xd2   : > { %v925_v10 = vpack.c.b16 %v909_v46, %v909_v46  ;;  %v926_v11 = vpack.c.b16 %v910_v28, %v910_v28  ;;  %v996_v13 = vshrl.u32 %v928_v22, 16  ;;  %v999_v14 = vshll.u32 %v928_v22, 16  ;;  %v823_v16 = vpop.permute.xlu1 %822 }
  0xd3   : > { %v8678_v18 = vrot.slane %v991_v6, 11  ;;  %v976_v35 = vsel %vm10489_vm5, %v8676_v59, %v975_v2  ;;  %v850_v56 = vsel %vm826_vm1, %v689_v38, %v777_v8  ;;  %v1133_v46 = vpack.c.b16 %v10504_v40, %v1132_v48 }
  0xd4   : > { %v978_v19 = vshrl.u32 %v925_v10, 16  ;;  %v983_v4 = vshrl.u32 %v926_v11, 16  ;;  %v986_v20 = vshll.u32 %v926_v11, 16  ;;  %v998_v21 = vrot.slane %v996_v13, 7 }
  0xd5   : > { %v1044_v24 = vunpack.c.l.b16 %v976_v35  ;;  %1270 = vmatpush.bf16.msra.mxu0 %v10471_v31 }
  0xd6   : > { %v8677_v26 = vrot.slane %v978_v19, 11  ;;  %v985_v29 = vrot.slane %v983_v4, 7  ;;  %v1001_v30 = vor.u32 %v999_v14, %v998_v21  ;;  %v775_v32 = vpop.permute.xlu0 %774 }
  0xd7   : > { %v10516_v36 = vpack.c.b16 %v1044_v24, %v1043_v42  ;;  %v847_v37 = vsel %vm826_vm1, %v10388_v3, %v775_v32  ;;  %v889_v42 = vpop.permute.xlu2 %888 }
  0xd8   : > { %v988_v12 = vor.u32 %v986_v20, %v985_v29  ;;  %v865_v45 = vsel %vm851_vm2, %v847_v37, %v823_v16  ;;  %v1002_v31 = vsel %vm10489_vm5, %v8678_v18, %v1001_v30 }
  0xd9   : > { %8712 = vmatmul.msk.bf16.vlgmr.msra.gmra.mxu1 %vm1072_vm6, %v10516_v36  ;;  %v913_v39 = vunpack.c.l.b16 %v865_v45  ;;  %v914_v44 = vunpack.c.h.b16 %v865_v45  ;;  %1271 = vmatpush.bf16.msra.mxu0 %v10477_v34  ;;  %v1046_v51 = vunpack.c.l.b16 %v1002_v31 }
  0xda   : > { %v989_v3 = vsel %vm10489_vm5, %v8677_v26, %v988_v12  ;;  %v883_v52 = vpop.permute.xlu1 %882 }
  0xdb   : > { %v929_v23 = vpack.c.b16 %v913_v39, %v913_v39  ;;  %v930_v43 = vpack.c.b16 %v914_v44, %v914_v44  ;;  %v1045_v25 = vunpack.c.l.b16 %v989_v3  ;;  %v892_v54 = vsel %vm826_vm1, %v10398_v15, %v883_v52 }
  0xdc   : > { %v894_v57 = vsel %vm851_vm2, %v892_v54, %v889_v42  ;;  %v9372_v15 = vunpack.c.h.b16 %v10418_v53 }
  0xdd   : > { %v1004_v59 = vshrl.u32 %v929_v23, 16  ;;  %v1009_v60 = vshrl.u32 %v930_v43, 16  ;;  %v1012_v34 = vshll.u32 %v930_v43, 16  ;;  %v1051_v61 = vpack.c.b16 %v1045_v25, %v1044_v24 }
  0xde   : > { %v825_v50 = vpop.permute.xlu0 %824  ;;  %v1135_v28 = vpack.c.b16 %v1046_v51, %v1045_v25  ;;  %v918_v2 = vunpack.c.h.b16 %v894_v57  ;;  %v917_v40 = vunpack.c.l.b16 %v894_v57  ;;  %v10540_v17 = vpack.c.b16 %v10414_v47, %v9372_v15 }
  0xdf   : > { %v1011_v22 = vrot.slane %v1009_v60, 7  ;;  %8695 = vmatmul.msk.bf16.vlgmr.msra.gmra.mxu3 %vm1072_vm6, %v1051_v61  ;;  %v867_v62 = vsel %vm851_vm2, %v850_v56, %v825_v50  ;;  %v8679_v6 = vrot.slane %v1004_v59, 11 }
  0xe0   : > { %v915_v8 = vunpack.c.l.b16 %v867_v62  ;;  %v916_v10 = vunpack.c.h.b16 %v867_v62  ;;  %8711 = vmatmul.msk.bf16.vlgmr.msrb.gmra.mxu0 %vm1072_vm6, %v1133_v46  ;;  %8729 = vmatmul.msk.bf16.vlgmr.msra.gmra.mxu2 %vm1072_vm6, %v1135_v28  ;;  %v934_v16 = vpack.c.b16 %v918_v2, %v918_v2  ;;  %v933_v32 = vpack.c.b16 %v917_v40, %v917_v40 }
  0xe1   : > { %v1014_v11 = vor.u32 %v1012_v34, %v1011_v22 }
  0xe2   : > { %v931_v13 = vpack.c.b16 %v915_v8, %v915_v8  ;;  %v932_v14 = vpack.c.b16 %v916_v10, %v916_v10  ;;  %v1217_v4 = vpop.permute.xlu1 %1216  ;;  %v1035_v33 = vshrl.u32 %v934_v16, 16  ;;  %v1030_v42 = vshrl.u32 %v933_v32, 16  ;;  %v10564_v10 = vld [vmem:[%s12949_s2] ss:$0 sm:$0xff] }
  0xe3   : > { %v1015_v19 = vsel %vm10489_vm5, %v8679_v6, %v1014_v11  ;;  %v1038_v3 = vshll.u32 %v934_v16, 16 }
  0xe4   : > { %v1017_v18 = vshrl.u32 %v931_v13, 16  ;;  %v1022_v35 = vshrl.u32 %v932_v14, 16  ;;  %v1025_v63 = vshll.u32 %v932_v14, 16  ;;  %v1047_v26 = vunpack.c.l.b16 %v1015_v19 }
  0xe5   : > { %v1037_v48 = vrot.slane %v1035_v33, 7  ;;  %v8681_v56 = vrot.slane %v1030_v42, 11 }
  0xe6   : > { %v8680_v20 = vrot.slane %v1017_v18, 11  ;;  %v1024_v21 = vrot.slane %v1022_v35, 7  ;;  %v1211_v24 = vpop.permute.xlu0 %1210  ;;  %v1052_v38 = vpack.c.b16 %v1047_v26, %v1046_v51 }
  0xe7   : > { %v1220_v29 = vsel %vm826_vm1, %v10540_v17, %v1211_v24  ;;  %v1040_v57 = vor.u32 %v1038_v3, %v1037_v48 }
  0xe8   : > { %v1027_v30 = vor.u32 %v1025_v63, %v1024_v21  ;;  %v1222_v47 = vsel %vm851_vm2, %v1220_v29, %v1217_v4 }
  0xe9   : > { %8713 = vmatmul.msk.bf16.gmra.mxu1 %vm1072_vm6, %v1135_v28  ;;  %v1224_v37 = vunpack.c.l.b16 %v1222_v47  ;;  %v1225_v12 = vunpack.c.h.b16 %v1222_v47  ;;  %v1041_v60 = vsel %vm10489_vm5, %v8681_v56, %v1040_v57 }
  0xea   : > { %v1028_v45 = vsel %vm10489_vm5, %v8680_v20, %v1027_v30  ;;  %v1049_v61 = vunpack.c.l.b16 %v1041_v60 }
  0xeb   : > { %v1226_v31 = vpack.c.b16 %v1224_v37, %v1224_v37  ;;  %v1227_v39 = vpack.c.b16 %v1225_v12, %v1225_v12  ;;  %v1048_v44 = vunpack.c.l.b16 %v1028_v45 }
  0xed   : > { %v1229_v52 = vshrl.u32 %v1226_v31, 16  ;;  %v1234_v23 = vshrl.u32 %v1227_v39, 16  ;;  %v1237_v43 = vshll.u32 %v1227_v39, 16  ;;  %v1136_v25 = vpack.c.b16 %v1048_v44, %v1047_v26 }
  0xee   : > { %v1053_v46 = vpack.c.b16 %v1049_v61, %v1048_v44 }
  0xef   : > { %8696 = vmatmul.msk.bf16.gmra.mxu3 %vm1072_vm6, %v1052_v38  ;;  %v1236_v54 = vrot.slane %v1234_v23, 7  ;;  %v8715_v51 = vrot.slane %v1229_v52, 11 }
  0xf0   : > { %8728 = vmatmul.msk.bf16.vlgmr.msra.gmra.mxu0 %vm1072_vm6, %v10516_v36  ;;  %8730 = vmatmul.msk.bf16.gmra.mxu2 %vm1072_vm6, %v1136_v25 }
  0xf1   : > { %v1239_v59 = vor.u32 %v1237_v43, %v1236_v54 }
  0xf3   : > { %v1240_v34 = vsel %vm10489_vm5, %v8715_v51, %v1239_v59 }
  0xf4   : > { %v1241_v50 = vunpack.c.l.b16 %v1240_v34 }
  0xf6   : > { %v1242_v28 = vpack.c.b16 %v1241_v50, %v1049_v61 }
  0xf9   : > { %8714 = vmatmul.msk.bf16.gmra.mxu1 %vm1072_vm6, %v1136_v25 }
  0xff   : > { %8697 = vmatmul.msk.bf16.gmra.mxu3 %vm1072_vm6, %v1053_v46 }
 0x100   : > { %8731 = vmatmul.msk.bf16.gmra.mxu2 %vm1072_vm6, %v1242_v28 }
 0x14d   : > { %v1094_v36 = vpop.f32.mrf.mxu0 }
 0x155   : > { %v1096_v22 = vpop.f32.mrf.mxu0 }
 0x156   : > { %v1181_v62 = vpop.f32.mrf.mxu1 }
 0x15d   : > { %v1176_v2 = vpop.f32.mrf.mxu0 }
 0x15e   : > { %v1183_v11 = vpop.f32.mrf.mxu1  ;;  %v1177_v4 = vadd.f32 %v1176_v2, %v1094_v36 }
 0x162   : > { %v1099_v15 = vpop.f32.mrf.mxu3 }
 0x163   : > { %v1182_v6 = vadd.f32 %v1181_v62, %v1099_v15  ;;  %v1278_v8 = vpop.f32.mrf.mxu2 }
 0x165   : > { %v1295_v13 = vadd.f32 %v1278_v8, %v1182_v6  ;;  %v1178_v14 = vpop.f32.mrf.mxu0 }
 0x166   : > { %v1186_v24 = vpop.f32.mrf.mxu1  ;;  %v1179_v45 = vadd.f32 %v1178_v14, %v1096_v22 }
 0x167   : > { %v1306_v40 = vadd.f32 %v10564_v10, %v1295_v13 }
 0x169   : > { %vm1314_vm7 = vcmp.ge.f32.partialorder %v1306_v40, 0.0  ;;  %v1322_v16 = vmul.f32 0.05, %v1306_v40 }
 0x16a   : > { %v1101_v18 = vpop.f32.mrf.mxu3 }
 0x16b   : > { %v1184_v35 = vadd.f32 %v1183_v11, %v1101_v18  ;;  %v1280_v63 = vpop.f32.mrf.mxu2  ;;  %v10567_v19 = vsel %vm1314_vm7, %v1306_v40, %v1322_v16  ;;  %vm1632_vm7 = vcmask 195584  }
 0x16c   : > { %v1354_v20 = vpack.c.bf16 %v10567_v19, %v10567_v19 }
 0x16d   : > { %v1273_v21 = vpop.f32.mrf.mxu0  ;;  %v1296_v26 = vadd.f32 %v1280_v63, %v1184_v35 }
 0x16e   : > { %v1293_v29 = vadd.f32 %v1273_v21, %v1177_v4  ;;  %1372 = vrot.lane.b32.xlu1 %v1354_v20, %s12896_s26  ;;  %v1188_v3 = vpop.f32.mrf.mxu1 }
 0x16f   : > { %v1307_v32 = vadd.f32 %v10564_v10, %v1296_v26 }
 0x170   : > { %v1304_v30 = vadd.f32 %v10564_v10, %v1293_v29 }
 0x171   : > { %v1323_v44 = vmul.f32 0.05, %v1307_v32  ;;  %vm1315_vm9 = vcmp.ge.f32.partialorder %v1307_v32, 0.0 }
 0x172   : > { %vm1312_vm8 = vcmp.ge.f32.partialorder %v1304_v30, 0.0  ;;  %v1320_v33 = vmul.f32 0.05, %v1304_v30  ;;  %v1104_v47 = vpop.f32.mrf.mxu3 }
 0x173   : > { %v1187_v37 = vadd.f32 %v1186_v24, %v1104_v47  ;;  %v1283_v12 = vpop.f32.mrf.mxu2  ;;  %v10581_v54 = vsel %vm1315_vm9, %v1307_v32, %v1323_v44 }
 0x174   : > { %v10574_v38 = vsel %vm1312_vm8, %v1304_v30, %v1320_v33  ;;  %v1355_v34 = vpack.c.bf16 %v10581_v54, %v10581_v54  ;;  %vm1847_vm8 = vcmask 293888  }
 0x175   : > { %v1275_v31 = vpop.f32.mrf.mxu0  ;;  %v1352_v39 = vpack.c.bf16 %v10574_v38, %v10574_v38  ;;  %v1297_v42 = vadd.f32 %v1283_v12, %v1187_v37 }
 0x176   : > { %v1294_v48 = vadd.f32 %v1275_v31, %v1179_v45  ;;  %v1191_v46 = vpop.f32.mrf.mxu1 }
 0x177   : > { %1368 = vrot.lane.b32.xlu2 %v1352_v39, %s12896_s26  ;;  %v1308_v23 = vadd.f32 %v10564_v10, %v1297_v42 }
 0x178   : > { %v1305_v52 = vadd.f32 %v10564_v10, %v1294_v48 }
 0x179   : > { %v1324_v61 = vmul.f32 0.05, %v1308_v23  ;;  %vm1316_vm11 = vcmp.ge.f32.partialorder %v1308_v23, 0.0 }
 0x17a   : > { %vm1313_vm10 = vcmp.ge.f32.partialorder %v1305_v52, 0.0  ;;  %v1321_v43 = vmul.f32 0.05, %v1305_v52  ;;  %v1106_v25 = vpop.f32.mrf.mxu3 }
 0x17b   : > { %v1189_v56 = vadd.f32 %v1188_v3, %v1106_v25  ;;  %v1285_v57 = vpop.f32.mrf.mxu2  ;;  %v10592_v22 = vsel %vm1316_vm11, %v1308_v23, %v1324_v61 }
 0x17c   : > { %v10583_v51 = vsel %vm1313_vm10, %v1305_v52, %v1321_v43  ;;  %v1356_v11 = vpack.c.bf16 %v10592_v22, %v10592_v22 }
 0x17d   : > { %v1298_v59 = vadd.f32 %v1285_v57, %v1189_v56  ;;  %v1353_v60 = vpack.c.bf16 %v10583_v51, %v10583_v51 }
 0x17e   : > { %v1193_v40 = vpop.f32.mrf.mxu1 }
 0x17f   : > { %v1309_v50 = vadd.f32 %v10564_v10, %v1298_v59  ;;  %1370 = vrot.lane.b32.xlu0 %v1353_v60, %s12896_s26  ;;  %1374 = vrot.lane.b32.xlu2 %v1355_v34, %s12896_s26 }
 0x181   : > { %vm1317_vm12 = vcmp.ge.f32.partialorder %v1309_v50, 0.0  ;;  %v1325_v28 = vmul.f32 0.05, %v1309_v50 }
 0x182   : > { %v1109_v36 = vpop.f32.mrf.mxu3 }
 0x183   : > { %v1192_v62 = vadd.f32 %v1191_v46, %v1109_v36  ;;  %v1288_v2 = vpop.f32.mrf.mxu2  ;;  %v10594_v15 = vsel %vm1317_vm12, %v1309_v50, %v1325_v28 }
 0x184   : > { %v1357_v6 = vpack.c.bf16 %v10594_v15, %v10594_v15 }
 0x185   : > { %v1299_v8 = vadd.f32 %v1288_v2, %v1192_v62 }
 0x186   : > { %1378 = vrot.lane.b32.xlu1 %v1357_v6, %s12896_s26 }
 0x187   : > { %v1310_v13 = vadd.f32 %v10564_v10, %v1299_v8  ;;  %1376 = vrot.lane.b32.xlu0 %v1356_v11, %s12896_s26 }
 0x189   : > { %vm1318_vm13 = vcmp.ge.f32.partialorder %v1310_v13, 0.0  ;;  %v1326_v14 = vmul.f32 0.05, %v1310_v13 }
 0x18a   : > { %v1111_v16 = vpop.f32.mrf.mxu3 }
 0x18b   : > { %v1194_v18 = vadd.f32 %v1193_v40, %v1111_v16  ;;  %v1290_v35 = vpop.f32.mrf.mxu2  ;;  %v10603_v63 = vsel %vm1318_vm13, %v1310_v13, %v1326_v14 }
 0x18c   : > { %v1358_v4 = vpack.c.bf16 %v10603_v63, %v10603_v63 }
 0x18d   : > { %v1300_v20 = vadd.f32 %v1290_v35, %v1194_v18 }
 0x18e   : > { %1380 = vrot.lane.b32.xlu2 %v1358_v4, %s12896_s26 }
 0x18f   : > { %v1311_v21 = vadd.f32 %v10564_v10, %v1300_v20 }
 0x191   : > { %vm1319_vm14 = vcmp.ge.f32.partialorder %v1311_v21, 0.0  ;;  %v1327_v24 = vmul.f32 0.05, %v1311_v21 }
 0x193   : > { %v10609_v26 = vsel %vm1319_vm14, %v1311_v21, %v1327_v24 }
 0x194   : > { %v1359_v29 = vpack.c.bf16 %v10609_v26, %v10609_v26 }
 0x196   : > { %1382 = vrot.lane.b32.xlu0 %v1359_v29, %s12896_s26  ;;  %s12952_s26 = smov 124  }
 0x1d1   : > { %v1369_v30 = vpop.permute.xlu2 %1368 }
 0x1d2   : > { %1393 = vst.msk [vmem:[#allocation2 + $0x10] sm:$0xf] %vm1392_vm15, %v1369_v30 }
 0x1d9   : > { %v1375_v32 = vpop.permute.xlu2 %1374  ;;  %v9872_v33 = vld [vmem:[#allocation2 + $0x10] sm:$0xff]  }
 0x1da   : > { %1396 = vst.msk [vmem:[#allocation2 + $0x34] sm:$0xf] %vm1392_vm15, %v1375_v32  ;;  %v1584_v47 = vrot.slane %v9872_v33, 5  ;;  %v10616_v37 = vunpack.c.l.b16 %v9872_v33 }
 0x1dc   : > { %1593 = vrot.lane.b32.xlu0 %v1584_v47, %s12902_s19  ;;  %v1472_v10 = vpack.c.b16 %v10616_v37, %v10616_v37 }
 0x1de   : > { %v1488_v12 = vshrl.u32 %v1472_v10, 16  ;;  %v1491_v45 = vshll.u32 %v1472_v10, 16  ;;  %v10654_v10 = vld [vmem:[#allocation2 + $0x38] sm:$0xff]  }
 0x1e0   : > { %v1373_v31 = vpop.permute.xlu1 %1372  ;;  %v1490_v39 = vrot.slane %v1488_v12, 4  ;;  %v1493_v44 = vrot.slane %v1491_v45, 5  ;;  %v9407_v45 = vunpack.c.l.b16 %v10654_v10 }
 0x1e1   : > { %1395 = vst.msk [vmem:[#allocation2 + $0x28] sm:$0xf] %vm1392_vm15, %v1373_v31  ;;  %v10622_v42 = vld [vmem:[#allocation2 + $0x30] sm:$0xff]  }
 0x1e2   : > { %v1494_v48 = vor.u32 %v1493_v44, %v1490_v39  ;;  %v9404_v3 = vunpack.c.h.b16 %v10622_v42 }
 0x1e4   : > { %1591 = vrot.lane.b32.xlu0 %v802_v0, %s12902_s19  ;;  %1545 = vrot.lane.b32.xlu1 %v1494_v48, %s12900_s21  ;;  %v1475_v52 = vpack.c.b16 %v9404_v3, %v9404_v3  ;;  %v10634_v0 = vld [vmem:[#allocation2 + $0x20] sm:$0xff]  }
 0x1e5   : > { %v9395_v46 = vunpack.c.l.b16 %v10634_v0 }
 0x1e6   : > { %v1512_v23 = vshrl.u32 %v1475_v52, 16  ;;  %v1515_v43 = vshll.u32 %v1475_v52, 16 }
 0x1e8   : > { %v1381_v25 = vpop.permute.xlu2 %1380  ;;  %v1514_v56 = vrot.slane %v1512_v23, 4  ;;  %v1517_v57 = vrot.slane %v1515_v43, 5  ;;  %v9875_v34 = vld [vmem:[#allocation2 + $0x28] sm:$0xff]   ;;  %v1579_v43 = vpack.c.b16 %v9407_v45, %v9404_v3 }
 0x1e9   : > { %1399 = vst.msk [vmem:[#allocation2 + $0x58] sm:$0xf] %vm1392_vm15, %v1381_v25  ;;  %v10632_v55 = vunpack.c.l.b16 %v9875_v34 }
 0x1ea   : > { %v1518_v59 = vor.u32 %v1517_v57, %v1514_v56  ;;  %v1587_v57 = vrot.slane %v1579_v43, 5 }
 0x1eb   : > { %v1474_v62 = vpack.c.b16 %v10632_v55, %v10632_v55 }
 0x1ec   : > { %1551 = vrot.lane.b32.xlu0 %v1518_v59, %s12900_s21 }
 0x1ed   : > { %v1504_v13 = vshrl.u32 %v1474_v62, 16  ;;  %v1507_v14 = vshll.u32 %v1474_v62, 16  ;;  %v1586_v62 = vrot.slane %v9875_v34, 5  ;;  %v10682_v34 = vld [vmem:[#allocation2 + $0x50] sm:$0xff]  }
 0x1ef   : > { %v1506_v24 = vrot.slane %v1504_v13, 4  ;;  %v1509_v29 = vrot.slane %v1507_v14, 5 }
 0x1f0   : > { %v10636_v61 = vld [vmem:[#allocation2 + $0x58] sm:$0xff]  }
 0x1f1   : > { %v1371_v60 = vpop.permute.xlu0 %1370  ;;  %v10647_v6 = vunpack.c.l.b16 %v10636_v61  ;;  %v1510_v31 = vor.u32 %v1509_v29, %v1506_v24  ;;  %v1590_v53 = vrot.slane %v10636_v61, 5  ;;  %v1345_v61 = vld [vmem:[%s12950_s3 + $0x24] sm:$0x3] }
 0x1f2   : > { %1394 = vst.msk [vmem:[#allocation2 + $0x1c] sm:$0xf] %vm1392_vm15, %v1371_v60 }
 0x1f3   : > { %v1478_v35 = vpack.c.b16 %v10647_v6, %v10647_v6 }
 0x1f5   : > { %v1536_v33 = vshrl.u32 %v1478_v35, 16  ;;  %v1539_v47 = vshll.u32 %v1478_v35, 16 }
 0x1f7   : > { %v1538_v39 = vrot.slane %v1536_v33, 4  ;;  %v1541_v44 = vrot.slane %v1539_v47, 5  ;;  %v1841_v47 = vunpack.c.l.b16 %v1345_v61 }
 0x1f8   : > { %v1379_v50 = vpop.permute.xlu1 %1378 }
 0x1f9   : > { %1398 = vst.msk [vmem:[#allocation2 + $0x4c] sm:$0xf] %vm1392_vm15, %v1379_v50  ;;  %v1377_v28 = vpop.permute.xlu0 %1376  ;;  %v10640_v36 = vld [vmem:[#allocation2 + $0x18] sm:$0xff]   ;;  %v1542_v23 = vor.u32 %v1541_v44, %v1538_v39 }
 0x1fa   : > { %1397 = vst.msk [vmem:[#allocation2 + $0x40] sm:$0xf] %vm1392_vm15, %v1377_v28  ;;  %v9392_v2 = vunpack.c.h.b16 %v10640_v36  ;;  %v9263_v44 = vld [vmem:[%s12950_s3 + $0x1c] sm:$0xff] }
 0x1fc   : > { %v1577_v8 = vpack.c.b16 %v9395_v46, %v9392_v2  ;;  %v1473_v11 = vpack.c.b16 %v9392_v2, %v9392_v2 }
 0x1fe   : > { %v1585_v40 = vrot.slane %v1577_v8, 5  ;;  %v1496_v16 = vshrl.u32 %v1473_v11, 16  ;;  %v1499_v18 = vshll.u32 %v1473_v11, 16 }
 0x200   : > { %1595 = vrot.lane.b32.xlu1 %v1585_v40, %s12902_s19  ;;  %v1498_v4 = vrot.slane %v1496_v16, 4  ;;  %v1501_v20 = vrot.slane %v1499_v18, 5  ;;  %v10656_v12 = vld [vmem:[#allocation2 + $0x48] sm:$0xff]  }
 0x201   : > { %v9878_v21 = vld [vmem:[#allocation2 + $0x40] sm:$0xff]   ;;  %v9416_v48 = vunpack.c.h.b16 %v10656_v12 }
 0x202   : > { %v1502_v30 = vor.u32 %v1501_v20, %v1498_v4  ;;  %v1588_v32 = vrot.slane %v9878_v21, 5  ;;  %v10666_v56 = vunpack.c.l.b16 %v9878_v21  ;;  %v9419_v4 = vunpack.c.l.b16 %v10682_v34 }
 0x203   : > { %v1477_v25 = vpack.c.b16 %v9416_v48, %v9416_v48 }
 0x204   : > { %1547 = vrot.lane.b32.xlu2 %v1502_v30, %s12900_s21  ;;  %1601 = vrot.lane.b32.xlu0 %v1588_v32, %s12902_s19  ;;  %v1476_v50 = vpack.c.b16 %v10666_v56, %v10666_v56 }
 0x205   : > { %v1528_v59 = vshrl.u32 %v1477_v25, 16  ;;  %v1531_v60 = vshll.u32 %v1477_v25, 16 }
 0x206   : > { %v1520_v11 = vshrl.u32 %v1476_v50, 16  ;;  %v1523_v13 = vshll.u32 %v1476_v50, 16  ;;  %v1464_v50 = vpack.c.b16 %v10616_v37, %v9324_v9  ;;  %v9264_v37 = vld [vmem:[%s12950_s3 + $0x28] sm:$0xff] }
 0x207   : > { %v1530_v2 = vrot.slane %v1528_v59, 4  ;;  %v1533_v8 = vrot.slane %v1531_v60, 5  ;;  %v9265_v59 = vld [vmem:[%s12950_s3 + $0x30] sm:$0xff]  ;;  %v9260_v60 = vld [vmem:[%s12950_s3] sm:$0xff] }
 0x208   : > { %v1383_v52 = vpop.permute.xlu0 %1382  ;;  %1549 = vrot.lane.b32.xlu1 %v1510_v31, %s12900_s21  ;;  %v1522_v16 = vrot.slane %v1520_v11, 4  ;;  %v1525_v18 = vrot.slane %v1523_v13, 5  ;;  %v1844_v31 = vpack.c.b16 %v1841_v47, %v1841_v47 }
 0x209   : > { %1400 = vst.msk [vmem:[#allocation2 + $0x64] sm:$0xf] %vm1392_vm15, %v1383_v52  ;;  %v1534_v40 = vor.u32 %v1533_v8, %v1530_v2 }
 0x20a   : > { %v1526_v35 = vor.u32 %v1525_v18, %v1522_v16  ;;  %v1862_v39 = vsel %vm1860_vm3, %v1844_v31, 0 }
 0x20b   : > { %1869 = vmatpush.bf16.msrb.mxu3 %v1862_v39 }
 0x20c   : > { %1543 = vrot.lane.b32.xlu2 %v10371_v49, %s12900_s21  ;;  %1557 = vrot.lane.b32.xlu0 %v1542_v23, %s12900_s21  ;;  %v1340_v23 = vld [vmem:[%s12950_s3 + $0x10] sm:$0x3] }
 0x20d   : > { %v1925_v41 = vunpack.c.l.b16 %v1340_v23 }
 0x20f   : > { %1870 = vmatpush.bf16.msrb.mxu3 %v9263_v44 }
 0x210   : > { %1599 = vrot.lane.b32.xlu1 %v1587_v57, %s12902_s19  ;;  %v10674_v28 = vld [vmem:[#allocation2 + $0x60] sm:$0xff]   ;;  %v9261_v57 = vld [vmem:[%s12950_s3 + $0x8] sm:$0xff] }
 0x211   : > { %v9428_v3 = vunpack.c.h.b16 %v10674_v28 }
 0x213   : > { %v1667_v49 = vpack.c.b16 %v9371_v58, %v9428_v3  ;;  %v1581_v58 = vpack.c.b16 %v9419_v4, %v9416_v48  ;;  %v1654_v20 = vpack.c.b16 %v9428_v3, %v9428_v3 }
 0x214   : > { %1597 = vrot.lane.b32.xlu2 %v1586_v62, %s12902_s19 }
 0x215   : > { %v1668_v14 = vrot.slane %v1667_v49, 5  ;;  %v1589_v21 = vrot.slane %v1581_v58, 5  ;;  %v1656_v24 = vshrl.u32 %v1654_v20, 16  ;;  %v1659_v29 = vshll.u32 %v1654_v20, 16  ;;  %v9262_v49 = vld [vmem:[%s12950_s3 + $0x14] sm:$0xff] }
 0x216   : > { %1871 = vmatpush.bf16.msrb.mxu3 %v9262_v49 }
 0x217   : > { %1669 = vrot.lane.b32.xlu0 %v1668_v14, %s12902_s19  ;;  %v1658_v30 = vrot.slane %v1656_v24, 4  ;;  %v1661_v32 = vrot.slane %v1659_v29, 5 }
 0x218   : > { %1555 = vrot.lane.b32.xlu1 %v1534_v40, %s12900_s21 }
 0x219   : > { %v1662_v33 = vor.u32 %v1661_v32, %v1658_v30 }
 0x21c   : > { %1553 = vrot.lane.b32.xlu2 %v1526_v35, %s12900_s21  ;;  %v10061_v35 = vld [vmem:[#allocation2] sm:$0xff]  }
 0x220   : > { %1605 = vrot.lane.b32.xlu1 %v1590_v53, %s12902_s19 }
 0x224   : > { %1603 = vrot.lane.b32.xlu2 %v1589_v21, %s12902_s19 }
 0x228   : > { %1989 = vrot.lane.b32.xlu1 %v10430_v7, %s12900_s21  ;;  %v1350_v7 = vld [vmem:[%s12950_s3 + $0x38] sm:$0x3] }
 0x229   : > { %v2031_v48 = vunpack.c.l.b16 %v1350_v7 }
 0x22b   : > { %v2034_v52 = vpack.c.b16 %v2031_v48, %v2031_v48 }
 0x22c   : > { %1663 = vrot.lane.b32.xlu2 %v1662_v33, %s12900_s21  ;;  %s9316_s21 = sshll.u32 %s10269_s28, 6 }
 0x22d   : > { %v2041_v43 = vsel %vm1860_vm3, %v2034_v52, 0 }
 0x22e   : > { %2048 = vmatpush.bf16.msrb.mxu1 %v2041_v43 }
 0x232   : > { %2049 = vmatpush.bf16.msrb.mxu1 %v9265_v59 }
 0x234   : > { %1995 = vrot.lane.b32.xlu2 %v1215_v5, %s12902_s19  ;;  %v1928_v5 = vpack.c.b16 %v1925_v41, %v1925_v41 }
 0x236   : > { %v1944_v25 = vsel %vm1860_vm3, %v1928_v5, 0  ;;  %2050 = vmatpush.bf16.msrb.mxu1 %v9264_v37 }
 0x237   : > { %1951 = vmatpush.bf16.msrb.mxu0 %v1944_v25 }
 0x23b   : > { %1952 = vmatpush.bf16.msrb.mxu0 %v9261_v57 }
 0x23f   : > { %1953 = vmatpush.bf16.msrb.mxu0 %v9260_v60 }
 0x24e   : > { %v1594_v2 = vpop.permute.xlu0 %1593 }
 0x256   : > { %v1546_v62 = vpop.permute.xlu1 %1545  ;;  %v1592_v16 = vpop.permute.xlu0 %1591 }
 0x257   : > { %v1613_v3 = vsel %vm1607_vm4, %v1464_v50, %v1546_v62 }
 0x258   : > { %v1636_v8 = vsel %vm1632_vm7, %v1613_v3, %v1594_v2  ;;  %v9408_v2 = vunpack.c.h.b16 %v10654_v10 }
 0x259   : > { %v1685_v11 = vunpack.c.h.b16 %v1636_v8  ;;  %v1684_v27 = vunpack.c.l.b16 %v1636_v8  ;;  %v9396_v8 = vunpack.c.h.b16 %v10634_v0 }
 0x25b   : > { %v1701_v14 = vpack.c.b16 %v1685_v11, %v1685_v11  ;;  %v1700_v18 = vpack.c.b16 %v1684_v27, %v1684_v27 }
 0x25d   : > { %v1722_v40 = vshrl.u32 %v1701_v14, 16  ;;  %v1717_v29 = vshrl.u32 %v1700_v18, 16  ;;  %v1725_v30 = vshll.u32 %v1701_v14, 16 }
 0x25e   : > { %v1548_v13 = vpop.permute.xlu2 %1547  ;;  %v1552_v25 = vpop.permute.xlu0 %1551 }
 0x25f   : > { %v1724_v20 = vrot.slane %v1722_v40, 7  ;;  %v8732_v44 = vrot.slane %v1717_v29, 11  ;;  %v1616_v41 = vsel %vm1607_vm4, %v10640_v36, %v1548_v13  ;;  %v1468_v40 = vpack.c.b16 %v10666_v56, %v9408_v2 }
 0x261   : > { %v1727_v61 = vor.u32 %v1725_v30, %v1724_v20 }
 0x263   : > { %v1728_v23 = vsel %vm10489_vm5, %v8732_v44, %v1727_v61 }
 0x264   : > { %v1820_v60 = vunpack.c.l.b16 %v1728_v23 }
 0x266   : > { %v1544_v9 = vpop.permute.xlu2 %1543 }
 0x267   : > { %v1610_v53 = vsel %vm1607_vm4, %v10061_v35, %v1544_v9  ;;  %v1466_v9 = vpack.c.b16 %v10632_v55, %v9396_v8 }
 0x268   : > { %v1634_v58 = vsel %vm1632_vm7, %v1610_v53, %v1592_v16 }
 0x269   : > { %v1894_v21 = vunpack.c.l.b16 %v1634_v58  ;;  %v1895_v24 = vunpack.c.h.b16 %v1634_v58 }
 0x26b   : > { %v1896_v32 = vpack.c.b16 %v1894_v21, %v1894_v21  ;;  %v1897_v33 = vpack.c.b16 %v1895_v24, %v1895_v24 }
 0x26d   : > { %v1899_v47 = vshrl.u32 %v1896_v32, 16  ;;  %v1904_v31 = vshrl.u32 %v1897_v33, 16  ;;  %v1907_v39 = vshll.u32 %v1897_v33, 16 }
 0x26e   : > { %v1598_v7 = vpop.permute.xlu2 %1597 }
 0x26f   : > { %v8752_v48 = vrot.slane %v1899_v47, 11  ;;  %v1906_v52 = vrot.slane %v1904_v31, 7 }
 0x271   : > { %v1909_v43 = vor.u32 %v1907_v39, %v1906_v52  ;;  %v1622_v39 = vsel %vm1607_vm4, %v10622_v42, %v1552_v25 }
 0x272   : > { %v1596_v5 = vpop.permute.xlu1 %1595 }
 0x273   : > { %v1910_v57 = vsel %vm10489_vm5, %v8752_v48, %v1909_v43  ;;  %v1638_v59 = vsel %vm1632_vm7, %v1616_v41, %v1596_v5 }
 0x274   : > { %v1911_v50 = vunpack.c.l.b16 %v1910_v57  ;;  %v1686_v62 = vunpack.c.l.b16 %v1638_v59  ;;  %v1687_v3 = vunpack.c.h.b16 %v1638_v59 }
 0x276   : > { %v1702_v11 = vpack.c.b16 %v1686_v62, %v1686_v62  ;;  %v1703_v49 = vpack.c.b16 %v1687_v3, %v1687_v3  ;;  %v1912_v14 = vpack.c.b16 %v1820_v60, %v1911_v50  ;;  %v1554_v27 = vpop.permute.xlu2 %1553  ;;  %v1602_v35 = vpop.permute.xlu0 %1601 }
 0x277   : > { %v1625_v53 = vsel %vm1607_vm4, %v1468_v40, %v1554_v27  ;;  %v9420_v40 = vunpack.c.h.b16 %v10682_v34 }
 0x278   : > { %v1730_v36 = vshrl.u32 %v1702_v11, 16  ;;  %v1735_v13 = vshrl.u32 %v1703_v49, 16  ;;  %8761 = vmatmul.msk.bf16.vlgmr.msrb.gmra.mxu0 %vm1847_vm8, %v1912_v14  ;;  %v1738_v16 = vshll.u32 %v1703_v49, 16  ;;  %v1644_v30 = vsel %vm1632_vm7, %v1625_v53, %v1602_v35 }
 0x279   : > { %v1693_v47 = vunpack.c.h.b16 %v1644_v30 }
 0x27a   : > { %v1737_v37 = vrot.slane %v1735_v13, 7  ;;  %v1550_v18 = vpop.permute.xlu1 %1549  ;;  %v8733_v20 = vrot.slane %v1730_v36, 11 }
 0x27b   : > { %v1619_v58 = vsel %vm1607_vm4, %v1466_v9, %v1550_v18  ;;  %v1709_v57 = vpack.c.b16 %v1693_v47, %v1693_v47 }
 0x27c   : > { %v1740_v21 = vor.u32 %v1738_v16, %v1737_v37  ;;  %v1640_v24 = vsel %vm1632_vm7, %v1619_v58, %v1598_v7 }
 0x27d   : > { %v1688_v29 = vunpack.c.l.b16 %v1640_v24  ;;  %v1689_v32 = vunpack.c.h.b16 %v1640_v24  ;;  %v1774_v14 = vshrl.u32 %v1709_v57, 16 }
 0x27e   : > { %v1741_v56 = vsel %vm10489_vm5, %v8733_v20, %v1740_v21  ;;  %v1604_v2 = vpop.permute.xlu2 %1603  ;;  %v1558_v9 = vpop.permute.xlu0 %1557 }
 0x27f   : > { %v1821_v55 = vunpack.c.l.b16 %v1741_v56  ;;  %v1704_v33 = vpack.c.b16 %v1688_v29, %v1688_v29  ;;  %v1705_v61 = vpack.c.b16 %v1689_v32, %v1689_v32  ;;  %v1776_v24 = vrot.slane %v1774_v14, 7 }
 0x281   : > { %v1828_v31 = vpack.c.b16 %v1821_v55, %v1820_v60  ;;  %v1743_v44 = vshrl.u32 %v1704_v33, 16  ;;  %v1748_v48 = vshrl.u32 %v1705_v61, 16  ;;  %v1751_v43 = vshll.u32 %v1705_v61, 16 }
 0x282   : > { %v1600_v52 = vpop.permute.xlu1 %1599  ;;  %v1692_v60 = vunpack.c.l.b16 %v1644_v30  ;;  %v1777_v30 = vshll.u32 %v1709_v57, 16 }
 0x283   : > { %v1642_v7 = vsel %vm1632_vm7, %v1622_v39, %v1600_v52  ;;  %8748 = vmatmul.msk.bf16.vlgmr.msrb.gmra.mxu3 %vm1847_vm8, %v1828_v31  ;;  %v1750_v23 = vrot.slane %v1748_v48, 7  ;;  %v8734_v59 = vrot.slane %v1743_v44, 11 }
 0x284   : > { %v1690_v41 = vunpack.c.l.b16 %v1642_v7  ;;  %v1691_v5 = vunpack.c.h.b16 %v1642_v7  ;;  %v1708_v18 = vpack.c.b16 %v1692_v60, %v1692_v60  ;;  %v1779_v61 = vor.u32 %v1777_v30, %v1776_v24 }
 0x285   : > { %v1753_v50 = vor.u32 %v1751_v43, %v1750_v23 }
 0x286   : > { %v1706_v62 = vpack.c.b16 %v1690_v41, %v1690_v41  ;;  %v1707_v3 = vpack.c.b16 %v1691_v5, %v1691_v5  ;;  %v1769_v56 = vshrl.u32 %v1708_v18, 16  ;;  %v1664_v31 = vpop.permute.xlu2 %1663 }
 0x287   : > { %v1754_v25 = vsel %vm10489_vm5, %v8734_v59, %v1753_v50 }
 0x288   : > { %v1756_v11 = vshrl.u32 %v1706_v62, 16  ;;  %v1761_v42 = vshrl.u32 %v1707_v3, 16  ;;  %v1822_v49 = vunpack.c.l.b16 %v1754_v25  ;;  %v1764_v13 = vshll.u32 %v1707_v3, 16 }
 0x289   : > { %v1670_v52 = vpop.permute.xlu0 %1669  ;;  %v8736_v23 = vrot.slane %v1769_v56, 11 }
 0x28a   : > { %v1763_v36 = vrot.slane %v1761_v42, 7  ;;  %v1556_v27 = vpop.permute.xlu1 %1555  ;;  %v1913_v16 = vpack.c.b16 %v1822_v49, %v1821_v55  ;;  %v8735_v35 = vrot.slane %v1756_v11, 11 }
 0x28b   : > { %v1628_v37 = vsel %vm1607_vm4, %v10656_v12, %v1556_v27  ;;  %v1470_v12 = vpack.c.b16 %v10647_v6, %v9420_v40  ;;  %v1673_v6 = vsel %vm1607_vm4, %v10674_v28, %v1664_v31  ;;  %v1780_v3 = vsel %vm10489_vm5, %v8736_v23, %v1779_v61 }
 0x28c   : > { %v1766_v53 = vor.u32 %v1764_v13, %v1763_v36  ;;  %v1646_v58 = vsel %vm1632_vm7, %v1628_v37, %v1604_v2  ;;  %8762 = vmatmul.msk.bf16.gmra.mxu0 %vm1847_vm8, %v1913_v16  ;;  %8774 = vmatmul.msk.bf16.vlgmr.msrb.gmra.mxu1 %vm1847_vm8, %v1913_v16  ;;  %v1675_v59 = vsel %vm1632_vm7, %v1673_v6, %v1670_v52  ;;  %v1824_v25 = vunpack.c.l.b16 %v1780_v3 }
 0x28d   : > { %v1694_v20 = vunpack.c.l.b16 %v1646_v58  ;;  %v1695_v21 = vunpack.c.h.b16 %v1646_v58  ;;  %v1631_v47 = vsel %vm1607_vm4, %v1470_v12, %v1558_v9  ;;  %v1699_v11 = vunpack.c.h.b16 %v1675_v59 }
 0x28e   : > { %v1767_v29 = vsel %vm10489_vm5, %v8735_v35, %v1766_v53  ;;  %v1996_v36 = vpop.permute.xlu2 %1995  ;;  %v1698_v58 = vunpack.c.l.b16 %v1675_v59 }
 0x28f   : > { %v1711_v32 = vpack.c.b16 %v1695_v21, %v1695_v21  ;;  %v1823_v55 = vunpack.c.l.b16 %v1767_v29  ;;  %v1710_v33 = vpack.c.b16 %v1694_v20, %v1694_v20  ;;  %v1715_v37 = vpack.c.b16 %v1699_v11, %v1699_v11 }
 0x290   : > { %v1714_v12 = vpack.c.b16 %v1698_v58, %v1698_v58 }
 0x291   : > { %v1787_v39 = vshrl.u32 %v1711_v32, 16  ;;  %v1829_v48 = vpack.c.b16 %v1823_v55, %v1822_v49  ;;  %v1782_v5 = vshrl.u32 %v1710_v33, 16  ;;  %v1790_v57 = vshll.u32 %v1711_v32, 16 }
 0x292   : > { %v1606_v44 = vpop.permute.xlu1 %1605  ;;  %v1914_v13 = vpack.c.b16 %v1824_v25, %v1823_v55  ;;  %v1813_v24 = vshrl.u32 %v1715_v37, 16  ;;  %v1808_v33 = vshrl.u32 %v1714_v12, 16  ;;  %v1816_v61 = vshll.u32 %v1715_v37, 16 }
 0x293   : > { %v1648_v7 = vsel %vm1632_vm7, %v1631_v47, %v1606_v44  ;;  %v1789_v43 = vrot.slane %v1787_v39, 7  ;;  %8749 = vmatmul.msk.bf16.gmra.mxu3 %vm1847_vm8, %v1829_v48  ;;  %v8737_v42 = vrot.slane %v1782_v5, 11 }
 0x294   : > { %v1697_v41 = vunpack.c.h.b16 %v1648_v7  ;;  %v1696_v50 = vunpack.c.l.b16 %v1648_v7  ;;  %v1815_v55 = vrot.slane %v1813_v24, 7  ;;  %v8739_v48 = vrot.slane %v1808_v33, 11 }
 0x295   : > { %v1792_v60 = vor.u32 %v1790_v57, %v1789_v43 }
 0x296   : > { %v1713_v62 = vpack.c.b16 %v1697_v41, %v1697_v41  ;;  %v1712_v49 = vpack.c.b16 %v1696_v50, %v1696_v50  ;;  %v1818_v44 = vor.u32 %v1816_v61, %v1815_v55 }
 0x297   : > { %v1793_v27 = vsel %vm10489_vm5, %v8737_v42, %v1792_v60 }
 0x298   : > { %v1800_v2 = vshrl.u32 %v1713_v62, 16  ;;  %v1795_v18 = vshrl.u32 %v1712_v49, 16  ;;  %v1803_v35 = vshll.u32 %v1713_v62, 16  ;;  %v1825_v53 = vunpack.c.l.b16 %v1793_v27 }
 0x299   : > { %v1819_v41 = vsel %vm10489_vm5, %v8739_v48, %v1818_v44 }
 0x29a   : > { %v1990_v14 = vpop.permute.xlu1 %1989  ;;  %v1802_v9 = vrot.slane %v1800_v2, 7  ;;  %v1830_v29 = vpack.c.b16 %v1825_v53, %v1824_v25  ;;  %v1827_v57 = vunpack.c.l.b16 %v1819_v41  ;;  %v10800_v25 = vld [vmem:[%s12951_s4] ss:$0 sm:$0xff] }
 0x29b   : > { %v1999_v28 = vsel %vm1607_vm4, %v10540_v17, %v1990_v14  ;;  %v8738_v17 = vrot.slane %v1795_v18, 11 }
 0x29c   : > { %v2001_v16 = vsel %vm1632_vm7, %v1999_v28, %v1996_v36  ;;  %8763 = vmatmul.msk.bf16.gmra.mxu0 %vm1847_vm8, %v1914_v13  ;;  %8775 = vmatmul.msk.bf16.gmra.mxu1 %vm1847_vm8, %v1914_v13  ;;  %v1805_v20 = vor.u32 %v1803_v35, %v1802_v9 }
 0x29d   : > { %v2004_v21 = vunpack.c.h.b16 %v2001_v16  ;;  %v2003_v56 = vunpack.c.l.b16 %v2001_v16 }
 0x29e   : > { %v1806_v32 = vsel %vm10489_vm5, %v8738_v17, %v1805_v20 }
 0x29f   : > { %v2006_v30 = vpack.c.b16 %v2004_v21, %v2004_v21  ;;  %v1826_v47 = vunpack.c.l.b16 %v1806_v32  ;;  %v2005_v31 = vpack.c.b16 %v2003_v56, %v2003_v56 }
 0x2a1   : > { %v2013_v39 = vshrl.u32 %v2006_v30, 16  ;;  %v1915_v52 = vpack.c.b16 %v1826_v47, %v1825_v53  ;;  %v2008_v7 = vshrl.u32 %v2005_v31, 16  ;;  %v2016_v43 = vshll.u32 %v2006_v30, 16 }
 0x2a2   : > { %v1831_v59 = vpack.c.b16 %v1827_v57, %v1826_v47 }
 0x2a3   : > { %8750 = vmatmul.msk.bf16.gmra.mxu3 %vm1847_vm8, %v1830_v29  ;;  %v2015_v23 = vrot.slane %v2013_v39, 7  ;;  %v8765_v6 = vrot.slane %v2008_v7, 11 }
 0x2a5   : > { %v2018_v5 = vor.u32 %v2016_v43, %v2015_v23 }
 0x2a7   : > { %v2019_v50 = vsel %vm10489_vm5, %v8765_v6, %v2018_v5 }
 0x2a8   : > { %v2020_v62 = vunpack.c.l.b16 %v2019_v50 }
 0x2aa   : > { %v2021_v3 = vpack.c.b16 %v2020_v62, %v1827_v57 }
 0x2ac   : > { %8764 = vmatmul.msk.bf16.gmra.mxu0 %vm1847_vm8, %v1915_v52  ;;  %8776 = vmatmul.msk.bf16.gmra.mxu1 %vm1847_vm8, %v1915_v52 }
 0x2b3   : > { %8751 = vmatmul.msk.bf16.gmra.mxu3 %vm1847_vm8, %v1831_v59 }
 0x2bc   : > { %8777 = vmatmul.msk.bf16.gmra.mxu1 %vm1847_vm8, %v2021_v3 }
 0x2f5   : > { %v1955_v60 = vpop.f32.mrf.mxu0 }
 0x2fd   : > { %v1957_v2 = vpop.f32.mrf.mxu0 }
 0x306   : > { %v1873_v11 = vpop.f32.mrf.mxu3 }
 0x307   : > { %v1956_v42 = vadd.f32 %v1955_v60, %v1873_v11 }
 0x309   : > { %v2052_v49 = vpop.f32.mrf.mxu1  ;;  %v1960_v36 = vpop.f32.mrf.mxu0 }
 0x30a   : > { %v2072_v14 = vadd.f32 %v2052_v49, %v1956_v42 }
 0x30c   : > { %v2083_v28 = vadd.f32 %v10800_v25, %v2072_v14 }
 0x30e   : > { %v1875_v13 = vpop.f32.mrf.mxu3  ;;  %vm2091_vm9 = vcmp.ge.f32.partialorder %v2083_v28, 0.0  ;;  %v2099_v27 = vmul.f32 0.05, %v2083_v28 }
 0x30f   : > { %v1958_v9 = vadd.f32 %v1957_v2, %v1875_v13 }
 0x310   : > { %v10803_v37 = vsel %vm2091_vm9, %v2083_v28, %v2099_v27 }
 0x311   : > { %v2054_v16 = vpop.f32.mrf.mxu1  ;;  %v2131_v18 = vpack.c.bf16 %v10803_v37, %v10803_v37  ;;  %v1962_v58 = vpop.f32.mrf.mxu0 }
 0x312   : > { %v2073_v35 = vadd.f32 %v2054_v16, %v1958_v9 }
 0x313   : > { %2147 = vrot.lane.b32.xlu0 %v2131_v18, %s12952_s26 }
 0x314   : > { %v2084_v53 = vadd.f32 %v10800_v25, %v2073_v35 }
 0x316   : > { %vm2092_vm10 = vcmp.ge.f32.partialorder %v2084_v53, 0.0  ;;  %v2100_v20 = vmul.f32 0.05, %v2084_v53  ;;  %v1878_v21 = vpop.f32.mrf.mxu3 }
 0x317   : > { %v1961_v24 = vadd.f32 %v1960_v36, %v1878_v21 }
 0x318   : > { %v10809_v17 = vsel %vm2092_vm10, %v2084_v53, %v2100_v20 }
 0x319   : > { %v2057_v29 = vpop.f32.mrf.mxu1  ;;  %v2132_v12 = vpack.c.bf16 %v10809_v17, %v10809_v17  ;;  %v1965_v61 = vpop.f32.mrf.mxu0 }
 0x31a   : > { %v2074_v56 = vadd.f32 %v2057_v29, %v1961_v24 }
 0x31b   : > { %2149 = vrot.lane.b32.xlu1 %v2132_v12, %s12952_s26 }
 0x31c   : > { %v2085_v30 = vadd.f32 %v10800_v25, %v2074_v56 }
 0x31e   : > { %vm2093_vm11 = vcmp.ge.f32.partialorder %v2085_v30, 0.0  ;;  %v2101_v32 = vmul.f32 0.05, %v2085_v30  ;;  %v1880_v55 = vpop.f32.mrf.mxu3 }
 0x31f   : > { %v1963_v33 = vadd.f32 %v1962_v58, %v1880_v55 }
 0x320   : > { %v10815_v47 = vsel %vm2093_vm11, %v2085_v30, %v2101_v32 }
 0x321   : > { %v2059_v31 = vpop.f32.mrf.mxu1  ;;  %v2133_v39 = vpack.c.bf16 %v10815_v47, %v10815_v47  ;;  %v1967_v5 = vpop.f32.mrf.mxu0 }
 0x322   : > { %v2075_v44 = vadd.f32 %v2059_v31, %v1963_v33 }
 0x323   : > { %2151 = vrot.lane.b32.xlu2 %v2133_v39, %s12952_s26 }
 0x324   : > { %v2086_v48 = vadd.f32 %v10800_v25, %v2075_v44 }
 0x326   : > { %vm2094_vm12 = vcmp.ge.f32.partialorder %v2086_v48, 0.0  ;;  %v2102_v52 = vmul.f32 0.05, %v2086_v48  ;;  %v1883_v7 = vpop.f32.mrf.mxu3 }
 0x327   : > { %v1966_v23 = vadd.f32 %v1965_v61, %v1883_v7  ;;  %v10850_v61 = vld [vmem:[#allocation2] sm:$0xff]  }
 0x328   : > { %v10821_v43 = vsel %vm2094_vm12, %v2086_v48, %v2102_v52  ;;  %v9440_v31 = vunpack.c.h.b16 %v10850_v61 }
 0x329   : > { %v2062_v41 = vpop.f32.mrf.mxu1  ;;  %v2134_v6 = vpack.c.bf16 %v10821_v43, %v10821_v43  ;;  %v1970_v49 = vpop.f32.mrf.mxu0 }
 0x32a   : > { %v2076_v57 = vadd.f32 %v2062_v41, %v1966_v23  ;;  %v2249_v39 = vpack.c.b16 %v9440_v31, %v9440_v31 }
 0x32b   : > { %2153 = vrot.lane.b32.xlu0 %v2134_v6, %s12952_s26 }
 0x32c   : > { %v2087_v59 = vadd.f32 %v10800_v25, %v2076_v57  ;;  %v2258_v44 = vshrl.u32 %v2249_v39, 16  ;;  %v2261_v48 = vshll.u32 %v2249_v39, 16 }
 0x32e   : > { %vm2095_vm13 = vcmp.ge.f32.partialorder %v2087_v59, 0.0  ;;  %v2103_v50 = vmul.f32 0.05, %v2087_v59  ;;  %v1885_v62 = vpop.f32.mrf.mxu3  ;;  %v2260_v52 = vrot.slane %v2258_v44, 4  ;;  %v2263_v7 = vrot.slane %v2261_v48, 5 }
 0x32f   : > { %v1968_v3 = vadd.f32 %v1967_v5, %v1885_v62 }
 0x330   : > { %v10827_v60 = vsel %vm2095_vm13, %v2087_v59, %v2103_v50  ;;  %v10853_v23 = vor.u32 %v2263_v7, %v2260_v52 }
 0x331   : > { %v2064_v2 = vpop.f32.mrf.mxu1  ;;  %v2135_v11 = vpack.c.bf16 %v10827_v60, %v10827_v60  ;;  %v1972_v53 = vpop.f32.mrf.mxu0 }
 0x332   : > { %v2077_v42 = vadd.f32 %v2064_v2, %v1968_v3 }
 0x333   : > { %2155 = vrot.lane.b32.xlu1 %v2135_v11, %s12952_s26 }
 0x334   : > { %v2088_v14 = vadd.f32 %v10800_v25, %v2077_v42 }
 0x336   : > { %vm2096_vm14 = vcmp.ge.f32.partialorder %v2088_v14, 0.0  ;;  %v2104_v36 = vmul.f32 0.05, %v2088_v14  ;;  %v1888_v28 = vpop.f32.mrf.mxu3 }
 0x337   : > { %v1971_v13 = vadd.f32 %v1970_v49, %v1888_v28 }
 0x338   : > { %v10833_v27 = vsel %vm2096_vm14, %v2088_v14, %v2104_v36 }
 0x339   : > { %v2067_v9 = vpop.f32.mrf.mxu1  ;;  %v2136_v16 = vpack.c.bf16 %v10833_v27, %v10833_v27 }
 0x33a   : > { %v2078_v18 = vadd.f32 %v2067_v9, %v1971_v13 }
 0x33b   : > { %2157 = vrot.lane.b32.xlu2 %v2136_v16, %s12952_s26 }
 0x33c   : > { %v2089_v35 = vadd.f32 %v10800_v25, %v2078_v18 }
 0x33e   : > { %vm2097_vm9 = vcmp.ge.f32.partialorder %v2089_v35, 0.0  ;;  %v2105_v58 = vmul.f32 0.05, %v2089_v35  ;;  %v1890_v20 = vpop.f32.mrf.mxu3 }
 0x33f   : > { %v1973_v21 = vadd.f32 %v1972_v53, %v1890_v20 }
 0x340   : > { %v10839_v24 = vsel %vm2097_vm9, %v2089_v35, %v2105_v58 }
 0x341   : > { %v2069_v29 = vpop.f32.mrf.mxu1  ;;  %v2137_v12 = vpack.c.bf16 %v10839_v24, %v10839_v24 }
 0x342   : > { %v2079_v56 = vadd.f32 %v2069_v29, %v1973_v21 }
 0x343   : > { %2159 = vrot.lane.b32.xlu0 %v2137_v12, %s12952_s26  ;;  %2321 = vrot.lane.b32.xlu2 %v10853_v23, %s12953_s29 }
 0x344   : > { %v2090_v30 = vadd.f32 %v10800_v25, %v2079_v56  ;;  %v10857_v25 = vld [vmem:[#allocation2 + $0x8] sm:$0xff]  }
 0x345   : > { %v9443_v41 = vunpack.c.l.b16 %v10857_v25 }
 0x346   : > { %vm2098_vm10 = vcmp.ge.f32.partialorder %v2090_v30, 0.0  ;;  %v2106_v32 = vmul.f32 0.05, %v2090_v30 }
 0x347   : > { %v10860_v6 = vpack.c.b16 %v9443_v41, %v9440_v31 }
 0x348   : > { %v10845_v55 = vsel %vm2098_vm10, %v2090_v30, %v2106_v32 }
 0x349   : > { %v2138_v33 = vpack.c.bf16 %v10845_v55, %v10845_v55  ;;  %v2361_v5 = vrot.slane %v10860_v6, 5 }
 0x34b   : > { %2161 = vrot.lane.b32.xlu1 %v2138_v33, %s12952_s26  ;;  %2369 = vrot.lane.b32.xlu2 %v2361_v5, %s12902_s19 }
 0x37d   : > { %v2152_v57 = vpop.permute.xlu2 %2151 }
 0x37e   : > { %2173 = vst.msk [vmem:[#allocation2 + $0x28] sm:$0xf] %vm1392_vm15, %v2152_v57 }
 0x385   : > { %v2148_v59 = vpop.permute.xlu0 %2147  ;;  %v9889_v50 = vld [vmem:[#allocation2 + $0x28] sm:$0xff]  }
 0x386   : > { %2171 = vst.msk [vmem:[#allocation2 + $0x10] sm:$0xf] %vm1392_vm15, %v2148_v59  ;;  %v10868_v62 = vunpack.c.l.b16 %v9889_v50 }
 0x388   : > { %v2252_v3 = vpack.c.b16 %v10868_v62, %v10868_v62 }
 0x38a   : > { %v2282_v2 = vshrl.u32 %v2252_v3, 16  ;;  %v2285_v11 = vshll.u32 %v2252_v3, 16 }
 0x38c   : > { %v2284_v42 = vrot.slane %v2282_v2, 4  ;;  %v2287_v49 = vrot.slane %v2285_v11, 5  ;;  %v2364_v2 = vrot.slane %v9889_v50, 5 }
 0x38d   : > { %v2150_v14 = vpop.permute.xlu1 %2149  ;;  %v9886_v36 = vld [vmem:[#allocation2 + $0x10] sm:$0xff]  }
 0x38e   : > { %2172 = vst.msk [vmem:[#allocation2 + $0x1c] sm:$0xf] %vm1392_vm15, %v2150_v14  ;;  %v2288_v28 = vor.u32 %v2287_v49, %v2284_v42  ;;  %v10873_v13 = vunpack.c.l.b16 %v9886_v36  ;;  %v2362_v39 = vrot.slane %v9886_v36, 5 }
 0x390   : > { %2327 = vrot.lane.b32.xlu2 %v2288_v28, %s12953_s29  ;;  %v2250_v9 = vpack.c.b16 %v10873_v13, %v10873_v13 }
 0x392   : > { %v2266_v16 = vshrl.u32 %v2250_v9, 16  ;;  %v2269_v18 = vshll.u32 %v2250_v9, 16 }
 0x394   : > { %v2268_v35 = vrot.slane %v2266_v16, 4  ;;  %v2271_v53 = vrot.slane %v2269_v18, 5 }
 0x395   : > { %v2158_v58 = vpop.permute.xlu2 %2157  ;;  %v10878_v20 = vld [vmem:[#allocation2 + $0x18] sm:$0xff]  }
 0x396   : > { %2176 = vst.msk [vmem:[#allocation2 + $0x4c] sm:$0xf] %vm1392_vm15, %v2158_v58  ;;  %v2272_v21 = vor.u32 %v2271_v53, %v2268_v35  ;;  %v9452_v29 = vunpack.c.h.b16 %v10878_v20 }
 0x398   : > { %2323 = vrot.lane.b32.xlu0 %v2272_v21, %s12953_s29  ;;  %v2251_v12 = vpack.c.b16 %v9452_v29, %v9452_v29  ;;  %v2355_v7 = vpack.c.b16 %v9395_v46, %v9452_v29 }
 0x39a   : > { %v2274_v56 = vshrl.u32 %v2251_v12, 16  ;;  %v2277_v30 = vshll.u32 %v2251_v12, 16  ;;  %v2363_v3 = vrot.slane %v2355_v7, 5 }
 0x39c   : > { %v2276_v32 = vrot.slane %v2274_v56, 4  ;;  %v2279_v33 = vrot.slane %v2277_v30, 5 }
 0x39d   : > { %v2154_v31 = vpop.permute.xlu0 %2153  ;;  %v10884_v48 = vld [vmem:[#allocation2 + $0x48] sm:$0xff]  }
 0x39e   : > { %2174 = vst.msk [vmem:[#allocation2 + $0x34] sm:$0xf] %vm1392_vm15, %v2154_v31  ;;  %v2280_v44 = vor.u32 %v2279_v33, %v2276_v32  ;;  %v9476_v52 = vunpack.c.h.b16 %v10884_v48 }
 0x3a0   : > { %2371 = vrot.lane.b32.xlu0 %v2362_v39, %s12902_s19  ;;  %2325 = vrot.lane.b32.xlu1 %v2280_v44, %s12953_s29  ;;  %v2255_v59 = vpack.c.b16 %v9476_v52, %v9476_v52  ;;  %v2359_v39 = vpack.c.b16 %v9419_v4, %v9476_v52 }
 0x3a2   : > { %v2306_v14 = vshrl.u32 %v2255_v59, 16  ;;  %v2309_v9 = vshll.u32 %v2255_v59, 16 }
 0x3a4   : > { %v2308_v53 = vrot.slane %v2306_v14, 4  ;;  %v2311_v58 = vrot.slane %v2309_v9, 5 }
 0x3a5   : > { %v2156_v41 = vpop.permute.xlu1 %2155  ;;  %v10891_v57 = vld [vmem:[#allocation2 + $0x30] sm:$0xff]  }
 0x3a6   : > { %2175 = vst.msk [vmem:[#allocation2 + $0x40] sm:$0xf] %vm1392_vm15, %v2156_v41  ;;  %v9464_v11 = vunpack.c.h.b16 %v10891_v57  ;;  %v2367_v41 = vrot.slane %v2359_v39, 5  ;;  %v2124_v39 = vld [vmem:[%s12877_s5 + $0x24] sm:$0x3] }
 0x3a8   : > { %2373 = vrot.lane.b32.xlu1 %v2363_v3, %s12902_s19  ;;  %2375 = vrot.lane.b32.xlu0 %v2364_v2, %s12902_s19  ;;  %v2357_v42 = vpack.c.b16 %v9407_v45, %v9464_v11  ;;  %v2253_v49 = vpack.c.b16 %v9464_v11, %v9464_v11  ;;  %v2312_v45 = vor.u32 %v2311_v58, %v2308_v53  ;;  %v10918_v11 = vld [vmem:[#allocation2 + $0x70] sm:$0xff]  }
 0x3aa   : > { %v2365_v46 = vrot.slane %v2357_v42, 5  ;;  %v2290_v36 = vshrl.u32 %v2253_v49, 16  ;;  %v2293_v28 = vshll.u32 %v2253_v49, 16  ;;  %v10921_v42 = vunpack.c.l.b16 %v10918_v11  ;;  %v10923_v49 = vld [vmem:[#allocation2 + $0x68] sm:$0xff]  }
 0x3ac   : > { %2377 = vrot.lane.b32.xlu2 %v2365_v46, %s12902_s19  ;;  %v2292_v16 = vrot.slane %v2290_v36, 4  ;;  %v2295_v18 = vrot.slane %v2293_v28, 5  ;;  %v2754_v28 = vpack.c.b16 %v10921_v42, %v10921_v42 }
 0x3ad   : > { %v9892_v50 = vld [vmem:[#allocation2 + $0x40] sm:$0xff]  }
 0x3ae   : > { %v2296_v35 = vor.u32 %v2295_v18, %v2292_v16  ;;  %v10900_v21 = vunpack.c.l.b16 %v9892_v50  ;;  %v2366_v33 = vrot.slane %v9892_v50, 5  ;;  %v9491_v18 = vunpack.c.l.b16 %v10923_v49 }
 0x3af   : > { %v2759_v53 = vshll.u32 %v2754_v28, 16 }
 0x3b0   : > { %2329 = vrot.lane.b32.xlu1 %v2296_v35, %s12953_s29  ;;  %v2254_v10 = vpack.c.b16 %v10900_v21, %v10900_v21  ;;  %v2756_v35 = vshrl.u32 %v2754_v28, 16 }
 0x3b2   : > { %v2298_v29 = vshrl.u32 %v2254_v10, 16  ;;  %v2301_v12 = vshll.u32 %v2254_v10, 16 }
 0x3b4   : > { %2333 = vrot.lane.b32.xlu2 %v2312_v45, %s12953_s29  ;;  %v2300_v56 = vrot.slane %v2298_v29, 4  ;;  %v2303_v30 = vrot.slane %v2301_v12, 5  ;;  %v2119_v29 = vld [vmem:[%s12877_s5 + $0x10] sm:$0x3]  ;;  %v2758_v12 = vrot.slane %v2756_v35, 4 }
 0x3b5   : > { %v2160_v32 = vpop.permute.xlu0 %2159  ;;  %v9271_v35 = vld [vmem:[%s12877_s5 + $0x30] sm:$0xff] }
 0x3b6   : > { %2177 = vst.msk [vmem:[#allocation2 + $0x58] sm:$0xf] %vm1392_vm15, %v2160_v32  ;;  %v2304_v31 = vor.u32 %v2303_v30, %v2300_v56  ;;  %v2761_v56 = vrot.slane %v2759_v53, 5  ;;  %v9269_v53 = vld [vmem:[%s12877_s5 + $0x1c] sm:$0xff] }
 0x3b8   : > { %2379 = vrot.lane.b32.xlu1 %v2366_v33, %s12902_s19  ;;  %2331 = vrot.lane.b32.xlu0 %v2304_v31, %s12953_s29  ;;  %v2699_v33 = vunpack.c.l.b16 %v2119_v29  ;;  %v2129_v31 = vld [vmem:[%s12877_s5 + $0x38] sm:$0x3] }
 0x3bd   : > { %v2162_v44 = vpop.permute.xlu1 %2161  ;;  %v9895_v7 = vld [vmem:[#allocation2 + $0x58] sm:$0xff]  }
 0x3be   : > { %2178 = vst.msk [vmem:[#allocation2 + $0x64] sm:$0xf] %vm1392_vm15, %v2162_v44  ;;  %v2368_v59 = vrot.slane %v9895_v7, 5  ;;  %v10912_v3 = vunpack.c.l.b16 %v9895_v7  ;;  %v10943_v44 = vor.u32 %v2761_v56, %v2758_v12  ;;  %v2805_v7 = vunpack.c.l.b16 %v2129_v31 }
 0x3c0   : > { %2381 = vrot.lane.b32.xlu0 %v2367_v41, %s12902_s19  ;;  %2383 = vrot.lane.b32.xlu2 %v2368_v59, %s12902_s19  ;;  %v2256_v2 = vpack.c.b16 %v10912_v3, %v10912_v3  ;;  %v2617_v41 = vunpack.c.l.b16 %v2124_v39  ;;  %s12909_s19 = smov 8  }
 0x3c2   : > { %v2314_v4 = vshrl.u32 %v2256_v2, 16  ;;  %v2317_v52 = vshll.u32 %v2256_v2, 16 }
 0x3c4   : > { %v2316_v14 = vrot.slane %v2314_v4, 4  ;;  %v2319_v46 = vrot.slane %v2317_v52, 5  ;;  %v2702_v4 = vpack.c.b16 %v2699_v33, %v2699_v33  ;;  %v2808_v52 = vpack.c.b16 %v2805_v7, %v2805_v7 }
 0x3c5   : > { %v10925_v36 = vld [vmem:[#allocation2 + $0x60] sm:$0xff]   ;;  %v12906_v7 = vunpack.c.h.b16 %v10857_v25 }
 0x3c6   : > { %v2320_v9 = vor.u32 %v2319_v46, %v2316_v14  ;;  %v9488_v16 = vunpack.c.h.b16 %v10925_v36  ;;  %v2620_v14 = vpack.c.b16 %v2617_v41, %v2617_v41  ;;  %v2718_v46 = vsel %vm1860_vm3, %v2702_v4, 0 }
 0x3c7   : > { %2725 = vmatpush.bf16.msra.mxu3 %v2718_v46  ;;  %v2815_v28 = vsel %vm1860_vm3, %v2808_v52, 0 }
 0x3c8   : > { %2335 = vrot.lane.b32.xlu1 %v2320_v9, %s12953_s29  ;;  %v2430_v50 = vpack.c.b16 %v9488_v16, %v9488_v16  ;;  %v2443_v58 = vpack.c.b16 %v9491_v18, %v9488_v16  ;;  %2763 = vrot.lane.b32.xlu2 %v10943_v44, %s12953_s29  ;;  %v2636_v9 = vsel %vm1860_vm3, %v2620_v14, 0  ;;  %v9267_v16 = vld [vmem:[%s12877_s5 + $0x8] sm:$0xff] }
 0x3c9   : > { %2822 = vmatpush.bf16.msra.mxu0 %v2815_v28  ;;  %2643 = vmatpush.bf16.msrb.mxu2 %v2636_v9 }
 0x3ca   : > { %v2432_v10 = vshrl.u32 %v2430_v50, 16  ;;  %v2435_v45 = vshll.u32 %v2430_v50, 16  ;;  %v2444_v59 = vrot.slane %v2443_v58, 5  ;;  %v12907_v50 = vrot.slane %v10918_v11, 5  ;;  %v2322_v58 = vpop.permute.xlu2 %2321 }
 0x3cb   : > { %2726 = vmatpush.bf16.msra.mxu3 %v9267_v16 }
 0x3cc   : > { %v2434_v30 = vrot.slane %v2432_v10, 4  ;;  %v2437_v32 = vrot.slane %v2435_v45, 5  ;;  %v9266_v10 = vld [vmem:[%s12877_s5] sm:$0xff]  ;;  %v2387_v45 = vsel %vm1607_vm4, %v10850_v61, %v2322_v58 }
 0x3cd   : > { %2823 = vmatpush.bf16.msra.mxu0 %v9271_v35  ;;  %2644 = vmatpush.bf16.msrb.mxu2 %v9269_v53 }
 0x3ce   : > { %v2438_v2 = vor.u32 %v2437_v32, %v2434_v30  ;;  %v9268_v30 = vld [vmem:[%s12877_s5 + $0x14] sm:$0xff]  ;;  %v9270_v32 = vld [vmem:[%s12877_s5 + $0x28] sm:$0xff] }
 0x3cf   : > { %2727 = vmatpush.bf16.msra.mxu3 %v9266_v10 }
 0x3d0   : > { %2445 = vrot.lane.b32.xlu1 %v2444_v59, %s12954_s0  ;;  %2439 = vrot.lane.b32.xlu0 %v2438_v2, %s12953_s29  ;;  %v2242_v59 = vpack.c.b16 %v10873_v13, %v12906_v7  ;;  %v2244_v13 = vpack.c.b16 %v10868_v62, %v9396_v8 }
 0x3d1   : > { %2645 = vmatpush.bf16.msrb.mxu2 %v9268_v30  ;;  %2824 = vmatpush.bf16.msra.mxu0 %v9270_v32 }
 0x3d2   : > { %v2370_v29 = vpop.permute.xlu2 %2369 }
 0x3d3   : > { %v2410_v12 = vsel %vm1632_vm7, %v2387_v45, %v2370_v29 }
 0x3d4   : > { %v2669_v56 = vunpack.c.h.b16 %v2410_v12  ;;  %v2668_v31 = vunpack.c.l.b16 %v2410_v12 }
 0x3d6   : > { %v2671_v39 = vpack.c.b16 %v2669_v56, %v2669_v56  ;;  %v2670_v61 = vpack.c.b16 %v2668_v31, %v2668_v31 }
 0x3d8   : > { %2769 = vrot.lane.b32.xlu0 %v12907_v50, %s12954_s0  ;;  %v2678_v41 = vshrl.u32 %v2671_v39, 16  ;;  %v2673_v14 = vshrl.u32 %v2670_v61, 16  ;;  %v2681_v28 = vshll.u32 %v2671_v39, 16 }
 0x3da   : > { %v2680_v46 = vrot.slane %v2678_v41, 7  ;;  %v8798_v10 = vrot.slane %v2673_v14, 11 }
 0x3dc   : > { %v2683_v45 = vor.u32 %v2681_v28, %v2680_v46 }
 0x3de   : > { %v2684_v41 = vsel %vm10489_vm5, %v8798_v10, %v2683_v45 }
 0x3ea   : > { %v2328_v29 = vpop.permute.xlu2 %2327 }
 0x3eb   : > { %v2396_v30 = vsel %vm1607_vm4, %v2244_v13, %v2328_v29 }
 0x40a   : > { %v2324_v33 = vpop.permute.xlu0 %2323 }
 0x40b   : > { %v2390_v2 = vsel %vm1607_vm4, %v2242_v59, %v2324_v33 }
 0x412   : > { %v2372_v4 = vpop.permute.xlu0 %2371  ;;  %v2326_v52 = vpop.permute.xlu1 %2325 }
 0x413   : > { %v2412_v9 = vsel %vm1632_vm7, %v2390_v2, %v2372_v4  ;;  %v2393_v31 = vsel %vm1607_vm4, %v10878_v20, %v2326_v52 }
 0x414   : > { %v2460_v16 = vunpack.c.l.b16 %v2412_v9  ;;  %v2461_v35 = vunpack.c.h.b16 %v2412_v9 }
 0x416   : > { %v2476_v53 = vpack.c.b16 %v2460_v16, %v2460_v16  ;;  %v2477_v58 = vpack.c.b16 %v2461_v35, %v2461_v35  ;;  %v2685_v16 = vunpack.c.l.b16 %v2684_v41 }
 0x418   : > { %v2493_v12 = vshrl.u32 %v2476_v53, 16  ;;  %v2498_v56 = vshrl.u32 %v2477_v58, 16  ;;  %v2501_v33 = vshll.u32 %v2477_v58, 16 }
 0x41a   : > { %v2500_v32 = vrot.slane %v2498_v56, 7  ;;  %v2374_v39 = vpop.permute.xlu1 %2373  ;;  %v2376_v61 = vpop.permute.xlu0 %2375  ;;  %v8778_v59 = vrot.slane %v2493_v12, 11 }
 0x41b   : > { %v2414_v2 = vsel %vm1632_vm7, %v2393_v31, %v2374_v39  ;;  %v2416_v0 = vsel %vm1632_vm7, %v2396_v30, %v2376_v61 }
 0x41c   : > { %v2503_v8 = vor.u32 %v2501_v33, %v2500_v32  ;;  %v2462_v62 = vunpack.c.l.b16 %v2414_v2  ;;  %v2463_v4 = vunpack.c.h.b16 %v2414_v2  ;;  %v2464_v14 = vunpack.c.l.b16 %v2416_v0  ;;  %v2378_v32 = vpop.permute.xlu2 %2377  ;;  %v10062_v2 = vld [vmem:[#allocation2 + $0x38] sm:$0xff]  }
 0x41d   : > { %v2465_v46 = vunpack.c.h.b16 %v2416_v0  ;;  %v9468_v0 = vunpack.c.h.b16 %v10062_v2 }
 0x41e   : > { %v2504_v28 = vsel %vm10489_vm5, %v8778_v59, %v2503_v8  ;;  %v2478_v9 = vpack.c.b16 %v2462_v62, %v2462_v62  ;;  %v2479_v20 = vpack.c.b16 %v2463_v4, %v2463_v4  ;;  %v2480_v52 = vpack.c.b16 %v2464_v14, %v2464_v14 }
 0x41f   : > { %v2596_v35 = vunpack.c.l.b16 %v2504_v28  ;;  %v2481_v53 = vpack.c.b16 %v2465_v46, %v2465_v46 }
 0x420   : > { %v2506_v58 = vshrl.u32 %v2478_v9, 16  ;;  %v2511_v10 = vshrl.u32 %v2479_v20, 16  ;;  %v2519_v29 = vshrl.u32 %v2480_v52, 16  ;;  %v2514_v56 = vshll.u32 %v2479_v20, 16 }
 0x421   : > { %v2686_v45 = vpack.c.b16 %v2596_v35, %v2685_v16  ;;  %v2524_v13 = vshrl.u32 %v2481_v53, 16  ;;  %v2527_v31 = vshll.u32 %v2481_v53, 16  ;;  %v2246_v53 = vpack.c.b16 %v10900_v21, %v9468_v0 }
 0x422   : > { %v2513_v12 = vrot.slane %v2511_v10, 7  ;;  %v2330_v30 = vpop.permute.xlu1 %2329  ;;  %v8779_v61 = vrot.slane %v2506_v58, 11  ;;  %v8780_v8 = vrot.slane %v2519_v29, 11 }
 0x423   : > { %v2526_v33 = vrot.slane %v2524_v13, 7  ;;  %v2399_v39 = vsel %vm1607_vm4, %v10891_v57, %v2330_v30  ;;  %8807 = vmatmul.msk.bf16.vlgmr.msra.gmra.mxu3 %vm1847_vm8, %v2686_v45 }
 0x424   : > { %v2516_v41 = vor.u32 %v2514_v56, %v2513_v12  ;;  %v2418_v59 = vsel %vm1632_vm7, %v2399_v39, %v2378_v32 }
 0x425   : > { %v2529_v62 = vor.u32 %v2527_v31, %v2526_v33  ;;  %v2466_v4 = vunpack.c.l.b16 %v2418_v59  ;;  %v2467_v14 = vunpack.c.h.b16 %v2418_v59 }
 0x426   : > { %v2517_v46 = vsel %vm10489_vm5, %v8779_v61, %v2516_v41  ;;  %v2334_v61 = vpop.permute.xlu2 %2333 }
 0x427   : > { %v2597_v28 = vunpack.c.l.b16 %v2517_v46  ;;  %v2530_v9 = vsel %vm10489_vm5, %v8780_v8, %v2529_v62  ;;  %v2483_v57 = vpack.c.b16 %v2467_v14, %v2467_v14  ;;  %v2482_v52 = vpack.c.b16 %v2466_v4, %v2466_v4 }
 0x428   : > { %v2598_v20 = vunpack.c.l.b16 %v2530_v9  ;;  %v2405_v0 = vsel %vm1607_vm4, %v10884_v48, %v2334_v61 }
 0x429   : > { %v2537_v16 = vshrl.u32 %v2483_v57, 16  ;;  %v2604_v58 = vpack.c.b16 %v2597_v28, %v2596_v35  ;;  %v2532_v56 = vshrl.u32 %v2482_v52, 16  ;;  %v2540_v30 = vshll.u32 %v2483_v57, 16 }
 0x42a   : > { %v2687_v10 = vpack.c.b16 %v2598_v20, %v2597_v28  ;;  %v2380_v45 = vpop.permute.xlu1 %2379  ;;  %v2332_v29 = vpop.permute.xlu0 %2331 }
 0x42b   : > { %v2539_v13 = vrot.slane %v2537_v16, 7  ;;  %v2402_v12 = vsel %vm1607_vm4, %v2246_v53, %v2332_v29  ;;  %8794 = vmatmul.msk.bf16.vlgmr.msrb.gmra.mxu2 %vm1847_vm8, %v2604_v58  ;;  %v8781_v41 = vrot.slane %v2532_v56, 11 }
 0x42c   : > { %v2420_v32 = vsel %vm1632_vm7, %v2402_v12, %v2380_v45  ;;  %8820 = vmatmul.msk.bf16.vlgmr.msra.gmra.mxu0 %vm1847_vm8, %v2687_v10 }
 0x42d   : > { %v2468_v33 = vunpack.c.l.b16 %v2420_v32  ;;  %v2469_v31 = vunpack.c.h.b16 %v2420_v32  ;;  %v2542_v39 = vor.u32 %v2540_v30, %v2539_v13  ;;  %v2248_v13 = vpack.c.b16 %v10912_v3, %v9420_v40 }
 0x42e   : > { %v2384_v32 = vpop.permute.xlu2 %2383 }
 0x42f   : > { %v2484_v21 = vpack.c.b16 %v2468_v33, %v2468_v33  ;;  %v2485_v35 = vpack.c.b16 %v2469_v31, %v2469_v31  ;;  %v2543_v62 = vsel %vm10489_vm5, %v8781_v41, %v2542_v39 }
 0x430   : > { %v2599_v16 = vunpack.c.l.b16 %v2543_v62 }
 0x431   : > { %v2545_v59 = vshrl.u32 %v2484_v21, 16  ;;  %v2550_v2 = vshrl.u32 %v2485_v35, 16  ;;  %v2553_v14 = vshll.u32 %v2485_v35, 16 }
 0x432   : > { %v2382_v8 = vpop.permute.xlu0 %2381  ;;  %v2605_v12 = vpack.c.b16 %v2599_v16, %v2598_v20  ;;  %v9492_v20 = vunpack.c.h.b16 %v10923_v49  ;;  %v9275_v49 = vld [vmem:[%s12879_s7 + $0x1c] sm:$0xff] }
 0x433   : > { %v2552_v4 = vrot.slane %v2550_v2, 7  ;;  %v2422_v46 = vsel %vm1632_vm7, %v2405_v0, %v2382_v8  ;;  %8808 = vmatmul.msk.bf16.gmra.mxu3 %vm1847_vm8, %v2687_v10  ;;  %v8782_v57 = vrot.slane %v2545_v59, 11 }
 0x434   : > { %v2470_v28 = vunpack.c.l.b16 %v2422_v46  ;;  %v2471_v9 = vunpack.c.h.b16 %v2422_v46 }
 0x435   : > { %v2555_v52 = vor.u32 %v2553_v14, %v2552_v4 }
 0x436   : > { %v2487_v53 = vpack.c.b16 %v2471_v9, %v2471_v9  ;;  %v2486_v58 = vpack.c.b16 %v2470_v28, %v2470_v28  ;;  %v11031_v9 = vpack.c.b16 %v10921_v42, %v9492_v20 }
 0x437   : > { %v2556_v48 = vsel %vm10489_vm5, %v8782_v57, %v2555_v52 }
 0x438   : > { %v2563_v45 = vshrl.u32 %v2487_v53, 16  ;;  %v2600_v29 = vunpack.c.l.b16 %v2556_v48  ;;  %v2558_v33 = vshrl.u32 %v2486_v58, 16  ;;  %v2566_v31 = vshll.u32 %v2487_v53, 16  ;;  %v2764_v48 = vpop.permute.xlu2 %2763 }
 0x43a   : > { %v2565_v56 = vrot.slane %v2563_v45, 7  ;;  %v2336_v30 = vpop.permute.xlu1 %2335  ;;  %v2688_v10 = vpack.c.b16 %v2600_v29, %v2599_v16  ;;  %v8783_v41 = vrot.slane %v2558_v33, 11 }
 0x43b   : > { %v2408_v39 = vsel %vm1607_vm4, %v2248_v13, %v2336_v30  ;;  %8795 = vmatmul.msk.bf16.gmra.mxu2 %vm1847_vm8, %v2605_v12 }
 0x43c   : > { %v2424_v61 = vsel %vm1632_vm7, %v2408_v39, %v2384_v32  ;;  %8821 = vmatmul.msk.bf16.gmra.mxu0 %vm1847_vm8, %v2688_v10  ;;  %v2568_v21 = vor.u32 %v2566_v31, %v2565_v56 }
 0x43d   : > { %v2472_v35 = vunpack.c.l.b16 %v2424_v61  ;;  %v2473_v34 = vunpack.c.h.b16 %v2424_v61 }
 0x43e   : > { %v2569_v0 = vsel %vm10489_vm5, %v8783_v41, %v2568_v21 }
 0x43f   : > { %v2488_v40 = vpack.c.b16 %v2472_v35, %v2472_v35  ;;  %v2489_v3 = vpack.c.b16 %v2473_v34, %v2473_v34  ;;  %v2601_v57 = vunpack.c.l.b16 %v2569_v0 }
 0x441   : > { %v2571_v59 = vshrl.u32 %v2488_v40, 16  ;;  %v2576_v2 = vshrl.u32 %v2489_v3, 16  ;;  %v2579_v14 = vshll.u32 %v2489_v3, 16 }
 0x442   : > { %v2446_v8 = vpop.permute.xlu1 %2445  ;;  %v2440_v62 = vpop.permute.xlu0 %2439 }
 0x443   : > { %v2578_v4 = vrot.slane %v2576_v2, 7  ;;  %v2449_v46 = vsel %vm1607_vm4, %v10925_v36, %v2440_v62  ;;  %8809 = vmatmul.msk.bf16.gmra.mxu3 %vm1847_vm8, %v2688_v10  ;;  %v8784_v52 = vrot.slane %v2571_v59, 11  ;;  %v2773_v36 = vsel %vm1607_vm4, %v11031_v9, %v2764_v48 }
 0x444   : > { %v2451_v28 = vsel %vm1632_vm7, %v2449_v46, %v2446_v8  ;;  %v2606_v10 = vpack.c.b16 %v2601_v57, %v2600_v29 }
 0x445   : > { %v2581_v16 = vor.u32 %v2579_v14, %v2578_v4  ;;  %v2474_v53 = vunpack.c.l.b16 %v2451_v28  ;;  %v2475_v58 = vunpack.c.h.b16 %v2451_v28 }
 0x447   : > { %v2491_v45 = vpack.c.b16 %v2475_v58, %v2475_v58  ;;  %v2582_v13 = vsel %vm10489_vm5, %v8784_v52, %v2581_v16  ;;  %v2490_v12 = vpack.c.b16 %v2474_v53, %v2474_v53 }
 0x448   : > { %v2602_v56 = vunpack.c.l.b16 %v2582_v13 }
 0x449   : > { %v2589_v30 = vshrl.u32 %v2491_v45, 16  ;;  %v2584_v39 = vshrl.u32 %v2490_v12, 16  ;;  %v2592_v61 = vshll.u32 %v2491_v45, 16  ;;  %v11050_v45 = vld [vmem:[%s12878_s6] ss:$0 sm:$0xff] }
 0x44a   : > { %v2770_v32 = vpop.permute.xlu0 %2769  ;;  %v2689_v42 = vpack.c.b16 %v2602_v56, %v2601_v57 }
 0x44b   : > { %v2591_v33 = vrot.slane %v2589_v30, 7  ;;  %v2775_v31 = vsel %vm1632_vm7, %v2773_v36, %v2770_v32  ;;  %8796 = vmatmul.msk.bf16.gmra.mxu2 %vm1847_vm8, %v2606_v10  ;;  %v8785_v3 = vrot.slane %v2584_v39, 11 }
 0x44c   : > { %v2777_v21 = vunpack.c.l.b16 %v2775_v31  ;;  %v2778_v35 = vunpack.c.h.b16 %v2775_v31  ;;  %8822 = vmatmul.msk.bf16.gmra.mxu0 %vm1847_vm8, %v2689_v42 }
 0x44d   : > { %v2594_v34 = vor.u32 %v2592_v61, %v2591_v33 }
 0x44e   : > { %v2779_v41 = vpack.c.b16 %v2777_v21, %v2777_v21  ;;  %v2780_v40 = vpack.c.b16 %v2778_v35, %v2778_v35 }
 0x44f   : > { %v2595_v8 = vsel %vm10489_vm5, %v8785_v3, %v2594_v34 }
 0x450   : > { %v2782_v20 = vshrl.u32 %v2779_v41, 16  ;;  %v2787_v59 = vshrl.u32 %v2780_v40, 16  ;;  %v2790_v29 = vshll.u32 %v2780_v40, 16  ;;  %v2603_v4 = vunpack.c.l.b16 %v2595_v8 }
 0x452   : > { %v8811_v2 = vrot.slane %v2782_v20, 11  ;;  %v2789_v0 = vrot.slane %v2787_v59, 7  ;;  %v2607_v28 = vpack.c.b16 %v2603_v4, %v2602_v56 }
 0x453   : > { %8810 = vmatmul.msk.bf16.gmra.mxu3 %vm1847_vm8, %v2689_v42 }
 0x454   : > { %v2792_v62 = vor.u32 %v2790_v29, %v2789_v0 }
 0x456   : > { %v2793_v14 = vsel %vm10489_vm5, %v8811_v2, %v2792_v62 }
 0x457   : > { %v2794_v46 = vunpack.c.l.b16 %v2793_v14 }
 0x459   : > { %v2795_v57 = vpack.c.b16 %v2794_v46, %v2603_v4 }
 0x45b   : > { %8797 = vmatmul.msk.bf16.gmra.mxu2 %vm1847_vm8, %v2607_v28 }
 0x45c   : > { %8823 = vmatmul.msk.bf16.gmra.mxu0 %vm1847_vm8, %v2795_v57 }
 0x4a6   : > { %v2729_v52 = vpop.f32.mrf.mxu3 }
 0x4a9   : > { %v2826_v16 = vpop.f32.mrf.mxu0 }
 0x4ae   : > { %v2647_v53 = vpop.f32.mrf.mxu2  ;;  %v2731_v58 = vpop.f32.mrf.mxu3 }
 0x4af   : > { %v2730_v48 = vadd.f32 %v2729_v52, %v2647_v53 }
 0x4b1   : > { %v2846_v13 = vadd.f32 %v2826_v16, %v2730_v48  ;;  %v2828_v12 = vpop.f32.mrf.mxu0 }
 0x4b3   : > { %v2857_v36 = vadd.f32 %v11050_v45, %v2846_v13 }
 0x4b5   : > { %v2873_v56 = vmul.f32 0.05, %v2857_v36  ;;  %vm2865_vm11 = vcmp.ge.f32.partialorder %v2857_v36, 0.0 }
 0x4b6   : > { %v2649_v30 = vpop.f32.mrf.mxu2  ;;  %v2734_v10 = vpop.f32.mrf.mxu3 }
 0x4b7   : > { %v2732_v32 = vadd.f32 %v2731_v58, %v2649_v30  ;;  %v11053_v42 = vsel %vm2865_vm11, %v2857_v36, %v2873_v56 }
 0x4b8   : > { %v2905_v33 = vpack.c.bf16 %v11053_v42, %v11053_v42 }
 0x4b9   : > { %v2847_v31 = vadd.f32 %v2828_v12, %v2732_v32  ;;  %v2831_v39 = vpop.f32.mrf.mxu0 }
 0x4ba   : > { %2921 = vrot.lane.b32.xlu1 %v2905_v33, %s12952_s26 }
 0x4bb   : > { %v2858_v61 = vadd.f32 %v11050_v45, %v2847_v31 }
 0x4bd   : > { %v2874_v21 = vmul.f32 0.05, %v2858_v61  ;;  %vm2866_vm12 = vcmp.ge.f32.partialorder %v2858_v61, 0.0 }
 0x4be   : > { %v2652_v35 = vpop.f32.mrf.mxu2  ;;  %v2736_v34 = vpop.f32.mrf.mxu3 }
 0x4bf   : > { %v2735_v41 = vadd.f32 %v2734_v10, %v2652_v35  ;;  %v11059_v40 = vsel %vm2866_vm12, %v2858_v61, %v2874_v21 }
 0x4c0   : > { %v2906_v3 = vpack.c.bf16 %v11059_v40, %v11059_v40 }
 0x4c1   : > { %v2848_v20 = vadd.f32 %v2831_v39, %v2735_v41  ;;  %v2833_v59 = vpop.f32.mrf.mxu0 }
 0x4c2   : > { %2923 = vrot.lane.b32.xlu2 %v2906_v3, %s12952_s26 }
 0x4c3   : > { %v2859_v29 = vadd.f32 %v11050_v45, %v2848_v20 }
 0x4c5   : > { %v2875_v2 = vmul.f32 0.05, %v2859_v29  ;;  %vm2867_vm13 = vcmp.ge.f32.partialorder %v2859_v29, 0.0 }
 0x4c6   : > { %v2654_v0 = vpop.f32.mrf.mxu2  ;;  %v2739_v4 = vpop.f32.mrf.mxu3 }
 0x4c7   : > { %v2737_v8 = vadd.f32 %v2736_v34, %v2654_v0  ;;  %v11065_v62 = vsel %vm2867_vm13, %v2859_v29, %v2875_v2  ;;  %vm3663_vm13 = vcmask 31744  }
 0x4c8   : > { %v2907_v14 = vpack.c.bf16 %v11065_v62, %v11065_v62 }
 0x4c9   : > { %v2849_v46 = vadd.f32 %v2833_v59, %v2737_v8  ;;  %v2836_v28 = vpop.f32.mrf.mxu0 }
 0x4ca   : > { %2925 = vrot.lane.b32.xlu0 %v2907_v14, %s12952_s26 }
 0x4cb   : > { %v2860_v57 = vadd.f32 %v11050_v45, %v2849_v46 }
 0x4cd   : > { %v2876_v52 = vmul.f32 0.05, %v2860_v57  ;;  %vm2868_vm14 = vcmp.ge.f32.partialorder %v2860_v57, 0.0 }
 0x4ce   : > { %v2657_v16 = vpop.f32.mrf.mxu2  ;;  %v2741_v12 = vpop.f32.mrf.mxu3 }
 0x4cf   : > { %v2740_v53 = vadd.f32 %v2739_v4, %v2657_v16  ;;  %v11071_v58 = vsel %vm2868_vm14, %v2860_v57, %v2876_v52 }
 0x4d0   : > { %v2908_v48 = vpack.c.bf16 %v11071_v58, %v11071_v58 }
 0x4d1   : > { %v2850_v13 = vadd.f32 %v2836_v28, %v2740_v53  ;;  %v2838_v56 = vpop.f32.mrf.mxu0 }
 0x4d2   : > { %2927 = vrot.lane.b32.xlu1 %v2908_v48, %s12952_s26 }
 0x4d3   : > { %v2861_v36 = vadd.f32 %v11050_v45, %v2850_v13 }
 0x4d5   : > { %v2877_v30 = vmul.f32 0.05, %v2861_v36  ;;  %vm2869_vm9 = vcmp.ge.f32.partialorder %v2861_v36, 0.0 }
 0x4d6   : > { %v2659_v10 = vpop.f32.mrf.mxu2  ;;  %v2744_v21 = vpop.f32.mrf.mxu3 }
 0x4d7   : > { %v2742_v32 = vadd.f32 %v2741_v12, %v2659_v10  ;;  %v11077_v33 = vsel %vm2869_vm9, %v2861_v36, %v2877_v30 }
 0x4d8   : > { %v2909_v31 = vpack.c.bf16 %v11077_v33, %v11077_v33 }
 0x4d9   : > { %v2851_v39 = vadd.f32 %v2838_v56, %v2742_v32  ;;  %v2841_v34 = vpop.f32.mrf.mxu0 }
 0x4da   : > { %2929 = vrot.lane.b32.xlu2 %v2909_v31, %s12952_s26 }
 0x4db   : > { %v2862_v61 = vadd.f32 %v11050_v45, %v2851_v39 }
 0x4dd   : > { %v2878_v35 = vmul.f32 0.05, %v2862_v61  ;;  %vm2870_vm10 = vcmp.ge.f32.partialorder %v2862_v61, 0.0 }
 0x4de   : > { %v2662_v41 = vpop.f32.mrf.mxu2  ;;  %v2746_v8 = vpop.f32.mrf.mxu3 }
 0x4df   : > { %v2745_v3 = vadd.f32 %v2744_v21, %v2662_v41  ;;  %v11083_v20 = vsel %vm2870_vm10, %v2862_v61, %v2878_v35  ;;  %v11116_v61 = vld [vmem:[#allocation2 + $0x38] sm:$0xff]  }
 0x4e0   : > { %v2910_v59 = vpack.c.bf16 %v11083_v20, %v11083_v20 }
 0x4e1   : > { %v2852_v29 = vadd.f32 %v2841_v34, %v2745_v3  ;;  %v2843_v28 = vpop.f32.mrf.mxu0 }
 0x4e2   : > { %2931 = vrot.lane.b32.xlu0 %v2910_v59, %s12952_s26  ;;  %v9528_v59 = vunpack.c.h.b16 %v11116_v61 }
 0x4e3   : > { %v2863_v2 = vadd.f32 %v11050_v45, %v2852_v29 }
 0x4e5   : > { %v2879_v0 = vmul.f32 0.05, %v2863_v2  ;;  %vm2871_vm11 = vcmp.ge.f32.partialorder %v2863_v2, 0.0 }
 0x4e6   : > { %v2664_v4 = vpop.f32.mrf.mxu2 }
 0x4e7   : > { %v2747_v14 = vadd.f32 %v2746_v8, %v2664_v4  ;;  %v11089_v46 = vsel %vm2871_vm11, %v2863_v2, %v2879_v0 }
 0x4e8   : > { %v2911_v57 = vpack.c.bf16 %v11089_v46, %v11089_v46 }
 0x4e9   : > { %v2853_v52 = vadd.f32 %v2843_v28, %v2747_v14 }
 0x4ea   : > { %2933 = vrot.lane.b32.xlu1 %v2911_v57, %s12952_s26  ;;  %3095 = vrot.lane.b32.xlu0 %v10853_v23, %s12953_s29 }
 0x4eb   : > { %v2864_v16 = vadd.f32 %v11050_v45, %v2853_v52  ;;  %v9902_v45 = vld [vmem:[#allocation2 + $0x20] sm:$0xff]  }
 0x4ec   : > { %v9515_v32 = vunpack.c.l.b16 %v9902_v45 }
 0x4ed   : > { %v2880_v53 = vmul.f32 0.05, %v2864_v16  ;;  %vm2872_vm12 = vcmp.ge.f32.partialorder %v2864_v16, 0.0 }
 0x4ef   : > { %v11097_v48 = vsel %vm2872_vm12, %v2864_v16, %v2880_v53 }
 0x4f0   : > { %v2912_v13 = vpack.c.bf16 %v11097_v48, %v11097_v48 }
 0x4f2   : > { %2935 = vrot.lane.b32.xlu2 %v2912_v13, %s12952_s26 }
 0x4fa   : > { %3143 = vrot.lane.b32.xlu2 %v2361_v5, %s12954_s0 }
 0x51c   : > { %v2924_v12 = vpop.permute.xlu2 %2923 }
 0x51d   : > { %2946 = vst.msk [vmem:[#allocation2 + $0x1c] sm:$0xf] %vm1392_vm15, %v2924_v12 }
 0x524   : > { %v11107_v23 = vld [vmem:[#allocation2 + $0x18] sm:$0xff]  }
 0x525   : > { %v9512_v10 = vunpack.c.h.b16 %v11107_v23 }
 0x527   : > { %v3129_v5 = vpack.c.b16 %v9515_v32, %v9512_v10  ;;  %v3025_v34 = vpack.c.b16 %v9512_v10, %v9512_v10 }
 0x529   : > { %v3137_v2 = vrot.slane %v3129_v5, 5  ;;  %v3048_v4 = vshrl.u32 %v3025_v34, 16  ;;  %v3051_v14 = vshll.u32 %v3025_v34, 16  ;;  %v3690_v34 = vsel %vm3663_vm13, %v10815_v47, 0.0 }
 0x52b   : > { %v3050_v16 = vrot.slane %v3048_v4, 4  ;;  %v3053_v53 = vrot.slane %v3051_v14, 5  ;;  %v3694_v4 = vsel %vm3663_vm13, %v10827_v60, 0.0 }
 0x52c   : > { %v2922_v36 = vpop.permute.xlu1 %2921 }
 0x52d   : > { %2945 = vst.msk [vmem:[#allocation2 + $0x10] sm:$0xf] %vm1392_vm15, %v2922_v36 }
 0x534   : > { %v2930_v56 = vpop.permute.xlu2 %2929  ;;  %v9900_v30 = vld [vmem:[#allocation2 + $0x10] sm:$0xff]  }
 0x535   : > { %2949 = vst.msk [vmem:[#allocation2 + $0x40] sm:$0xf] %vm1392_vm15, %v2930_v56  ;;  %v3136_v31 = vrot.slane %v9900_v30, 5  ;;  %v11111_v39 = vunpack.c.l.b16 %v9900_v30  ;;  %v9516_v30 = vunpack.c.h.b16 %v9902_v45 }
 0x537   : > { %3145 = vrot.lane.b32.xlu0 %v3136_v31, %s12954_s0  ;;  %v3024_v6 = vpack.c.b16 %v11111_v39, %v11111_v39  ;;  %v3688_v31 = vsel %vm3663_vm13, %v10809_v17, 0.0 }
 0x539   : > { %v3040_v21 = vshrl.u32 %v3024_v6, 16  ;;  %v3043_v35 = vshll.u32 %v3024_v6, 16  ;;  %v3054_v6 = vor.u32 %v3053_v53, %v3050_v16  ;;  %v3696_v16 = vsel %vm3663_vm13, %v10833_v27, 0.0 }
 0x53b   : > { %v3042_v41 = vrot.slane %v3040_v21, 4  ;;  %v3045_v3 = vrot.slane %v3043_v35, 5  ;;  %v3687_v35 = vsel %vm3663_vm13, %v10803_v37, 0.0 }
 0x53c   : > { %v2926_v29 = vpop.permute.xlu0 %2925  ;;  %v11119_v0 = vld [vmem:[#allocation2 + $0x40] sm:$0xff]  }
 0x53d   : > { %2947 = vst.msk [vmem:[#allocation2 + $0x28] sm:$0xf] %vm1392_vm15, %v2926_v29  ;;  %v3046_v8 = vor.u32 %v3045_v3, %v3042_v41  ;;  %v9531_v28 = vunpack.c.l.b16 %v11119_v0  ;;  %v3689_v3 = vadd.f32 %v3688_v31, %v3687_v35  ;;  %v3711_v31 = vsel %vm3663_vm13, %v11059_v40, 0.0 }
 0x53e   : > { %v3713_v35 = vsel %vm3663_vm13, %v11065_v62, 0.0 }
 0x53f   : > { %3097 = vrot.lane.b32.xlu1 %v3046_v8, %s12953_s29  ;;  %3147 = vrot.lane.b32.xlu0 %v3137_v2, %s12954_s0  ;;  %v3028_v57 = vpack.c.b16 %v9531_v28, %v9531_v28  ;;  %v11125_v52 = vpack.c.b16 %v9531_v28, %v9528_v59  ;;  %v3692_v59 = vsel %vm3663_vm13, %v10821_v43, 0.0  ;;  %v3691_v8 = vadd.f32 %v3690_v34, %v3689_v3 }
 0x540   : > { %v3700_v3 = vsel %vm3663_vm13, %v10845_v55, 0.0 }
 0x541   : > { %v3072_v13 = vshrl.u32 %v3028_v57, 16  ;;  %v3075_v12 = vshll.u32 %v3028_v57, 16  ;;  %v3693_v57 = vadd.f32 %v3692_v59, %v3691_v8 }
 0x543   : > { %v3074_v36 = vrot.slane %v3072_v13, 4  ;;  %v3077_v56 = vrot.slane %v3075_v12, 5 }
 0x544   : > { %v2928_v10 = vpop.permute.xlu1 %2927  ;;  %v9903_v32 = vld [vmem:[#allocation2 + $0x28] sm:$0xff]  }
 0x545   : > { %2948 = vst.msk [vmem:[#allocation2 + $0x34] sm:$0xf] %vm1392_vm15, %v2928_v10  ;;  %v3078_v5 = vor.u32 %v3077_v56, %v3074_v36  ;;  %v9519_v21 = vunpack.c.l.b16 %v9903_v32  ;;  %v3138_v36 = vrot.slane %v9903_v32, 5  ;;  %v3695_v10 = vadd.f32 %v3694_v4, %v3693_v57 }
 0x546   : > { %v3710_v32 = vsel %vm3663_vm13, %v11053_v42, 0.0 }
 0x547   : > { %3099 = vrot.lane.b32.xlu1 %v3054_v6, %s12953_s29  ;;  %3105 = vrot.lane.b32.xlu0 %v3078_v5, %s12953_s29  ;;  %v3026_v45 = vpack.c.b16 %v9519_v21, %v9519_v21  ;;  %v11136_v41 = vpack.c.b16 %v9519_v21, %v9516_v30  ;;  %v9527_v30 = vunpack.c.l.b16 %v11116_v61  ;;  %v3697_v5 = vadd.f32 %v3696_v16, %v3695_v10 }
 0x548   : > { %v3698_v21 = vsel %vm3663_vm13, %v10839_v24, 0.0  ;;  %v3712_v59 = vadd.f32 %v3711_v31, %v3710_v32  ;;  %v3717_v16 = vsel %vm3663_vm13, %v11077_v33, 0.0  ;;  %v3721_v10 = vsel %vm3663_vm13, %v11089_v46, 0.0 }
 0x549   : > { %v3056_v29 = vshrl.u32 %v3026_v45, 16  ;;  %v3059_v2 = vshll.u32 %v3026_v45, 16 }
 0x54b   : > { %v3058_v14 = vrot.slane %v3056_v29, 4  ;;  %v3061_v28 = vrot.slane %v3059_v2, 5  ;;  %v3699_v29 = vadd.f32 %v3698_v21, %v3697_v5  ;;  %v3715_v2 = vsel %vm3663_vm13, %v11071_v58, 0.0  ;;  %v9908_v5 = vld [vmem:[#allocation2 + $0x50] sm:$0xff]  }
 0x54c   : > { %v2936_v53 = vpop.permute.xlu2 %2935  ;;  %v11144_v13 = vld [vmem:[#allocation2 + $0x30] sm:$0xff]   ;;  %v3723_v21 = vsel %vm3663_vm13, %v11097_v48, 0.0 }
 0x54d   : > { %2952 = vst.msk [vmem:[#allocation2 + $0x64] sm:$0xf] %vm1392_vm15, %v2936_v53  ;;  %v3062_v12 = vor.u32 %v3061_v28, %v3058_v14  ;;  %v9524_v56 = vunpack.c.h.b16 %v11144_v13  ;;  %v3714_v14 = vadd.f32 %v3713_v35, %v3712_v59  ;;  %v3701_v57 = vadd.f32 %v3700_v3, %v3699_v29 }
 0x54e   : > { %v9539_v59 = vunpack.c.l.b16 %v9908_v5 }
 0x54f   : > { %3101 = vrot.lane.b32.xlu2 %v3062_v12, %s12953_s29  ;;  %3149 = vrot.lane.b32.xlu1 %v3138_v36, %s12954_s0  ;;  %v3027_v6 = vpack.c.b16 %v9524_v56, %v9524_v56  ;;  %v3131_v45 = vpack.c.b16 %v9527_v30, %v9524_v56  ;;  %v3716_v36 = vadd.f32 %v3715_v2, %v3714_v14  ;;  %v3719_v56 = vsel %vm3663_vm13, %v11083_v20, 0.0  ;;  %v2903_v14 = vld [vmem:[%s12879_s7 + $0x38] sm:$0x3] }
 0x550   : > { %v3702_v31 = vsel %vm3663_vm13, %v3701_v57, 0.0 }
 0x551   : > { %v3064_v61 = vshrl.u32 %v3027_v6, 16  ;;  %v3067_v34 = vshll.u32 %v3027_v6, 16  ;;  %v3139_v12 = vrot.slane %v3131_v45, 5  ;;  %v3718_v30 = vadd.f32 %v3717_v16, %v3716_v36 }
 0x552   : > { %v3140_v45 = vrot.slane %v11119_v0, 5  ;;  %v2898_v0 = vld [vmem:[%s12879_s7 + $0x24] sm:$0x3] }
 0x553   : > { %v3066_v8 = vrot.slane %v3064_v61, 4  ;;  %v3069_v4 = vrot.slane %v3067_v34, 5  ;;  %v3720_v6 = vadd.f32 %v3719_v56, %v3718_v30  ;;  %v3703_v34 = vrot.slane %v3702_v31, 4 }
 0x554   : > { %v2932_v28 = vpop.permute.xlu0 %2931  ;;  %v3579_v56 = vunpack.c.l.b16 %v2903_v14  ;;  %v3391_v30 = vunpack.c.l.b16 %v2898_v0 }
 0x555   : > { %2950 = vst.msk [vmem:[#allocation2 + $0x4c] sm:$0xf] %vm1392_vm15, %v2932_v28  ;;  %v3070_v53 = vor.u32 %v3069_v4, %v3066_v8  ;;  %v3722_v32 = vadd.f32 %v3721_v10, %v3720_v6  ;;  %v3704_v8 = vadd.f32 %v3703_v34, %v3702_v31  ;;  %v2893_v4 = vld [vmem:[%s12879_s7 + $0x10] sm:$0x3] }
 0x556   : > { %v3394_v7 = vpack.c.b16 %v3391_v30, %v3391_v30 }
 0x557   : > { %3103 = vrot.lane.b32.xlu2 %v3070_v53, %s12953_s29  ;;  %3151 = vrot.lane.b32.xlu1 %v3139_v12, %s12954_s0  ;;  %v3724_v29 = vadd.f32 %v3723_v21, %v3722_v32  ;;  %v11190_v53 = vld [vmem:[#allocation2 + $0x60] sm:$0xff]   ;;  %v3473_v12 = vunpack.c.l.b16 %v2893_v4  ;;  %v9540_v21 = vunpack.c.h.b16 %v9908_v5  ;;  %v9273_v5 = vld [vmem:[%s12879_s7 + $0x8] sm:$0xff] }
 0x558   : > { %v9548_v34 = vunpack.c.h.b16 %v11190_v53  ;;  %v3410_v14 = vsel %vm1860_vm3, %v3394_v7, 0 }
 0x559   : > { %v3725_v36 = vsel %vm3663_vm13, %v3724_v29, 0.0  ;;  %v3476_v6 = vpack.c.b16 %v3473_v12, %v3473_v12  ;;  %3417 = vmatpush.bf16.msra.mxu1 %v3410_v14 }
 0x55a   : > { %v3726_v4 = vrot.slane %v3725_v36, 4  ;;  %v3204_v12 = vpack.c.b16 %v9548_v34, %v9548_v34 }
 0x55b   : > { %v3492_v50 = vsel %vm1860_vm3, %v3476_v6, 0 }
 0x55c   : > { %v2934_v35 = vpop.permute.xlu1 %2933  ;;  %v11175_v61 = vld [vmem:[#allocation2 + $0x48] sm:$0xff]   ;;  %3499 = vmatpush.bf16.msra.mxu2 %v3492_v50  ;;  %v9277_v50 = vld [vmem:[%s12879_s7 + $0x30] sm:$0xff] }
 0x55d   : > { %2951 = vst.msk [vmem:[#allocation2 + $0x58] sm:$0xf] %vm1392_vm15, %v2934_v35  ;;  %v9536_v3 = vunpack.c.h.b16 %v11175_v61  ;;  %v3705_v35 = vrot.slane %v3704_v8, 2  ;;  %3418 = vmatpush.bf16.msra.mxu1 %v9275_v49 }
 0x55f   : > { %3153 = vrot.lane.b32.xlu2 %v3140_v45, %s12954_s0  ;;  %v3029_v2 = vpack.c.b16 %v9536_v3, %v9536_v3  ;;  %v3133_v28 = vpack.c.b16 %v9539_v59, %v9536_v3  ;;  %v3582_v45 = vpack.c.b16 %v3579_v56, %v3579_v56  ;;  %v3706_v7 = vadd.f32 %v3705_v35, %v3704_v8 }
 0x560   : > { %v3727_v56 = vadd.f32 %v3726_v4, %v3725_v36  ;;  %3500 = vmatpush.bf16.msra.mxu2 %v9273_v5 }
 0x561   : > { %v3080_v57 = vshrl.u32 %v3029_v2, 16  ;;  %v3083_v16 = vshll.u32 %v3029_v2, 16  ;;  %v3141_v3 = vrot.slane %v3133_v28, 5  ;;  %v3589_v29 = vsel %vm1860_vm3, %v3582_v45, 0 }
 0x562   : > { %3596 = vmatpush.bf16.msrb.mxu3 %v3589_v29  ;;  %v3707_v6 = vrot.slane %v3706_v7, 1  ;;  %v3206_v45 = vshrl.u32 %v3204_v12, 16 }
 0x563   : > { %v3082_v10 = vrot.slane %v3080_v57, 4  ;;  %v3085_v31 = vrot.slane %v3083_v16, 5 }
 0x564   : > { %v9909_v32 = vld [vmem:[#allocation2 + $0x58] sm:$0xff]   ;;  %v3708_v8 = vadd.f32 %v3707_v6, %v3706_v7  ;;  %v3208_v35 = vrot.slane %v3206_v45, 4  ;;  %v3144_v7 = vpop.permute.xlu2 %3143 }
 0x565   : > { %v3086_v59 = vor.u32 %v3085_v31, %v3082_v10  ;;  %v9543_v2 = vunpack.c.l.b16 %v9909_v32 }
 0x566   : > { %3597 = vmatpush.bf16.msrb.mxu3 %v9277_v50  ;;  %v3709_v29 = vmul.f32 0.015625, %v3708_v8  ;;  %v12955_v50 = vrot.slane %v10918_v11, 5 }
 0x567   : > { %3155 = vrot.lane.b32.xlu2 %v3141_v3, %s12954_s0  ;;  %3107 = vrot.lane.b32.xlu0 %v3086_v59, %s12953_s29  ;;  %v3030_v0 = vpack.c.b16 %v9543_v2, %v9543_v2  ;;  %v11202_v28 = vpack.c.b16 %v9543_v2, %v9540_v21  ;;  %v3209_v21 = vshll.u32 %v3204_v12, 16  ;;  %v3142_v3 = vrot.slane %v9909_v32, 5 }
 0x568   : > { %v3728_v59 = vrot.slane %v3727_v56, 2  ;;  %v3217_v2 = vpack.c.b16 %v9491_v18, %v9548_v34  ;;  %v3096_v18 = vpop.permute.xlu0 %3095  ;;  %v9272_v34 = vld [vmem:[%s12879_s7] sm:$0xff] }
 0x569   : > { %v3088_v57 = vshrl.u32 %v3030_v0, 16  ;;  %v3091_v16 = vshll.u32 %v3030_v0, 16  ;;  %v3211_v36 = vrot.slane %v3209_v21, 5  ;;  %3501 = vmatpush.bf16.msra.mxu2 %v9272_v34 }
 0x56a   : > { %v3729_v4 = vadd.f32 %v3728_v59, %v3727_v56  ;;  %v3218_v5 = vrot.slane %v3217_v2, 5  ;;  %v9274_v56 = vld [vmem:[%s12879_s7 + $0x14] sm:$0xff]  ;;  %v12956_v59 = vunpack.c.h.b16 %v10857_v25 }
 0x56b   : > { %v3090_v30 = vrot.slane %v3088_v57, 4  ;;  %v3093_v10 = vrot.slane %v3091_v16, 5  ;;  %v3212_v14 = vor.u32 %v3211_v36, %v3208_v35  ;;  %v10063_v57 = vld [vmem:[#allocation2] sm:$0xff]   ;;  %3419 = vmatpush.bf16.msra.mxu1 %v9274_v56 }
 0x56c   : > { %v3730_v0 = vrot.slane %v3729_v4, 1  ;;  %v3161_v16 = vsel %vm1607_vm4, %v10063_v57, %v3096_v18  ;;  %v3016_v8 = vpack.c.b16 %v11111_v39, %v12956_v59 }
 0x56d   : > { %v3094_v31 = vor.u32 %v3093_v10, %v3090_v30  ;;  %v3184_v11 = vsel %vm1632_vm7, %v3161_v16, %v3144_v7  ;;  %v9276_v30 = vld [vmem:[%s12879_s7 + $0x28] sm:$0xff] }
 0x56e   : > { %v3443_v12 = vunpack.c.h.b16 %v3184_v11  ;;  %3598 = vmatpush.bf16.msrb.mxu3 %v9276_v30 }
 0x56f   : > { %3109 = vrot.lane.b32.xlu1 %v3094_v31, %s12953_s29  ;;  %3537 = vrot.lane.b32.xlu2 %v10943_v44, %s12953_s29  ;;  %v3731_v44 = vadd.f32 %v3730_v0, %v3729_v4  ;;  %v3442_v31 = vunpack.c.l.b16 %v3184_v11 }
 0x570   : > { %3157 = vrot.lane.b32.xlu0 %v3142_v3, %s12954_s0  ;;  %v3445_v6 = vpack.c.b16 %v3443_v12, %v3443_v12 }
 0x571   : > { %v3732_v32 = vmul.f32 0.015625, %v3731_v44  ;;  %v3444_v21 = vpack.c.b16 %v3442_v31, %v3442_v31 }
 0x572   : > { %v3452_v3 = vshrl.u32 %v3445_v6, 16  ;;  %v3455_v4 = vshll.u32 %v3445_v6, 16 }
 0x573   : > { %v3447_v36 = vshrl.u32 %v3444_v21, 16 }
 0x574   : > { %v3454_v2 = vrot.slane %v3452_v3, 7 }
 0x577   : > { %3757 = vrot.lane.b32.xlu2 %v3709_v29, %s12908_s20  ;;  %3213 = vrot.lane.b32.xlu1 %v3212_v14, %s12953_s29  ;;  %s12914_s20 = smov 116  }
 0x578   : > { %3219 = vrot.lane.b32.xlu0 %v3218_v5, %s12954_s0 }
 0x57f   : > { %3543 = vrot.lane.b32.xlu1 %v12955_v50, %s12954_s0  ;;  %v3457_v50 = vor.u32 %v3455_v4, %v3454_v2 }
 0x580   : > { %3761 = vrot.lane.b32.xlu0 %v3732_v32, %s12909_s19  ;;  %v8844_v32 = vrot.slane %v3447_v36, 11  ;;  %s12913_s19 = smov 120  }
 0x582   : > { %v3458_v39 = vsel %vm10489_vm5, %v8844_v32, %v3457_v50 }
 0x583   : > { %v3459_v21 = vunpack.c.l.b16 %v3458_v39 }
 0x5a9   : > { %v3146_v10 = vpop.permute.xlu0 %3145  ;;  %v3102_v45 = vpop.permute.xlu2 %3101 }
 0x5b1   : > { %v3098_v35 = vpop.permute.xlu1 %3097  ;;  %v3148_v5 = vpop.permute.xlu0 %3147 }
 0x5b2   : > { %v3164_v29 = vsel %vm1607_vm4, %v3016_v8, %v3098_v35  ;;  %v3104_v34 = vpop.permute.xlu2 %3103 }
 0x5b3   : > { %v3186_v14 = vsel %vm1632_vm7, %v3164_v29, %v3146_v10 }
 0x5b4   : > { %v3234_v0 = vunpack.c.l.b16 %v3186_v14  ;;  %v3235_v44 = vunpack.c.h.b16 %v3186_v14  ;;  %v3170_v14 = vsel %vm1607_vm4, %v11136_v41, %v3102_v45 }
 0x5b6   : > { %v3250_v49 = vpack.c.b16 %v3234_v0, %v3234_v0  ;;  %v3251_v18 = vpack.c.b16 %v3235_v44, %v3235_v44 }
 0x5b8   : > { %v3267_v57 = vshrl.u32 %v3250_v49, 16  ;;  %v3272_v25 = vshrl.u32 %v3251_v18, 16  ;;  %v3275_v11 = vshll.u32 %v3251_v18, 16 }
 0x5b9   : > { %v3100_v16 = vpop.permute.xlu1 %3099  ;;  %v3106_v3 = vpop.permute.xlu0 %3105 }
 0x5ba   : > { %v3274_v7 = vrot.slane %v3272_v25, 7  ;;  %v3167_v12 = vsel %vm1607_vm4, %v11107_v23, %v3100_v16  ;;  %v8824_v30 = vrot.slane %v3267_v57, 11  ;;  %v3176_v29 = vsel %vm1607_vm4, %v11125_v52, %v3106_v3  ;;  %v3154_v23 = vpop.permute.xlu2 %3153 }
 0x5bb   : > { %v3188_v56 = vsel %vm1632_vm7, %v3167_v12, %v3148_v5  ;;  %v3194_v49 = vsel %vm1632_vm7, %v3176_v29, %v3154_v23 }
 0x5bc   : > { %v3277_v10 = vor.u32 %v3275_v11, %v3274_v7  ;;  %v3236_v31 = vunpack.c.l.b16 %v3188_v56  ;;  %v3237_v6 = vunpack.c.h.b16 %v3188_v56  ;;  %v3243_v41 = vunpack.c.h.b16 %v3194_v49 }
 0x5bd   : > { %v3173_v56 = vsel %vm1607_vm4, %v11144_v13, %v3104_v34 }
 0x5be   : > { %v3278_v59 = vsel %vm10489_vm5, %v8824_v30, %v3277_v10  ;;  %v3252_v8 = vpack.c.b16 %v3236_v31, %v3236_v31  ;;  %v3253_v35 = vpack.c.b16 %v3237_v6, %v3237_v6 }
 0x5bf   : > { %v3370_v36 = vunpack.c.l.b16 %v3278_v59 }
 0x5c0   : > { %v3280_v2 = vshrl.u32 %v3252_v8, 16  ;;  %v3285_v4 = vshrl.u32 %v3253_v35, 16  ;;  %v3288_v32 = vshll.u32 %v3253_v35, 16 }
 0x5c1   : > { %v3150_v5 = vpop.permute.xlu1 %3149  ;;  %v3460_v0 = vpack.c.b16 %v3370_v36, %v3459_v21  ;;  %v3259_v21 = vpack.c.b16 %v3243_v41, %v3243_v41 }
 0x5c2   : > { %v3287_v44 = vrot.slane %v3285_v4, 7  ;;  %v3190_v50 = vsel %vm1632_vm7, %v3170_v14, %v3150_v5  ;;  %v8825_v25 = vrot.slane %v3280_v2, 11  ;;  %v3242_v4 = vunpack.c.l.b16 %v3194_v49 }
 0x5c3   : > { %v3238_v18 = vunpack.c.l.b16 %v3190_v50  ;;  %v3239_v57 = vunpack.c.h.b16 %v3190_v50  ;;  %8853 = vmatmul.msk.bf16.vlgmr.msra.gmra.mxu2 %vm1847_vm8, %v3460_v0  ;;  %v3324_v34 = vshrl.u32 %v3259_v21, 16 }
 0x5c4   : > { %v3290_v16 = vor.u32 %v3288_v32, %v3287_v44  ;;  %v3258_v44 = vpack.c.b16 %v3242_v4, %v3242_v4 }
 0x5c5   : > { %v3254_v39 = vpack.c.b16 %v3238_v18, %v3238_v18  ;;  %v3255_v52 = vpack.c.b16 %v3239_v57, %v3239_v57  ;;  %v3326_v18 = vrot.slane %v3324_v34, 7 }
 0x5c6   : > { %v3291_v7 = vsel %vm10489_vm5, %v8825_v25, %v3290_v16  ;;  %v3319_v49 = vshrl.u32 %v3258_v44, 16  ;;  %v3327_v16 = vshll.u32 %v3259_v21, 16 }
 0x5c7   : > { %v3371_v45 = vunpack.c.l.b16 %v3291_v7  ;;  %v3293_v11 = vshrl.u32 %v3254_v39, 16  ;;  %v3298_v12 = vshrl.u32 %v3255_v52, 16  ;;  %v3301_v10 = vshll.u32 %v3255_v52, 16 }
 0x5c8   : > { %v3329_v7 = vor.u32 %v3327_v16, %v3326_v18 }
 0x5c9   : > { %v3300_v30 = vrot.slane %v3298_v12, 7  ;;  %v3152_v31 = vpop.permute.xlu1 %3151  ;;  %v3378_v6 = vpack.c.b16 %v3371_v45, %v3370_v36  ;;  %v8826_v59 = vrot.slane %v3293_v11, 11  ;;  %v8828_v11 = vrot.slane %v3319_v49, 11  ;;  %v3156_v12 = vpop.permute.xlu2 %3155 }
 0x5ca   : > { %v3192_v3 = vsel %vm1632_vm7, %v3173_v56, %v3152_v31 }
 0x5cb   : > { %v3303_v8 = vor.u32 %v3301_v10, %v3300_v30  ;;  %v3240_v35 = vunpack.c.l.b16 %v3192_v3  ;;  %v3241_v2 = vunpack.c.h.b16 %v3192_v3  ;;  %8840 = vmatmul.msk.bf16.vlgmr.msra.gmra.mxu1 %vm1847_vm8, %v3378_v6  ;;  %v3330_v30 = vsel %vm10489_vm5, %v8828_v11, %v3329_v7 }
 0x5cc   : > { %v3374_v21 = vunpack.c.l.b16 %v3330_v30 }
 0x5cd   : > { %v3304_v29 = vsel %vm10489_vm5, %v8826_v59, %v3303_v8  ;;  %v3256_v23 = vpack.c.b16 %v3240_v35, %v3240_v35  ;;  %v3257_v14 = vpack.c.b16 %v3241_v2, %v3241_v2 }
 0x5ce   : > { %v3372_v13 = vunpack.c.l.b16 %v3304_v29 }
 0x5cf   : > { %v3306_v5 = vshrl.u32 %v3256_v23, 16  ;;  %v3311_v0 = vshrl.u32 %v3257_v14, 16  ;;  %v3314_v50 = vshll.u32 %v3257_v14, 16 }
 0x5d0   : > { %v3461_v36 = vpack.c.b16 %v3372_v13, %v3371_v45 }
 0x5d1   : > { %v3313_v32 = vrot.slane %v3311_v0, 7  ;;  %v8827_v57 = vrot.slane %v3306_v5, 11  ;;  %v3538_v30 = vpop.permute.xlu2 %3537 }
 0x5d2   : > { %8866 = vmatmul.msk.bf16.vlgmr.msrb.gmra.mxu3 %vm1847_vm8, %v3461_v36 }
 0x5d3   : > { %v3316_v25 = vor.u32 %v3314_v50, %v3313_v32  ;;  %8854 = vmatmul.msk.bf16.gmra.mxu2 %vm1847_vm8, %v3461_v36 }
 0x5d5   : > { %v3317_v39 = vsel %vm10489_vm5, %v8827_v57, %v3316_v25 }
 0x5d6   : > { %v3373_v52 = vunpack.c.l.b16 %v3317_v39 }
 0x5d8   : > { %v3379_v41 = vpack.c.b16 %v3373_v52, %v3372_v13  ;;  %v3462_v2 = vpack.c.b16 %v3374_v21, %v3373_v52 }
 0x5d9   : > { %v3108_v45 = vpop.permute.xlu0 %3107 }
 0x5da   : > { %v3179_v56 = vsel %vm1607_vm4, %v11175_v61, %v3108_v45 }
 0x5db   : > { %v3196_v10 = vsel %vm1632_vm7, %v3179_v56, %v3156_v12  ;;  %8841 = vmatmul.msk.bf16.gmra.mxu1 %vm1847_vm8, %v3379_v41 }
 0x5dc   : > { %v3244_v31 = vunpack.c.l.b16 %v3196_v10  ;;  %v3245_v6 = vunpack.c.h.b16 %v3196_v10 }
 0x5de   : > { %v3260_v3 = vpack.c.b16 %v3244_v31, %v3244_v31  ;;  %v3261_v59 = vpack.c.b16 %v3245_v6, %v3245_v6 }
 0x5e0   : > { %v3332_v8 = vshrl.u32 %v3260_v3, 16  ;;  %v3337_v35 = vshrl.u32 %v3261_v59, 16  ;;  %v3340_v23 = vshll.u32 %v3261_v59, 16 }
 0x5e1   : > { %v3110_v4 = vpop.permute.xlu1 %3109 }
 0x5e2   : > { %v3339_v29 = vrot.slane %v3337_v35, 7  ;;  %v3182_v61 = vsel %vm1607_vm4, %v11202_v28, %v3110_v4  ;;  %v3158_v14 = vpop.permute.xlu0 %3157  ;;  %8867 = vmatmul.msk.bf16.gmra.mxu3 %vm1847_vm8, %v3462_v2  ;;  %v8829_v34 = vrot.slane %v3332_v8, 11 }
 0x5e3   : > { %v3198_v13 = vsel %vm1632_vm7, %v3182_v61, %v3158_v14  ;;  %8855 = vmatmul.msk.bf16.gmra.mxu2 %vm1847_vm8, %v3462_v2 }
 0x5e4   : > { %v3342_v5 = vor.u32 %v3340_v23, %v3339_v29  ;;  %v3246_v0 = vunpack.c.l.b16 %v3198_v13  ;;  %v3247_v36 = vunpack.c.h.b16 %v3198_v13 }
 0x5e6   : > { %v3262_v44 = vpack.c.b16 %v3246_v0, %v3246_v0  ;;  %v3263_v32 = vpack.c.b16 %v3247_v36, %v3247_v36  ;;  %v3343_v50 = vsel %vm10489_vm5, %v8829_v34, %v3342_v5 }
 0x5e7   : > { %v3375_v18 = vunpack.c.l.b16 %v3343_v50 }
 0x5e8   : > { %v3345_v57 = vshrl.u32 %v3262_v44, 16  ;;  %v3350_v25 = vshrl.u32 %v3263_v32, 16  ;;  %v3353_v39 = vshll.u32 %v3263_v32, 16 }
 0x5e9   : > { %v3214_v28 = vpop.permute.xlu1 %3213  ;;  %v3380_v49 = vpack.c.b16 %v3375_v18, %v3374_v21  ;;  %v3547_v21 = vsel %vm1607_vm4, %v11031_v9, %v3538_v30 }
 0x5ea   : > { %v3352_v16 = vrot.slane %v3350_v25, 7  ;;  %v3220_v52 = vpop.permute.xlu0 %3219  ;;  %v3223_v7 = vsel %vm1607_vm4, %v11190_v53, %v3214_v28  ;;  %v8830_v11 = vrot.slane %v3345_v57, 11 }
 0x5eb   : > { %v3225_v41 = vsel %vm1632_vm7, %v3223_v7, %v3220_v52  ;;  %8842 = vmatmul.msk.bf16.gmra.mxu1 %vm1847_vm8, %v3380_v49 }
 0x5ec   : > { %v3355_v45 = vor.u32 %v3353_v39, %v3352_v16  ;;  %v3248_v12 = vunpack.c.l.b16 %v3225_v41  ;;  %v3249_v56 = vunpack.c.h.b16 %v3225_v41 }
 0x5ee   : > { %v3264_v10 = vpack.c.b16 %v3248_v12, %v3248_v12  ;;  %v3265_v31 = vpack.c.b16 %v3249_v56, %v3249_v56  ;;  %v3356_v6 = vsel %vm10489_vm5, %v8830_v11, %v3355_v45 }
 0x5ef   : > { %v3376_v3 = vunpack.c.l.b16 %v3356_v6 }
 0x5f0   : > { %v3358_v59 = vshrl.u32 %v3264_v10, 16  ;;  %v3363_v53 = vshrl.u32 %v3265_v31, 16  ;;  %v3366_v4 = vshll.u32 %v3265_v31, 16 }
 0x5f1   : > { %v3544_v8 = vpop.permute.xlu1 %3543  ;;  %v3463_v35 = vpack.c.b16 %v3376_v3, %v3375_v18 }
 0x5f2   : > { %v3365_v2 = vrot.slane %v3363_v53, 7  ;;  %v3549_v29 = vsel %vm1632_vm7, %v3547_v21, %v3544_v8  ;;  %v8831_v14 = vrot.slane %v3358_v59, 11 }
 0x5f3   : > { %v3551_v23 = vunpack.c.l.b16 %v3549_v29  ;;  %v3552_v61 = vunpack.c.h.b16 %v3549_v29  ;;  %8856 = vmatmul.msk.bf16.gmra.mxu2 %vm1847_vm8, %v3463_v35  ;;  %8868 = vmatmul.msk.bf16.gmra.mxu3 %vm1847_vm8, %v3463_v35 }
 0x5f4   : > { %v3368_v13 = vor.u32 %v3366_v4, %v3365_v2 }
 0x5f5   : > { %v3553_v34 = vpack.c.b16 %v3551_v23, %v3551_v23  ;;  %v3554_v5 = vpack.c.b16 %v3552_v61, %v3552_v61  ;;  %v10045_v61 = vld [vmem:[%s12880_s8] ss:$0 sm:$0xff] }
 0x5f6   : > { %v3369_v9 = vsel %vm10489_vm5, %v8831_v14, %v3368_v13 }
 0x5f7   : > { %v3556_v0 = vshrl.u32 %v3553_v34, 16  ;;  %v3561_v36 = vshrl.u32 %v3554_v5, 16  ;;  %v3564_v44 = vshll.u32 %v3554_v5, 16  ;;  %v3377_v32 = vunpack.c.l.b16 %v3369_v9 }
 0x5f9   : > { %v8857_v50 = vrot.slane %v3556_v0, 11  ;;  %v3563_v18 = vrot.slane %v3561_v36, 7  ;;  %v3381_v57 = vpack.c.b16 %v3377_v32, %v3376_v3 }
 0x5fb   : > { %v3566_v25 = vor.u32 %v3564_v44, %v3563_v18  ;;  %8843 = vmatmul.msk.bf16.gmra.mxu1 %vm1847_vm8, %v3381_v57 }
 0x5fd   : > { %v3567_v28 = vsel %vm10489_vm5, %v8857_v50, %v3566_v25 }
 0x5fe   : > { %v3568_v49 = vunpack.c.l.b16 %v3567_v28 }
 0x600   : > { %v3569_v16 = vpack.c.b16 %v3568_v49, %v3377_v32 }
 0x603   : > { %8869 = vmatmul.msk.bf16.gmra.mxu3 %vm1847_vm8, %v3569_v16 }
 0x646   : > { %v3503_v39 = vpop.f32.mrf.mxu2 }
 0x648   : > { %v3421_v52 = vpop.f32.mrf.mxu1 }
 0x649   : > { %v3504_v2 = vadd.f32 %v3503_v39, %v3421_v52 }
 0x64e   : > { %v3505_v7 = vpop.f32.mrf.mxu2 }
 0x650   : > { %v3423_v41 = vpop.f32.mrf.mxu1 }
 0x651   : > { %v3506_v8 = vadd.f32 %v3505_v7, %v3423_v41 }
 0x655   : > { %v3600_v11 = vpop.f32.mrf.mxu3 }
 0x656   : > { %v3508_v12 = vpop.f32.mrf.mxu2  ;;  %v3620_v23 = vadd.f32 %v3600_v11, %v3504_v2 }
 0x658   : > { %v3426_v45 = vpop.f32.mrf.mxu1  ;;  %v3631_v36 = vadd.f32 %v10045_v61, %v3620_v23 }
 0x659   : > { %v3509_v4 = vadd.f32 %v3508_v12, %v3426_v45 }
 0x65a   : > { %v3647_v16 = vmul.f32 0.05, %v3631_v36  ;;  %vm3639_vm9 = vcmp.ge.f32.partialorder %v3631_v36, 0.0 }
 0x65d   : > { %v3602_v56 = vpop.f32.mrf.mxu3 }
 0x65e   : > { %v3510_v10 = vpop.f32.mrf.mxu2  ;;  %v3621_v29 = vadd.f32 %v3602_v56, %v3506_v8  ;;  %v11300_v56 = vsel %vm3639_vm9, %v3631_v36, %v3647_v16 }
 0x65f   : > { %v3733_v8 = vsel %vm3663_vm13, %v11300_v56, 0.0 }
 0x660   : > { %v3428_v30 = vpop.f32.mrf.mxu1  ;;  %v3632_v34 = vadd.f32 %v10045_v61, %v3621_v29 }
 0x661   : > { %v3511_v14 = vadd.f32 %v3510_v10, %v3428_v30 }
 0x662   : > { %v3648_v57 = vmul.f32 0.05, %v3632_v34  ;;  %vm3640_vm14 = vcmp.ge.f32.partialorder %v3632_v34, 0.0 }
 0x664   : > { %v11298_v7 = vsel %vm3640_vm14, %v3632_v34, %v3648_v57 }
 0x665   : > { %v3605_v31 = vpop.f32.mrf.mxu3 }
 0x666   : > { %v3513_v3 = vpop.f32.mrf.mxu2  ;;  %v3622_v13 = vadd.f32 %v3605_v31, %v3509_v4 }
 0x668   : > { %v3431_v6 = vpop.f32.mrf.mxu1  ;;  %v3633_v44 = vadd.f32 %v10045_v61, %v3622_v13 }
 0x669   : > { %v3514_v5 = vadd.f32 %v3513_v3, %v3431_v6  ;;  %v3734_v6 = vsel %vm3663_vm13, %v11298_v7, 0.0 }
 0x66a   : > { %v3649_v39 = vmul.f32 0.05, %v3633_v44  ;;  %vm3641_vm10 = vcmp.ge.f32.partialorder %v3633_v44, 0.0  ;;  %v3735_v4 = vadd.f32 %v3734_v6, %v3733_v8  ;;  %v3664_v8 = vsel %vm3663_vm13, %v10574_v38, 0.0 }
 0x66c   : > { %v11302_v30 = vsel %vm3641_vm10, %v3633_v44, %v3649_v39 }
 0x66d   : > { %v3607_v21 = vpop.f32.mrf.mxu3 }
 0x66e   : > { %v3515_v35 = vpop.f32.mrf.mxu2  ;;  %v3623_v9 = vadd.f32 %v3607_v21, %v3511_v14  ;;  %v9278_v21 = vld [vmem:[%s12881_s9] sm:$0xff] }
 0x66f   : > { %3792 = vmatpush.bf16.msrb.mxu0 %v9278_v21 }
 0x670   : > { %v3433_v59 = vpop.f32.mrf.mxu1  ;;  %v3634_v25 = vadd.f32 %v10045_v61, %v3623_v9 }
 0x671   : > { %v3516_v32 = vadd.f32 %v3515_v35, %v3433_v59  ;;  %v3736_v35 = vsel %vm3663_vm13, %v11302_v30, 0.0 }
 0x672   : > { %v3650_v41 = vmul.f32 0.05, %v3634_v25  ;;  %vm3642_vm11 = vcmp.ge.f32.partialorder %v3634_v25, 0.0  ;;  %v3737_v34 = vadd.f32 %v3736_v35, %v3735_v4 }
 0x674   : > { %v11309_v3 = vsel %vm3642_vm11, %v3634_v25, %v3650_v41  ;;  %vm3806_vm11 = vcmask 1040384  }
 0x675   : > { %v3738_v14 = vsel %vm3663_vm13, %v11309_v3, 0.0 }
 0x676   : > { %v3610_v53 = vpop.f32.mrf.mxu3  ;;  %v3518_v49 = vpop.f32.mrf.mxu2  ;;  %v3739_v44 = vadd.f32 %v3738_v14, %v3737_v34 }
 0x677   : > { %v3624_v50 = vadd.f32 %v3610_v53, %v3514_v5 }
 0x678   : > { %v3436_v18 = vpop.f32.mrf.mxu1 }
 0x679   : > { %v3635_v52 = vadd.f32 %v10045_v61, %v3624_v50  ;;  %v3519_v11 = vadd.f32 %v3518_v49, %v3436_v18 }
 0x67b   : > { %v3651_v10 = vmul.f32 0.05, %v3635_v52  ;;  %vm3643_vm12 = vcmp.ge.f32.partialorder %v3635_v52, 0.0 }
 0x67d   : > { %v11315_v29 = vsel %vm3643_vm12, %v3635_v52, %v3651_v10  ;;  %vm12912_vm12 = vcmask 64512  }
 0x67e   : > { %v3612_v0 = vpop.f32.mrf.mxu3  ;;  %v3520_v13 = vpop.f32.mrf.mxu2 }
 0x67f   : > { %v3625_v28 = vadd.f32 %v3612_v0, %v3516_v32  ;;  %v3740_v0 = vsel %vm3663_vm13, %v11315_v29, 0.0 }
 0x680   : > { %v3438_v2 = vpop.f32.mrf.mxu1  ;;  %v3741_v57 = vadd.f32 %v3740_v0, %v3739_v44  ;;  %v3675_v0 = vsel %vm3663_vm13, %v10603_v63, 0.0  ;;  %v3677_v44 = vsel %vm3663_vm13, %v10609_v26, 0.0 }
 0x681   : > { %v3636_v45 = vadd.f32 %v10045_v61, %v3625_v28  ;;  %v3521_v9 = vadd.f32 %v3520_v13, %v3438_v2  ;;  %v3667_v2 = vsel %vm3663_vm13, %v10567_v19, 0.0  ;;  %v3671_v13 = vsel %vm3663_vm13, %v10592_v22, 0.0 }
 0x683   : > { %v3652_v59 = vmul.f32 0.05, %v3636_v45  ;;  %vm3644_vm14 = vcmp.ge.f32.partialorder %v3636_v45, 0.0 }
 0x685   : > { %v11319_v5 = vsel %vm3644_vm14, %v3636_v45, %v3652_v59  ;;  %vm12911_vm14 = vcmask 15360  }
 0x686   : > { %v3615_v12 = vpop.f32.mrf.mxu3  ;;  %v3742_v18 = vsel %vm3663_vm13, %v11319_v5, 0.0 }
 0x687   : > { %v3626_v31 = vadd.f32 %v3615_v12, %v3519_v11  ;;  %v3743_v49 = vadd.f32 %v3742_v18, %v3741_v57 }
 0x689   : > { %v3637_v53 = vadd.f32 %v10045_v61, %v3626_v31 }
 0x68b   : > { %v3653_v23 = vmul.f32 0.05, %v3637_v53  ;;  %vm3645_vm9 = vcmp.ge.f32.partialorder %v3637_v53, 0.0 }
 0x68d   : > { %v11323_v32 = vsel %vm3645_vm9, %v3637_v53, %v3653_v23  ;;  %v3665_v53 = vsel %vm3663_vm13, %v10583_v51, 0.0  ;;  %v3669_v23 = vsel %vm3663_vm13, %v10581_v54, 0.0 }
 0x68e   : > { %v3617_v36 = vpop.f32.mrf.mxu3  ;;  %v3744_v28 = vsel %vm3663_vm13, %v11323_v32, 0.0  ;;  %v3666_v35 = vadd.f32 %v3665_v53, %v3664_v8  ;;  %v3775_v8 = vld [vmem:[%s12882_s10] sm:$0x1] }
 0x68f   : > { %v3627_v50 = vadd.f32 %v3617_v36, %v3521_v9  ;;  %v3745_v39 = vadd.f32 %v3744_v28, %v3743_v49  ;;  %v3673_v9 = vsel %vm3663_vm13, %v10594_v15, 0.0 }
 0x690   : > { %v3668_v4 = vadd.f32 %v3667_v2, %v3666_v35 }
 0x691   : > { %v3638_v25 = vadd.f32 %v10045_v61, %v3627_v50 }
 0x692   : > { %v3670_v14 = vadd.f32 %v3669_v23, %v3668_v4 }
 0x693   : > { %vm3646_vm10 = vcmp.ge.f32.partialorder %v3638_v25, 0.0  ;;  %v3654_v16 = vmul.f32 0.05, %v3638_v25 }
 0x694   : > { %v3672_v34 = vadd.f32 %v3671_v13, %v3670_v14  ;;  %v3801_v13 = vld [vmem:[%s12884_s12] sm:$0x1] }
 0x695   : > { %v11329_v52 = vsel %vm3646_vm10, %v3638_v25, %v3654_v16  ;;  %v3800_v25 = vld [vmem:[%s12883_s11] sm:$0x1] }
 0x696   : > { %v3746_v41 = vsel %vm3663_vm13, %v11329_v52, 0.0  ;;  %v3674_v36 = vadd.f32 %v3673_v9, %v3672_v34  ;;  %v3808_v49 = vsel %vm3806_vm11, %v3800_v25, 0 }
 0x697   : > { %v3747_v11 = vadd.f32 %v3746_v41, %v3745_v39  ;;  %3817 = vmatpush.bf16.msrb.mxu1 %v3808_v49 }
 0x698   : > { %v3676_v50 = vadd.f32 %v3675_v0, %v3674_v36  ;;  %v3842_v0 = vld [vmem:[%s12885_s13] sm:$0xf] }
 0x699   : > { %v3748_v45 = vsel %vm3663_vm13, %v3747_v11, 0.0 }
 0x69a   : > { %v3749_v12 = vrot.slane %v3748_v45, 4  ;;  %v3678_v18 = vadd.f32 %v3677_v44, %v3676_v50  ;;  %v3982_v44 = vsel %vm1860_vm3, %v3842_v0, 0 }
 0x69b   : > { %3991 = vmatpush.bf16.msra.mxu3 %v3982_v44 }
 0x69c   : > { %v3750_v10 = vadd.f32 %v3749_v12, %v3748_v45  ;;  %v3679_v57 = vsel %vm3663_vm13, %v3678_v18, 0.0  ;;  %v3758_v12 = vpop.permute.xlu2 %3757 }
 0x69d   : > { %v3680_v28 = vrot.slane %v3679_v57, 4 }
 0x69e   : > { %v3751_v31 = vrot.slane %v3750_v10, 2 }
 0x69f   : > { %v3681_v16 = vadd.f32 %v3680_v28, %v3679_v57 }
 0x6a0   : > { %v3752_v6 = vadd.f32 %v3751_v31, %v3750_v10  ;;  %v3762_v31 = vpop.permute.xlu0 %3761 }
 0x6a1   : > { %v3682_v39 = vrot.slane %v3681_v16, 2 }
 0x6a2   : > { %v3753_v61 = vrot.slane %v3752_v6, 1 }
 0x6a3   : > { %v3683_v41 = vadd.f32 %v3682_v39, %v3681_v16 }
 0x6a4   : > { %v3754_v21 = vadd.f32 %v3753_v61, %v3752_v6 }
 0x6a5   : > { %v3684_v11 = vrot.slane %v3683_v41, 1 }
 0x6a6   : > { %v3755_v59 = vmul.f32 0.015625, %v3754_v21 }
 0x6a7   : > { %v3685_v45 = vadd.f32 %v3684_v11, %v3683_v41 }
 0x6a8   : > { %3765 = vrot.lane.b32.xlu1 %v3755_v59, %s12953_s29 }
 0x6a9   : > { %v3686_v10 = vmul.f32 0.015625, %v3685_v45 }
 0x6ab   : > { %v3768_v6 = vsel %vm3663_vm13, %v3686_v10, %v3758_v12 }
 0x6ac   : > { %v3770_v61 = vsel %vm12912_vm12, %v3768_v6, %v3762_v31 }
 0x71a   : > { %v3766_v21 = vpop.permute.xlu1 %3765 }
 0x71b   : > { %v3771_v59 = vsel %vm1607_vm4, %v3770_v61, %v3766_v21 }
 0x71c   : > { %v3772_v53 = vpack.c.bf16 %v3771_v59, %v3771_v59 }
 0x71e   : > { %8874 = vmatmul.msk.bf16.vlgmr.msrb.gmra.mxu0 %vm826_vm1, %v3772_v53  ;;  %v3902_v53 = vunpack.c.l.b16 %v3842_v0 }
 0x79b   : > { %v3794_v35 = vpop.f32.mrf.mxu0 }
 0x79c   : > { %v3795_v2 = vadd.f32 %v3794_v35, %v3775_v8 }
 0x79e   : > { %v3798_v4 = vmax.f32 %v3795_v2, 0.0 }
 0x7a0   : > { %v3799_v23 = vpack.c.bf16 %v3798_v4, %v3798_v4  ;;  %v3903_v4 = vpack.c.b16 %v3902_v53, %v3902_v53 }
 0x7a2   : > { %8875 = vmatmul.msk.bf16.vlgmr.msrb.gmra.mxu1 %vm12911_vm14, %v3799_v23 }
 0x7a3   : > { %v3796_v14 = vpop.f32.mrf.mxu0 }
 0x81f   : > { %v3819_v34 = vpop.f32.mrf.mxu1 }
 0x820   : > { %v3820_v9 = vadd.f32 %v3819_v34, %v3801_v13  ;;  %v3904_v13 = vrot.slane %v3903_v4, 2 }
 0x822   : > { %v8876_v36 = vmul.f32 -1.442695, %v3820_v9 }
 0x824   : > { %10053 = vpow2.f32 %v8876_v36 }
 0x827   : > { %v3821_v50 = vpop.f32.mrf.mxu1 }
 0x82a   : > { %v10054_v18 = vpop.eup %10053 }
 0x82b   : > { %v3826_v57 = vadd.f32 1.0, %v10054_v18 }
 0x82d   : > { %10055 = vrcp.f32 %v3826_v57  ;;  %v3838_v16 = vand.u32 2147483648, %v3826_v57  ;;  %v3836_v41 = vand.u32 2147483647, %v3826_v57  ;;  %vm3832_vm10 = vweird.f32 %v3826_v57 }
 0x82f   : > { %v3839_v45 = vor.u32 1.1754944e-38, %v3838_v16  ;;  %vm3837_vm12 = vcmp.eq.f32.partialorder %v3836_v41, 8.507059e+37 }
 0x833   : > { %v10056_v25 = vpop.eup %10055 }
 0x834   : > { %v3828_v28 = vmul.f32 %v10056_v25, %v3826_v57  ;;  %vm3833_vm9 = vweird.f32 %v10056_v25 }
 0x835   : > { %vm3834_vm14 = vmor %vm3832_vm10, %vm3833_vm9 }
 0x836   : > { %v3829_v49 = vsub.f32 1.0, %v3828_v28 }
 0x838   : > { %v3830_v39 = vmul.f32 %v10056_v25, %v3829_v49 }
 0x83a   : > { %v3831_v11 = vadd.f32 %v10056_v25, %v3830_v39 }
 0x83c   : > { %v3835_v12 = vsel %vm3834_vm14, %v10056_v25, %v3831_v11 }
 0x83d   : > { %v3840_v10 = vsel %vm3837_vm12, %v3839_v45, %v3835_v12 }
 0x83e   : > { %v3844_v31 = vperm.slane %v3840_v10, 0 }
 0x840   : > { %4104 = vrot.lane.b32.xlu1 %v3844_v31, %s12914_s20  ;;  %4013 = vrot.lane.b32.xlu0 %v3844_v31, %s12913_s19  ;;  %v3845_v6 = vmul.f32 %v3844_v31, %v10574_v38  ;;  %v3846_v61 = vmul.f32 %v3844_v31, %v10583_v51  ;;  %v3847_v23 = vmul.f32 %v3844_v31, %v10567_v19  ;;  %v3918_v38 = vsel %vm1860_vm3, %v3904_v13, 0  ;;  %s12970_s19 = smov 4   ;;  %s12976_s20 = smov 116  }
 0x841   : > { %3862 = vrot.lane.b32.xlu2 %v3844_v31, %s12952_s26  ;;  %v3848_v14 = vmul.f32 %v3844_v31, %v10581_v54  ;;  %3927 = vmatpush.bf16.msrb.mxu2 %v3918_v38  ;;  %v3849_v0 = vmul.f32 %v3844_v31, %v10592_v22  ;;  %v3850_v50 = vmul.f32 %v3844_v31, %v10594_v15  ;;  %v3843_v22 = vld [vmem:[%s12885_s13 + $0x4] sm:$0xf] }
 0x842   : > { %v3853_v21 = vpack.c.bf16 %v3845_v6, %v3845_v6  ;;  %v3854_v59 = vpack.c.bf16 %v3846_v61, %v3846_v61  ;;  %v3855_v51 = vpack.c.bf16 %v3847_v23, %v3847_v23  ;;  %v3851_v28 = vmul.f32 %v3844_v31, %v10603_v63 }
 0x843   : > { %v3856_v34 = vpack.c.bf16 %v3848_v14, %v3848_v14  ;;  %v3857_v18 = vpack.c.bf16 %v3849_v0, %v3849_v0  ;;  %v3858_v57 = vpack.c.bf16 %v3850_v50, %v3850_v50  ;;  %v3852_v49 = vmul.f32 %v3844_v31, %v10609_v26 }
 0x844   : > { %v3957_v8 = vunpack.c.l.b16 %v3853_v21  ;;  %v3958_v35 = vunpack.c.l.b16 %v3854_v59  ;;  %v3959_v9 = vunpack.c.l.b16 %v3855_v51  ;;  %v3859_v16 = vpack.c.bf16 %v3851_v28, %v3851_v28 }
 0x845   : > { %v3960_v36 = vunpack.c.l.b16 %v3856_v34  ;;  %v3961_v19 = vunpack.c.l.b16 %v3857_v18  ;;  %v3962_v25 = vunpack.c.l.b16 %v3858_v57  ;;  %v3860_v39 = vpack.c.bf16 %v3852_v49, %v3852_v49 }
 0x846   : > { %v3965_v2 = vpack.c.b16 %v3958_v35, %v3957_v8  ;;  %v3963_v41 = vunpack.c.l.b16 %v3859_v16  ;;  %v4065_v15 = vsel %vm1860_vm3, %v3843_v22, 0  ;;  %v4144_v12 = vunpack.c.l.b16 %v3843_v22 }
 0x847   : > { %v3966_v44 = vpack.c.b16 %v3960_v36, %v3959_v9  ;;  %v3967_v54 = vpack.c.b16 %v3962_v25, %v3961_v19  ;;  %v3964_v11 = vunpack.c.l.b16 %v3860_v39  ;;  %4074 = vmatpush.bf16.msra.mxu0 %v4065_v15 }
 0x848   : > { %8881 = vmatmul.msk.bf16.vlgmr.msra.gmra.mxu3 %vm3663_vm13, %v3965_v2  ;;  %v4145_v10 = vpack.c.b16 %v4144_v12, %v4144_v12 }
 0x849   : > { %v3968_v45 = vpack.c.b16 %v3964_v11, %v3963_v41 }
 0x84a   : > { %v4146_v6 = vrot.slane %v4145_v10, 2 }
 0x84c   : > { %v4160_v63 = vsel %vm1860_vm3, %v4146_v6, 0 }
 0x84d   : > { %4169 = vmatpush.bf16.msra.mxu1 %v4160_v63 }
 0x858   : > { %8882 = vmatmul.msk.bf16.gmra.mxu3 %vm3663_vm13, %v3966_v44 }
 0x868   : > { %8883 = vmatmul.msk.bf16.gmra.mxu3 %vm3663_vm13, %v3967_v54 }
 0x878   : > { %8884 = vmatmul.msk.bf16.gmra.mxu3 %vm3663_vm13, %v3968_v45 }
 0x89b   : > { %v3863_v26 = vpop.permute.xlu2 %3862 }
 0x89c   : > { %v3865_v31 = vmul.f32 %v3863_v26, %v10803_v37  ;;  %v3866_v61 = vmul.f32 %v3863_v26, %v10809_v17  ;;  %v3867_v2 = vmul.f32 %v3863_v26, %v10815_v47  ;;  %v3868_v4 = vmul.f32 %v3863_v26, %v10821_v43 }
 0x89d   : > { %v3869_v18 = vmul.f32 %v3863_v26, %v10827_v60  ;;  %v3870_v57 = vmul.f32 %v3863_v26, %v10833_v27 }
 0x89e   : > { %v3873_v21 = vpack.c.bf16 %v3865_v31, %v3865_v31  ;;  %v3874_v59 = vpack.c.bf16 %v3866_v61, %v3866_v61  ;;  %v3875_v23 = vpack.c.bf16 %v3867_v2, %v3867_v2  ;;  %v3876_v14 = vpack.c.bf16 %v3868_v4, %v3868_v4 }
 0x89f   : > { %v3878_v49 = vpack.c.bf16 %v3870_v57, %v3870_v57 }
 0x8a0   : > { %v3889_v53 = vunpack.c.l.b16 %v3873_v21  ;;  %v3890_v8 = vunpack.c.l.b16 %v3874_v59  ;;  %v3891_v13 = vunpack.c.l.b16 %v3875_v23  ;;  %v3892_v38 = vunpack.c.l.b16 %v3876_v14 }
 0x8a1   : > { %v3894_v41 = vunpack.c.l.b16 %v3878_v49 }
 0x8a2   : > { %v3897_v35 = vpack.c.b16 %v3890_v8, %v3889_v53  ;;  %v3898_v17 = vpack.c.b16 %v3892_v38, %v3891_v13 }
 0x8a4   : > { %8877 = vmatmul.msk.bf16.vlgmr.msrb.gmra.mxu2 %vm3663_vm13, %v3897_v35 }
 0x8b2   : > { %v11397_v51 = vpop.permute.xlu1 %4104  ;;  %v11399_v37 = vpop.permute.xlu0 %4013 }
 0x8b3   : > { %v4107_v34 = vmul.f32 %v11397_v51, %v11300_v56  ;;  %v4108_v9 = vmul.f32 %v11397_v51, %v11298_v7  ;;  %v4016_v47 = vmul.f32 %v11399_v37, %v11053_v42  ;;  %v4017_v43 = vmul.f32 %v11399_v37, %v11059_v40 }
 0x8b4   : > { %8878 = vmatmul.msk.bf16.gmra.mxu2 %vm3663_vm13, %v3898_v17  ;;  %v3877_v42 = vpack.c.bf16 %v3869_v18, %v3869_v18  ;;  %v4018_v40 = vmul.f32 %v11399_v37, %v11065_v62  ;;  %v4019_v60 = vmul.f32 %v11399_v37, %v11071_v58  ;;  %v4109_v27 = vmul.f32 %v11397_v51, %v11302_v30 }
 0x8b5   : > { %v4024_v36 = vpack.c.bf16 %v4016_v47, %v4016_v47  ;;  %v4025_v44 = vpack.c.bf16 %v4017_v43, %v4017_v43  ;;  %v4115_v0 = vpack.c.bf16 %v4107_v34, %v4107_v34  ;;  %v4116_v50 = vpack.c.bf16 %v4108_v9, %v4108_v9 }
 0x8b6   : > { %v4110_v16 = vmul.f32 %v11397_v51, %v11309_v3  ;;  %v3893_v39 = vunpack.c.l.b16 %v3877_v42  ;;  %v4026_v11 = vpack.c.bf16 %v4018_v40, %v4018_v40  ;;  %v4027_v45 = vpack.c.bf16 %v4019_v60, %v4019_v60  ;;  %v11458_v60 = vld [vmem:[%s12886_s14] ss:$0 sm:$0xff] }
 0x8b7   : > { %v4040_v56 = vunpack.c.l.b16 %v4024_v36  ;;  %v4041_v19 = vunpack.c.l.b16 %v4025_v44  ;;  %v4131_v25 = vunpack.c.l.b16 %v4115_v0  ;;  %v4132_v7 = vunpack.c.l.b16 %v4116_v50 }
 0x8b8   : > { %v4117_v22 = vpack.c.bf16 %v4109_v27, %v4109_v27  ;;  %v4118_v15 = vpack.c.bf16 %v4110_v16, %v4110_v16  ;;  %v3899_v12 = vpack.c.b16 %v3894_v41, %v3893_v39  ;;  %v4042_v10 = vunpack.c.l.b16 %v4026_v11 }
 0x8b9   : > { %v4048_v54 = vpack.c.b16 %v4041_v19, %v4040_v56  ;;  %v4139_v28 = vpack.c.b16 %v4132_v7, %v4131_v25  ;;  %v4043_v62 = vunpack.c.l.b16 %v4027_v45  ;;  %v3871_v58 = vmul.f32 %v3863_v26, %v10839_v24  ;;  %v11448_v7 = vld [vmem:[#allocation2] sm:$0xff]  }
 0x8ba   : > { %v4133_v6 = vunpack.c.l.b16 %v4117_v22  ;;  %v4134_v63 = vunpack.c.l.b16 %v4118_v15  ;;  %v3872_v30 = vmul.f32 %v3863_v26, %v10845_v55  ;;  %v4020_v59 = vmul.f32 %v11399_v37, %v11077_v33 }
 0x8bb   : > { %8885 = vmatmul.msk.bf16.vlgmr.msra.gmra.mxu0 %vm3663_vm13, %v4048_v54  ;;  %8889 = vmatmul.msk.bf16.vlgmr.msra.gmra.mxu1 %vm3663_vm13, %v4139_v28  ;;  %v4049_v31 = vpack.c.b16 %v4043_v62, %v4042_v10  ;;  %v3879_v3 = vpack.c.bf16 %v3871_v58, %v3871_v58  ;;  %v4021_v53 = vmul.f32 %v11399_v37, %v11083_v20  ;;  %v10064_v10 = vld [vmem:[%s10305_s18] sm:$0xff]  ;;  %v9913_v58 = vld [vmem:[#allocation2 + $0x8] sm:$0xff]  }
 0x8bc   : > { %v4140_v61 = vpack.c.b16 %v4134_v63, %v4133_v6  ;;  %v3880_v21 = vpack.c.bf16 %v3872_v30, %v3872_v30  ;;  %v4111_v8 = vmul.f32 %v11397_v51, %v11315_v29  ;;  %v4112_v24 = vmul.f32 %v11397_v51, %v11319_v5 }
 0x8bd   : > { %v3895_v55 = vunpack.c.l.b16 %v3879_v3  ;;  %v4028_v35 = vpack.c.bf16 %v4020_v59, %v4020_v59  ;;  %v4029_v2 = vpack.c.bf16 %v4021_v53, %v4021_v53  ;;  %v4022_v29 = vmul.f32 %v11399_v37, %v11089_v46 }
 0x8be   : > { %v3896_v26 = vunpack.c.l.b16 %v3880_v21  ;;  %v4119_v4 = vpack.c.bf16 %v4111_v8, %v4111_v8  ;;  %v4120_v23 = vpack.c.bf16 %v4112_v24, %v4112_v24  ;;  %v4023_v5 = vmul.f32 %v11399_v37, %v11097_v48 }
 0x8bf   : > { %v4044_v13 = vunpack.c.l.b16 %v4028_v35  ;;  %v4045_v33 = vunpack.c.l.b16 %v4029_v2  ;;  %v4113_v9 = vmul.f32 %v11397_v51, %v11323_v32  ;;  %v4114_v47 = vmul.f32 %v11397_v51, %v11329_v52 }
 0x8c0   : > { %v3900_v14 = vpack.c.b16 %v3896_v26, %v3895_v55  ;;  %v4135_v38 = vunpack.c.l.b16 %v4119_v4  ;;  %v4136_v17 = vunpack.c.l.b16 %v4120_v23  ;;  %v4030_v43 = vpack.c.bf16 %v4022_v29, %v4022_v29  ;;  %v10065_v26 = vld [vmem:[%s10305_s18 + $0x8] sm:$0xff] }
 0x8c1   : > { %v4050_v20 = vpack.c.b16 %v4045_v33, %v4044_v13  ;;  %v4031_v36 = vpack.c.bf16 %v4023_v5, %v4023_v5  ;;  %v4121_v44 = vpack.c.bf16 %v4113_v9, %v4113_v9  ;;  %v4122_v0 = vpack.c.bf16 %v4114_v47, %v4114_v47 }
 0x8c2   : > { %v4141_v34 = vpack.c.b16 %v4136_v17, %v4135_v38  ;;  %v4046_v50 = vunpack.c.l.b16 %v4030_v43  ;;  %v11451_v52 = vunpack.c.h.b16 %v11448_v7  ;;  %v9564_v13 = vunpack.c.h.b16 %v9913_v58  ;;  %v10066_v43 = vld [vmem:[%s10305_s18 + $0x10] sm:$0xff] }
 0x8c3   : > { %v4047_v18 = vunpack.c.l.b16 %v4031_v36  ;;  %v4137_v57 = vunpack.c.l.b16 %v4121_v44  ;;  %v4138_v56 = vunpack.c.l.b16 %v4122_v0 }
 0x8c4   : > { %8879 = vmatmul.msk.bf16.gmra.mxu2 %vm3663_vm13, %v3899_v12  ;;  %v4326_v54 = vpack.c.b16 %v11451_v52, %v11451_v52 }
 0x8c5   : > { %v4051_v19 = vpack.c.b16 %v4047_v18, %v4046_v50  ;;  %v4142_v25 = vpack.c.b16 %v4138_v56, %v4137_v57 }
 0x8c6   : > { %v4335_v27 = vshrl.u32 %v4326_v54, 16  ;;  %v4338_v16 = vshll.u32 %v4326_v54, 16 }
 0x8c8   : > { %v4337_v11 = vrot.slane %v4335_v27, 4  ;;  %v4340_v45 = vrot.slane %v4338_v16, 5 }
 0x8ca   : > { %v11461_v15 = vor.u32 %v4340_v45, %v4337_v11 }
 0x8cb   : > { %8886 = vmatmul.msk.bf16.gmra.mxu0 %vm3663_vm13, %v4049_v31  ;;  %8890 = vmatmul.msk.bf16.gmra.mxu1 %vm3663_vm13, %v4140_v61  ;;  %v3993_v46 = vpop.f32.mrf.mxu3  ;;  %v9563_v61 = vunpack.c.l.b16 %v9913_v58 }
 0x8cc   : > { %4398 = vrot.lane.b32.xlu2 %v11461_v15, %s12957_s24 }
 0x8cd   : > { %v4430_v59 = vpack.c.b16 %v9563_v61, %v11451_v52 }
 0x8cf   : > { %v4438_v24 = vrot.slane %v4430_v59, 5 }
 0x8d3   : > { %v3995_v37 = vpop.f32.mrf.mxu3 }
 0x8d4   : > { %8880 = vmatmul.msk.bf16.gmra.mxu2 %vm3663_vm13, %v3900_v14  ;;  %4446 = vrot.lane.b32.xlu2 %v4438_v24, %s12958_s23 }
 0x8db   : > { %8887 = vmatmul.msk.bf16.gmra.mxu0 %vm3663_vm13, %v4050_v20  ;;  %8891 = vmatmul.msk.bf16.gmra.mxu1 %vm3663_vm13, %v4141_v34  ;;  %v3998_v39 = vpop.f32.mrf.mxu3 }
 0x8e3   : > { %v4000_v53 = vpop.f32.mrf.mxu3 }
 0x8eb   : > { %8888 = vmatmul.msk.bf16.gmra.mxu0 %vm3663_vm13, %v4051_v19  ;;  %8892 = vmatmul.msk.bf16.gmra.mxu1 %vm3663_vm13, %v4142_v25  ;;  %v4003_v9 = vpop.f32.mrf.mxu3 }
 0x927   : > { %v3929_v48 = vpop.f32.mrf.mxu2 }
 0x928   : > { %v3994_v51 = vadd.f32 %v3993_v46, %v3929_v48 }
 0x92f   : > { %v3931_v32 = vpop.f32.mrf.mxu2 }
 0x930   : > { %v3996_v12 = vadd.f32 %v3995_v37, %v3931_v32 }
 0x937   : > { %v3934_v49 = vpop.f32.mrf.mxu2 }
 0x938   : > { %v4076_v28 = vpop.f32.mrf.mxu0  ;;  %v4171_v42 = vpop.f32.mrf.mxu1  ;;  %v3999_v55 = vadd.f32 %v3998_v39, %v3934_v49  ;;  %v10067_v49 = vld [vmem:[%s10305_s18 + $0x18] sm:$0xff]  ;;  %v11497_v39 = vld [vmem:[#allocation2 + $0x20] sm:$0xff]  }
 0x939   : > { %v4096_v40 = vadd.f32 %v4076_v28, %v3994_v51  ;;  %v9575_v58 = vunpack.c.l.b16 %v11497_v39 }
 0x93b   : > { %v4191_v41 = vadd.f32 %v4171_v42, %v4096_v40 }
 0x93d   : > { %v4203_v22 = vadd.f32 %v11458_v60, %v4191_v41 }
 0x93f   : > { %v11464_v62 = vadd.f32 %v10064_v10, %v4203_v22  ;;  %v3936_v3 = vpop.f32.mrf.mxu2 }
 0x940   : > { %v4078_v6 = vpop.f32.mrf.mxu0  ;;  %v4173_v63 = vpop.f32.mrf.mxu1  ;;  %v4001_v47 = vadd.f32 %v4000_v53, %v3936_v3 }
 0x941   : > { %v4240_v30 = vpack.c.bf16 %v11464_v62, %v11464_v62  ;;  %v4097_v31 = vadd.f32 %v4078_v6, %v3996_v12  ;;  %v4005_v6 = vpop.f32.mrf.mxu3 }
 0x943   : > { %4248 = vst.msk [vmem:[#allocation2 + $0x10] sm:$0xf] %vm548_vm0, %v4240_v30  ;;  %v4192_v21 = vadd.f32 %v4173_v63, %v4097_v31 }
 0x945   : > { %v4204_v8 = vadd.f32 %v11458_v60, %v4192_v21 }
 0x947   : > { %v11474_v35 = vadd.f32 %v10065_v26, %v4204_v8  ;;  %v3939_v20 = vpop.f32.mrf.mxu2  ;;  %v10068_v8 = vld [vmem:[%s10305_s18 + $0x20] sm:$0xff] }
 0x948   : > { %v4081_v2 = vpop.f32.mrf.mxu0  ;;  %v4176_v4 = vpop.f32.mrf.mxu1  ;;  %v4004_v28 = vadd.f32 %v4003_v9, %v3939_v20 }
 0x949   : > { %v4241_v23 = vpack.c.bf16 %v11474_v35, %v11474_v35  ;;  %v4098_v14 = vadd.f32 %v4081_v2, %v3999_v55 }
 0x94a   : > { %v9914_v33 = vld [vmem:[#allocation2 + $0x10] sm:$0xff]  }
 0x94b   : > { %4249 = vst.msk [vmem:[#allocation2 + $0x1c] sm:$0xf] %vm548_vm0, %v4241_v23  ;;  %v4193_v38 = vadd.f32 %v4176_v4, %v4098_v14  ;;  %v9567_v17 = vunpack.c.l.b16 %v9914_v33  ;;  %v4439_v61 = vrot.slane %v9914_v33, 5  ;;  %v11515_v4 = vld [vmem:[#allocation2 + $0x38] sm:$0xff]  }
 0x94d   : > { %v4205_v34 = vadd.f32 %v11458_v60, %v4193_v38  ;;  %v4327_v29 = vpack.c.b16 %v9567_v17, %v9567_v17  ;;  %v11481_v5 = vpack.c.b16 %v9567_v17, %v9564_v13 }
 0x94f   : > { %v11484_v36 = vadd.f32 %v10066_v43, %v4205_v34  ;;  %v4343_v44 = vshrl.u32 %v4327_v29, 16  ;;  %v4346_v0 = vshll.u32 %v4327_v29, 16  ;;  %v3941_v42 = vpop.f32.mrf.mxu2  ;;  %v9587_v29 = vunpack.c.l.b16 %v11515_v4 }
 0x950   : > { %v4083_v50 = vpop.f32.mrf.mxu0  ;;  %v4178_v18 = vpop.f32.mrf.mxu1  ;;  %v4006_v53 = vadd.f32 %v4005_v6, %v3941_v42 }
 0x951   : > { %v4242_v57 = vpack.c.bf16 %v11484_v36, %v11484_v36  ;;  %v4099_v56 = vadd.f32 %v4083_v50, %v4001_v47  ;;  %v4345_v19 = vrot.slane %v4343_v44, 4  ;;  %v4348_v25 = vrot.slane %v4346_v0, 5  ;;  %v4008_v0 = vpop.f32.mrf.mxu3 }
 0x952   : > { %v11488_v46 = vld [vmem:[#allocation2 + $0x18] sm:$0xff]  }
 0x953   : > { %4250 = vst.msk [vmem:[#allocation2 + $0x28] sm:$0xf] %vm548_vm0, %v4242_v57  ;;  %v4194_v48 = vadd.f32 %v4178_v18, %v4099_v56  ;;  %v4349_v32 = vor.u32 %v4348_v25, %v4345_v19  ;;  %v9572_v37 = vunpack.c.h.b16 %v11488_v46  ;;  %v10069_v19 = vld [vmem:[%s10305_s18 + $0x28] sm:$0xff] }
 0x955   : > { %v4206_v51 = vadd.f32 %v11458_v60, %v4194_v48  ;;  %4400 = vrot.lane.b32.xlu0 %v4349_v32, %s12957_s24  ;;  %v4328_v54 = vpack.c.b16 %v9572_v37, %v9572_v37  ;;  %v4432_v2 = vpack.c.b16 %v9575_v58, %v9572_v37 }
 0x957   : > { %v11495_v40 = vadd.f32 %v10067_v49, %v4206_v51  ;;  %v4351_v27 = vshrl.u32 %v4328_v54, 16  ;;  %v4354_v16 = vshll.u32 %v4328_v54, 16  ;;  %v3944_v20 = vpop.f32.mrf.mxu2  ;;  %v4440_v43 = vrot.slane %v4432_v2, 5 }
 0x958   : > { %v4086_v41 = vpop.f32.mrf.mxu0  ;;  %v4181_v11 = vpop.f32.mrf.mxu1  ;;  %v4009_v56 = vadd.f32 %v4008_v0, %v3944_v20  ;;  %v9281_v0 = vld [vmem:[%s12946_s30 + $0x58] sm:$0xff] }
 0x959   : > { %12959 = vst [vmem:[#allocation13_spill] sm:$0xff] %v11495_v40  ;;  %v4243_v45 = vpack.c.bf16 %v11495_v40, %v11495_v40  ;;  %v4100_v22 = vadd.f32 %v4086_v41, %v4004_v28  ;;  %v4353_v12 = vrot.slane %v4351_v27, 4  ;;  %v4356_v10 = vrot.slane %v4354_v16, 5  ;;  %4802 = vmatpush.bf16.msrb.mxu3 %v9281_v0  ;;  %v9283_v0 = vld [vmem:[%s12946_s30 + $0x68] sm:$0xff] }
 0x95a   : > { %v9917_v63 = vld [vmem:[#allocation2 + $0x28] sm:$0xff]  }
 0x95b   : > { %4251 = vst.msk [vmem:[#allocation2 + $0x34] sm:$0xf] %vm548_vm0, %v4243_v45  ;;  %v4195_v30 = vadd.f32 %v4181_v11, %v4100_v22  ;;  %v4357_v31 = vor.u32 %v4356_v10, %v4353_v12  ;;  %v11503_v3 = vunpack.c.l.b16 %v9917_v63  ;;  %v4441_v50 = vrot.slane %v9917_v63, 5  ;;  %v4010_v63 = vpop.f32.mrf.mxu3 }
 0x95d   : > { %v4207_v21 = vadd.f32 %v11458_v60, %v4195_v30  ;;  %4402 = vrot.lane.b32.xlu1 %v4357_v31, %s12957_s24  ;;  %4448 = vrot.lane.b32.xlu0 %v4439_v61, %s12958_s23  ;;  %v4329_v59 = vpack.c.b16 %v11503_v3, %v11503_v3  ;;  %v10070_v31 = vld [vmem:[%s10305_s18 + $0x30] sm:$0xff] }
 0x95f   : > { %v11511_v24 = vadd.f32 %v10068_v8, %v4207_v21  ;;  %v4359_v55 = vshrl.u32 %v4329_v59, 16  ;;  %v4362_v26 = vshll.u32 %v4329_v59, 16  ;;  %v3946_v12 = vpop.f32.mrf.mxu2 }
 0x960   : > { %v4088_v23 = vpop.f32.mrf.mxu0  ;;  %v4183_v14 = vpop.f32.mrf.mxu1  ;;  %v4011_v30 = vadd.f32 %v4010_v63, %v3946_v12  ;;  %v11588_v12 = vld [vmem:[#allocation2 + $0x68] sm:$0xff]  }
 0x961   : > { %12960 = vst [vmem:[#allocation14_spill] sm:$0xff] %v11511_v24  ;;  %v4244_v13 = vpack.c.bf16 %v11511_v24, %v11511_v24  ;;  %v4101_v33 = vadd.f32 %v4088_v23, %v4006_v53  ;;  %v4361_v38 = vrot.slane %v4359_v55, 4  ;;  %v4364_v17 = vrot.slane %v4362_v26, 5  ;;  %v11546_v53 = vld [vmem:[#allocation2 + $0x50] sm:$0xff]  }
 0x962   : > { %v11519_v34 = vld [vmem:[#allocation2 + $0x30] sm:$0xff]  }
 0x963   : > { %4252 = vst.msk [vmem:[#allocation2 + $0x40] sm:$0xf] %vm548_vm0, %v4244_v13  ;;  %v4196_v9 = vadd.f32 %v4183_v14, %v4101_v33  ;;  %v4365_v47 = vor.u32 %v4364_v17, %v4361_v38  ;;  %v9584_v44 = vunpack.c.h.b16 %v11519_v34  ;;  %v9599_v33 = vunpack.c.l.b16 %v11546_v53 }
 0x965   : > { %v4208_v18 = vadd.f32 %v11458_v60, %v4196_v9  ;;  %4404 = vrot.lane.b32.xlu2 %v4365_v47, %s12957_s24  ;;  %4450 = vrot.lane.b32.xlu1 %v4440_v43, %s12958_s23  ;;  %v4330_v57 = vpack.c.b16 %v9584_v44, %v9584_v44  ;;  %v4434_v48 = vpack.c.b16 %v9587_v29, %v9584_v44  ;;  %v9284_v44 = vld [vmem:[%s12946_s30 + $0x70] sm:$0xff] }
 0x966   : > { %4452 = vrot.lane.b32.xlu0 %v4441_v50, %s12958_s23  ;;  %v10071_v50 = vld [vmem:[%s10305_s18 + $0x38] sm:$0xff]  ;;  %4720 = vmatpush.bf16.msra.mxu2 %v9284_v44 }
 0x967   : > { %v11529_v25 = vadd.f32 %v10069_v19, %v4208_v18  ;;  %v4367_v32 = vshrl.u32 %v4330_v57, 16  ;;  %v4370_v37 = vshll.u32 %v4330_v57, 16  ;;  %v4442_v11 = vrot.slane %v4434_v48, 5 }
 0x968   : > { %v4091_v51 = vpop.f32.mrf.mxu0  ;;  %v4186_v54 = vpop.f32.mrf.mxu1 }
 0x969   : > { %12961 = vst [vmem:[#allocation15_spill] sm:$0xff] %v11529_v25  ;;  %v4245_v28 = vpack.c.bf16 %v11529_v25, %v11529_v25  ;;  %v4102_v42 = vadd.f32 %v4091_v51, %v4009_v56  ;;  %v4369_v49 = vrot.slane %v4367_v32, 4  ;;  %v4372_v27 = vrot.slane %v4370_v37, 5  ;;  %v11571_v37 = vld [vmem:[#allocation2 + $0x70] sm:$0xff]  }
 0x96a   : > { %v9920_v16 = vld [vmem:[#allocation2 + $0x40] sm:$0xff]   ;;  %4721 = vmatpush.bf16.msra.mxu2 %v9283_v0 }
 0x96b   : > { %4253 = vst.msk [vmem:[#allocation2 + $0x4c] sm:$0xf] %vm548_vm0, %v4245_v28  ;;  %v4197_v41 = vadd.f32 %v4186_v54, %v4102_v42  ;;  %v4373_v45 = vor.u32 %v4372_v27, %v4369_v49  ;;  %v11536_v22 = vunpack.c.l.b16 %v9920_v16  ;;  %v4443_v17 = vrot.slane %v9920_v16, 5  ;;  %v9287_v28 = vld [vmem:[%s12946_s30 + $0x88] sm:$0xff] }
 0x96c   : > { %v11574_v54 = vunpack.c.l.b16 %v11571_v37  ;;  %4899 = vmatpush.bf16.msrb.mxu0 %v9287_v28 }
 0x96d   : > { %v4209_v10 = vadd.f32 %v11458_v60, %v4197_v41  ;;  %4454 = vrot.lane.b32.xlu2 %v4442_v11, %s12958_s23  ;;  %4406 = vrot.lane.b32.xlu1 %v4373_v45, %s12957_s24  ;;  %v4331_v6 = vpack.c.b16 %v11536_v22, %v11536_v22 }
 0x96e   : > { %v4831_v41 = vpack.c.b16 %v11574_v54, %v11574_v54 }
 0x96f   : > { %v11544_v61 = vadd.f32 %v10070_v31, %v4209_v10  ;;  %v4375_v21 = vshrl.u32 %v4331_v6, 16  ;;  %v4378_v59 = vshll.u32 %v4331_v6, 16 }
 0x970   : > { %v4093_v8 = vpop.f32.mrf.mxu0  ;;  %v4188_v14 = vpop.f32.mrf.mxu1  ;;  %v4836_v31 = vshll.u32 %v4831_v41, 16 }
 0x971   : > { %12962 = vst [vmem:[#allocation16_spill] sm:$0xff] %v11544_v61  ;;  %v4246_v55 = vpack.c.bf16 %v11544_v61, %v11544_v61  ;;  %v4103_v26 = vadd.f32 %v4093_v8, %v4011_v30  ;;  %v4377_v2 = vrot.slane %v4375_v21, 4  ;;  %v4380_v23 = vrot.slane %v4378_v59, 5 }
 0x972   : > { %v11550_v13 = vld [vmem:[#allocation2 + $0x48] sm:$0xff]   ;;  %v4833_v30 = vshrl.u32 %v4831_v41, 16 }
 0x973   : > { %4254 = vst.msk [vmem:[#allocation2 + $0x58] sm:$0xf] %vm548_vm0, %v4246_v55  ;;  %v4198_v38 = vadd.f32 %v4188_v14, %v4103_v26  ;;  %v4381_v20 = vor.u32 %v4380_v23, %v4377_v2  ;;  %v9596_v9 = vunpack.c.h.b16 %v11550_v13  ;;  %v9611_v55 = vunpack.c.l.b16 %v11588_v12 }
 0x974   : > { %v4835_v2 = vrot.slane %v4833_v30, 4  ;;  %v4838_v23 = vrot.slane %v4836_v31, 5 }
 0x975   : > { %v4210_v47 = vadd.f32 %v11458_v60, %v4198_v38  ;;  %4456 = vrot.lane.b32.xlu1 %v4443_v17, %s12958_s23  ;;  %4408 = vrot.lane.b32.xlu0 %v4381_v20, %s12957_s24  ;;  %v4332_v43 = vpack.c.b16 %v9596_v9, %v9596_v9  ;;  %v4436_v60 = vpack.c.b16 %v9599_v33, %v9596_v9 }
 0x977   : > { %v11565_v18 = vadd.f32 %v10071_v50, %v4210_v47  ;;  %v4383_v57 = vshrl.u32 %v4332_v43, 16  ;;  %v4386_v56 = vshll.u32 %v4332_v43, 16  ;;  %v4444_v49 = vrot.slane %v4436_v60, 5  ;;  %v9280_v50 = vld [vmem:[%s12946_s30 + $0x50] sm:$0xff]  ;;  %v4399_v60 = vpop.permute.xlu2 %4398 }
 0x978   : > { %v11598_v47 = vor.u32 %v4838_v23, %v4835_v2  ;;  %4803 = vmatpush.bf16.msrb.mxu3 %v9280_v50  ;;  %v9576_v23 = vunpack.c.h.b16 %v11497_v39 }
 0x979   : > { %12963 = vst [vmem:[#allocation17_spill] sm:$0xff] %v11565_v18  ;;  %v4247_v19 = vpack.c.bf16 %v11565_v18, %v11565_v18  ;;  %v4385_v48 = vrot.slane %v4383_v57, 4  ;;  %v4388_v32 = vrot.slane %v4386_v56, 5  ;;  %v4845_v57 = vrot.slane %v11571_v37, 5  ;;  %v9286_v56 = vld [vmem:[%s12946_s30 + $0x80] sm:$0xff] }
 0x97a   : > { %v9923_v51 = vld [vmem:[#allocation2 + $0x58] sm:$0xff]   ;;  %4900 = vmatpush.bf16.msrb.mxu0 %v9286_v56  ;;  %v9292_v37 = vld [vmem:[%s12950_s3 + $0x64] sm:$0xff] }
 0x97b   : > { %4255 = vst.msk [vmem:[#allocation2 + $0x64] sm:$0xf] %vm548_vm0, %v4247_v19  ;;  %v4389_v42 = vor.u32 %v4388_v32, %v4385_v48  ;;  %v11580_v27 = vunpack.c.l.b16 %v9923_v51  ;;  %v4445_v21 = vrot.slane %v9923_v51, 5  ;;  %v4464_v19 = vsel %vm826_vm1, %v11448_v7, %v4399_v60  ;;  %v9282_v48 = vld [vmem:[%s12946_s30 + $0x60] sm:$0xff]  ;;  %v9279_v32 = vld [vmem:[%s12946_s30 + $0x48] sm:$0xff] }
 0x97c   : > { %4722 = vmatpush.bf16.msra.mxu2 %v9282_v48  ;;  %4804 = vmatpush.bf16.msrb.mxu3 %v9279_v32 }
 0x97d   : > { %4410 = vrot.lane.b32.xlu2 %v4389_v42, %s12957_s24  ;;  %4458 = vrot.lane.b32.xlu0 %v4444_v49, %s12958_s23  ;;  %v4333_v16 = vpack.c.b16 %v11580_v27, %v11580_v27 }
 0x97f   : > { %v4391_v11 = vshrl.u32 %v4333_v16, 16  ;;  %v4394_v45 = vshll.u32 %v4333_v16, 16  ;;  %v4447_v51 = vpop.permute.xlu2 %4446  ;;  %v9285_v16 = vld [vmem:[%s12946_s30 + $0x78] sm:$0xff] }
 0x980   : > { %v4487_v28 = vsel %vm851_vm2, %v4464_v19, %v4447_v51  ;;  %4901 = vmatpush.bf16.msrb.mxu0 %v9285_v16 }
 0x981   : > { %v4393_v10 = vrot.slane %v4391_v11, 4  ;;  %v4396_v6 = vrot.slane %v4394_v45, 5  ;;  %v4746_v42 = vunpack.c.h.b16 %v4487_v28  ;;  %v4745_v7 = vunpack.c.l.b16 %v4487_v28 }
 0x982   : > { %v11590_v63 = vld [vmem:[#allocation2 + $0x60] sm:$0xff]  }
 0x983   : > { %v4397_v59 = vor.u32 %v4396_v6, %v4393_v10  ;;  %v9608_v8 = vunpack.c.h.b16 %v11590_v63  ;;  %v4748_v41 = vpack.c.b16 %v4746_v42, %v4746_v42  ;;  %v4747_v11 = vpack.c.b16 %v4745_v7, %v4745_v7 }
 0x985   : > { %4460 = vrot.lane.b32.xlu2 %v4445_v21, %s12958_s23  ;;  %4412 = vrot.lane.b32.xlu1 %v4397_v59, %s12957_s24  ;;  %v4507_v26 = vpack.c.b16 %v9608_v8, %v9608_v8  ;;  %v4520_v14 = vpack.c.b16 %v9611_v55, %v9608_v8  ;;  %v4755_v45 = vshrl.u32 %v4748_v41, 16  ;;  %v4750_v31 = vshrl.u32 %v4747_v11, 16 }
 0x986   : > { %v4758_v59 = vshll.u32 %v4748_v41, 16 }
 0x987   : > { %v4509_v38 = vshrl.u32 %v4507_v26, 16  ;;  %v4512_v17 = vshll.u32 %v4507_v26, 16  ;;  %v4521_v43 = vrot.slane %v4520_v14, 5  ;;  %v4757_v21 = vrot.slane %v4755_v45, 7 }
 0x989   : > { %v4511_v20 = vrot.slane %v4509_v38, 4  ;;  %v4514_v9 = vrot.slane %v4512_v17, 5  ;;  %v8936_v17 = vrot.slane %v4750_v31, 11 }
 0x98b   : > { %v4515_v44 = vor.u32 %v4514_v9, %v4511_v20  ;;  %v4760_v20 = vor.u32 %v4758_v59, %v4757_v21 }
 0x98d   : > { %4522 = vrot.lane.b32.xlu1 %v4521_v43, %s12958_s23  ;;  %4516 = vrot.lane.b32.xlu0 %v4515_v44, %s12957_s24  ;;  %v4761_v19 = vsel %vm10489_vm5, %v8936_v17, %v4760_v20 }
 0x98e   : > { %4840 = vrot.lane.b32.xlu2 %v11598_v47, %s12957_s24 }
 0x995   : > { %4846 = vrot.lane.b32.xlu0 %v4845_v57, %s12958_s23 }
 0x9bf   : > { %v4405_v9 = vpop.permute.xlu2 %4404 }
 0x9c7   : > { %v4401_v49 = vpop.permute.xlu0 %4400  ;;  %v4455_v20 = vpop.permute.xlu2 %4454 }
 0x9c8   : > { %v4467_v10 = vsel %vm826_vm1, %v11481_v5, %v4401_v49  ;;  %v4321_v5 = vpack.c.b16 %v11503_v3, %v9576_v23 }
 0x9ca   : > { %v4473_v48 = vsel %vm826_vm1, %v4321_v5, %v4405_v9 }
 0x9cf   : > { %v4403_v6 = vpop.permute.xlu1 %4402  ;;  %v4449_v30 = vpop.permute.xlu0 %4448 }
 0x9d0   : > { %v4489_v8 = vsel %vm851_vm2, %v4467_v10, %v4449_v30  ;;  %v4470_v0 = vsel %vm826_vm1, %v11488_v46, %v4403_v6  ;;  %v4762_v10 = vunpack.c.l.b16 %v4761_v19 }
 0x9d1   : > { %v4537_v26 = vunpack.c.l.b16 %v4489_v8  ;;  %v4538_v2 = vunpack.c.h.b16 %v4489_v8 }
 0x9d3   : > { %v4553_v14 = vpack.c.b16 %v4537_v26, %v4537_v26  ;;  %v4554_v38 = vpack.c.b16 %v4538_v2, %v4538_v2 }
 0x9d5   : > { %v4570_v43 = vshrl.u32 %v4553_v14, 16  ;;  %v4575_v44 = vshrl.u32 %v4554_v38, 16  ;;  %v4578_v56 = vshll.u32 %v4554_v38, 16 }
 0x9d7   : > { %v4577_v50 = vrot.slane %v4575_v44, 7  ;;  %v4451_v60 = vpop.permute.xlu1 %4450  ;;  %v8912_v32 = vrot.slane %v4570_v43, 11 }
 0x9d8   : > { %v4491_v51 = vsel %vm851_vm2, %v4470_v0, %v4451_v60  ;;  %v4453_v28 = vpop.permute.xlu0 %4452 }
 0x9d9   : > { %v4580_v42 = vor.u32 %v4578_v56, %v4577_v50  ;;  %v4539_v49 = vunpack.c.l.b16 %v4491_v51  ;;  %v4540_v16 = vunpack.c.h.b16 %v4491_v51  ;;  %v4493_v3 = vsel %vm851_vm2, %v4473_v48, %v4453_v28 }
 0x9da   : > { %v4541_v7 = vunpack.c.l.b16 %v4493_v3  ;;  %v4542_v41 = vunpack.c.h.b16 %v4493_v3  ;;  %v9588_v56 = vunpack.c.h.b16 %v11515_v4 }
 0x9db   : > { %v4581_v46 = vsel %vm10489_vm5, %v8912_v32, %v4580_v42  ;;  %v4555_v11 = vpack.c.b16 %v4539_v49, %v4539_v49  ;;  %v4556_v45 = vpack.c.b16 %v4540_v16, %v4540_v16 }
 0x9dc   : > { %v4673_v6 = vunpack.c.l.b16 %v4581_v46  ;;  %v4557_v30 = vpack.c.b16 %v4541_v7, %v4541_v7  ;;  %v4558_v31 = vpack.c.b16 %v4542_v41, %v4542_v41  ;;  %v4323_v41 = vpack.c.b16 %v11536_v22, %v9588_v56 }
 0x9dd   : > { %v4583_v21 = vshrl.u32 %v4555_v11, 16  ;;  %v4588_v59 = vshrl.u32 %v4556_v45, 16  ;;  %v4591_v38 = vshll.u32 %v4556_v45, 16 }
 0x9de   : > { %v4763_v8 = vpack.c.b16 %v4673_v6, %v4762_v10  ;;  %v4596_v26 = vshrl.u32 %v4557_v30, 16  ;;  %v4601_v2 = vshrl.u32 %v4558_v31, 16  ;;  %v4604_v43 = vshll.u32 %v4558_v31, 16 }
 0x9df   : > { %v4590_v14 = vrot.slane %v4588_v59, 7  ;;  %v4407_v17 = vpop.permute.xlu1 %4406  ;;  %v8913_v5 = vrot.slane %v4583_v21, 11 }
 0x9e0   : > { %v4603_v9 = vrot.slane %v4601_v2, 7  ;;  %v4476_v44 = vsel %vm826_vm1, %v11519_v34, %v4407_v17  ;;  %8949 = vmatmul.msk.bf16.vlgmr.msrb.gmra.mxu3 %vm1072_vm6, %v4763_v8  ;;  %v8914_v60 = vrot.slane %v4596_v26, 11  ;;  %v4411_v2 = vpop.permute.xlu2 %4410 }
 0x9e1   : > { %v4593_v0 = vor.u32 %v4591_v38, %v4590_v14  ;;  %v4495_v50 = vsel %vm851_vm2, %v4476_v44, %v4455_v20 }
 0x9e2   : > { %v4606_v19 = vor.u32 %v4604_v43, %v4603_v9  ;;  %v4543_v48 = vunpack.c.l.b16 %v4495_v50  ;;  %v4544_v32 = vunpack.c.h.b16 %v4495_v50  ;;  %v4482_v9 = vsel %vm826_vm1, %v11550_v13, %v4411_v2 }
 0x9e3   : > { %v4594_v51 = vsel %vm10489_vm5, %v8913_v5, %v4593_v0 }
 0x9e4   : > { %v4674_v28 = vunpack.c.l.b16 %v4594_v51  ;;  %v4607_v42 = vsel %vm10489_vm5, %v8914_v60, %v4606_v19  ;;  %v4560_v34 = vpack.c.b16 %v4544_v32, %v4544_v32  ;;  %v4559_v16 = vpack.c.b16 %v4543_v48, %v4543_v48 }
 0x9e5   : > { %v4675_v49 = vunpack.c.l.b16 %v4607_v42  ;;  %v9600_v51 = vunpack.c.h.b16 %v11546_v53 }
 0x9e6   : > { %v4681_v3 = vpack.c.b16 %v4674_v28, %v4673_v6  ;;  %v4614_v7 = vshrl.u32 %v4560_v34, 16  ;;  %v4609_v31 = vshrl.u32 %v4559_v16, 16  ;;  %v4617_v21 = vshll.u32 %v4560_v34, 16 }
 0x9e7   : > { %v4764_v46 = vpack.c.b16 %v4675_v49, %v4674_v28  ;;  %v4457_v11 = vpop.permute.xlu1 %4456  ;;  %v4409_v45 = vpop.permute.xlu0 %4408 }
 0x9e8   : > { %v4616_v10 = vrot.slane %v4614_v7, 7  ;;  %v4479_v30 = vsel %vm826_vm1, %v4323_v41, %v4409_v45  ;;  %8932 = vmatmul.msk.bf16.vlgmr.msra.gmra.mxu2 %vm1072_vm6, %v4681_v3  ;;  %v8915_v38 = vrot.slane %v4609_v31, 11  ;;  %v4325_v7 = vpack.c.b16 %v11580_v27, %v9600_v51 }
 0x9e9   : > { %v4497_v59 = vsel %vm851_vm2, %v4479_v30, %v4457_v11  ;;  %8966 = vmatmul.msk.bf16.vlgmr.msrb.gmra.mxu0 %vm1072_vm6, %v4764_v46 }
 0x9ea   : > { %v4545_v6 = vunpack.c.l.b16 %v4497_v59  ;;  %v4546_v8 = vunpack.c.h.b16 %v4497_v59  ;;  %v4619_v26 = vor.u32 %v4617_v21, %v4616_v10  ;;  %v4461_v10 = vpop.permute.xlu2 %4460 }
 0x9ec   : > { %v4561_v14 = vpack.c.b16 %v4545_v6, %v4545_v6  ;;  %v4562_v22 = vpack.c.b16 %v4546_v8, %v4546_v8  ;;  %v4620_v44 = vsel %vm10489_vm5, %v8915_v38, %v4619_v26 }
 0x9ed   : > { %v4676_v28 = vunpack.c.l.b16 %v4620_v44 }
 0x9ee   : > { %v4622_v17 = vshrl.u32 %v4561_v14, 16  ;;  %v4627_v20 = vshrl.u32 %v4562_v22, 16  ;;  %v4630_v0 = vshll.u32 %v4562_v22, 16  ;;  %v9612_v14 = vunpack.c.h.b16 %v11588_v12  ;;  %v9291_v12 = vld [vmem:[%s12950_s3 + $0x58] sm:$0xff] }
 0x9ef   : > { %v4459_v43 = vpop.permute.xlu0 %4458  ;;  %v4682_v41 = vpack.c.b16 %v4676_v28, %v4675_v49 }
 0x9f0   : > { %v4629_v5 = vrot.slane %v4627_v20, 7  ;;  %v4499_v50 = vsel %vm851_vm2, %v4482_v9, %v4459_v43  ;;  %8950 = vmatmul.msk.bf16.gmra.mxu3 %vm1072_vm6, %v4764_v46  ;;  %v8916_v48 = vrot.slane %v4622_v17, 11 }
 0x9f1   : > { %v4547_v60 = vunpack.c.l.b16 %v4499_v50  ;;  %v4548_v19 = vunpack.c.h.b16 %v4499_v50 }
 0x9f2   : > { %v4632_v32 = vor.u32 %v4630_v0, %v4629_v5 }
 0x9f3   : > { %v4564_v42 = vpack.c.b16 %v4548_v19, %v4548_v19  ;;  %v4563_v34 = vpack.c.b16 %v4547_v60, %v4547_v60  ;;  %v11685_v60 = vpack.c.b16 %v11574_v54, %v9612_v14 }
 0x9f4   : > { %v4633_v13 = vsel %vm10489_vm5, %v8916_v48, %v4632_v32 }
 0x9f5   : > { %v4640_v16 = vshrl.u32 %v4564_v42, 16  ;;  %v4677_v3 = vunpack.c.l.b16 %v4633_v13  ;;  %v4635_v30 = vshrl.u32 %v4563_v34, 16  ;;  %v4643_v31 = vshll.u32 %v4564_v42, 16  ;;  %v4841_v42 = vpop.permute.xlu2 %4840 }
 0x9f7   : > { %v4642_v46 = vrot.slane %v4640_v16, 7  ;;  %v4413_v11 = vpop.permute.xlu1 %4412  ;;  %v4765_v45 = vpack.c.b16 %v4677_v3, %v4676_v28  ;;  %v8917_v2 = vrot.slane %v4635_v30, 11 }
 0x9f8   : > { %v4485_v21 = vsel %vm826_vm1, %v4325_v7, %v4413_v11  ;;  %8933 = vmatmul.msk.bf16.gmra.mxu2 %vm1072_vm6, %v4682_v41 }
 0x9f9   : > { %v4501_v59 = vsel %vm851_vm2, %v4485_v21, %v4461_v10  ;;  %8967 = vmatmul.msk.bf16.gmra.mxu0 %vm1072_vm6, %v4765_v45  ;;  %v4645_v6 = vor.u32 %v4643_v31, %v4642_v46 }
 0x9fa   : > { %v4549_v8 = vunpack.c.l.b16 %v4501_v59  ;;  %v4550_v26 = vunpack.c.h.b16 %v4501_v59 }
 0x9fb   : > { %v4646_v22 = vsel %vm10489_vm5, %v8917_v2, %v4645_v6 }
 0x9fc   : > { %v4565_v27 = vpack.c.b16 %v4549_v8, %v4549_v8  ;;  %v4566_v49 = vpack.c.b16 %v4550_v26, %v4550_v26  ;;  %v4678_v0 = vunpack.c.l.b16 %v4646_v22 }
 0x9fe   : > { %v4648_v38 = vshrl.u32 %v4565_v27, 16  ;;  %v4653_v17 = vshrl.u32 %v4566_v49, 16  ;;  %v4656_v44 = vshll.u32 %v4566_v49, 16  ;;  %v4683_v46 = vpack.c.b16 %v4678_v0, %v4677_v3 }
 0x9ff   : > { %v4523_v20 = vpop.permute.xlu1 %4522  ;;  %v4517_v9 = vpop.permute.xlu0 %4516 }
 0xa00   : > { %v4655_v43 = vrot.slane %v4653_v17, 7  ;;  %v4526_v5 = vsel %vm826_vm1, %v11590_v63, %v4517_v9  ;;  %8951 = vmatmul.msk.bf16.gmra.mxu3 %vm1072_vm6, %v4765_v45  ;;  %v8918_v19 = vrot.slane %v4648_v38, 11  ;;  %v4850_v63 = vsel %vm826_vm1, %v11685_v60, %v4841_v42 }
 0xa01   : > { %v4528_v50 = vsel %vm851_vm2, %v4526_v5, %v4523_v20 }
 0xa02   : > { %v4658_v48 = vor.u32 %v4656_v44, %v4655_v43  ;;  %v4551_v32 = vunpack.c.l.b16 %v4528_v50  ;;  %v4552_v28 = vunpack.c.h.b16 %v4528_v50 }
 0xa04   : > { %v4568_v34 = vpack.c.b16 %v4552_v28, %v4552_v28  ;;  %v4659_v13 = vsel %vm10489_vm5, %v8918_v19, %v4658_v48  ;;  %v4567_v16 = vpack.c.b16 %v4551_v32, %v4551_v32  ;;  %v11704_v28 = vld [vmem:[%s12949_s2 + $0x1] ss:$0 sm:$0xff]  ;;  %s12969_s2 = smov 8  }
 0xa05   : > { %v4679_v7 = vunpack.c.l.b16 %v4659_v13 }
 0xa06   : > { %v4666_v41 = vshrl.u32 %v4568_v34, 16  ;;  %v4661_v30 = vshrl.u32 %v4567_v16, 16  ;;  %v4669_v31 = vshll.u32 %v4568_v34, 16 }
 0xa07   : > { %v4847_v11 = vpop.permute.xlu0 %4846  ;;  %v4766_v45 = vpack.c.b16 %v4679_v7, %v4678_v0 }
 0xa08   : > { %v4668_v54 = vrot.slane %v4666_v41, 7  ;;  %v4852_v10 = vsel %vm851_vm2, %v4850_v63, %v4847_v11  ;;  %8934 = vmatmul.msk.bf16.gmra.mxu2 %vm1072_vm6, %v4683_v46  ;;  %v8919_v2 = vrot.slane %v4661_v30, 11 }
 0xa09   : > { %v4854_v21 = vunpack.c.l.b16 %v4852_v10  ;;  %v4855_v59 = vunpack.c.h.b16 %v4852_v10  ;;  %8968 = vmatmul.msk.bf16.gmra.mxu0 %vm1072_vm6, %v4766_v45 }
 0xa0a   : > { %v4671_v6 = vor.u32 %v4669_v31, %v4668_v54 }
 0xa0b   : > { %v4856_v8 = vpack.c.b16 %v4854_v21, %v4854_v21  ;;  %v4857_v26 = vpack.c.b16 %v4855_v59, %v4855_v59 }
 0xa0c   : > { %v4672_v38 = vsel %vm10489_vm5, %v8919_v2, %v4671_v6 }
 0xa0d   : > { %v4859_v27 = vshrl.u32 %v4856_v8, 16  ;;  %v4864_v49 = vshrl.u32 %v4857_v26, 16  ;;  %v4867_v3 = vshll.u32 %v4857_v26, 16  ;;  %v4680_v20 = vunpack.c.l.b16 %v4672_v38 }
 0xa0f   : > { %v8953_v14 = vrot.slane %v4859_v27, 11  ;;  %v4866_v22 = vrot.slane %v4864_v49, 7  ;;  %v4684_v44 = vpack.c.b16 %v4680_v20, %v4679_v7 }
 0xa10   : > { %8952 = vmatmul.msk.bf16.gmra.mxu3 %vm1072_vm6, %v4766_v45 }
 0xa11   : > { %v4869_v17 = vor.u32 %v4867_v3, %v4866_v22 }
 0xa13   : > { %v4870_v9 = vsel %vm10489_vm5, %v8953_v14, %v4869_v17 }
 0xa14   : > { %v4871_v43 = vunpack.c.l.b16 %v4870_v9 }
 0xa16   : > { %v4872_v5 = vpack.c.b16 %v4871_v43, %v4680_v20 }
 0xa18   : > { %8935 = vmatmul.msk.bf16.gmra.mxu2 %vm1072_vm6, %v4684_v44 }
 0xa19   : > { %8969 = vmatmul.msk.bf16.gmra.mxu0 %vm1072_vm6, %v4872_v5 }
 0xa63   : > { %v4806_v0 = vpop.f32.mrf.mxu3 }
 0xa66   : > { %v4903_v50 = vpop.f32.mrf.mxu0 }
 0xa6b   : > { %v4724_v19 = vpop.f32.mrf.mxu2  ;;  %v4808_v48 = vpop.f32.mrf.mxu3 }
 0xa6c   : > { %v4807_v32 = vadd.f32 %v4806_v0, %v4724_v19 }
 0xa6e   : > { %v4923_v42 = vadd.f32 %v4903_v50, %v4807_v32  ;;  %v4905_v34 = vpop.f32.mrf.mxu0 }
 0xa70   : > { %v4934_v13 = vadd.f32 %v11704_v28, %v4923_v42 }
 0xa72   : > { %v4950_v16 = vmul.f32 0.05, %v4934_v13  ;;  %vm4942_vm12 = vcmp.ge.f32.partialorder %v4934_v13, 0.0 }
 0xa73   : > { %v4726_v63 = vpop.f32.mrf.mxu2  ;;  %v4811_v7 = vpop.f32.mrf.mxu3 }
 0xa74   : > { %v4809_v41 = vadd.f32 %v4808_v48, %v4726_v63  ;;  %v11707_v46 = vsel %vm4942_vm12, %v4934_v13, %v4950_v16 }
 0xa75   : > { %v4984_v11 = vpack.c.bf16 %v11707_v46, %v11707_v46 }
 0xa76   : > { %v4924_v45 = vadd.f32 %v4905_v34, %v4809_v41  ;;  %v4908_v54 = vpop.f32.mrf.mxu0 }
 0xa77   : > { %5000 = vrot.lane.b32.xlu1 %v4984_v11, %s12952_s26 }
 0xa78   : > { %v4935_v10 = vadd.f32 %v11704_v28, %v4924_v45 }
 0xa7a   : > { %v4951_v30 = vmul.f32 0.05, %v4935_v10  ;;  %vm4943_vm14 = vcmp.ge.f32.partialorder %v4935_v10, 0.0 }
 0xa7b   : > { %v4729_v31 = vpop.f32.mrf.mxu2  ;;  %v4813_v21 = vpop.f32.mrf.mxu3 }
 0xa7c   : > { %v4812_v59 = vadd.f32 %v4811_v7, %v4729_v31  ;;  %v11713_v6 = vsel %vm4943_vm14, %v4935_v10, %v4951_v30 }
 0xa7d   : > { %v4985_v8 = vpack.c.bf16 %v11713_v6, %v11713_v6 }
 0xa7e   : > { %v4925_v26 = vadd.f32 %v4908_v54, %v4812_v59  ;;  %v4910_v2 = vpop.f32.mrf.mxu0 }
 0xa7f   : > { %5002 = vrot.lane.b32.xlu2 %v4985_v8, %s12952_s26 }
 0xa80   : > { %v4936_v27 = vadd.f32 %v11704_v28, %v4925_v26 }
 0xa82   : > { %v4952_v49 = vmul.f32 0.05, %v4936_v27  ;;  %vm4944_vm9 = vcmp.ge.f32.partialorder %v4936_v27, 0.0 }
 0xa83   : > { %v4731_v3 = vpop.f32.mrf.mxu2  ;;  %v4816_v38 = vpop.f32.mrf.mxu3 }
 0xa84   : > { %v4814_v14 = vadd.f32 %v4813_v21, %v4731_v3  ;;  %v11719_v22 = vsel %vm4944_vm9, %v4936_v27, %v4952_v49 }
 0xa85   : > { %v4986_v17 = vpack.c.bf16 %v11719_v22, %v11719_v22 }
 0xa86   : > { %v4926_v20 = vadd.f32 %v4910_v2, %v4814_v14  ;;  %v4913_v9 = vpop.f32.mrf.mxu0 }
 0xa87   : > { %5004 = vrot.lane.b32.xlu0 %v4986_v17, %s12952_s26 }
 0xa88   : > { %v4937_v43 = vadd.f32 %v11704_v28, %v4926_v20 }
 0xa8a   : > { %v4953_v44 = vmul.f32 0.05, %v4937_v43  ;;  %vm4945_vm10 = vcmp.ge.f32.partialorder %v4937_v43, 0.0 }
 0xa8b   : > { %v4734_v5 = vpop.f32.mrf.mxu2  ;;  %v4818_v32 = vpop.f32.mrf.mxu3 }
 0xa8c   : > { %v4817_v0 = vadd.f32 %v4816_v38, %v4734_v5  ;;  %v11725_v50 = vsel %vm4945_vm10, %v4937_v43, %v4953_v44 }
 0xa8d   : > { %v4987_v19 = vpack.c.bf16 %v11725_v50, %v11725_v50 }
 0xa8e   : > { %v4927_v48 = vadd.f32 %v4913_v9, %v4817_v0  ;;  %v4915_v34 = vpop.f32.mrf.mxu0 }
 0xa8f   : > { %5006 = vrot.lane.b32.xlu1 %v4987_v19, %s12952_s26 }
 0xa90   : > { %v4938_v42 = vadd.f32 %v11704_v28, %v4927_v48  ;;  %v11757_v48 = vld [vmem:[#allocation2 + $0x8] sm:$0xff]  }
 0xa92   : > { %v4954_v13 = vmul.f32 0.05, %v4938_v42  ;;  %vm4946_vm12 = vcmp.ge.f32.partialorder %v4938_v42, 0.0 }
 0xa93   : > { %v4736_v16 = vpop.f32.mrf.mxu2  ;;  %v4821_v54 = vpop.f32.mrf.mxu3 }
 0xa94   : > { %v4819_v63 = vadd.f32 %v4818_v32, %v4736_v16  ;;  %v11731_v7 = vsel %vm4946_vm12, %v4938_v42, %v4954_v13  ;;  %v9623_v32 = vunpack.c.l.b16 %v11757_v48 }
 0xa95   : > { %v4988_v41 = vpack.c.bf16 %v11731_v7, %v11731_v7 }
 0xa96   : > { %v4928_v11 = vadd.f32 %v4915_v34, %v4819_v63  ;;  %v4918_v30 = vpop.f32.mrf.mxu0 }
 0xa97   : > { %5008 = vrot.lane.b32.xlu2 %v4988_v41, %s12952_s26 }
 0xa98   : > { %v4939_v45 = vadd.f32 %v11704_v28, %v4928_v11 }
 0xa9a   : > { %v4955_v10 = vmul.f32 0.05, %v4939_v45  ;;  %vm4947_vm14 = vcmp.ge.f32.partialorder %v4939_v45, 0.0 }
 0xa9b   : > { %v4739_v31 = vpop.f32.mrf.mxu2  ;;  %v4823_v49 = vpop.f32.mrf.mxu3 }
 0xa9c   : > { %v4822_v21 = vadd.f32 %v4821_v54, %v4739_v31  ;;  %v11737_v59 = vsel %vm4947_vm14, %v4939_v45, %v4955_v10 }
 0xa9d   : > { %v4989_v8 = vpack.c.bf16 %v11737_v59, %v11737_v59 }
 0xa9e   : > { %v4929_v26 = vadd.f32 %v4918_v30, %v4822_v21  ;;  %v4920_v17 = vpop.f32.mrf.mxu0 }
 0xa9f   : > { %5010 = vrot.lane.b32.xlu0 %v4989_v8, %s12952_s26 }
 0xaa0   : > { %v4940_v2 = vadd.f32 %v11704_v28, %v4929_v26 }
 0xaa2   : > { %v4956_v27 = vmul.f32 0.05, %v4940_v2  ;;  %vm4948_vm9 = vcmp.ge.f32.partialorder %v4940_v2, 0.0 }
 0xaa3   : > { %v4741_v3 = vpop.f32.mrf.mxu2 }
 0xaa4   : > { %v4824_v14 = vadd.f32 %v4823_v49, %v4741_v3  ;;  %v11743_v38 = vsel %vm4948_vm9, %v4940_v2, %v4956_v27 }
 0xaa5   : > { %v4990_v20 = vpack.c.bf16 %v11743_v38, %v11743_v38 }
 0xaa6   : > { %v4930_v9 = vadd.f32 %v4920_v17, %v4824_v14 }
 0xaa7   : > { %5012 = vrot.lane.b32.xlu1 %v4990_v20, %s12952_s26  ;;  %5174 = vrot.lane.b32.xlu0 %v11461_v15, %s12953_s29  ;;  %v5206_v15 = vpack.c.b16 %v9623_v32, %v11451_v52 }
 0xaa8   : > { %v4941_v43 = vadd.f32 %v11704_v28, %v4930_v9 }
 0xaa9   : > { %v5214_v28 = vrot.slane %v5206_v15, 5 }
 0xaaa   : > { %v4957_v44 = vmul.f32 0.05, %v4941_v43  ;;  %vm4949_vm10 = vcmp.ge.f32.partialorder %v4941_v43, 0.0 }
 0xaac   : > { %v11751_v5 = vsel %vm4949_vm10, %v4941_v43, %v4957_v44 }
 0xaad   : > { %v4991_v0 = vpack.c.bf16 %v11751_v5, %v11751_v5 }
 0xaaf   : > { %5014 = vrot.lane.b32.xlu2 %v4991_v0, %s12952_s26 }
 0xab7   : > { %5222 = vrot.lane.b32.xlu2 %v5214_v28, %s12954_s0 }
 0xad9   : > { %v5003_v19 = vpop.permute.xlu2 %5002 }
 0xada   : > { %5025 = vst.msk [vmem:[#allocation2 + $0x1c] sm:$0xf] %vm1392_vm15, %v5003_v19 }
 0xae1   : > { %v11765_v34 = vld [vmem:[#allocation2 + $0x18] sm:$0xff]  }
 0xae2   : > { %v9632_v63 = vunpack.c.h.b16 %v11765_v34 }
 0xae4   : > { %v5208_v45 = vpack.c.b16 %v9575_v58, %v9632_v63  ;;  %v5104_v30 = vpack.c.b16 %v9632_v63, %v9632_v63 }
 0xae6   : > { %v5216_v26 = vrot.slane %v5208_v45, 5  ;;  %v5127_v3 = vshrl.u32 %v5104_v30, 16  ;;  %v5130_v14 = vshll.u32 %v5104_v30, 16 }
 0xae8   : > { %v5129_v9 = vrot.slane %v5127_v3, 4  ;;  %v5132_v43 = vrot.slane %v5130_v14, 5 }
 0xae9   : > { %v5001_v42 = vpop.permute.xlu1 %5000 }
 0xaea   : > { %5024 = vst.msk [vmem:[#allocation2 + $0x10] sm:$0xf] %vm1392_vm15, %v5001_v42  ;;  %v5133_v42 = vor.u32 %v5132_v43, %v5129_v9 }
 0xaf1   : > { %v5009_v13 = vpop.permute.xlu2 %5008  ;;  %v9928_v16 = vld [vmem:[#allocation2 + $0x10] sm:$0xff]  }
 0xaf2   : > { %5028 = vst.msk [vmem:[#allocation2 + $0x40] sm:$0xf] %vm1392_vm15, %v5009_v13  ;;  %v5215_v41 = vrot.slane %v9928_v16, 5  ;;  %v11769_v11 = vunpack.c.l.b16 %v9928_v16 }
 0xaf4   : > { %5224 = vrot.lane.b32.xlu0 %v5215_v41, %s12954_s0  ;;  %v5103_v52 = vpack.c.b16 %v11769_v11, %v11769_v11 }
 0xaf6   : > { %v5119_v54 = vshrl.u32 %v5103_v52, 16  ;;  %v5122_v10 = vshll.u32 %v5103_v52, 16 }
 0xaf8   : > { %v5121_v31 = vrot.slane %v5119_v54, 4  ;;  %v5124_v21 = vrot.slane %v5122_v10, 5 }
 0xaf9   : > { %v5005_v8 = vpop.permute.xlu0 %5004  ;;  %v9934_v2 = vld [vmem:[#allocation2 + $0x40] sm:$0xff]  }
 0xafa   : > { %5026 = vst.msk [vmem:[#allocation2 + $0x28] sm:$0xf] %vm1392_vm15, %v5005_v8  ;;  %v5125_v27 = vor.u32 %v5124_v21, %v5121_v31  ;;  %v11777_v49 = vunpack.c.l.b16 %v9934_v2 }
 0xafc   : > { %5226 = vrot.lane.b32.xlu0 %v5216_v26, %s12954_s0  ;;  %5176 = vrot.lane.b32.xlu1 %v5125_v27, %s12953_s29  ;;  %v5107_v58 = vpack.c.b16 %v11777_v49, %v11777_v49 }
 0xafe   : > { %v5151_v17 = vshrl.u32 %v5107_v58, 16  ;;  %v5154_v20 = vshll.u32 %v5107_v58, 16 }
 0xb00   : > { %v5153_v44 = vrot.slane %v5151_v17, 4  ;;  %v5156_v0 = vrot.slane %v5154_v20, 5 }
 0xb01   : > { %v5007_v19 = vpop.permute.xlu1 %5006  ;;  %v9931_v15 = vld [vmem:[#allocation2 + $0x28] sm:$0xff]  }
 0xb02   : > { %5027 = vst.msk [vmem:[#allocation2 + $0x34] sm:$0xf] %vm1392_vm15, %v5007_v19  ;;  %v5157_v28 = vor.u32 %v5156_v0, %v5153_v44  ;;  %v11784_v13 = vunpack.c.l.b16 %v9931_v15  ;;  %v5217_v30 = vrot.slane %v9931_v15, 5  ;;  %v5219_v0 = vrot.slane %v9934_v2, 5  ;;  %v8974_v15 = vld [vmem:[%s12950_s3 + $0x4c] sm:$0x3] }
 0xb04   : > { %5184 = vrot.lane.b32.xlu0 %v5157_v28, %s12953_s29  ;;  %5178 = vrot.lane.b32.xlu1 %v5133_v42, %s12953_s29  ;;  %v5105_v16 = vpack.c.b16 %v11784_v13, %v11784_v13  ;;  %v8984_v28 = vld [vmem:[%s12950_s3 + $0x74] sm:$0x3]  ;;  %v8979_v42 = vld [vmem:[%s12950_s3 + $0x60] sm:$0x3] }
 0xb05   : > { %v5470_v2 = vunpack.c.l.b16 %v8979_v42 }
 0xb06   : > { %v5135_v63 = vshrl.u32 %v5105_v16, 16  ;;  %v5138_v41 = vshll.u32 %v5105_v16, 16  ;;  %v5552_v16 = vunpack.c.l.b16 %v8974_v15 }
 0xb08   : > { %v5137_v52 = vrot.slane %v5135_v63, 4  ;;  %v5140_v45 = vrot.slane %v5138_v41, 5  ;;  %v5658_v63 = vunpack.c.l.b16 %v8984_v28 }
 0xb09   : > { %v5015_v54 = vpop.permute.xlu2 %5014  ;;  %v11790_v10 = vld [vmem:[#allocation2 + $0x30] sm:$0xff]  }
 0xb0a   : > { %5031 = vst.msk [vmem:[#allocation2 + $0x64] sm:$0xf] %vm1392_vm15, %v5015_v54  ;;  %v5141_v31 = vor.u32 %v5140_v45, %v5137_v52  ;;  %v9644_v21 = vunpack.c.h.b16 %v11790_v10 }
 0xb0c   : > { %5228 = vrot.lane.b32.xlu1 %v5217_v30, %s12954_s0  ;;  %5180 = vrot.lane.b32.xlu2 %v5141_v31, %s12953_s29  ;;  %v5106_v8 = vpack.c.b16 %v9644_v21, %v9644_v21  ;;  %v5210_v26 = vpack.c.b16 %v9587_v29, %v9644_v21  ;;  %v5555_v30 = vpack.c.b16 %v5552_v16, %v5552_v16 }
 0xb0d   : > { %v5661_v31 = vpack.c.b16 %v5658_v63, %v5658_v63  ;;  %v5473_v21 = vpack.c.b16 %v5470_v2, %v5470_v2 }
 0xb0e   : > { %v5143_v27 = vshrl.u32 %v5106_v8, 16  ;;  %v5146_v3 = vshll.u32 %v5106_v8, 16  ;;  %v5218_v20 = vrot.slane %v5210_v26, 5 }
 0xb10   : > { %v5145_v14 = vrot.slane %v5143_v27, 4  ;;  %v5148_v58 = vrot.slane %v5146_v3, 5  ;;  %v5571_v3 = vsel %vm1860_vm3, %v5555_v30, 0  ;;  %v9289_v30 = vld [vmem:[%s12950_s3 + $0x44] sm:$0xff] }
 0xb11   : > { %v5011_v17 = vpop.permute.xlu0 %5010  ;;  %v11817_v54 = vld [vmem:[#allocation2 + $0x60] sm:$0xff]   ;;  %5578 = vmatpush.bf16.msrb.mxu2 %v5571_v3 }
 0xb12   : > { %5029 = vst.msk [vmem:[#allocation2 + $0x4c] sm:$0xf] %vm1392_vm15, %v5011_v17  ;;  %v5149_v9 = vor.u32 %v5148_v58, %v5145_v14  ;;  %v5668_v14 = vsel %vm1860_vm3, %v5661_v31, 0  ;;  %v5489_v58 = vsel %vm1860_vm3, %v5473_v21, 0  ;;  %v9293_v31 = vld [vmem:[%s12950_s3 + $0x6c] sm:$0xff] }
 0xb13   : > { %5675 = vmatpush.bf16.msra.mxu3 %v5668_v14  ;;  %5496 = vmatpush.bf16.msrb.mxu1 %v5489_v58  ;;  %v9288_v58 = vld [vmem:[%s12950_s3 + $0x3c] sm:$0xff] }
 0xb14   : > { %5230 = vrot.lane.b32.xlu1 %v5218_v20, %s12954_s0  ;;  %5182 = vrot.lane.b32.xlu2 %v5149_v9, %s12953_s29 }
 0xb15   : > { %5579 = vmatpush.bf16.msrb.mxu2 %v9289_v30 }
 0xb17   : > { %5676 = vmatpush.bf16.msra.mxu3 %v9293_v31  ;;  %5497 = vmatpush.bf16.msrb.mxu1 %v9291_v12 }
 0xb19   : > { %v5013_v43 = vpop.permute.xlu1 %5012  ;;  %v11801_v44 = vld [vmem:[#allocation2 + $0x48] sm:$0xff]   ;;  %5580 = vmatpush.bf16.msrb.mxu2 %v9288_v58 }
 0xb1a   : > { %5030 = vst.msk [vmem:[#allocation2 + $0x58] sm:$0xf] %vm1392_vm15, %v5013_v43  ;;  %v9656_v29 = vunpack.c.h.b16 %v11801_v44 }
 0xb1b   : > { %5677 = vmatpush.bf16.msra.mxu3 %v9292_v37 }
 0xb1c   : > { %5232 = vrot.lane.b32.xlu2 %v5219_v0, %s12954_s0  ;;  %v5108_v19 = vpack.c.b16 %v9656_v29, %v9656_v29  ;;  %v5212_v45 = vpack.c.b16 %v9599_v33, %v9656_v29  ;;  %v9668_v33 = vunpack.c.h.b16 %v11817_v54 }
 0xb1e   : > { %v5159_v41 = vshrl.u32 %v5108_v19, 16  ;;  %v5162_v52 = vshll.u32 %v5108_v19, 16  ;;  %v5220_v20 = vrot.slane %v5212_v45, 5  ;;  %v5283_v19 = vpack.c.b16 %v9668_v33, %v9668_v33 }
 0xb20   : > { %v5161_v8 = vrot.slane %v5159_v41, 4  ;;  %v5164_v26 = vrot.slane %v5162_v52, 5  ;;  %v5285_v63 = vshrl.u32 %v5283_v19, 16  ;;  %v5288_v2 = vshll.u32 %v5283_v19, 16 }
 0xb21   : > { %v9937_v27 = vld [vmem:[#allocation2 + $0x58] sm:$0xff]   ;;  %v5296_v41 = vpack.c.b16 %v9611_v55, %v9668_v33  ;;  %v5175_v55 = vpop.permute.xlu0 %5174 }
 0xb22   : > { %v5165_v17 = vor.u32 %v5164_v26, %v5161_v8  ;;  %v11822_v9 = vunpack.c.l.b16 %v9937_v27  ;;  %v5221_v42 = vrot.slane %v9937_v27, 5  ;;  %v5287_v52 = vrot.slane %v5285_v63, 4  ;;  %v5223_v27 = vpop.permute.xlu2 %5222 }
 0xb23   : > { %v5290_v45 = vrot.slane %v5288_v2, 5  ;;  %v5297_v21 = vrot.slane %v5296_v41, 5 }
 0xb24   : > { %5186 = vrot.lane.b32.xlu0 %v5165_v17, %s12953_s29  ;;  %5234 = vrot.lane.b32.xlu2 %v5220_v20, %s12954_s0  ;;  %v5109_v43 = vpack.c.b16 %v11822_v9, %v11822_v9 }
 0xb25   : > { %v5291_v8 = vor.u32 %v5290_v45, %v5287_v52 }
 0xb26   : > { %v5167_v0 = vshrl.u32 %v5109_v43, 16  ;;  %v5170_v29 = vshll.u32 %v5109_v43, 16 }
 0xb28   : > { %v5169_v15 = vrot.slane %v5167_v0, 4  ;;  %v5172_v28 = vrot.slane %v5170_v29, 5  ;;  %v12921_v0 = vunpack.c.h.b16 %v11757_v48 }
 0xb2a   : > { %v5173_v16 = vor.u32 %v5172_v28, %v5169_v15  ;;  %v5095_v15 = vpack.c.b16 %v11769_v11, %v12921_v0 }
 0xb2c   : > { %5236 = vrot.lane.b32.xlu0 %v5221_v42, %s12954_s0  ;;  %5188 = vrot.lane.b32.xlu1 %v5173_v16, %s12953_s29 }
 0xb2d   : > { %5616 = vrot.lane.b32.xlu2 %v11598_v47, %s12953_s29  ;;  %v10072_v47 = vld [vmem:[#allocation2] sm:$0xff]  }
 0xb2e   : > { %v5240_v26 = vsel %vm1607_vm4, %v10072_v47, %v5175_v55 }
 0xb2f   : > { %v5263_v3 = vsel %vm1632_vm7, %v5240_v26, %v5223_v27 }
 0xb30   : > { %v5522_v14 = vunpack.c.h.b16 %v5263_v3  ;;  %v5521_v20 = vunpack.c.l.b16 %v5263_v3 }
 0xb32   : > { %v5524_v33 = vpack.c.b16 %v5522_v14, %v5522_v14  ;;  %v5523_v29 = vpack.c.b16 %v5521_v20, %v5521_v20 }
 0xb34   : > { %5298 = vrot.lane.b32.xlu0 %v5297_v21, %s12954_s0  ;;  %5292 = vrot.lane.b32.xlu1 %v5291_v8, %s12953_s29  ;;  %v5531_v19 = vshrl.u32 %v5524_v33, 16  ;;  %v5526_v16 = vshrl.u32 %v5523_v29, 16  ;;  %v5534_v2 = vshll.u32 %v5524_v33, 16 }
 0xb36   : > { %v5533_v63 = vrot.slane %v5531_v19, 7  ;;  %v9006_v12 = vrot.slane %v5526_v16, 11  ;;  %v5097_v16 = vpack.c.b16 %v11784_v13, %v9576_v23 }
 0xb38   : > { %v5536_v55 = vor.u32 %v5534_v2, %v5533_v63 }
 0xb3a   : > { %v5537_v58 = vsel %vm10489_vm5, %v9006_v12, %v5536_v55 }
 0xb3c   : > { %5622 = vrot.lane.b32.xlu1 %v4845_v57, %s12954_s0  ;;  %v9290_v57 = vld [vmem:[%s12950_s3 + $0x50] sm:$0xff] }
 0xb3d   : > { %5498 = vmatpush.bf16.msrb.mxu1 %v9290_v57 }
 0xb66   : > { %v5225_v17 = vpop.permute.xlu0 %5224  ;;  %v5181_v43 = vpop.permute.xlu2 %5180 }
 0xb6e   : > { %v5177_v28 = vpop.permute.xlu1 %5176  ;;  %v5227_v41 = vpop.permute.xlu0 %5226 }
 0xb6f   : > { %v5243_v42 = vsel %vm1607_vm4, %v5095_v15, %v5177_v28  ;;  %v5183_v8 = vpop.permute.xlu2 %5182  ;;  %v5099_v15 = vpack.c.b16 %v11777_v49, %v9588_v56 }
 0xb70   : > { %v5265_v52 = vsel %vm1632_vm7, %v5243_v42, %v5225_v17 }
 0xb71   : > { %v5313_v45 = vunpack.c.l.b16 %v5265_v52  ;;  %v5314_v30 = vunpack.c.h.b16 %v5265_v52 }
 0xb73   : > { %v5329_v31 = vpack.c.b16 %v5313_v45, %v5313_v45  ;;  %v5330_v21 = vpack.c.b16 %v5314_v30, %v5314_v30  ;;  %v5249_v30 = vsel %vm1607_vm4, %v5097_v16, %v5181_v43 }
 0xb75   : > { %v5346_v47 = vshrl.u32 %v5329_v31, 16  ;;  %v5351_v26 = vshrl.u32 %v5330_v21, 16  ;;  %v5354_v3 = vshll.u32 %v5330_v21, 16 }
 0xb76   : > { %v5179_v27 = vpop.permute.xlu1 %5178  ;;  %v5185_v29 = vpop.permute.xlu0 %5184 }
 0xb77   : > { %v5353_v11 = vrot.slane %v5351_v26, 7  ;;  %v5246_v14 = vsel %vm1607_vm4, %v11765_v34, %v5179_v27  ;;  %v8986_v37 = vrot.slane %v5346_v47, 11  ;;  %v5538_v34 = vunpack.c.l.b16 %v5537_v58  ;;  %v5233_v45 = vpop.permute.xlu2 %5232 }
 0xb78   : > { %v5267_v17 = vsel %vm1632_vm7, %v5246_v14, %v5227_v41  ;;  %v5255_v2 = vsel %vm1607_vm4, %v5099_v15, %v5185_v29  ;;  %v5252_v58 = vsel %vm1607_vm4, %v11790_v10, %v5183_v8 }
 0xb79   : > { %v5356_v57 = vor.u32 %v5354_v3, %v5353_v11  ;;  %v5315_v20 = vunpack.c.l.b16 %v5267_v17  ;;  %v5316_v33 = vunpack.c.h.b16 %v5267_v17  ;;  %v5273_v49 = vsel %vm1632_vm7, %v5255_v2, %v5233_v45 }
 0xb7a   : > { %v5322_v43 = vunpack.c.h.b16 %v5273_v49 }
 0xb7b   : > { %v5357_v19 = vsel %vm10489_vm5, %v8986_v37, %v5356_v57  ;;  %v5331_v28 = vpack.c.b16 %v5315_v20, %v5315_v20  ;;  %v5332_v42 = vpack.c.b16 %v5316_v33, %v5316_v33 }
 0xb7c   : > { %v5449_v63 = vunpack.c.l.b16 %v5357_v19  ;;  %v5338_v33 = vpack.c.b16 %v5322_v43, %v5322_v43 }
 0xb7d   : > { %v5359_v41 = vshrl.u32 %v5331_v28, 16  ;;  %v5364_v52 = vshrl.u32 %v5332_v42, 16  ;;  %v5367_v12 = vshll.u32 %v5332_v42, 16 }
 0xb7e   : > { %v5539_v31 = vpack.c.b16 %v5449_v63, %v5538_v34  ;;  %v5229_v21 = vpop.permute.xlu1 %5228  ;;  %v5321_v34 = vunpack.c.l.b16 %v5273_v49  ;;  %v5403_v8 = vshrl.u32 %v5338_v33, 16 }
 0xb7f   : > { %v5366_v4 = vrot.slane %v5364_v52, 7  ;;  %v5269_v56 = vsel %vm1632_vm7, %v5249_v30, %v5229_v21  ;;  %v8987_v23 = vrot.slane %v5359_v41, 11  ;;  %v5235_v43 = vpop.permute.xlu2 %5234 }
 0xb80   : > { %v5317_v55 = vunpack.c.l.b16 %v5269_v56  ;;  %v5318_v39 = vunpack.c.h.b16 %v5269_v56  ;;  %9015 = vmatmul.msk.bf16.vlgmr.msrb.gmra.mxu2 %vm1847_vm8, %v5539_v31  ;;  %v5337_v30 = vpack.c.b16 %v5321_v34, %v5321_v34 }
 0xb81   : > { %v5369_v13 = vor.u32 %v5367_v12, %v5366_v4  ;;  %v5405_v4 = vrot.slane %v5403_v8, 7 }
 0xb82   : > { %v5333_v47 = vpack.c.b16 %v5317_v55, %v5317_v55  ;;  %v5334_v26 = vpack.c.b16 %v5318_v39, %v5318_v39  ;;  %v5398_v49 = vshrl.u32 %v5337_v30, 16  ;;  %v5406_v55 = vshll.u32 %v5338_v33, 16 }
 0xb83   : > { %v5370_v27 = vsel %vm10489_vm5, %v8987_v23, %v5369_v13 }
 0xb84   : > { %v5450_v11 = vunpack.c.l.b16 %v5370_v27  ;;  %v5372_v3 = vshrl.u32 %v5333_v47, 16  ;;  %v5377_v14 = vshrl.u32 %v5334_v26, 16  ;;  %v5380_v57 = vshll.u32 %v5334_v26, 16 }
 0xb85   : > { %v5408_v13 = vor.u32 %v5406_v55, %v5405_v4  ;;  %v8990_v26 = vrot.slane %v5398_v49, 11 }
 0xb86   : > { %v5457_v17 = vpack.c.b16 %v5450_v11, %v5449_v63  ;;  %v5379_v37 = vrot.slane %v5377_v14, 7  ;;  %v5231_v20 = vpop.permute.xlu1 %5230  ;;  %v8988_v19 = vrot.slane %v5372_v3, 11 }
 0xb87   : > { %v5271_v29 = vsel %vm1632_vm7, %v5252_v58, %v5231_v20  ;;  %v5409_v3 = vsel %vm10489_vm5, %v8990_v26, %v5408_v13  ;;  %v5617_v26 = vpop.permute.xlu2 %5616 }
 0xb88   : > { %v5382_v15 = vor.u32 %v5380_v57, %v5379_v37  ;;  %v5319_v28 = vunpack.c.l.b16 %v5271_v29  ;;  %v5320_v42 = vunpack.c.h.b16 %v5271_v29  ;;  %9002 = vmatmul.msk.bf16.vlgmr.msrb.gmra.mxu1 %vm1847_vm8, %v5457_v17  ;;  %v5453_v37 = vunpack.c.l.b16 %v5409_v3 }
 0xb89   : > { %v5626_v3 = vsel %vm1607_vm4, %v11685_v60, %v5617_v26 }
 0xb8a   : > { %v5383_v16 = vsel %vm10489_vm5, %v8988_v19, %v5382_v15  ;;  %v5335_v2 = vpack.c.b16 %v5319_v28, %v5319_v28  ;;  %v5336_v41 = vpack.c.b16 %v5320_v42, %v5320_v42  ;;  %v5101_v19 = vpack.c.b16 %v11822_v9, %v9600_v51 }
 0xb8b   : > { %v5451_v10 = vunpack.c.l.b16 %v5383_v16 }
 0xb8c   : > { %v5385_v63 = vshrl.u32 %v5335_v2, 16  ;;  %v5390_v52 = vshrl.u32 %v5336_v41, 16  ;;  %v5393_v21 = vshll.u32 %v5336_v41, 16 }
 0xb8d   : > { %v5540_v45 = vpack.c.b16 %v5451_v10, %v5450_v11 }
 0xb8e   : > { %v5392_v31 = vrot.slane %v5390_v52, 7  ;;  %v8989_v12 = vrot.slane %v5385_v63, 11 }
 0xb8f   : > { %9028 = vmatmul.msk.bf16.vlgmr.msra.gmra.mxu3 %vm1847_vm8, %v5540_v45 }
 0xb90   : > { %v5395_v56 = vor.u32 %v5393_v21, %v5392_v31  ;;  %9016 = vmatmul.msk.bf16.gmra.mxu2 %vm1847_vm8, %v5540_v45 }
 0xb92   : > { %v5396_v39 = vsel %vm10489_vm5, %v8989_v12, %v5395_v56 }
 0xb93   : > { %v5452_v23 = vunpack.c.l.b16 %v5396_v39 }
 0xb95   : > { %v5458_v47 = vpack.c.b16 %v5452_v23, %v5451_v10  ;;  %v5541_v15 = vpack.c.b16 %v5453_v37, %v5452_v23 }
 0xb96   : > { %v5187_v27 = vpop.permute.xlu0 %5186 }
 0xb97   : > { %v5258_v11 = vsel %vm1607_vm4, %v11801_v44, %v5187_v27 }
 0xb98   : > { %v5275_v14 = vsel %vm1632_vm7, %v5258_v11, %v5235_v43  ;;  %9003 = vmatmul.msk.bf16.gmra.mxu1 %vm1847_vm8, %v5458_v47 }
 0xb99   : > { %v5323_v58 = vunpack.c.l.b16 %v5275_v14  ;;  %v5324_v17 = vunpack.c.h.b16 %v5275_v14 }
 0xb9b   : > { %v5339_v57 = vpack.c.b16 %v5323_v58, %v5323_v58  ;;  %v5340_v20 = vpack.c.b16 %v5324_v17, %v5324_v17 }
 0xb9d   : > { %v5411_v33 = vshrl.u32 %v5339_v57, 16  ;;  %v5416_v29 = vshrl.u32 %v5340_v20, 16  ;;  %v5419_v34 = vshll.u32 %v5340_v20, 16 }
 0xb9e   : > { %v5237_v44 = vpop.permute.xlu0 %5236  ;;  %v5189_v28 = vpop.permute.xlu1 %5188 }
 0xb9f   : > { %v5418_v42 = vrot.slane %v5416_v29, 7  ;;  %v5261_v16 = vsel %vm1607_vm4, %v5101_v19, %v5189_v28  ;;  %9029 = vmatmul.msk.bf16.gmra.mxu3 %vm1847_vm8, %v5541_v15  ;;  %v8991_v41 = vrot.slane %v5411_v33, 11 }
 0xba0   : > { %v5277_v2 = vsel %vm1632_vm7, %v5261_v16, %v5237_v44  ;;  %9017 = vmatmul.msk.bf16.gmra.mxu2 %vm1847_vm8, %v5541_v15 }
 0xba1   : > { %v5421_v10 = vor.u32 %v5419_v34, %v5418_v42  ;;  %v5325_v8 = vunpack.c.l.b16 %v5277_v2  ;;  %v5326_v63 = vunpack.c.h.b16 %v5277_v2 }
 0xba3   : > { %v5341_v53 = vpack.c.b16 %v5325_v8, %v5325_v8  ;;  %v5342_v52 = vpack.c.b16 %v5326_v63, %v5326_v63  ;;  %v5422_v51 = vsel %vm10489_vm5, %v8991_v41, %v5421_v10 }
 0xba4   : > { %v5454_v9 = vunpack.c.l.b16 %v5422_v51 }
 0xba5   : > { %v5424_v45 = vshrl.u32 %v5341_v53, 16  ;;  %v5429_v30 = vshrl.u32 %v5342_v52, 16  ;;  %v5432_v56 = vshll.u32 %v5342_v52, 16 }
 0xba6   : > { %v5299_v31 = vpop.permute.xlu0 %5298  ;;  %v5293_v21 = vpop.permute.xlu1 %5292  ;;  %v5459_v4 = vpack.c.b16 %v5454_v9, %v5453_v37 }
 0xba7   : > { %v5431_v12 = vrot.slane %v5429_v30, 7  ;;  %v5302_v49 = vsel %vm1607_vm4, %v11817_v54, %v5293_v21  ;;  %v8992_v39 = vrot.slane %v5424_v45, 11 }
 0xba8   : > { %v5304_v55 = vsel %vm1632_vm7, %v5302_v49, %v5299_v31  ;;  %9004 = vmatmul.msk.bf16.gmra.mxu1 %vm1847_vm8, %v5459_v4 }
 0xba9   : > { %v5434_v23 = vor.u32 %v5432_v56, %v5431_v12  ;;  %v5327_v13 = vunpack.c.l.b16 %v5304_v55  ;;  %v5328_v47 = vunpack.c.h.b16 %v5304_v55  ;;  %v11931_v12 = vld [vmem:[%s12951_s4 + $0x1] ss:$0 sm:$0xff] }
 0xbab   : > { %v5343_v27 = vpack.c.b16 %v5327_v13, %v5327_v13  ;;  %v5344_v43 = vpack.c.b16 %v5328_v47, %v5328_v47  ;;  %v5435_v11 = vsel %vm10489_vm5, %v8992_v39, %v5434_v23 }
 0xbac   : > { %v5455_v14 = vunpack.c.l.b16 %v5435_v11 }
 0xbad   : > { %v5437_v58 = vshrl.u32 %v5343_v27, 16  ;;  %v5442_v54 = vshrl.u32 %v5344_v43, 16  ;;  %v5445_v20 = vshll.u32 %v5344_v43, 16 }
 0xbae   : > { %v5623_v17 = vpop.permute.xlu1 %5622  ;;  %v5542_v37 = vpack.c.b16 %v5455_v14, %v5454_v9 }
 0xbaf   : > { %v5444_v57 = vrot.slane %v5442_v54, 7  ;;  %v5628_v33 = vsel %vm1632_vm7, %v5626_v3, %v5623_v17  ;;  %v8993_v15 = vrot.slane %v5437_v58, 11 }
 0xbb0   : > { %v5630_v29 = vunpack.c.l.b16 %v5628_v33  ;;  %v5631_v19 = vunpack.c.h.b16 %v5628_v33  ;;  %9018 = vmatmul.msk.bf16.gmra.mxu2 %vm1847_vm8, %v5542_v37  ;;  %9030 = vmatmul.msk.bf16.gmra.mxu3 %vm1847_vm8, %v5542_v37 }
 0xbb1   : > { %v5447_v44 = vor.u32 %v5445_v20, %v5444_v57 }
 0xbb2   : > { %v5632_v28 = vpack.c.b16 %v5630_v29, %v5630_v29  ;;  %v5633_v42 = vpack.c.b16 %v5631_v19, %v5631_v19 }
 0xbb3   : > { %v5448_v60 = vsel %vm10489_vm5, %v8993_v15, %v5447_v44 }
 0xbb4   : > { %v5635_v34 = vshrl.u32 %v5632_v28, 16  ;;  %v5640_v16 = vshrl.u32 %v5633_v42, 16  ;;  %v5643_v2 = vshll.u32 %v5633_v42, 16  ;;  %v5456_v41 = vunpack.c.l.b16 %v5448_v60 }
 0xbb6   : > { %v9019_v10 = vrot.slane %v5635_v34, 11  ;;  %v5642_v8 = vrot.slane %v5640_v16, 7  ;;  %v5460_v63 = vpack.c.b16 %v5456_v41, %v5455_v14 }
 0xbb8   : > { %v5645_v53 = vor.u32 %v5643_v2, %v5642_v8  ;;  %9005 = vmatmul.msk.bf16.gmra.mxu1 %vm1847_vm8, %v5460_v63 }
 0xbba   : > { %v5646_v52 = vsel %vm10489_vm5, %v9019_v10, %v5645_v53 }
 0xbbb   : > { %v5647_v51 = vunpack.c.l.b16 %v5646_v52 }
 0xbbd   : > { %v5648_v9 = vpack.c.b16 %v5647_v51, %v5456_v41 }
 0xbc0   : > { %9031 = vmatmul.msk.bf16.gmra.mxu3 %vm1847_vm8, %v5648_v9 }
 0xc03   : > { %v5582_v45 = vpop.f32.mrf.mxu2 }
 0xc05   : > { %v5500_v30 = vpop.f32.mrf.mxu1 }
 0xc06   : > { %v5583_v4 = vadd.f32 %v5582_v45, %v5500_v30 }
 0xc0b   : > { %v5584_v31 = vpop.f32.mrf.mxu2 }
 0xc0d   : > { %v5502_v21 = vpop.f32.mrf.mxu1 }
 0xc0e   : > { %v5585_v47 = vadd.f32 %v5584_v31, %v5502_v21 }
 0xc12   : > { %v5679_v56 = vpop.f32.mrf.mxu3 }
 0xc13   : > { %v5699_v49 = vadd.f32 %v5679_v56, %v5583_v4  ;;  %v5587_v13 = vpop.f32.mrf.mxu2 }
 0xc15   : > { %v5710_v55 = vadd.f32 %v11931_v12, %v5699_v49  ;;  %v5505_v39 = vpop.f32.mrf.mxu1 }
 0xc16   : > { %v5588_v54 = vadd.f32 %v5587_v13, %v5505_v39 }
 0xc17   : > { %vm5718_vm12 = vcmp.ge.f32.partialorder %v5710_v55, 0.0  ;;  %v5726_v23 = vmul.f32 0.05, %v5710_v55 }
 0xc19   : > { %v11934_v26 = vsel %vm5718_vm12, %v5710_v55, %v5726_v23 }
 0xc1a   : > { %v5681_v27 = vpop.f32.mrf.mxu3  ;;  %v5760_v43 = vpack.c.bf16 %v11934_v26, %v11934_v26 }
 0xc1b   : > { %v5700_v11 = vadd.f32 %v5681_v27, %v5585_v47  ;;  %v5589_v37 = vpop.f32.mrf.mxu2 }
 0xc1c   : > { %5776 = vrot.lane.b32.xlu1 %v5760_v43, %s12952_s26 }
 0xc1d   : > { %v5711_v3 = vadd.f32 %v11931_v12, %v5700_v11  ;;  %v5507_v58 = vpop.f32.mrf.mxu1 }
 0xc1e   : > { %v5590_v15 = vadd.f32 %v5589_v37, %v5507_v58 }
 0xc1f   : > { %vm5719_vm14 = vcmp.ge.f32.partialorder %v5711_v3, 0.0  ;;  %v5727_v14 = vmul.f32 0.05, %v5711_v3 }
 0xc21   : > { %v11940_v17 = vsel %vm5719_vm14, %v5711_v3, %v5727_v14 }
 0xc22   : > { %v5684_v57 = vpop.f32.mrf.mxu3  ;;  %v5761_v20 = vpack.c.bf16 %v11940_v17, %v11940_v17 }
 0xc23   : > { %v5701_v33 = vadd.f32 %v5684_v57, %v5588_v54  ;;  %v5592_v34 = vpop.f32.mrf.mxu2 }
 0xc24   : > { %5778 = vrot.lane.b32.xlu2 %v5761_v20, %s12952_s26 }
 0xc25   : > { %v5712_v29 = vadd.f32 %v11931_v12, %v5701_v33  ;;  %v5510_v28 = vpop.f32.mrf.mxu1 }
 0xc26   : > { %v5593_v8 = vadd.f32 %v5592_v34, %v5510_v28 }
 0xc27   : > { %vm5720_vm9 = vcmp.ge.f32.partialorder %v5712_v29, 0.0  ;;  %v5728_v19 = vmul.f32 0.05, %v5712_v29 }
 0xc29   : > { %v11946_v44 = vsel %vm5720_vm9, %v5712_v29, %v5728_v19 }
 0xc2a   : > { %v5686_v42 = vpop.f32.mrf.mxu3  ;;  %v5762_v60 = vpack.c.bf16 %v11946_v44, %v11946_v44 }
 0xc2b   : > { %v5702_v16 = vadd.f32 %v5686_v42, %v5590_v15  ;;  %v5594_v9 = vpop.f32.mrf.mxu2 }
 0xc2c   : > { %5780 = vrot.lane.b32.xlu0 %v5762_v60, %s12952_s26 }
 0xc2d   : > { %v5713_v2 = vadd.f32 %v11931_v12, %v5702_v16  ;;  %v5512_v53 = vpop.f32.mrf.mxu1 }
 0xc2e   : > { %v5595_v31 = vadd.f32 %v5594_v9, %v5512_v53 }
 0xc2f   : > { %vm5721_vm10 = vcmp.ge.f32.partialorder %v5713_v2, 0.0  ;;  %v5729_v41 = vmul.f32 0.05, %v5713_v2 }
 0xc31   : > { %v11952_v10 = vsel %vm5721_vm10, %v5713_v2, %v5729_v41  ;;  %v11985_v41 = vld [vmem:[#allocation2] sm:$0xff]  }
 0xc32   : > { %v5763_v63 = vpack.c.bf16 %v11952_v10, %v11952_v10 }
 0xc33   : > { %v5689_v52 = vpop.f32.mrf.mxu3  ;;  %v5597_v23 = vpop.f32.mrf.mxu2 }
 0xc34   : > { %v5703_v51 = vadd.f32 %v5689_v52, %v5593_v8  ;;  %5782 = vrot.lane.b32.xlu2 %v5763_v63, %s12952_s26 }
 0xc35   : > { %v5515_v55 = vpop.f32.mrf.mxu1 }
 0xc36   : > { %v5714_v45 = vadd.f32 %v11931_v12, %v5703_v51  ;;  %v5598_v47 = vadd.f32 %v5597_v23, %v5515_v55 }
 0xc38   : > { %vm5722_vm12 = vcmp.ge.f32.partialorder %v5714_v45, 0.0  ;;  %v5730_v30 = vmul.f32 0.05, %v5714_v45 }
 0xc3a   : > { %v11958_v21 = vsel %vm5722_vm12, %v5714_v45, %v5730_v30 }
 0xc3b   : > { %v5691_v4 = vpop.f32.mrf.mxu3  ;;  %v5764_v56 = vpack.c.bf16 %v11958_v21, %v11958_v21  ;;  %v5599_v37 = vpop.f32.mrf.mxu2 }
 0xc3c   : > { %v5704_v49 = vadd.f32 %v5691_v4, %v5595_v31 }
 0xc3d   : > { %5784 = vrot.lane.b32.xlu0 %v5764_v56, %s12952_s26  ;;  %v5517_v58 = vpop.f32.mrf.mxu1 }
 0xc3e   : > { %v5715_v39 = vadd.f32 %v11931_v12, %v5704_v49  ;;  %v5600_v57 = vadd.f32 %v5599_v37, %v5517_v58 }
 0xc40   : > { %vm5723_vm14 = vcmp.ge.f32.partialorder %v5715_v39, 0.0  ;;  %v5731_v13 = vmul.f32 0.05, %v5715_v39 }
 0xc42   : > { %v11964_v27 = vsel %vm5723_vm14, %v5715_v39, %v5731_v13 }
 0xc43   : > { %v5694_v43 = vpop.f32.mrf.mxu3  ;;  %v5765_v11 = vpack.c.bf16 %v11964_v27, %v11964_v27 }
 0xc44   : > { %v5705_v3 = vadd.f32 %v5694_v43, %v5598_v47 }
 0xc45   : > { %5786 = vrot.lane.b32.xlu1 %v5765_v11, %s12952_s26 }
 0xc46   : > { %v5716_v14 = vadd.f32 %v11931_v12, %v5705_v3  ;;  %v12003_v3 = vld [vmem:[#allocation2 + $0x20] sm:$0xff]  }
 0xc48   : > { %vm5724_vm9 = vcmp.ge.f32.partialorder %v5716_v14, 0.0  ;;  %v5732_v54 = vmul.f32 0.05, %v5716_v14 }
 0xc4a   : > { %v11970_v20 = vsel %vm5724_vm9, %v5716_v14, %v5732_v54 }
 0xc4b   : > { %v5696_v33 = vpop.f32.mrf.mxu3  ;;  %v5766_v29 = vpack.c.bf16 %v11970_v20, %v11970_v20 }
 0xc4c   : > { %v5706_v19 = vadd.f32 %v5696_v33, %v5600_v57  ;;  %v12920_v33 = vunpack.c.l.b16 %v12003_v3 }
 0xc4d   : > { %5788 = vrot.lane.b32.xlu2 %v5766_v29, %s12952_s26 }
 0xc4e   : > { %v5717_v15 = vadd.f32 %v11931_v12, %v5706_v19  ;;  %v11988_v12 = vunpack.c.h.b16 %v11985_v41 }
 0xc50   : > { %vm5725_vm10 = vcmp.ge.f32.partialorder %v5717_v15, 0.0  ;;  %v5733_v28 = vmul.f32 0.05, %v5717_v15  ;;  %v5878_v52 = vpack.c.b16 %v11988_v12, %v11988_v12 }
 0xc52   : > { %v11976_v42 = vsel %vm5725_vm10, %v5717_v15, %v5733_v28  ;;  %v5887_v45 = vshrl.u32 %v5878_v52, 16  ;;  %v5890_v30 = vshll.u32 %v5878_v52, 16 }
 0xc53   : > { %v5767_v60 = vpack.c.bf16 %v11976_v42, %v11976_v42 }
 0xc54   : > { %v5889_v49 = vrot.slane %v5887_v45, 4  ;;  %v5892_v55 = vrot.slane %v5890_v30, 5 }
 0xc55   : > { %5790 = vrot.lane.b32.xlu0 %v5767_v60, %s12952_s26 }
 0xc56   : > { %v11995_v39 = vor.u32 %v5892_v55, %v5889_v49 }
 0xc58   : > { %5950 = vrot.lane.b32.xlu2 %v11995_v39, %s12953_s29 }
 0xc7e   : > { %v5779_v34 = vpop.permute.xlu2 %5778 }
 0xc7f   : > { %5801 = vst.msk [vmem:[#allocation2 + $0x1c] sm:$0xf] %vm1392_vm15, %v5779_v34 }
 0xc86   : > { %v11982_v16 = vld [vmem:[#allocation2 + $0x18] sm:$0xff]  }
 0xc87   : > { %v9692_v2 = vunpack.c.h.b16 %v11982_v16 }
 0xc89   : > { %v5880_v8 = vpack.c.b16 %v9692_v2, %v9692_v2  ;;  %v5984_v19 = vpack.c.b16 %v12920_v33, %v9692_v2  ;;  %v5982_v2 = vpack.c.b16 %v9623_v32, %v11988_v12 }
 0xc8b   : > { %v5903_v63 = vshrl.u32 %v5880_v8, 16  ;;  %v5906_v53 = vshll.u32 %v5880_v8, 16  ;;  %v5992_v34 = vrot.slane %v5984_v19, 5  ;;  %v5990_v49 = vrot.slane %v5982_v2, 5 }
 0xc8d   : > { %v5905_v51 = vrot.slane %v5903_v63, 4  ;;  %v5908_v9 = vrot.slane %v5906_v53, 5 }
 0xc8e   : > { %v5777_v31 = vpop.permute.xlu1 %5776  ;;  %v5783_v4 = vpop.permute.xlu2 %5782 }
 0xc8f   : > { %5800 = vst.msk [vmem:[#allocation2 + $0x10] sm:$0xf] %vm1392_vm15, %v5777_v31  ;;  %v5909_v56 = vor.u32 %v5908_v9, %v5905_v51 }
 0xc90   : > { %5803 = vst.msk [vmem:[#allocation2 + $0x34] sm:$0xf] %vm1392_vm15, %v5783_v4 }
 0xc91   : > { %5954 = vrot.lane.b32.xlu1 %v5909_v56, %s12953_s29 }
 0xc96   : > { %v9942_v23 = vld [vmem:[#allocation2 + $0x10] sm:$0xff]  }
 0xc97   : > { %v11999_v13 = vunpack.c.l.b16 %v9942_v23  ;;  %v12005_v54 = vld [vmem:[#allocation2 + $0x30] sm:$0xff]  }
 0xc98   : > { %v9704_v29 = vunpack.c.h.b16 %v12005_v54 }
 0xc99   : > { %v5879_v47 = vpack.c.b16 %v11999_v13, %v11999_v13 }
 0xc9a   : > { %v5882_v15 = vpack.c.b16 %v9704_v29, %v9704_v29 }
 0xc9b   : > { %v5895_v43 = vshrl.u32 %v5879_v47, 16  ;;  %v5898_v11 = vshll.u32 %v5879_v47, 16 }
 0xc9c   : > { %v5919_v53 = vshrl.u32 %v5882_v15, 16  ;;  %v5922_v52 = vshll.u32 %v5882_v15, 16  ;;  %v12035_v15 = vld [vmem:[#allocation2 + $0x70] sm:$0xff]  }
 0xc9d   : > { %v5897_v14 = vrot.slane %v5895_v43, 4  ;;  %v5900_v58 = vrot.slane %v5898_v11, 5  ;;  %v12027_v11 = vld [vmem:[#allocation2 + $0x38] sm:$0xff]  }
 0xc9e   : > { %v5781_v37 = vpop.permute.xlu0 %5780  ;;  %v5921_v30 = vrot.slane %v5919_v53, 4  ;;  %v5924_v31 = vrot.slane %v5922_v52, 5 }
 0xc9f   : > { %5802 = vst.msk [vmem:[#allocation2 + $0x28] sm:$0xf] %vm1392_vm15, %v5781_v37  ;;  %v5901_v57 = vor.u32 %v5900_v58, %v5897_v14  ;;  %v5991_v58 = vrot.slane %v9942_v23, 5 }
 0xca0   : > { %v5925_v43 = vor.u32 %v5924_v31, %v5921_v30 }
 0xca1   : > { %5952 = vrot.lane.b32.xlu0 %v5901_v57, %s12953_s29  ;;  %v12919_v57 = vunpack.c.l.b16 %v12027_v11 }
 0xca3   : > { %v5986_v53 = vpack.c.b16 %v12919_v57, %v9704_v29 }
 0xca6   : > { %v9945_v28 = vld [vmem:[#allocation2 + $0x28] sm:$0xff]  }
 0xca7   : > { %v5789_v60 = vpop.permute.xlu2 %5788  ;;  %v5993_v8 = vrot.slane %v9945_v28, 5  ;;  %v12013_v63 = vunpack.c.l.b16 %v9945_v28 }
 0xca8   : > { %5806 = vst.msk [vmem:[#allocation2 + $0x58] sm:$0xf] %vm1392_vm15, %v5789_v60 }
 0xca9   : > { %6002 = vrot.lane.b32.xlu0 %v5992_v34, %s12954_s0  ;;  %6004 = vrot.lane.b32.xlu1 %v5993_v8, %s12954_s0  ;;  %v5881_v51 = vpack.c.b16 %v12013_v63, %v12013_v63  ;;  %v12045_v34 = vunpack.c.l.b16 %v12035_v15  ;;  %v9046_v8 = vld [vmem:[%s12877_s5 + $0x74] sm:$0x3] }
 0xcab   : > { %v5911_v9 = vshrl.u32 %v5881_v51, 16  ;;  %v5914_v45 = vshll.u32 %v5881_v51, 16  ;;  %v6434_v51 = vunpack.c.l.b16 %v9046_v8 }
 0xcad   : > { %v5913_v4 = vrot.slane %v5911_v9, 4  ;;  %v5916_v56 = vrot.slane %v5914_v45, 5  ;;  %v12054_v45 = vld [vmem:[#allocation2 + $0x50] sm:$0xff]   ;;  %v6437_v30 = vpack.c.b16 %v6434_v51, %v6434_v51  ;;  %v9036_v51 = vld [vmem:[%s12877_s5 + $0x4c] sm:$0x3] }
 0xcaf   : > { %v5785_v55 = vpop.permute.xlu0 %5784  ;;  %v5917_v47 = vor.u32 %v5916_v56, %v5913_v4  ;;  %v12029_v32 = vld [vmem:[#allocation2 + $0x58] sm:$0xff]   ;;  %v12918_v56 = vunpack.c.l.b16 %v12054_v45 }
 0xcb0   : > { %5804 = vst.msk [vmem:[#allocation2 + $0x40] sm:$0xf] %vm1392_vm15, %v5785_v55  ;;  %v12033_v19 = vunpack.c.l.b16 %v12029_v32  ;;  %v5994_v55 = vrot.slane %v5986_v53, 5 }
 0xcb1   : > { %5956 = vrot.lane.b32.xlu2 %v5917_v47, %s12953_s29  ;;  %5998 = vrot.lane.b32.xlu1 %v5990_v49, %s12954_s0  ;;  %v6383_v49 = vpack.c.b16 %v12045_v34, %v12045_v34 }
 0xcb2   : > { %5958 = vrot.lane.b32.xlu0 %v5925_v43, %s12953_s29  ;;  %v5885_v52 = vpack.c.b16 %v12033_v19, %v12033_v19 }
 0xcb3   : > { %v6385_v8 = vshrl.u32 %v6383_v49, 16  ;;  %v6388_v53 = vshll.u32 %v6383_v49, 16 }
 0xcb4   : > { %v5943_v29 = vshrl.u32 %v5885_v52, 16  ;;  %v5946_v43 = vshll.u32 %v5885_v52, 16  ;;  %v9041_v52 = vld [vmem:[%s12877_s5 + $0x60] sm:$0x3] }
 0xcb5   : > { %v6387_v57 = vrot.slane %v6385_v8, 4  ;;  %v6390_v33 = vrot.slane %v6388_v53, 5 }
 0xcb7   : > { %v5787_v14 = vpop.permute.xlu1 %5786  ;;  %v9948_v37 = vld [vmem:[#allocation2 + $0x40] sm:$0xff]  }
 0xcb8   : > { %5805 = vst.msk [vmem:[#allocation2 + $0x4c] sm:$0xf] %vm1392_vm15, %v5787_v14  ;;  %v5995_v28 = vrot.slane %v9948_v37, 5  ;;  %v12038_v60 = vunpack.c.l.b16 %v9948_v37  ;;  %v6444_v14 = vsel %vm1860_vm3, %v6437_v30, 0  ;;  %v6246_v30 = vunpack.c.l.b16 %v9041_v52 }
 0xcb9   : > { %6000 = vrot.lane.b32.xlu2 %v5991_v58, %s12954_s0  ;;  %6451 = vmatpush.bf16.msra.mxu2 %v6444_v14 }
 0xcba   : > { %6008 = vrot.lane.b32.xlu0 %v5995_v28, %s12954_s0  ;;  %v5883_v23 = vpack.c.b16 %v12038_v60, %v12038_v60 }
 0xcbc   : > { %v5927_v2 = vshrl.u32 %v5883_v23, 16  ;;  %v5930_v9 = vshll.u32 %v5883_v23, 16 }
 0xcbe   : > { %v5929_v31 = vrot.slane %v5927_v2, 4  ;;  %v5932_v4 = vrot.slane %v5930_v9, 5  ;;  %v5945_v2 = vrot.slane %v5943_v29, 4  ;;  %v5948_v9 = vrot.slane %v5946_v43, 5 }
 0xcbf   : > { %v12059_v47 = vld [vmem:[#allocation2 + $0x48] sm:$0xff]  }
 0xcc0   : > { %v5933_v58 = vor.u32 %v5932_v4, %v5929_v31  ;;  %v9716_v37 = vunpack.c.h.b16 %v12059_v47  ;;  %v6328_v31 = vunpack.c.l.b16 %v9036_v51  ;;  %v5949_v18 = vor.u32 %v5948_v9, %v5945_v2 }
 0xcc1   : > { %6006 = vrot.lane.b32.xlu2 %v5994_v55, %s12954_s0 }
 0xcc2   : > { %5960 = vrot.lane.b32.xlu1 %v5933_v58, %s12953_s29  ;;  %v5988_v28 = vpack.c.b16 %v12918_v56, %v9716_v37  ;;  %v5884_v23 = vpack.c.b16 %v9716_v37, %v9716_v37  ;;  %v6249_v58 = vpack.c.b16 %v6246_v30, %v6246_v30  ;;  %v6331_v56 = vpack.c.b16 %v6328_v31, %v6328_v31  ;;  %v9299_v30 = vld [vmem:[%s12877_s5 + $0x6c] sm:$0xff]  ;;  %v9297_v31 = vld [vmem:[%s12877_s5 + $0x58] sm:$0xff] }
 0xcc3   : > { %6452 = vmatpush.bf16.msra.mxu2 %v9299_v30 }
 0xcc4   : > { %v5996_v4 = vrot.slane %v5988_v28, 5  ;;  %v5935_v55 = vshrl.u32 %v5884_v23, 16  ;;  %v5938_v14 = vshll.u32 %v5884_v23, 16  ;;  %v6265_v61 = vsel %vm1860_vm3, %v6249_v58, 0  ;;  %v12081_v23 = vld [vmem:[#allocation2 + $0x68] sm:$0xff]  }
 0xcc5   : > { %v6347_v29 = vsel %vm1860_vm3, %v6331_v56, 0  ;;  %6272 = vmatpush.bf16.msra.mxu0 %v6265_v61  ;;  %v12079_v28 = vor.u32 %v6390_v33, %v6387_v57  ;;  %v5997_v56 = vrot.slane %v12029_v32, 5  ;;  %v12926_v61 = vunpack.c.l.b16 %v12081_v23 }
 0xcc6   : > { %6010 = vrot.lane.b32.xlu0 %v5996_v4, %s12954_s0  ;;  %v5937_v49 = vrot.slane %v5935_v55, 4  ;;  %v5940_v37 = vrot.slane %v5938_v14, 5  ;;  %6354 = vmatpush.bf16.msra.mxu1 %v6347_v29  ;;  %v12925_v32 = vrot.slane %v12035_v15, 5  ;;  %v9295_v4 = vld [vmem:[%s12877_s5 + $0x44] sm:$0xff]  ;;  %v5951_v55 = vpop.permute.xlu2 %5950 }
 0xcc7   : > { %v5791_v0 = vpop.permute.xlu0 %5790  ;;  %v9298_v14 = vld [vmem:[%s12877_s5 + $0x64] sm:$0xff] }
 0xcc8   : > { %5807 = vst.msk [vmem:[#allocation2 + $0x64] sm:$0xf] %vm1392_vm15, %v5791_v0  ;;  %v5941_v43 = vor.u32 %v5940_v37, %v5937_v49  ;;  %6453 = vmatpush.bf16.msra.mxu2 %v9298_v14  ;;  %v9296_v49 = vld [vmem:[%s12877_s5 + $0x50] sm:$0xff]  ;;  %v9294_v37 = vld [vmem:[%s12877_s5 + $0x3c] sm:$0xff] }
 0xcc9   : > { %5964 = vrot.lane.b32.xlu2 %v5949_v18, %s12953_s29  ;;  %6273 = vmatpush.bf16.msra.mxu0 %v9297_v31 }
 0xcca   : > { %5962 = vrot.lane.b32.xlu1 %v5941_v43, %s12953_s29  ;;  %6355 = vmatpush.bf16.msra.mxu1 %v9295_v4  ;;  %v12964_v43 = vunpack.c.h.b16 %v11757_v48 }
 0xccd   : > { %6274 = vmatpush.bf16.msra.mxu0 %v9296_v49 }
 0xcce   : > { %6392 = vrot.lane.b32.xlu0 %v12079_v28, %s12953_s29  ;;  %6356 = vmatpush.bf16.msra.mxu1 %v9294_v37 }
 0xccf   : > { %v12085_v8 = vld [vmem:[#allocation2 + $0x60] sm:$0xff]  }
 0xcd0   : > { %v9728_v0 = vunpack.c.h.b16 %v12085_v8 }
 0xcd2   : > { %6012 = vrot.lane.b32.xlu1 %v5997_v56, %s12954_s0  ;;  %v6059_v18 = vpack.c.b16 %v9728_v0, %v9728_v0  ;;  %v6072_v33 = vpack.c.b16 %v12926_v61, %v9728_v0  ;;  %v5871_v56 = vpack.c.b16 %v11999_v13, %v12964_v43 }
 0xcd4   : > { %v6061_v57 = vshrl.u32 %v6059_v18, 16  ;;  %v6064_v53 = vshll.u32 %v6059_v18, 16  ;;  %v6073_v2 = vrot.slane %v6072_v33, 5 }
 0xcd6   : > { %v6063_v52 = vrot.slane %v6061_v57, 4  ;;  %v6066_v51 = vrot.slane %v6064_v53, 5  ;;  %v12924_v57 = vunpack.c.h.b16 %v12003_v3 }
 0xcd8   : > { %v6067_v9 = vor.u32 %v6066_v51, %v6063_v52  ;;  %v5873_v30 = vpack.c.b16 %v12013_v63, %v12924_v57 }
 0xcda   : > { %6074 = vrot.lane.b32.xlu1 %v6073_v2, %s12954_s0  ;;  %6068 = vrot.lane.b32.xlu2 %v6067_v9, %s12953_s29 }
 0xce2   : > { %6398 = vrot.lane.b32.xlu2 %v12925_v32, %s12954_s0 }
 0xd03   : > { %v5955_v29 = vpop.permute.xlu1 %5954 }
 0xd04   : > { %v6022_v48 = vsel %vm1607_vm4, %v11982_v16, %v5955_v29 }
 0xd0b   : > { %v5957_v58 = vpop.permute.xlu2 %5956 }
 0xd0c   : > { %v6025_v13 = vsel %vm1607_vm4, %v5873_v30, %v5957_v58 }
 0xd13   : > { %v5953_v0 = vpop.permute.xlu0 %5952  ;;  %v6001_v18 = vpop.permute.xlu2 %6000 }
 0xd14   : > { %v6019_v33 = vsel %vm1607_vm4, %v5871_v56, %v5953_v0 }
 0xd15   : > { %v6041_v53 = vsel %vm1632_vm7, %v6019_v33, %v6001_v18 }
 0xd16   : > { %v6089_v52 = vunpack.c.l.b16 %v6041_v53  ;;  %v6090_v51 = vunpack.c.h.b16 %v6041_v53 }
 0xd18   : > { %v6105_v2 = vpack.c.b16 %v6089_v52, %v6089_v52  ;;  %v6106_v9 = vpack.c.b16 %v6090_v51, %v6090_v51 }
 0xd1a   : > { %v6127_v31 = vshrl.u32 %v6106_v9, 16  ;;  %v6122_v4 = vshrl.u32 %v6105_v2, 16  ;;  %v6130_v43 = vshll.u32 %v6106_v9, 16  ;;  %v6016_v9 = vsel %vm1607_vm4, %v11985_v41, %v5951_v55 }
 0xd1b   : > { %v6003_v14 = vpop.permute.xlu0 %6002  ;;  %v6005_v49 = vpop.permute.xlu1 %6004 }
 0xd1c   : > { %v6129_v37 = vrot.slane %v6127_v31, 7  ;;  %v6043_v56 = vsel %vm1632_vm7, %v6022_v48, %v6003_v14  ;;  %v6045_v0 = vsel %vm1632_vm7, %v6025_v13, %v6005_v49  ;;  %v9048_v29 = vrot.slane %v6122_v4, 11 }
 0xd1d   : > { %v6091_v18 = vunpack.c.l.b16 %v6043_v56  ;;  %v6092_v33 = vunpack.c.h.b16 %v6043_v56  ;;  %v6093_v53 = vunpack.c.l.b16 %v6045_v0  ;;  %v6094_v52 = vunpack.c.h.b16 %v6045_v0 }
 0xd1e   : > { %v6132_v63 = vor.u32 %v6130_v43, %v6129_v37 }
 0xd1f   : > { %v6107_v51 = vpack.c.b16 %v6091_v18, %v6091_v18  ;;  %v6108_v57 = vpack.c.b16 %v6092_v33, %v6092_v33  ;;  %v6109_v32 = vpack.c.b16 %v6093_v53, %v6093_v53  ;;  %v6110_v16 = vpack.c.b16 %v6094_v52, %v6094_v52  ;;  %v6007_v18 = vpop.permute.xlu2 %6006 }
 0xd20   : > { %v6133_v31 = vsel %vm10489_vm5, %v9048_v29, %v6132_v63 }
 0xd21   : > { %v6135_v58 = vshrl.u32 %v6107_v51, 16  ;;  %v6140_v2 = vshrl.u32 %v6108_v57, 16  ;;  %v6148_v30 = vshrl.u32 %v6109_v32, 16  ;;  %v6153_v61 = vshrl.u32 %v6110_v16, 16 }
 0xd22   : > { %v6143_v13 = vshll.u32 %v6108_v57, 16  ;;  %v6156_v43 = vshll.u32 %v6110_v16, 16  ;;  %v6225_v16 = vunpack.c.l.b16 %v6133_v31 }
 0xd23   : > { %v6142_v48 = vrot.slane %v6140_v2, 7  ;;  %v5999_v14 = vpop.permute.xlu1 %5998  ;;  %v9049_v49 = vrot.slane %v6135_v58, 11  ;;  %v6155_v37 = vrot.slane %v6153_v61, 7  ;;  %v9050_v41 = vrot.slane %v6148_v30, 11 }
 0xd24   : > { %v6039_v56 = vsel %vm1632_vm7, %v6016_v9, %v5999_v14  ;;  %v5959_v0 = vpop.permute.xlu0 %5958 }
 0xd25   : > { %v6145_v4 = vor.u32 %v6143_v13, %v6142_v48  ;;  %v6297_v33 = vunpack.c.l.b16 %v6039_v56  ;;  %v6298_v32 = vunpack.c.h.b16 %v6039_v56  ;;  %v6028_v53 = vsel %vm1607_vm4, %v12005_v54, %v5959_v0 }
 0xd26   : > { %v6158_v55 = vor.u32 %v6156_v43, %v6155_v37  ;;  %v6047_v52 = vsel %vm1632_vm7, %v6028_v53, %v6007_v18  ;;  %v12927_v53 = vunpack.c.h.b16 %v12027_v11 }
 0xd27   : > { %v6146_v57 = vsel %vm10489_vm5, %v9049_v49, %v6145_v4  ;;  %v6299_v63 = vpack.c.b16 %v6297_v33, %v6297_v33  ;;  %v6300_v61 = vpack.c.b16 %v6298_v32, %v6298_v32  ;;  %v6095_v51 = vunpack.c.l.b16 %v6047_v52 }
 0xd28   : > { %v6226_v29 = vunpack.c.l.b16 %v6146_v57  ;;  %v6159_v58 = vsel %vm10489_vm5, %v9050_v41, %v6158_v55  ;;  %v6096_v2 = vunpack.c.h.b16 %v6047_v52 }
 0xd29   : > { %v6227_v9 = vunpack.c.l.b16 %v6159_v58  ;;  %v6302_v48 = vshrl.u32 %v6299_v63, 16  ;;  %v6307_v13 = vshrl.u32 %v6300_v61, 16  ;;  %v6111_v30 = vpack.c.b16 %v6095_v51, %v6095_v51 }
 0xd2a   : > { %v6233_v54 = vpack.c.b16 %v6226_v29, %v6225_v16  ;;  %v6112_v14 = vpack.c.b16 %v6096_v2, %v6096_v2  ;;  %v6310_v56 = vshll.u32 %v6300_v61, 16  ;;  %v5965_v61 = vpop.permute.xlu2 %5964  ;;  %v5875_v51 = vpack.c.b16 %v12038_v60, %v12927_v53 }
 0xd2b   : > { %v6316_v37 = vpack.c.b16 %v6227_v9, %v6226_v29  ;;  %v6309_v43 = vrot.slane %v6307_v13, 7  ;;  %v9068_v49 = vrot.slane %v6302_v48, 11  ;;  %v6161_v31 = vshrl.u32 %v6111_v30, 16 }
 0xd2c   : > { %v6166_v0 = vshrl.u32 %v6112_v14, 16  ;;  %9064 = vmatmul.msk.bf16.vlgmr.msra.gmra.mxu0 %vm1847_vm8, %v6233_v54  ;;  %v6169_v33 = vshll.u32 %v6112_v14, 16  ;;  %v6009_v52 = vpop.permute.xlu0 %6008 }
 0xd2d   : > { %v6312_v4 = vor.u32 %v6310_v56, %v6309_v43  ;;  %9090 = vmatmul.msk.bf16.vlgmr.msra.gmra.mxu2 %vm1847_vm8, %v6316_v37  ;;  %v9051_v57 = vrot.slane %v6161_v31, 11 }
 0xd2e   : > { %v6168_v18 = vrot.slane %v6166_v0, 7  ;;  %v9732_v0 = vunpack.c.h.b16 %v12081_v23 }
 0xd2f   : > { %v6313_v32 = vsel %vm10489_vm5, %v9068_v49, %v6312_v4 }
 0xd30   : > { %v6314_v41 = vunpack.c.l.b16 %v6313_v32  ;;  %v6171_v55 = vor.u32 %v6169_v33, %v6168_v18 }
 0xd32   : > { %v6315_v63 = vpack.c.b16 %v6225_v16, %v6314_v41  ;;  %v6172_v29 = vsel %vm10489_vm5, %v9051_v57, %v6171_v55  ;;  %v9720_v41 = vunpack.c.h.b16 %v12054_v45 }
 0xd33   : > { %v6228_v13 = vunpack.c.l.b16 %v6172_v29 }
 0xd34   : > { %v5961_v58 = vpop.permute.xlu1 %5960  ;;  %9077 = vmatmul.msk.bf16.vlgmr.msra.gmra.mxu1 %vm1847_vm8, %v6315_v63  ;;  %v6069_v4 = vpop.permute.xlu2 %6068 }
 0xd35   : > { %v6031_v2 = vsel %vm1607_vm4, %v5875_v51, %v5961_v58  ;;  %v6234_v56 = vpack.c.b16 %v6228_v13, %v6227_v9 }
 0xd36   : > { %v6049_v48 = vsel %vm1632_vm7, %v6031_v2, %v6009_v52  ;;  %v12163_v52 = vpack.c.b16 %v12045_v34, %v9732_v0 }
 0xd37   : > { %v6097_v54 = vunpack.c.l.b16 %v6049_v48  ;;  %v6098_v30 = vunpack.c.h.b16 %v6049_v48 }
 0xd38   : > { %v6011_v14 = vpop.permute.xlu0 %6010 }
 0xd39   : > { %v6113_v16 = vpack.c.b16 %v6097_v54, %v6097_v54  ;;  %v6114_v43 = vpack.c.b16 %v6098_v30, %v6098_v30  ;;  %v5877_v54 = vpack.c.b16 %v12033_v19, %v9720_v41 }
 0xd3b   : > { %v6174_v60 = vshrl.u32 %v6113_v16, 16  ;;  %v6179_v49 = vshrl.u32 %v6114_v43, 16  ;;  %v6182_v33 = vshll.u32 %v6114_v43, 16  ;;  %v6037_v43 = vsel %vm1607_vm4, %v5877_v54, %v5965_v61 }
 0xd3c   : > { %v5963_v31 = vpop.permute.xlu1 %5962  ;;  %9065 = vmatmul.msk.bf16.gmra.mxu0 %vm1847_vm8, %v6234_v56  ;;  %v6399_v34 = vpop.permute.xlu2 %6398 }
 0xd3d   : > { %v6181_v18 = vrot.slane %v6179_v49, 7  ;;  %v6034_v32 = vsel %vm1607_vm4, %v12059_v47, %v5963_v31  ;;  %v9052_v9 = vrot.slane %v6174_v60, 11 }
 0xd3e   : > { %v6051_v55 = vsel %vm1632_vm7, %v6034_v32, %v6011_v14 }
 0xd3f   : > { %v6184_v57 = vor.u32 %v6182_v33, %v6181_v18  ;;  %v6099_v63 = vunpack.c.l.b16 %v6051_v55  ;;  %v6100_v51 = vunpack.c.h.b16 %v6051_v55 }
 0xd40   : > { %v6393_v29 = vpop.permute.xlu0 %6392 }
 0xd41   : > { %v6115_v58 = vpack.c.b16 %v6099_v63, %v6099_v63  ;;  %v6116_v2 = vpack.c.b16 %v6100_v51, %v6100_v51  ;;  %v6185_v48 = vsel %vm10489_vm5, %v9052_v9, %v6184_v57  ;;  %v6402_v14 = vsel %vm1607_vm4, %v12163_v52, %v6393_v29 }
 0xd42   : > { %v6229_v47 = vunpack.c.l.b16 %v6185_v48  ;;  %v6404_v19 = vsel %vm1632_vm7, %v6402_v14, %v6399_v34  ;;  %v6078_v51 = vsel %vm1607_vm4, %v12085_v8, %v6069_v4 }
 0xd43   : > { %v6187_v30 = vshrl.u32 %v6115_v58, 16  ;;  %v6192_v16 = vshrl.u32 %v6116_v2, 16  ;;  %v6195_v49 = vshll.u32 %v6116_v2, 16  ;;  %v6407_v57 = vunpack.c.h.b16 %v6404_v19 }
 0xd44   : > { %v6013_v56 = vpop.permute.xlu1 %6012  ;;  %9078 = vmatmul.msk.bf16.gmra.mxu1 %vm1847_vm8, %v6316_v37  ;;  %v6317_v0 = vpack.c.b16 %v6229_v47, %v6228_v13  ;;  %v6406_v54 = vunpack.c.l.b16 %v6404_v19 }
 0xd45   : > { %v6194_v60 = vrot.slane %v6192_v16, 7  ;;  %v6053_v31 = vsel %vm1632_vm7, %v6037_v43, %v6013_v56  ;;  %v9053_v32 = vrot.slane %v6187_v30, 11  ;;  %v6409_v30 = vpack.c.b16 %v6407_v57, %v6407_v57 }
 0xd46   : > { %v6101_v18 = vunpack.c.l.b16 %v6053_v31  ;;  %v6102_v33 = vunpack.c.h.b16 %v6053_v31  ;;  %9091 = vmatmul.msk.bf16.gmra.mxu2 %vm1847_vm8, %v6317_v0  ;;  %v6408_v4 = vpack.c.b16 %v6406_v54, %v6406_v54 }
 0xd47   : > { %v6197_v41 = vor.u32 %v6195_v49, %v6194_v60  ;;  %v6419_v57 = vshll.u32 %v6409_v30, 16 }
 0xd48   : > { %v6117_v55 = vpack.c.b16 %v6101_v18, %v6101_v18  ;;  %v6118_v9 = vpack.c.b16 %v6102_v33, %v6102_v33  ;;  %v6416_v18 = vshrl.u32 %v6409_v30, 16 }
 0xd49   : > { %v6198_v61 = vsel %vm10489_vm5, %v9053_v32, %v6197_v41 }
 0xd4a   : > { %v6200_v37 = vshrl.u32 %v6117_v55, 16  ;;  %v6205_v13 = vshrl.u32 %v6118_v9, 16  ;;  %v6230_v63 = vunpack.c.l.b16 %v6198_v61  ;;  %v6208_v58 = vshll.u32 %v6118_v9, 16 }
 0xd4b   : > { %v6418_v9 = vrot.slane %v6416_v18, 7 }
 0xd4c   : > { %v6207_v29 = vrot.slane %v6205_v13, 7  ;;  %v6075_v2 = vpop.permute.xlu1 %6074  ;;  %v6235_v16 = vpack.c.b16 %v6230_v63, %v6229_v47  ;;  %v9054_v14 = vrot.slane %v6200_v37, 11  ;;  %v6411_v47 = vshrl.u32 %v6408_v4, 16 }
 0xd4d   : > { %v6080_v48 = vsel %vm1632_vm7, %v6078_v51, %v6075_v2 }
 0xd4e   : > { %v6210_v34 = vor.u32 %v6208_v58, %v6207_v29  ;;  %v6103_v43 = vunpack.c.l.b16 %v6080_v48  ;;  %v6104_v56 = vunpack.c.h.b16 %v6080_v48  ;;  %9066 = vmatmul.msk.bf16.gmra.mxu0 %vm1847_vm8, %v6235_v16  ;;  %v9081_v29 = vrot.slane %v6411_v47, 11 }
 0xd4f   : > { %v6421_v58 = vor.u32 %v6419_v57, %v6418_v9 }
 0xd50   : > { %v6211_v60 = vsel %vm10489_vm5, %v9054_v14, %v6210_v34  ;;  %v6119_v49 = vpack.c.b16 %v6103_v43, %v6103_v43  ;;  %v6120_v31 = vpack.c.b16 %v6104_v56, %v6104_v56  ;;  %v12195_v34 = vld [vmem:[%s12878_s6 + $0x1] ss:$0 sm:$0xff] }
 0xd51   : > { %v6231_v8 = vunpack.c.l.b16 %v6211_v60 }
 0xd52   : > { %v6213_v33 = vshrl.u32 %v6119_v49, 16  ;;  %v6218_v32 = vshrl.u32 %v6120_v31, 16  ;;  %v6221_v55 = vshll.u32 %v6120_v31, 16 }
 0xd53   : > { %v6318_v41 = vpack.c.b16 %v6231_v8, %v6230_v63  ;;  %v6422_v63 = vsel %vm10489_vm5, %v9081_v29, %v6421_v58 }
 0xd54   : > { %v6220_v19 = vrot.slane %v6218_v32, 7  ;;  %9079 = vmatmul.msk.bf16.gmra.mxu1 %vm1847_vm8, %v6317_v0  ;;  %v9055_v61 = vrot.slane %v6213_v33, 11  ;;  %v6423_v0 = vunpack.c.l.b16 %v6422_v63 }
 0xd56   : > { %v6223_v37 = vor.u32 %v6221_v55, %v6220_v19  ;;  %9092 = vmatmul.msk.bf16.gmra.mxu2 %vm1847_vm8, %v6318_v41 }
 0xd58   : > { %v6224_v13 = vsel %vm10489_vm5, %v9055_v61, %v6223_v37 }
 0xd59   : > { %v6232_v51 = vunpack.c.l.b16 %v6224_v13 }
 0xd5b   : > { %v6236_v2 = vpack.c.b16 %v6232_v51, %v6231_v8  ;;  %v6424_v48 = vpack.c.b16 %v6423_v0, %v6232_v51 }
 0xd5e   : > { %9067 = vmatmul.msk.bf16.gmra.mxu0 %vm1847_vm8, %v6236_v2 }
 0xd64   : > { %9080 = vmatmul.msk.bf16.gmra.mxu1 %vm1847_vm8, %v6318_v41 }
 0xd66   : > { %9093 = vmatmul.msk.bf16.gmra.mxu2 %vm1847_vm8, %v6424_v48 }
 0xda9   : > { %v6276_v54 = vpop.f32.mrf.mxu0 }
 0xdb0   : > { %v6455_v30 = vpop.f32.mrf.mxu2 }
 0xdb1   : > { %v6358_v16 = vpop.f32.mrf.mxu1  ;;  %v6278_v43 = vpop.f32.mrf.mxu0 }
 0xdb2   : > { %v6359_v14 = vadd.f32 %v6358_v16, %v6276_v54 }
 0xdb4   : > { %v6475_v56 = vadd.f32 %v6455_v30, %v6359_v14 }
 0xdb6   : > { %v6486_v60 = vadd.f32 %v12195_v34, %v6475_v56 }
 0xdb8   : > { %vm6494_vm12 = vcmp.ge.f32.partialorder %v6486_v60, 0.0  ;;  %v6502_v49 = vmul.f32 0.05, %v6486_v60  ;;  %v6457_v18 = vpop.f32.mrf.mxu2 }
 0xdb9   : > { %v6360_v31 = vpop.f32.mrf.mxu1  ;;  %v6281_v41 = vpop.f32.mrf.mxu0 }
 0xdba   : > { %v12198_v8 = vsel %vm6494_vm12, %v6486_v60, %v6502_v49  ;;  %v6361_v4 = vadd.f32 %v6360_v31, %v6278_v43 }
 0xdbb   : > { %v6536_v33 = vpack.c.bf16 %v12198_v8, %v12198_v8 }
 0xdbc   : > { %v6476_v32 = vadd.f32 %v6457_v18, %v6361_v4 }
 0xdbd   : > { %6552 = vrot.lane.b32.xlu0 %v6536_v33, %s12952_s26 }
 0xdbe   : > { %v6487_v19 = vadd.f32 %v12195_v34, %v6476_v32 }
 0xdc0   : > { %vm6495_vm14 = vcmp.ge.f32.partialorder %v6487_v19, 0.0  ;;  %v6503_v55 = vmul.f32 0.05, %v6487_v19 }
 0xdc1   : > { %v6363_v47 = vpop.f32.mrf.mxu1  ;;  %v6283_v61 = vpop.f32.mrf.mxu0 }
 0xdc2   : > { %v12204_v9 = vsel %vm6495_vm14, %v6487_v19, %v6503_v55  ;;  %v6364_v37 = vadd.f32 %v6363_v47, %v6281_v41 }
 0xdc3   : > { %v6537_v57 = vpack.c.bf16 %v12204_v9, %v12204_v9 }
 0xdc5   : > { %6554 = vrot.lane.b32.xlu1 %v6537_v57, %s12952_s26 }
 0xdc9   : > { %v6365_v13 = vpop.f32.mrf.mxu1  ;;  %v6460_v51 = vpop.f32.mrf.mxu2 }
 0xdca   : > { %v6477_v29 = vadd.f32 %v6460_v51, %v6364_v37  ;;  %v6366_v63 = vadd.f32 %v6365_v13, %v6283_v61 }
 0xdcb   : > { %v6286_v48 = vpop.f32.mrf.mxu0 }
 0xdcc   : > { %v6488_v58 = vadd.f32 %v12195_v34, %v6477_v29 }
 0xdce   : > { %vm6496_vm9 = vcmp.ge.f32.partialorder %v6488_v58, 0.0  ;;  %v6504_v2 = vmul.f32 0.05, %v6488_v58 }
 0xdd0   : > { %v12210_v0 = vsel %vm6496_vm9, %v6488_v58, %v6504_v2 }
 0xdd1   : > { %v6368_v54 = vpop.f32.mrf.mxu1  ;;  %v6462_v30 = vpop.f32.mrf.mxu2  ;;  %v6538_v16 = vpack.c.bf16 %v12210_v0, %v12210_v0 }
 0xdd2   : > { %v6478_v14 = vadd.f32 %v6462_v30, %v6366_v63  ;;  %v6369_v60 = vadd.f32 %v6368_v54, %v6286_v48 }
 0xdd3   : > { %6556 = vrot.lane.b32.xlu2 %v6538_v16, %s12952_s26  ;;  %v6288_v32 = vpop.f32.mrf.mxu0 }
 0xdd4   : > { %v6489_v43 = vadd.f32 %v12195_v34, %v6478_v14 }
 0xdd6   : > { %vm6497_vm10 = vcmp.ge.f32.partialorder %v6489_v43, 0.0  ;;  %v6505_v56 = vmul.f32 0.05, %v6489_v43 }
 0xdd8   : > { %v12216_v49 = vsel %vm6497_vm10, %v6489_v43, %v6505_v56 }
 0xdd9   : > { %v6370_v31 = vpop.f32.mrf.mxu1  ;;  %v6465_v4 = vpop.f32.mrf.mxu2  ;;  %v6539_v18 = vpack.c.bf16 %v12216_v49, %v12216_v49 }
 0xdda   : > { %v6479_v33 = vadd.f32 %v6465_v4, %v6369_v60  ;;  %v6371_v55 = vadd.f32 %v6370_v31, %v6288_v32 }
 0xddb   : > { %6558 = vrot.lane.b32.xlu0 %v6539_v18, %s12952_s26  ;;  %v6291_v29 = vpop.f32.mrf.mxu0 }
 0xddc   : > { %v6490_v41 = vadd.f32 %v12195_v34, %v6479_v33 }
 0xdde   : > { %vm6498_vm12 = vcmp.ge.f32.partialorder %v6490_v41, 0.0  ;;  %v6506_v19 = vmul.f32 0.05, %v6490_v41 }
 0xde0   : > { %v12222_v47 = vsel %vm6498_vm12, %v6490_v41, %v6506_v19 }
 0xde1   : > { %v6467_v57 = vpop.f32.mrf.mxu2  ;;  %v6540_v61 = vpack.c.bf16 %v12222_v47, %v12222_v47  ;;  %v6373_v13 = vpop.f32.mrf.mxu1 }
 0xde2   : > { %v6480_v37 = vadd.f32 %v6467_v57, %v6371_v55  ;;  %v6374_v2 = vadd.f32 %v6373_v13, %v6291_v29 }
 0xde3   : > { %6560 = vrot.lane.b32.xlu1 %v6540_v61, %s12952_s26  ;;  %v6293_v56 = vpop.f32.mrf.mxu0 }
 0xde4   : > { %v6491_v51 = vadd.f32 %v12195_v34, %v6480_v37  ;;  %v9955_v37 = vld [vmem:[#allocation2 + $0x8] sm:$0xff]  }
 0xde5   : > { %v9743_v13 = vunpack.c.l.b16 %v9955_v37 }
 0xde6   : > { %vm6499_vm14 = vcmp.ge.f32.partialorder %v6491_v51, 0.0  ;;  %v6507_v58 = vmul.f32 0.05, %v6491_v51 }
 0xde8   : > { %v12228_v63 = vsel %vm6499_vm14, %v6491_v51, %v6507_v58  ;;  %v9744_v51 = vunpack.c.h.b16 %v9955_v37 }
 0xde9   : > { %v6470_v48 = vpop.f32.mrf.mxu2  ;;  %v6541_v54 = vpack.c.bf16 %v12228_v63, %v12228_v63  ;;  %v6375_v14 = vpop.f32.mrf.mxu1 }
 0xdea   : > { %v6481_v30 = vadd.f32 %v6470_v48, %v6374_v2  ;;  %v6376_v60 = vadd.f32 %v6375_v14, %v6293_v56 }
 0xdeb   : > { %6562 = vrot.lane.b32.xlu2 %v6541_v54, %s12952_s26  ;;  %v6758_v54 = vpack.c.b16 %v9743_v13, %v11988_v12  ;;  %v12965_v12 = vunpack.c.l.b16 %v12003_v3 }
 0xdec   : > { %v6492_v16 = vadd.f32 %v12195_v34, %v6481_v30 }
 0xdee   : > { %vm6500_vm9 = vcmp.ge.f32.partialorder %v6492_v16, 0.0  ;;  %v6508_v43 = vmul.f32 0.05, %v6492_v16 }
 0xdf0   : > { %v12234_v31 = vsel %vm6500_vm9, %v6492_v16, %v6508_v43 }
 0xdf1   : > { %v6472_v4 = vpop.f32.mrf.mxu2  ;;  %v6542_v18 = vpack.c.bf16 %v12234_v31, %v12234_v31 }
 0xdf2   : > { %v6482_v33 = vadd.f32 %v6472_v4, %v6376_v60  ;;  %v6766_v4 = vrot.slane %v6758_v54, 5 }
 0xdf3   : > { %6564 = vrot.lane.b32.xlu0 %v6542_v18, %s12952_s26 }
 0xdf4   : > { %v6493_v32 = vadd.f32 %v12195_v34, %v6482_v33 }
 0xdf6   : > { %vm6501_vm10 = vcmp.ge.f32.partialorder %v6493_v32, 0.0  ;;  %v6509_v41 = vmul.f32 0.05, %v6493_v32 }
 0xdf8   : > { %v12240_v19 = vsel %vm6501_vm10, %v6493_v32, %v6509_v41 }
 0xdf9   : > { %v6543_v55 = vpack.c.bf16 %v12240_v19, %v12240_v19 }
 0xdfb   : > { %6566 = vrot.lane.b32.xlu1 %v6543_v55, %s12952_s26 }
 0xe2d   : > { %v6557_v57 = vpop.permute.xlu2 %6556 }
 0xe2e   : > { %6578 = vst.msk [vmem:[#allocation2 + $0x28] sm:$0xf] %vm1392_vm15, %v6557_v57 }
 0xe2f   : > { %v6553_v61 = vpop.permute.xlu0 %6552 }
 0xe30   : > { %6576 = vst.msk [vmem:[#allocation2 + $0x10] sm:$0xf] %vm1392_vm15, %v6553_v61 }
 0xe35   : > { %v9959_v43 = vld [vmem:[#allocation2 + $0x28] sm:$0xff]  }
 0xe36   : > { %v12255_v41 = vunpack.c.l.b16 %v9959_v43 }
 0xe37   : > { %v6555_v29 = vpop.permute.xlu1 %6554  ;;  %v9956_v34 = vld [vmem:[#allocation2 + $0x10] sm:$0xff]  }
 0xe38   : > { %6577 = vst.msk [vmem:[#allocation2 + $0x1c] sm:$0xf] %vm1392_vm15, %v6555_v29  ;;  %v9747_v58 = vunpack.c.l.b16 %v9956_v34  ;;  %v6767_v2 = vrot.slane %v9956_v34, 5  ;;  %v6657_v13 = vpack.c.b16 %v12255_v41, %v12255_v41 }
 0xe3a   : > { %6776 = vrot.lane.b32.xlu1 %v6767_v2, %s12954_s0  ;;  %v6655_v48 = vpack.c.b16 %v9747_v58, %v9747_v58  ;;  %v12250_v30 = vpack.c.b16 %v9747_v58, %v9744_v51  ;;  %v6690_v54 = vshll.u32 %v6657_v13, 16 }
 0xe3c   : > { %v6671_v16 = vshrl.u32 %v6655_v48, 16  ;;  %v6674_v14 = vshll.u32 %v6655_v48, 16  ;;  %v6687_v48 = vshrl.u32 %v6657_v13, 16 }
 0xe3e   : > { %v6673_v56 = vrot.slane %v6671_v16, 4  ;;  %v6676_v60 = vrot.slane %v6674_v14, 5  ;;  %v6689_v16 = vrot.slane %v6687_v48, 4  ;;  %v6692_v14 = vrot.slane %v6690_v54, 5 }
 0xe3f   : > { %v12252_v18 = vld [vmem:[#allocation2 + $0x18] sm:$0xff]   ;;  %v7349_v54 = vsel %vm3663_vm13, %v12228_v63, 0.0 }
 0xe40   : > { %v6677_v33 = vor.u32 %v6676_v60, %v6673_v56  ;;  %v9752_v32 = vunpack.c.h.b16 %v12252_v18 }
 0xe42   : > { %6728 = vrot.lane.b32.xlu2 %v6677_v33, %s12953_s29  ;;  %v6656_v55 = vpack.c.b16 %v9752_v32, %v9752_v32  ;;  %6774 = vrot.lane.b32.xlu1 %v6766_v4, %s12954_s0  ;;  %v6760_v57 = vpack.c.b16 %v12965_v12, %v9752_v32  ;;  %v7341_v4 = vsel %vm3663_vm13, %v12204_v9, 0.0  ;;  %v6693_v33 = vor.u32 %v6692_v14, %v6689_v16 }
 0xe43   : > { %v7343_v12 = vsel %vm3663_vm13, %v12210_v0, 0.0  ;;  %v6769_v16 = vrot.slane %v9959_v43, 5  ;;  %v12966_v14 = vunpack.c.l.b16 %v12027_v11 }
 0xe44   : > { %v6679_v61 = vshrl.u32 %v6656_v55, 16  ;;  %v6682_v37 = vshll.u32 %v6656_v55, 16  ;;  %v6768_v58 = vrot.slane %v6760_v57, 5  ;;  %v7340_v55 = vsel %vm3663_vm13, %v12198_v8, 0.0 }
 0xe45   : > { %v6563_v51 = vpop.permute.xlu2 %6562  ;;  %v7342_v57 = vadd.f32 %v7341_v4, %v7340_v55 }
 0xe46   : > { %6581 = vst.msk [vmem:[#allocation2 + $0x4c] sm:$0xf] %vm1392_vm15, %v6563_v51  ;;  %v6681_v29 = vrot.slane %v6679_v61, 4  ;;  %v6684_v34 = vrot.slane %v6682_v37, 5  ;;  %v7345_v61 = vsel %vm3663_vm13, %v12216_v49, 0.0 }
 0xe47   : > { %v7344_v37 = vadd.f32 %v7343_v12, %v7342_v57  ;;  %v7351_v12 = vsel %vm3663_vm13, %v12234_v31, 0.0 }
 0xe48   : > { %v6685_v2 = vor.u32 %v6684_v34, %v6681_v29  ;;  %v7347_v34 = vsel %vm3663_vm13, %v12222_v47, 0.0 }
 0xe49   : > { %v7346_v48 = vadd.f32 %v7345_v61, %v7344_v37 }
 0xe4a   : > { %6778 = vrot.lane.b32.xlu2 %v6768_v58, %s12954_s0  ;;  %6730 = vrot.lane.b32.xlu0 %v6685_v2, %s12953_s29  ;;  %v7317_v58 = vsel %vm3663_vm13, %v11934_v26, 0.0  ;;  %v7318_v2 = vsel %vm3663_vm13, %v11940_v17, 0.0 }
 0xe4b   : > { %v7348_v55 = vadd.f32 %v7347_v34, %v7346_v48  ;;  %v7319_v25 = vadd.f32 %v7318_v2, %v7317_v58  ;;  %v7324_v48 = vsel %vm3663_vm13, %v11958_v21, 0.0 }
 0xe4d   : > { %v6559_v56 = vpop.permute.xlu0 %6558  ;;  %v12267_v60 = vld [vmem:[#allocation2 + $0x48] sm:$0xff]   ;;  %v7350_v43 = vadd.f32 %v7349_v54, %v7348_v55  ;;  %v7326_v55 = vsel %vm3663_vm13, %v11964_v27, 0.0 }
 0xe4e   : > { %6579 = vst.msk [vmem:[#allocation2 + $0x34] sm:$0xf] %vm1392_vm15, %v6559_v56  ;;  %v12272_v32 = vunpack.c.h.b16 %v12267_v60 }
 0xe4f   : > { %v7352_v40 = vadd.f32 %v7351_v12, %v7350_v43  ;;  %v7328_v12 = vsel %vm3663_vm13, %v11970_v20, 0.0 }
 0xe50   : > { %v6660_v29 = vpack.c.b16 %v12272_v32, %v12272_v32 }
 0xe52   : > { %6726 = vrot.lane.b32.xlu0 %v11995_v39, %s12953_s29  ;;  %6732 = vrot.lane.b32.xlu2 %v6693_v33, %s12953_s29  ;;  %v7320_v33 = vsel %vm3663_vm13, %v11946_v44, 0.0  ;;  %v6711_v57 = vshrl.u32 %v6660_v29, 16  ;;  %v6714_v53 = vshll.u32 %v6660_v29, 16 }
 0xe53   : > { %v7321_v34 = vadd.f32 %v7320_v33, %v7319_v25 }
 0xe54   : > { %v6713_v29 = vrot.slane %v6711_v57, 4  ;;  %v6716_v58 = vrot.slane %v6714_v53, 5 }
 0xe55   : > { %v6561_v13 = vpop.permute.xlu1 %6560  ;;  %v12283_v51 = vld [vmem:[#allocation2 + $0x30] sm:$0xff]  }
 0xe56   : > { %6580 = vst.msk [vmem:[#allocation2 + $0x40] sm:$0xf] %vm1392_vm15, %v6561_v13  ;;  %v9764_v39 = vunpack.c.h.b16 %v12283_v51 }
 0xe58   : > { %v6762_v56 = vpack.c.b16 %v12966_v14, %v9764_v39  ;;  %v6658_v4 = vpack.c.b16 %v9764_v39, %v9764_v39  ;;  %v7322_v14 = vsel %vm3663_vm13, %v11952_v10, 0.0 }
 0xe59   : > { %v7323_v54 = vadd.f32 %v7322_v14, %v7321_v34 }
 0xe5a   : > { %6780 = vrot.lane.b32.xlu0 %v6769_v16, %s12954_s0  ;;  %v6770_v13 = vrot.slane %v6762_v56, 5  ;;  %v6695_v61 = vshrl.u32 %v6658_v4, 16  ;;  %v6698_v37 = vshll.u32 %v6658_v4, 16  ;;  %v7353_v16 = vsel %vm3663_vm13, %v12240_v19, 0.0 }
 0xe5b   : > { %v7325_v33 = vadd.f32 %v7324_v48, %v7323_v54  ;;  %v9098_v54 = vld [vmem:[%s12879_s7 + $0x4c] sm:$0x3] }
 0xe5c   : > { %6782 = vrot.lane.b32.xlu2 %v6770_v13, %s12954_s0  ;;  %v6697_v39 = vrot.slane %v6695_v61, 4  ;;  %v6700_v24 = vrot.slane %v6698_v37, 5  ;;  %v7354_v13 = vadd.f32 %v7353_v16, %v7352_v40  ;;  %v6717_v61 = vor.u32 %v6716_v58, %v6713_v29  ;;  %v9103_v58 = vld [vmem:[%s12879_s7 + $0x60] sm:$0x3] }
 0xe5d   : > { %v9962_v56 = vld [vmem:[#allocation2 + $0x40] sm:$0xff]   ;;  %v7327_v53 = vadd.f32 %v7326_v55, %v7325_v33  ;;  %v7330_v37 = vsel %vm3663_vm13, %v11976_v42, 0.0  ;;  %v7022_v55 = vunpack.c.l.b16 %v9103_v58 }
 0xe5e   : > { %v6701_v4 = vor.u32 %v6700_v24, %v6697_v39  ;;  %v12311_v2 = vunpack.c.l.b16 %v9962_v56  ;;  %v7355_v43 = vsel %vm3663_vm13, %v7354_v13, 0.0  ;;  %v6771_v48 = vrot.slane %v9962_v56, 5 }
 0xe5f   : > { %v7329_v39 = vadd.f32 %v7328_v12, %v7327_v53  ;;  %v7356_v29 = vrot.slane %v7355_v43, 4  ;;  %v7104_v13 = vunpack.c.l.b16 %v9098_v54  ;;  %v12967_v56 = vunpack.c.l.b16 %v12054_v45 }
 0xe60   : > { %6734 = vrot.lane.b32.xlu1 %v6701_v4, %s12953_s29  ;;  %v6659_v25 = vpack.c.b16 %v12311_v2, %v12311_v2 }
 0xe61   : > { %v7331_v4 = vadd.f32 %v7330_v37, %v7329_v39  ;;  %v7357_v12 = vadd.f32 %v7356_v29, %v7355_v43 }
 0xe62   : > { %v6703_v24 = vshrl.u32 %v6659_v25, 16  ;;  %v6706_v57 = vshll.u32 %v6659_v25, 16  ;;  %v6764_v25 = vpack.c.b16 %v12967_v56, %v12272_v32 }
 0xe63   : > { %v7332_v33 = vsel %vm3663_vm13, %v7331_v4, 0.0  ;;  %v7358_v45 = vrot.slane %v7357_v12, 2 }
 0xe64   : > { %6738 = vrot.lane.b32.xlu2 %v6717_v61, %s12953_s29  ;;  %v6705_v40 = vrot.slane %v6703_v24, 4  ;;  %v6708_v14 = vrot.slane %v6706_v57, 5  ;;  %v7025_v61 = vpack.c.b16 %v7022_v55, %v7022_v55  ;;  %v7107_v24 = vpack.c.b16 %v7104_v13, %v7104_v13 }
 0xe65   : > { %v6565_v34 = vpop.permute.xlu0 %6564  ;;  %v6772_v39 = vrot.slane %v6764_v25, 5  ;;  %v7359_v29 = vadd.f32 %v7358_v45, %v7357_v12 }
 0xe66   : > { %6582 = vst.msk [vmem:[#allocation2 + $0x58] sm:$0xf] %vm1392_vm15, %v6565_v34  ;;  %v6709_v16 = vor.u32 %v6708_v14, %v6705_v40  ;;  %v7041_v37 = vsel %vm1860_vm3, %v7025_v61, 0  ;;  %v7123_v40 = vsel %vm1860_vm3, %v7107_v24, 0  ;;  %v7333_v14 = vrot.slane %v7332_v33, 4 }
 0xe67   : > { %7048 = vmatpush.bf16.msrb.mxu3 %v7041_v37  ;;  %7130 = vmatpush.bf16.msrb.mxu0 %v7123_v40  ;;  %v7360_v61 = vrot.slane %v7359_v29, 1 }
 0xe68   : > { %6784 = vrot.lane.b32.xlu1 %v6771_v48, %s12954_s0  ;;  %6736 = vrot.lane.b32.xlu0 %v6709_v16, %s12953_s29  ;;  %v7334_v4 = vadd.f32 %v7333_v14, %v7332_v33 }
 0xe69   : > { %v7361_v40 = vadd.f32 %v7360_v61, %v7359_v29  ;;  %v9303_v29 = vld [vmem:[%s12879_s7 + $0x58] sm:$0xff] }
 0xe6a   : > { %v7335_v25 = vrot.slane %v7334_v4, 2 }
 0xe6b   : > { %7049 = vmatpush.bf16.msrb.mxu3 %v9303_v29 }
 0xe6c   : > { %v7336_v37 = vadd.f32 %v7335_v25, %v7334_v4  ;;  %v9305_v25 = vld [vmem:[%s12879_s7 + $0x6c] sm:$0xff] }
 0xe6d   : > { %v6567_v57 = vpop.permute.xlu1 %6566  ;;  %v9965_v53 = vld [vmem:[#allocation2 + $0x58] sm:$0xff]  }
 0xe6e   : > { %6583 = vst.msk [vmem:[#allocation2 + $0x64] sm:$0xf] %vm1392_vm15, %v6567_v57  ;;  %v12340_v34 = vunpack.c.l.b16 %v9965_v53  ;;  %v6773_v48 = vrot.slane %v9965_v53, 5  ;;  %v12968_v57 = vunpack.c.l.b16 %v12081_v23 }
 0xe70   : > { %6786 = vrot.lane.b32.xlu0 %v6772_v39, %s12954_s0  ;;  %6788 = vrot.lane.b32.xlu2 %v6773_v48, %s12954_s0  ;;  %v6661_v32 = vpack.c.b16 %v12340_v34, %v12340_v34  ;;  %v9108_v48 = vld [vmem:[%s12879_s7 + $0x74] sm:$0x3] }
 0xe72   : > { %v6719_v43 = vshrl.u32 %v6661_v32, 16  ;;  %v6722_v16 = vshll.u32 %v6661_v32, 16 }
 0xe74   : > { %v6721_v58 = vrot.slane %v6719_v43, 4  ;;  %v6724_v54 = vrot.slane %v6722_v16, 5  ;;  %v7337_v43 = vrot.slane %v7336_v37, 1  ;;  %v7210_v16 = vunpack.c.l.b16 %v9108_v48 }
 0xe75   : > { %v12346_v55 = vld [vmem:[#allocation2 + $0x60] sm:$0xff]  }
 0xe76   : > { %v6725_v13 = vor.u32 %v6724_v54, %v6721_v58  ;;  %v9788_v56 = vunpack.c.h.b16 %v12346_v55  ;;  %v7362_v58 = vmul.f32 0.015625, %v7361_v40  ;;  %v7338_v23 = vadd.f32 %v7337_v43, %v7336_v37  ;;  %v9304_v37 = vld [vmem:[%s12879_s7 + $0x64] sm:$0xff] }
 0xe78   : > { %6740 = vrot.lane.b32.xlu1 %v6725_v13, %s12953_s29  ;;  %7168 = vrot.lane.b32.xlu2 %v12079_v28, %s12953_s29  ;;  %v6835_v24 = vpack.c.b16 %v9788_v56, %v9788_v56  ;;  %v6848_v53 = vpack.c.b16 %v12968_v57, %v9788_v56  ;;  %v7213_v28 = vpack.c.b16 %v7210_v16, %v7210_v16  ;;  %v7339_v54 = vmul.f32 0.015625, %v7338_v23  ;;  %v9301_v56 = vld [vmem:[%s12879_s7 + $0x44] sm:$0xff]  ;;  %v9302_v57 = vld [vmem:[%s12879_s7 + $0x50] sm:$0xff] }
 0xe79   : > { %v12971_v13 = vrot.slane %v12035_v15, 5  ;;  %7131 = vmatpush.bf16.msrb.mxu0 %v9301_v56  ;;  %7050 = vmatpush.bf16.msrb.mxu3 %v9302_v57 }
 0xe7a   : > { %v6837_v33 = vshrl.u32 %v6835_v24, 16  ;;  %v6840_v12 = vshll.u32 %v6835_v24, 16  ;;  %v6849_v45 = vrot.slane %v6848_v53, 5  ;;  %v7220_v4 = vsel %vm1860_vm3, %v7213_v28, 0 }
 0xe7b   : > { %7227 = vmatpush.bf16.msrb.mxu1 %v7220_v4 }
 0xe7c   : > { %v6839_v14 = vrot.slane %v6837_v33, 4  ;;  %v6842_v39 = vrot.slane %v6840_v12, 5  ;;  %v9300_v12 = vld [vmem:[%s12879_s7 + $0x3c] sm:$0xff] }
 0xe7d   : > { %7132 = vmatpush.bf16.msrb.mxu0 %v9300_v12 }
 0xe7e   : > { %v6843_v32 = vor.u32 %v6842_v39, %v6839_v14 }
 0xe7f   : > { %7228 = vmatpush.bf16.msrb.mxu1 %v9305_v25 }
 0xe80   : > { %6850 = vrot.lane.b32.xlu1 %v6849_v45, %s12954_s0  ;;  %6844 = vrot.lane.b32.xlu0 %v6843_v32, %s12953_s29 }
 0xe81   : > { %7391 = vrot.lane.b32.xlu2 %v7362_v58, %s12969_s2 }
 0xe83   : > { %7229 = vmatpush.bf16.msrb.mxu1 %v9304_v37 }
 0xe88   : > { %7387 = vrot.lane.b32.xlu1 %v7339_v54, %s12970_s19  ;;  %7174 = vrot.lane.b32.xlu0 %v12971_v13, %s12954_s0 }
 0xe9c   : > { %v6729_v61 = vpop.permute.xlu2 %6728 }
 0xe9d   : > { %v6795_v15 = vsel %vm1607_vm4, %v12250_v30, %v6729_v61 }
 0xea4   : > { %v6779_v30 = vpop.permute.xlu2 %6778 }
 0xeac   : > { %v6777_v24 = vpop.permute.xlu1 %6776 }
 0xead   : > { %v6817_v53 = vsel %vm1632_vm7, %v6795_v15, %v6777_v24 }
 0xeae   : > { %v6866_v33 = vunpack.c.h.b16 %v6817_v53  ;;  %v6865_v14 = vunpack.c.l.b16 %v6817_v53 }
 0xeb0   : > { %v6882_v40 = vpack.c.b16 %v6866_v33, %v6866_v33  ;;  %v6881_v48 = vpack.c.b16 %v6865_v14, %v6865_v14  ;;  %v10073_v33 = vld [vmem:[#allocation2] sm:$0xff]  }
 0xeb2   : > { %v6903_v39 = vshrl.u32 %v6882_v40, 16  ;;  %v6898_v23 = vshrl.u32 %v6881_v48, 16  ;;  %v6906_v4 = vshll.u32 %v6882_v40, 16 }
 0xeb4   : > { %v6905_v43 = vrot.slane %v6903_v39, 7  ;;  %v6775_v61 = vpop.permute.xlu1 %6774  ;;  %v9110_v24 = vrot.slane %v6898_v23, 11 }
 0xeb6   : > { %v6908_v13 = vor.u32 %v6906_v4, %v6905_v43 }
 0xeb8   : > { %v6909_v12 = vsel %vm10489_vm5, %v9110_v24, %v6908_v13 }
 0xebc   : > { %v6731_v45 = vpop.permute.xlu0 %6730 }
 0xebd   : > { %v6798_v32 = vsel %vm1607_vm4, %v12252_v18, %v6731_v45  ;;  %v6733_v45 = vpop.permute.xlu2 %6732 }
 0xebe   : > { %v6819_v16 = vsel %vm1632_vm7, %v6798_v32, %v6779_v30 }
 0xebf   : > { %v6867_v58 = vunpack.c.l.b16 %v6819_v16  ;;  %v6868_v28 = vunpack.c.h.b16 %v6819_v16  ;;  %v7001_v16 = vunpack.c.l.b16 %v6909_v12 }
 0xec1   : > { %v6883_v29 = vpack.c.b16 %v6867_v58, %v6867_v58  ;;  %v6884_v54 = vpack.c.b16 %v6868_v28, %v6868_v28  ;;  %v12972_v58 = vunpack.c.h.b16 %v12003_v3 }
 0xec3   : > { %v6911_v56 = vshrl.u32 %v6883_v29, 16  ;;  %v6916_v25 = vshrl.u32 %v6884_v54, 16  ;;  %v6919_v53 = vshll.u32 %v6884_v54, 16  ;;  %v6649_v28 = vpack.c.b16 %v12255_v41, %v12972_v58 }
 0xec4   : > { %v6727_v57 = vpop.permute.xlu0 %6726 }
 0xec5   : > { %v6918_v15 = vrot.slane %v6916_v25, 7  ;;  %v6792_v18 = vsel %vm1607_vm4, %v10073_v33, %v6727_v57  ;;  %v9111_v14 = vrot.slane %v6911_v56, 11  ;;  %v6801_v54 = vsel %vm1607_vm4, %v6649_v28, %v6733_v45 }
 0xec6   : > { %v6815_v37 = vsel %vm1632_vm7, %v6792_v18, %v6775_v61 }
 0xec7   : > { %v6921_v40 = vor.u32 %v6919_v53, %v6918_v15  ;;  %v7073_v39 = vunpack.c.l.b16 %v6815_v37  ;;  %v7074_v48 = vunpack.c.h.b16 %v6815_v37 }
 0xec9   : > { %v6922_v30 = vsel %vm10489_vm5, %v9111_v14, %v6921_v40  ;;  %v7075_v32 = vpack.c.b16 %v7073_v39, %v7073_v39  ;;  %v7076_v43 = vpack.c.b16 %v7074_v48, %v7074_v48  ;;  %v6783_v39 = vpop.permute.xlu2 %6782 }
 0xeca   : > { %v7002_v23 = vunpack.c.l.b16 %v6922_v30 }
 0xecb   : > { %v7078_v4 = vshrl.u32 %v7075_v32, 16  ;;  %v7083_v29 = vshrl.u32 %v7076_v43, 16  ;;  %v7086_v61 = vshll.u32 %v7076_v43, 16 }
 0xecc   : > { %v7009_v13 = vpack.c.b16 %v7002_v23, %v7001_v16  ;;  %v6781_v56 = vpop.permute.xlu0 %6780 }
 0xecd   : > { %v7085_v25 = vrot.slane %v7083_v29, 7  ;;  %v6821_v24 = vsel %vm1632_vm7, %v6801_v54, %v6781_v56  ;;  %v9130_v53 = vrot.slane %v7078_v4, 11 }
 0xece   : > { %v6869_v57 = vunpack.c.l.b16 %v6821_v24  ;;  %v6870_v15 = vunpack.c.h.b16 %v6821_v24  ;;  %9126 = vmatmul.msk.bf16.vlgmr.msrb.gmra.mxu3 %vm1847_vm8, %v7009_v13 }
 0xecf   : > { %v7088_v33 = vor.u32 %v7086_v61, %v7085_v25 }
 0xed0   : > { %v6885_v3 = vpack.c.b16 %v6869_v57, %v6869_v57  ;;  %v6886_v18 = vpack.c.b16 %v6870_v15, %v6870_v15 }
 0xed1   : > { %v7089_v41 = vsel %vm10489_vm5, %v9130_v53, %v7088_v33 }
 0xed2   : > { %v7090_v12 = vunpack.c.l.b16 %v7089_v41  ;;  %v6924_v37 = vshrl.u32 %v6885_v3, 16  ;;  %v6929_v14 = vshrl.u32 %v6886_v18, 16  ;;  %v6735_v40 = vpop.permute.xlu1 %6734  ;;  %v6932_v32 = vshll.u32 %v6886_v18, 16 }
 0xed3   : > { %v6804_v48 = vsel %vm1607_vm4, %v12283_v51, %v6735_v40  ;;  %v12973_v51 = vunpack.c.h.b16 %v12027_v11 }
 0xed4   : > { %v7091_v45 = vpack.c.b16 %v7001_v16, %v7090_v12  ;;  %v6931_v30 = vrot.slane %v6929_v14, 7  ;;  %v6823_v43 = vsel %vm1632_vm7, %v6804_v48, %v6783_v39  ;;  %v9112_v4 = vrot.slane %v6924_v37, 11  ;;  %v6739_v39 = vpop.permute.xlu2 %6738 }
 0xed5   : > { %v6871_v58 = vunpack.c.l.b16 %v6823_v43  ;;  %v6872_v28 = vunpack.c.h.b16 %v6823_v43  ;;  %v6651_v16 = vpack.c.b16 %v12311_v2, %v12973_v51 }
 0xed6   : > { %v6934_v29 = vor.u32 %v6932_v32, %v6931_v30  ;;  %9139 = vmatmul.msk.bf16.vlgmr.msrb.gmra.mxu0 %vm1847_vm8, %v7091_v45  ;;  %v6810_v32 = vsel %vm1607_vm4, %v12267_v60, %v6739_v39 }
 0xed7   : > { %v6887_v54 = vpack.c.b16 %v6871_v58, %v6871_v58  ;;  %v6888_v13 = vpack.c.b16 %v6872_v28, %v6872_v28 }
 0xed8   : > { %v6935_v56 = vsel %vm10489_vm5, %v9112_v4, %v6934_v29 }
 0xed9   : > { %v7003_v25 = vunpack.c.l.b16 %v6935_v56  ;;  %v6937_v61 = vshrl.u32 %v6887_v54, 16  ;;  %v6942_v24 = vshrl.u32 %v6888_v13, 16  ;;  %v6945_v3 = vshll.u32 %v6888_v13, 16 }
 0xeda   : > { %v6785_v57 = vpop.permute.xlu1 %6784  ;;  %v6737_v15 = vpop.permute.xlu0 %6736 }
 0xedb   : > { %v7092_v53 = vpack.c.b16 %v7003_v25, %v7002_v23  ;;  %v6944_v33 = vrot.slane %v6942_v24, 7  ;;  %v6807_v18 = vsel %vm1607_vm4, %v6651_v16, %v6737_v15  ;;  %v9113_v12 = vrot.slane %v6937_v61, 11  ;;  %v10074_v24 = vld [vmem:[#allocation2 + $0x50] sm:$0xff]  }
 0xedc   : > { %v6825_v41 = vsel %vm1632_vm7, %v6807_v18, %v6785_v57  ;;  %v9780_v51 = vunpack.c.h.b16 %v10074_v24 }
 0xedd   : > { %v6947_v37 = vor.u32 %v6945_v3, %v6944_v33  ;;  %v6873_v14 = vunpack.c.l.b16 %v6825_v41  ;;  %v6874_v40 = vunpack.c.h.b16 %v6825_v41  ;;  %9152 = vmatmul.msk.bf16.vlgmr.msrb.gmra.mxu1 %vm1847_vm8, %v7092_v53 }
 0xede   : > { %v6653_v3 = vpack.c.b16 %v12340_v34, %v9780_v51 }
 0xedf   : > { %v6889_v48 = vpack.c.b16 %v6873_v14, %v6873_v14  ;;  %v6890_v11 = vpack.c.b16 %v6874_v40, %v6874_v40  ;;  %v6948_v2 = vsel %vm10489_vm5, %v9113_v12, %v6947_v37  ;;  %v6789_v14 = vpop.permute.xlu2 %6788 }
 0xee0   : > { %v7004_v45 = vunpack.c.l.b16 %v6948_v2 }
 0xee1   : > { %v6950_v23 = vshrl.u32 %v6889_v48, 16  ;;  %v6955_v30 = vshrl.u32 %v6890_v11, 16  ;;  %v6958_v4 = vshll.u32 %v6890_v11, 16 }
 0xee2   : > { %v6787_v43 = vpop.permute.xlu0 %6786  ;;  %v7010_v58 = vpack.c.b16 %v7004_v45, %v7003_v25 }
 0xee3   : > { %v6957_v28 = vrot.slane %v6955_v30, 7  ;;  %v6827_v29 = vsel %vm1632_vm7, %v6810_v32, %v6787_v43  ;;  %v9114_v56 = vrot.slane %v6950_v23, 11 }
 0xee4   : > { %v6875_v54 = vunpack.c.l.b16 %v6827_v29  ;;  %v6876_v13 = vunpack.c.h.b16 %v6827_v29  ;;  %9127 = vmatmul.msk.bf16.gmra.mxu3 %vm1847_vm8, %v7010_v58 }
 0xee5   : > { %v6960_v61 = vor.u32 %v6958_v4, %v6957_v28 }
 0xee6   : > { %v6891_v16 = vpack.c.b16 %v6875_v54, %v6875_v54  ;;  %v6892_v57 = vpack.c.b16 %v6876_v13, %v6876_v13  ;;  %9140 = vmatmul.msk.bf16.gmra.mxu0 %vm1847_vm8, %v7092_v53 }
 0xee7   : > { %v6961_v60 = vsel %vm10489_vm5, %v9114_v56, %v6960_v61 }
 0xee8   : > { %v6963_v25 = vshrl.u32 %v6891_v16, 16  ;;  %v6968_v15 = vshrl.u32 %v6892_v57, 16  ;;  %v7005_v33 = vunpack.c.l.b16 %v6961_v60  ;;  %v6971_v41 = vshll.u32 %v6892_v57, 16  ;;  %v7169_v57 = vpop.permute.xlu2 %7168 }
 0xeea   : > { %v6970_v18 = vrot.slane %v6968_v15, 7  ;;  %v6741_v12 = vpop.permute.xlu1 %6740  ;;  %v7093_v37 = vpack.c.b16 %v7005_v33, %v7004_v45  ;;  %v9115_v39 = vrot.slane %v6963_v25, 11 }
 0xeeb   : > { %v6813_v40 = vsel %vm1607_vm4, %v6653_v3, %v6741_v12 }
 0xeec   : > { %v6973_v48 = vor.u32 %v6971_v41, %v6970_v18  ;;  %v6829_v11 = vsel %vm1632_vm7, %v6813_v40, %v6789_v14 }
 0xeed   : > { %v6877_v53 = vunpack.c.l.b16 %v6829_v11  ;;  %v6878_v2 = vunpack.c.h.b16 %v6829_v11  ;;  %9153 = vmatmul.msk.bf16.gmra.mxu1 %vm1847_vm8, %v7093_v37 }
 0xeee   : > { %v6974_v23 = vsel %vm10489_vm5, %v9115_v39, %v6973_v48 }
 0xeef   : > { %v7006_v30 = vunpack.c.l.b16 %v6974_v23  ;;  %v6893_v34 = vpack.c.b16 %v6877_v53, %v6877_v53  ;;  %v6894_v32 = vpack.c.b16 %v6878_v2, %v6878_v2 }
 0xef1   : > { %v6976_v43 = vshrl.u32 %v6893_v34, 16  ;;  %v6981_v58 = vshrl.u32 %v6894_v32, 16  ;;  %v7011_v45 = vpack.c.b16 %v7006_v30, %v7005_v33  ;;  %v6984_v54 = vshll.u32 %v6894_v32, 16 }
 0xef2   : > { %v6851_v28 = vpop.permute.xlu1 %6850  ;;  %v6845_v4 = vpop.permute.xlu0 %6844  ;;  %v7178_v33 = vsel %vm1607_vm4, %v12163_v52, %v7169_v57 }
 0xef3   : > { %v6983_v29 = vrot.slane %v6981_v58, 7  ;;  %v6854_v13 = vsel %vm1607_vm4, %v12346_v55, %v6845_v4  ;;  %v9116_v61 = vrot.slane %v6976_v43, 11 }
 0xef4   : > { %v6856_v56 = vsel %vm1632_vm7, %v6854_v13, %v6851_v28  ;;  %9128 = vmatmul.msk.bf16.gmra.mxu3 %vm1847_vm8, %v7011_v45 }
 0xef5   : > { %v6986_v24 = vor.u32 %v6984_v54, %v6983_v29  ;;  %v6879_v51 = vunpack.c.l.b16 %v6856_v56  ;;  %v6880_v16 = vunpack.c.h.b16 %v6856_v56 }
 0xef6   : > { %9141 = vmatmul.msk.bf16.gmra.mxu0 %vm1847_vm8, %v7093_v37 }
 0xef7   : > { %v6895_v60 = vpack.c.b16 %v6879_v51, %v6879_v51  ;;  %v6896_v25 = vpack.c.b16 %v6880_v16, %v6880_v16  ;;  %v6987_v15 = vsel %vm10489_vm5, %v9116_v61, %v6986_v24 }
 0xef8   : > { %v7007_v55 = vunpack.c.l.b16 %v6987_v15 }
 0xef9   : > { %v6989_v3 = vshrl.u32 %v6895_v60, 16  ;;  %v6994_v18 = vshrl.u32 %v6896_v25, 16  ;;  %v6997_v40 = vshll.u32 %v6896_v25, 16 }
 0xefa   : > { %v7175_v41 = vpop.permute.xlu0 %7174  ;;  %v7094_v12 = vpack.c.b16 %v7007_v55, %v7006_v30 }
 0xefb   : > { %v6996_v14 = vrot.slane %v6994_v18, 7  ;;  %v7180_v39 = vsel %vm1632_vm7, %v7178_v33, %v7175_v41  ;;  %v9117_v11 = vrot.slane %v6989_v3, 11 }
 0xefc   : > { %v7182_v48 = vunpack.c.l.b16 %v7180_v39  ;;  %v7183_v37 = vunpack.c.h.b16 %v7180_v39 }
 0xefd   : > { %v6999_v53 = vor.u32 %v6997_v40, %v6996_v14  ;;  %9154 = vmatmul.msk.bf16.gmra.mxu1 %vm1847_vm8, %v7094_v12 }
 0xefe   : > { %v7184_v2 = vpack.c.b16 %v7182_v48, %v7182_v48  ;;  %v7185_v23 = vpack.c.b16 %v7183_v37, %v7183_v37 }
 0xeff   : > { %v7000_v52 = vsel %vm10489_vm5, %v9117_v11, %v6999_v53 }
 0xf00   : > { %v7187_v34 = vshrl.u32 %v7184_v2, 16  ;;  %v7192_v32 = vshrl.u32 %v7185_v23, 16  ;;  %v7195_v43 = vshll.u32 %v7185_v23, 16  ;;  %v7008_v58 = vunpack.c.l.b16 %v7000_v52  ;;  %v10050_v2 = vld [vmem:[%s12880_s8 + $0x1] ss:$0 sm:$0xff] }
 0xf02   : > { %v9143_v30 = vrot.slane %v7187_v34, 11  ;;  %v7194_v45 = vrot.slane %v7192_v32, 7  ;;  %v7012_v28 = vpack.c.b16 %v7008_v58, %v7007_v55 }
 0xf04   : > { %v7197_v4 = vor.u32 %v7195_v43, %v7194_v45  ;;  %9129 = vmatmul.msk.bf16.gmra.mxu3 %vm1847_vm8, %v7012_v28 }
 0xf06   : > { %v7198_v29 = vsel %vm10489_vm5, %v9143_v30, %v7197_v4  ;;  %9142 = vmatmul.msk.bf16.gmra.mxu0 %vm1847_vm8, %v7094_v12 }
 0xf07   : > { %v7199_v54 = vunpack.c.l.b16 %v7198_v29 }
 0xf09   : > { %v7200_v13 = vpack.c.b16 %v7199_v54, %v7008_v58 }
 0xf0d   : > { %9155 = vmatmul.msk.bf16.gmra.mxu1 %vm1847_vm8, %v7200_v13 }
 0xf51   : > { %v7052_v61 = vpop.f32.mrf.mxu3 }
 0xf53   : > { %v7134_v56 = vpop.f32.mrf.mxu0 }
 0xf54   : > { %v7135_v48 = vadd.f32 %v7134_v56, %v7052_v61 }
 0xf59   : > { %v7054_v16 = vpop.f32.mrf.mxu3 }
 0xf5a   : > { %v7231_v24 = vpop.f32.mrf.mxu1 }
 0xf5b   : > { %v7136_v51 = vpop.f32.mrf.mxu0  ;;  %v7251_v53 = vadd.f32 %v7231_v24, %v7135_v48 }
 0xf5c   : > { %v7137_v12 = vadd.f32 %v7136_v51, %v7054_v16 }
 0xf5d   : > { %v7262_v45 = vadd.f32 %v10050_v2, %v7251_v53 }
 0xf5f   : > { %v7278_v61 = vmul.f32 0.05, %v7262_v45  ;;  %vm7270_vm7 = vcmp.ge.f32.partialorder %v7262_v45, 0.0 }
 0xf62   : > { %v7233_v57 = vpop.f32.mrf.mxu1 }
 0xf63   : > { %v7139_v60 = vpop.f32.mrf.mxu0  ;;  %v7252_v37 = vadd.f32 %v7233_v57, %v7137_v12  ;;  %v9306_v12 = vld [vmem:[%s12881_s9 + $0x8] sm:$0xff] }
 0xf64   : > { %7423 = vmatpush.bf16.msrb.mxu2 %v9306_v12 }
 0xf65   : > { %v7263_v32 = vadd.f32 %v10050_v2, %v7252_v37 }
 0xf67   : > { %v7057_v25 = vpop.f32.mrf.mxu3  ;;  %v7279_v29 = vmul.f32 0.05, %v7263_v32  ;;  %vm7271_vm15 = vcmp.ge.f32.partialorder %v7263_v32, 0.0 }
 0xf68   : > { %v7140_v40 = vadd.f32 %v7139_v60, %v7057_v25 }
 0xf69   : > { %v12451_v60 = vsel %vm7271_vm15, %v7263_v32, %v7279_v29 }
 0xf6a   : > { %v7236_v15 = vpop.f32.mrf.mxu1 }
 0xf6b   : > { %v7141_v33 = vpop.f32.mrf.mxu0  ;;  %v7253_v23 = vadd.f32 %v7236_v15, %v7140_v40 }
 0xf6d   : > { %v7264_v28 = vadd.f32 %v10050_v2, %v7253_v23 }
 0xf6f   : > { %v7059_v55 = vpop.f32.mrf.mxu3  ;;  %v7280_v24 = vmul.f32 0.05, %v7264_v28  ;;  %vm7272_vm8 = vcmp.ge.f32.partialorder %v7264_v28, 0.0 }
 0xf70   : > { %v7142_v11 = vadd.f32 %v7141_v33, %v7059_v55  ;;  %v12453_v55 = vsel %vm7270_vm7, %v7262_v45, %v7278_v61  ;;  %vm12974_vm7 = vcmask 64512  }
 0xf71   : > { %v7363_v37 = vsel %vm3663_vm13, %v12453_v55, 0.0 }
 0xf72   : > { %v7238_v3 = vpop.f32.mrf.mxu1 }
 0xf73   : > { %v7144_v18 = vpop.f32.mrf.mxu0  ;;  %v7254_v43 = vadd.f32 %v7238_v3, %v7142_v11  ;;  %v12455_v3 = vsel %vm7272_vm8, %v7264_v28, %v7280_v24 }
 0xf74   : > { %v7366_v11 = vsel %vm3663_vm13, %v12455_v3, 0.0 }
 0xf75   : > { %v7265_v54 = vadd.f32 %v10050_v2, %v7254_v43 }
 0xf77   : > { %v7062_v41 = vpop.f32.mrf.mxu3  ;;  %v7281_v25 = vmul.f32 0.05, %v7265_v54  ;;  %vm7273_vm12 = vcmp.ge.f32.partialorder %v7265_v54, 0.0 }
 0xf78   : > { %v7145_v52 = vadd.f32 %v7144_v18, %v7062_v41 }
 0xf79   : > { %v12462_v40 = vsel %vm7273_vm12, %v7265_v54, %v7281_v25 }
 0xf7a   : > { %v7241_v14 = vpop.f32.mrf.mxu1  ;;  %v7368_v43 = vsel %vm3663_vm13, %v12462_v40, 0.0 }
 0xf7b   : > { %v7146_v39 = vpop.f32.mrf.mxu0  ;;  %v7255_v4 = vadd.f32 %v7241_v14, %v7145_v52  ;;  %v7364_v14 = vsel %vm3663_vm13, %v12451_v60, 0.0 }
 0xf7c   : > { %v7365_v53 = vadd.f32 %v7364_v14, %v7363_v37 }
 0xf7d   : > { %v7266_v51 = vadd.f32 %v10050_v2, %v7255_v4 }
 0xf7f   : > { %v7064_v34 = vpop.f32.mrf.mxu3  ;;  %v7282_v18 = vmul.f32 0.05, %v7266_v51  ;;  %vm7274_vm14 = vcmp.ge.f32.partialorder %v7266_v51, 0.0 }
 0xf80   : > { %v7147_v58 = vadd.f32 %v7146_v39, %v7064_v34 }
 0xf81   : > { %v12468_v23 = vsel %vm7274_vm14, %v7266_v51, %v7282_v18 }
 0xf82   : > { %v7243_v30 = vpop.f32.mrf.mxu1  ;;  %v7370_v28 = vsel %vm3663_vm13, %v12468_v23, 0.0 }
 0xf83   : > { %v7256_v13 = vadd.f32 %v7243_v30, %v7147_v58  ;;  %v7149_v56 = vpop.f32.mrf.mxu0  ;;  %v7367_v30 = vadd.f32 %v7366_v11, %v7365_v53  ;;  %v7295_v53 = vsel %vm3663_vm13, %v11713_v6, 0.0 }
 0xf85   : > { %v7267_v15 = vadd.f32 %v10050_v2, %v7256_v13  ;;  %v7369_v29 = vadd.f32 %v7368_v43, %v7367_v30  ;;  %v7299_v43 = vsel %vm3663_vm13, %v11725_v50, 0.0  ;;  %v7301_v30 = vsel %vm3663_vm13, %v11731_v7, 0.0 }
 0xf87   : > { %v7067_v16 = vpop.f32.mrf.mxu3  ;;  %v7283_v39 = vmul.f32 0.05, %v7267_v15  ;;  %vm7275_vm9 = vcmp.ge.f32.partialorder %v7267_v15, 0.0  ;;  %v7371_v61 = vadd.f32 %v7370_v28, %v7369_v29 }
 0xf88   : > { %v7150_v57 = vadd.f32 %v7149_v56, %v7067_v16 }
 0xf89   : > { %v12472_v45 = vsel %vm7275_vm9, %v7267_v15, %v7283_v39 }
 0xf8a   : > { %v7246_v33 = vpop.f32.mrf.mxu1  ;;  %v7372_v56 = vsel %vm3663_vm13, %v12472_v45, 0.0 }
 0xf8b   : > { %v7257_v41 = vadd.f32 %v7246_v33, %v7150_v57  ;;  %v7151_v34 = vpop.f32.mrf.mxu0  ;;  %v7373_v16 = vadd.f32 %v7372_v56, %v7371_v61  ;;  %v7307_v61 = vsel %vm3663_vm13, %v11751_v5, 0.0 }
 0xf8d   : > { %v7268_v48 = vadd.f32 %v10050_v2, %v7257_v41 }
 0xf8f   : > { %v7284_v52 = vmul.f32 0.05, %v7268_v48  ;;  %v7069_v32 = vpop.f32.mrf.mxu3  ;;  %vm7276_vm10 = vcmp.ge.f32.partialorder %v7268_v48, 0.0 }
 0xf90   : > { %v7152_v58 = vadd.f32 %v7151_v34, %v7069_v32  ;;  %v7297_v34 = vsel %vm3663_vm13, %v11719_v22, 0.0 }
 0xf91   : > { %v12476_v54 = vsel %vm7276_vm10, %v7268_v48, %v7284_v52  ;;  %v7294_v52 = vsel %vm3663_vm13, %v11707_v46, 0.0 }
 0xf92   : > { %v7248_v4 = vpop.f32.mrf.mxu1  ;;  %v7374_v51 = vsel %vm3663_vm13, %v12476_v54, 0.0  ;;  %v7296_v32 = vadd.f32 %v7295_v53, %v7294_v52 }
 0xf93   : > { %v7258_v13 = vadd.f32 %v7248_v4, %v7152_v58  ;;  %v7375_v25 = vadd.f32 %v7374_v51, %v7373_v16  ;;  %v7303_v4 = vsel %vm3663_vm13, %v11737_v59, 0.0 }
 0xf94   : > { %v7298_v58 = vadd.f32 %v7297_v34, %v7296_v32 }
 0xf95   : > { %v7269_v24 = vadd.f32 %v10050_v2, %v7258_v13  ;;  %v7305_v13 = vsel %vm3663_vm13, %v11743_v38, 0.0 }
 0xf96   : > { %v7300_v28 = vadd.f32 %v7299_v43, %v7298_v58  ;;  %v9158_v43 = vld [vmem:[%s12882_s10 + $0x1] sm:$0x1] }
 0xf97   : > { %vm7277_vm15 = vcmp.ge.f32.partialorder %v7269_v24, 0.0  ;;  %v7285_v57 = vmul.f32 0.05, %v7269_v24 }
 0xf98   : > { %v7302_v29 = vadd.f32 %v7301_v30, %v7300_v28 }
 0xf99   : > { %v12482_v15 = vsel %vm7277_vm15, %v7269_v24, %v7285_v57 }
 0xf9a   : > { %v7376_v33 = vsel %vm3663_vm13, %v12482_v15, 0.0  ;;  %v7304_v56 = vadd.f32 %v7303_v4, %v7302_v29 }
 0xf9b   : > { %v7377_v18 = vadd.f32 %v7376_v33, %v7375_v25  ;;  %v9164_v25 = vld [vmem:[%s12883_s11 + $0x1] sm:$0x1] }
 0xf9c   : > { %v7306_v24 = vadd.f32 %v7305_v13, %v7304_v56  ;;  %v7439_v33 = vsel %vm3806_vm11, %v9164_v25, 0  ;;  %vm12975_vm11 = vcmask 15360   ;;  %v9165_v13 = vld [vmem:[%s12884_s12 + $0x1] sm:$0x1] }
 0xf9d   : > { %v7378_v41 = vsel %vm3663_vm13, %v7377_v18, 0.0  ;;  %7448 = vmatpush.bf16.msra.mxu3 %v7439_v33 }
 0xf9e   : > { %v7379_v14 = vrot.slane %v7378_v41, 4  ;;  %v7308_v51 = vadd.f32 %v7307_v61, %v7306_v24  ;;  %v9168_v24 = vld [vmem:[%s12885_s13 + $0x8] sm:$0xf] }
 0xfa0   : > { %v7380_v12 = vadd.f32 %v7379_v14, %v7378_v41  ;;  %v7309_v16 = vsel %vm3663_vm13, %v7308_v51, 0.0 }
 0xfa1   : > { %v7310_v57 = vrot.slane %v7309_v16, 4 }
 0xfa2   : > { %v7381_v39 = vrot.slane %v7380_v12, 2 }
 0xfa3   : > { %v7311_v18 = vadd.f32 %v7310_v57, %v7309_v16  ;;  %v7614_v16 = vsel %vm1860_vm3, %v9168_v24, 0 }
 0xfa4   : > { %v7382_v48 = vadd.f32 %v7381_v39, %v7380_v12  ;;  %7623 = vmatpush.bf16.msra.mxu1 %v7614_v16 }
 0xfa5   : > { %v7312_v41 = vrot.slane %v7311_v18, 2 }
 0xfa6   : > { %v7383_v2 = vrot.slane %v7382_v48, 1 }
 0xfa7   : > { %v7313_v14 = vadd.f32 %v7312_v41, %v7311_v18 }
 0xfa8   : > { %v7384_v37 = vadd.f32 %v7383_v2, %v7382_v48  ;;  %v7388_v48 = vpop.permute.xlu1 %7387 }
 0xfa9   : > { %v7314_v12 = vrot.slane %v7313_v14, 1 }
 0xfaa   : > { %v7385_v11 = vmul.f32 0.015625, %v7384_v37 }
 0xfab   : > { %v7315_v39 = vadd.f32 %v7314_v12, %v7313_v14 }
 0xfac   : > { %7395 = vrot.lane.b32.xlu0 %v7385_v11, %s12953_s29  ;;  %v7392_v11 = vpop.permute.xlu2 %7391  ;;  %s12977_s29 = smov 120  }
 0xfad   : > { %v7316_v2 = vmul.f32 0.015625, %v7315_v39 }
 0xfaf   : > { %v7398_v37 = vsel %vm3663_vm13, %v7316_v2, %v7388_v48 }
 0xfb0   : > { %v7399_v52 = vsel %vm12974_vm7, %v7398_v37, %v7392_v11 }
0x101e   : > { %v7396_v53 = vpop.permute.xlu0 %7395 }
0x101f   : > { %v7400_v34 = vsel %vm1607_vm4, %v7399_v52, %v7396_v53 }
0x1020   : > { %v7401_v32 = vpack.c.bf16 %v7400_v34, %v7400_v34 }
0x1022   : > { %9163 = vmatmul.msk.bf16.vlgmr.msrb.gmra.mxu2 %vm826_vm1, %v7401_v32 }
0x10a5   : > { %v7425_v58 = vpop.f32.mrf.mxu2 }
0x10a6   : > { %v7426_v30 = vadd.f32 %v9158_v43, %v7425_v58 }
0x10a8   : > { %v7429_v28 = vmax.f32 %v7426_v30, 0.0 }
0x10aa   : > { %v7430_v4 = vpack.c.bf16 %v7429_v28, %v7429_v28 }
0x10ac   : > { %9166 = vmatmul.msk.bf16.vlgmr.msra.gmra.mxu3 %vm12975_vm11, %v7430_v4 }
0x10ad   : > { %v7427_v29 = vpop.f32.mrf.mxu2 }
0x112f   : > { %v7450_v56 = vpop.f32.mrf.mxu3 }
0x1130   : > { %v7451_v61 = vadd.f32 %v9165_v13, %v7450_v56 }
0x1132   : > { %v9167_v51 = vmul.f32 -1.442695, %v7451_v61 }
0x1134   : > { %10057 = vpow2.f32 %v9167_v51 }
0x1137   : > { %v7452_v57 = vpop.f32.mrf.mxu3 }
0x113a   : > { %v10058_v25 = vpop.eup %10057 }
0x113b   : > { %v7457_v33 = vadd.f32 1.0, %v10058_v25 }
0x113d   : > { %10059 = vrcp.f32 %v7457_v33  ;;  %v7469_v12 = vand.u32 2147483648, %v7457_v33  ;;  %v7467_v48 = vand.u32 2147483647, %v7457_v33  ;;  %vm7463_vm8 = vweird.f32 %v7457_v33 }
0x113f   : > { %v7470_v37 = vor.u32 1.1754944e-38, %v7469_v12  ;;  %vm7468_vm14 = vcmp.eq.f32.partialorder %v7467_v48, 8.507059e+37 }
0x1143   : > { %v10060_v18 = vpop.eup %10059 }
0x1144   : > { %v7459_v41 = vmul.f32 %v10060_v18, %v7457_v33  ;;  %vm7464_vm4 = vweird.f32 %v10060_v18 }
0x1145   : > { %vm7465_vm12 = vmor %vm7463_vm8, %vm7464_vm4 }
0x1146   : > { %v7460_v14 = vsub.f32 1.0, %v7459_v41 }
0x1148   : > { %v7461_v39 = vmul.f32 %v10060_v18, %v7460_v14 }
0x114a   : > { %v7462_v2 = vadd.f32 %v10060_v18, %v7461_v39 }
0x114c   : > { %v7466_v11 = vsel %vm7465_vm12, %v10060_v18, %v7462_v2 }
0x114d   : > { %v7471_v53 = vsel %vm7468_vm14, %v7470_v37, %v7466_v11 }
0x114e   : > { %v7476_v52 = vperm.slane %v7471_v53, 0  ;;  %v9169_v53 = vld [vmem:[%s12885_s13 + $0xc] sm:$0xf] }
0x1150   : > { %7494 = vrot.lane.b32.xlu0 %v7476_v52, %s12952_s26  ;;  %7736 = vrot.lane.b32.xlu2 %v7476_v52, %s12976_s20  ;;  %v7477_v34 = vmul.f32 %v7476_v52, %v11707_v46  ;;  %v7478_v32 = vmul.f32 %v7476_v52, %v11713_v6  ;;  %v7479_v29 = vmul.f32 %v7476_v52, %v11719_v22  ;;  %v7534_v46 = vunpack.c.l.b16 %v9168_v24  ;;  %s539_s26 = sand.u32 1, %s10137_s25  }
0x1151   : > { %7645 = vrot.lane.b32.xlu1 %v7476_v52, %s12977_s29  ;;  %v7480_v13 = vmul.f32 %v7476_v52, %v11725_v50  ;;  %v7481_v25 = vmul.f32 %v7476_v52, %v11731_v7  ;;  %v7482_v33 = vmul.f32 %v7476_v52, %v11737_v59  ;;  %v7483_v24 = vmul.f32 %v7476_v52, %v11743_v38  ;;  %s8671_s27 = sshll.u32 %s539_s26, 6  ;;  %s8590_s28 = scalar_lea.sflag [#allocation4], %s539_s26 }
0x1152   : > { %v7485_v43 = vpack.c.bf16 %v7477_v34, %v7477_v34  ;;  %v7486_v58 = vpack.c.bf16 %v7478_v32, %v7478_v32  ;;  %v7487_v56 = vpack.c.bf16 %v7479_v29, %v7479_v29  ;;  %v7535_v6 = vpack.c.b16 %v7534_v46, %v7534_v46  ;;  %s12805_s1 = scalar_lea.vmem [#allocation3], %s8671_s27 }
0x1153   : > { %v7488_v61 = vpack.c.bf16 %v7480_v13, %v7480_v13  ;;  %v7489_v22 = vpack.c.bf16 %v7481_v25, %v7481_v25  ;;  %v7490_v14 = vpack.c.bf16 %v7482_v33, %v7482_v33  ;;  %v7484_v48 = vmul.f32 %v7476_v52, %v11751_v5  ;;  %s8602_s20 = sshll.u32 %s12805_s1, 4  ;;  %s8603_s20 = int_to_ptr.vmem [resolvable:$true] %s8602_s20 }
0x1154   : > { %v7589_v30 = vunpack.c.l.b16 %v7485_v43  ;;  %v7590_v28 = vunpack.c.l.b16 %v7486_v58  ;;  %v7591_v51 = vunpack.c.l.b16 %v7487_v56  ;;  %v7536_v18 = vrot.slane %v7535_v6, 2 }
0x1155   : > { %v7592_v16 = vunpack.c.l.b16 %v7488_v61  ;;  %v7593_v50 = vunpack.c.l.b16 %v7489_v22  ;;  %v7594_v12 = vunpack.c.l.b16 %v7490_v14  ;;  %v7491_v2 = vpack.c.bf16 %v7483_v24, %v7483_v24 }
0x1156   : > { %v7597_v4 = vpack.c.b16 %v7590_v28, %v7589_v30  ;;  %v7550_v41 = vsel %vm1860_vm3, %v7536_v18, 0  ;;  %v7492_v37 = vpack.c.bf16 %v7484_v48, %v7484_v48  ;;  %v7776_v34 = vunpack.c.l.b16 %v9169_v53 }
0x1157   : > { %v7598_v57 = vpack.c.b16 %v7592_v16, %v7591_v51  ;;  %7559 = vmatpush.bf16.msra.mxu0 %v7550_v41  ;;  %v7599_v39 = vpack.c.b16 %v7594_v12, %v7593_v50  ;;  %v7595_v7 = vunpack.c.l.b16 %v7491_v2  ;;  %v7697_v38 = vsel %vm1860_vm3, %v9169_v53, 0 }
0x1158   : > { %9174 = vmatmul.msk.bf16.vlgmr.msra.gmra.mxu1 %vm3663_vm13, %v7597_v4  ;;  %v7596_v11 = vunpack.c.l.b16 %v7492_v37  ;;  %v7777_v32 = vpack.c.b16 %v7776_v34, %v7776_v34  ;;  %7706 = vmatpush.bf16.msra.mxu2 %v7697_v38 }
0x115a   : > { %v7600_v59 = vpack.c.b16 %v7596_v11, %v7595_v7  ;;  %v7778_v43 = vrot.slane %v7777_v32, 2 }
0x115c   : > { %v7792_v58 = vsel %vm1860_vm3, %v7778_v43, 0 }
0x115d   : > { %7801 = vmatpush.bf16.msrb.mxu3 %v7792_v58 }
0x1168   : > { %9175 = vmatmul.msk.bf16.gmra.mxu1 %vm3663_vm13, %v7598_v57 }
0x1178   : > { %9176 = vmatmul.msk.bf16.gmra.mxu1 %vm3663_vm13, %v7599_v39 }
0x1188   : > { %9177 = vmatmul.msk.bf16.gmra.mxu1 %vm3663_vm13, %v7600_v59 }
0x11aa   : > { %v7737_v5 = vpop.permute.xlu2 %7736 }
0x11ab   : > { %v7739_v52 = vmul.f32 %v7737_v5, %v12453_v55  ;;  %v7740_v30 = vmul.f32 %v7737_v5, %v12451_v60  ;;  %v7741_v61 = vmul.f32 %v7737_v5, %v12455_v3  ;;  %v7742_v51 = vmul.f32 %v7737_v5, %v12462_v40 }
0x11ac   : > { %v7743_v14 = vmul.f32 %v7737_v5, %v12468_v23  ;;  %v7744_v50 = vmul.f32 %v7737_v5, %v12472_v45 }
0x11ad   : > { %v7747_v28 = vpack.c.bf16 %v7739_v52, %v7739_v52  ;;  %v7748_v4 = vpack.c.bf16 %v7740_v30, %v7740_v30  ;;  %v7749_v16 = vpack.c.bf16 %v7741_v61, %v7741_v61  ;;  %v7750_v46 = vpack.c.bf16 %v7742_v51, %v7742_v51 }
0x11ae   : > { %v7751_v37 = vpack.c.bf16 %v7743_v14, %v7743_v14  ;;  %v7752_v7 = vpack.c.bf16 %v7744_v50, %v7744_v50 }
0x11af   : > { %v7763_v29 = vunpack.c.l.b16 %v7747_v28  ;;  %v7764_v13 = vunpack.c.l.b16 %v7748_v4  ;;  %v7765_v57 = vunpack.c.l.b16 %v7749_v16  ;;  %v7766_v6 = vunpack.c.l.b16 %v7750_v46 }
0x11b0   : > { %v7746_v28 = vmul.f32 %v7737_v5, %v12482_v15 }
0x11b1   : > { %v7771_v56 = vpack.c.b16 %v7764_v13, %v7763_v29  ;;  %v7772_v25 = vpack.c.b16 %v7766_v6, %v7765_v57 }
0x11b2   : > { %v7754_v13 = vpack.c.bf16 %v7746_v28, %v7746_v28 }
0x11b3   : > { %9182 = vmatmul.msk.bf16.vlgmr.msrb.gmra.mxu3 %vm3663_vm13, %v7771_v56 }
0x11b4   : > { %v7770_v61 = vunpack.c.l.b16 %v7754_v13 }
0x11c2   : > { %v12550_v33 = vpop.permute.xlu0 %7494 }
0x11c3   : > { %v7497_v60 = vmul.f32 %v12550_v33, %v11934_v26  ;;  %v7498_v55 = vmul.f32 %v12550_v33, %v11940_v17  ;;  %v12556_v18 = vpop.permute.xlu1 %7645  ;;  %9183 = vmatmul.msk.bf16.gmra.mxu3 %vm3663_vm13, %v7772_v25  ;;  %v7499_v23 = vmul.f32 %v12550_v33, %v11946_v44  ;;  %v7500_v45 = vmul.f32 %v12550_v33, %v11952_v10 }
0x11c4   : > { %v7648_v3 = vmul.f32 %v12556_v18, %v12198_v8  ;;  %v7649_v40 = vmul.f32 %v12556_v18, %v12204_v9  ;;  %v7767_v8 = vunpack.c.l.b16 %v7751_v37  ;;  %v7768_v9 = vunpack.c.l.b16 %v7752_v7 }
0x11c5   : > { %v7505_v41 = vpack.c.bf16 %v7497_v60, %v7497_v60  ;;  %v7506_v22 = vpack.c.bf16 %v7498_v55, %v7498_v55  ;;  %v7650_v59 = vmul.f32 %v12556_v18, %v12210_v0  ;;  %v7651_v53 = vmul.f32 %v12556_v18, %v12216_v49 }
0x11c6   : > { %v7656_v26 = vpack.c.bf16 %v7648_v3, %v7648_v3  ;;  %v7657_v12 = vpack.c.bf16 %v7649_v40, %v7649_v40  ;;  %v7773_v34 = vpack.c.b16 %v7768_v9, %v7767_v8  ;;  %v7507_v32 = vpack.c.bf16 %v7499_v23, %v7499_v23  ;;  %v12604_v8 = vld [vmem:[%s12886_s14 + $0x1] ss:$0 sm:$0xff] }
0x11c7   : > { %v7521_v39 = vunpack.c.l.b16 %v7505_v41  ;;  %v7522_v17 = vunpack.c.l.b16 %v7506_v22  ;;  %v7508_v43 = vpack.c.bf16 %v7500_v45, %v7500_v45  ;;  %v7658_v58 = vpack.c.bf16 %v7650_v59, %v7650_v59  ;;  %v12606_v45 = vld [vmem:[#allocation2] sm:$0xff]  }
0x11c8   : > { %v7672_v24 = vunpack.c.l.b16 %v7656_v26  ;;  %v7673_v48 = vunpack.c.l.b16 %v7657_v12  ;;  %v7659_v38 = vpack.c.bf16 %v7651_v53, %v7651_v53  ;;  %v7523_v52 = vunpack.c.l.b16 %v7507_v32 }
0x11c9   : > { %v7529_v2 = vpack.c.b16 %v7522_v17, %v7521_v39  ;;  %v7524_v30 = vunpack.c.l.b16 %v7508_v43  ;;  %v7745_v44 = vmul.f32 %v7737_v5, %v12476_v54  ;;  %v7674_v10 = vunpack.c.l.b16 %v7658_v58 }
0x11ca   : > { %v7680_v11 = vpack.c.b16 %v7673_v48, %v7672_v24  ;;  %v7675_v4 = vunpack.c.l.b16 %v7659_v38  ;;  %v7501_v51 = vmul.f32 %v12550_v33, %v11958_v21  ;;  %v7502_v54 = vmul.f32 %v12550_v33, %v11964_v27 }
0x11cb   : > { %9170 = vmatmul.msk.bf16.vlgmr.msra.gmra.mxu0 %vm3663_vm13, %v7529_v2  ;;  %v7530_v29 = vpack.c.b16 %v7524_v30, %v7523_v52  ;;  %v7753_v0 = vpack.c.bf16 %v7745_v44, %v7745_v44  ;;  %v7652_v15 = vmul.f32 %v12556_v18, %v12222_v47  ;;  %v7653_v5 = vmul.f32 %v12556_v18, %v12228_v63 }
0x11cc   : > { %9178 = vmatmul.msk.bf16.vlgmr.msra.gmra.mxu2 %vm3663_vm13, %v7680_v11  ;;  %v7681_v56 = vpack.c.b16 %v7675_v4, %v7674_v10  ;;  %v7509_v46 = vpack.c.bf16 %v7501_v51, %v7501_v51  ;;  %v7510_v57 = vpack.c.bf16 %v7502_v54, %v7502_v54  ;;  %v7503_v27 = vmul.f32 %v12550_v33, %v11970_v20 }
0x11cd   : > { %v7769_v49 = vunpack.c.l.b16 %v7753_v0  ;;  %v7660_v6 = vpack.c.bf16 %v7652_v15, %v7652_v15  ;;  %v7661_v25 = vpack.c.bf16 %v7653_v5, %v7653_v5  ;;  %v7504_v47 = vmul.f32 %v12550_v33, %v11976_v42 }
0x11ce   : > { %v7525_v60 = vunpack.c.l.b16 %v7509_v46  ;;  %v7526_v55 = vunpack.c.l.b16 %v7510_v57  ;;  %v7654_v63 = vmul.f32 %v12556_v18, %v12234_v31  ;;  %v7655_v22 = vmul.f32 %v12556_v18, %v12240_v19 }
0x11cf   : > { %v7774_v16 = vpack.c.b16 %v7770_v61, %v7769_v49  ;;  %v7676_v3 = vunpack.c.l.b16 %v7660_v6  ;;  %v7677_v21 = vunpack.c.l.b16 %v7661_v25  ;;  %v7511_v14 = vpack.c.bf16 %v7503_v27, %v7503_v27 }
0x11d0   : > { %v7531_v40 = vpack.c.b16 %v7526_v55, %v7525_v60  ;;  %v7512_v50 = vpack.c.bf16 %v7504_v47, %v7504_v47  ;;  %v7662_v26 = vpack.c.bf16 %v7654_v63, %v7654_v63  ;;  %v7663_v12 = vpack.c.bf16 %v7655_v22, %v7655_v22 }
0x11d1   : > { %v7682_v41 = vpack.c.b16 %v7677_v21, %v7676_v3  ;;  %v7527_v39 = vunpack.c.l.b16 %v7511_v14  ;;  %v12609_v53 = vunpack.c.h.b16 %v12606_v45  ;;  %v9972_v14 = vld [vmem:[#allocation2 + $0x20] sm:$0xff]  }
0x11d2   : > { %v7528_v17 = vunpack.c.l.b16 %v7512_v50  ;;  %v7678_v24 = vunpack.c.l.b16 %v7662_v26  ;;  %v7679_v48 = vunpack.c.l.b16 %v7663_v12 }
0x11d3   : > { %9184 = vmatmul.msk.bf16.gmra.mxu3 %vm3663_vm13, %v7773_v34  ;;  %v7957_v32 = vpack.c.b16 %v12609_v53, %v12609_v53 }
0x11d4   : > { %v7532_v2 = vpack.c.b16 %v7528_v17, %v7527_v39  ;;  %v7683_v37 = vpack.c.b16 %v7679_v48, %v7678_v24 }
0x11d5   : > { %v7625_v20 = vpop.f32.mrf.mxu1  ;;  %v7966_v30 = vshrl.u32 %v7957_v32, 16  ;;  %v7969_v44 = vshll.u32 %v7957_v32, 16 }
0x11d7   : > { %v7971_v0 = vrot.slane %v7969_v44, 5 }
0x11db   : > { %9171 = vmatmul.msk.bf16.gmra.mxu0 %vm3663_vm13, %v7530_v29  ;;  %v7968_v29 = vrot.slane %v7966_v30, 4 }
0x11dc   : > { %9179 = vmatmul.msk.bf16.gmra.mxu2 %vm3663_vm13, %v7681_v56 }
0x11dd   : > { %v7627_v33 = vpop.f32.mrf.mxu1  ;;  %v7972_v56 = vor.u32 %v7971_v0, %v7968_v29 }
0x11df   : > { %8029 = vrot.lane.b32.xlu2 %v7972_v56, %s12957_s24 }
0x11e3   : > { %9185 = vmatmul.msk.bf16.gmra.mxu3 %vm3663_vm13, %v7774_v16 }
0x11e5   : > { %v7630_v59 = vpop.f32.mrf.mxu1 }
0x11eb   : > { %9172 = vmatmul.msk.bf16.gmra.mxu0 %vm3663_vm13, %v7531_v40 }
0x11ec   : > { %9180 = vmatmul.msk.bf16.gmra.mxu2 %vm3663_vm13, %v7682_v41 }
0x11ed   : > { %v7632_v61 = vpop.f32.mrf.mxu1 }
0x11f5   : > { %v7635_v63 = vpop.f32.mrf.mxu1 }
0x11fb   : > { %9173 = vmatmul.msk.bf16.gmra.mxu0 %vm3663_vm13, %v7532_v2 }
0x11fc   : > { %9181 = vmatmul.msk.bf16.gmra.mxu2 %vm3663_vm13, %v7683_v37 }
0x1236   : > { %v7803_v42 = vpop.f32.mrf.mxu3 }
0x123e   : > { %v7805_v7 = vpop.f32.mrf.mxu3 }
0x1246   : > { %v7808_v38 = vpop.f32.mrf.mxu3 }
0x1248   : > { %v7561_v31 = vpop.f32.mrf.mxu0 }
0x1249   : > { %v7626_v19 = vadd.f32 %v7625_v20, %v7561_v31 }
0x124e   : > { %v7810_v6 = vpop.f32.mrf.mxu3 }
0x124f   : > { %v7708_v18 = vpop.f32.mrf.mxu2 }
0x1250   : > { %v7728_v11 = vadd.f32 %v7708_v18, %v7626_v19  ;;  %v7563_v9 = vpop.f32.mrf.mxu0 }
0x1251   : > { %v7628_v58 = vadd.f32 %v7627_v33, %v7563_v9 }
0x1252   : > { %v7823_v23 = vadd.f32 %v7803_v42, %v7728_v11 }
0x1254   : > { %v7836_v34 = vadd.f32 %v12604_v8, %v7823_v23 }
0x1256   : > { %v7844_v43 = vadd.f32 %v7836_v34, %v11464_v62  ;;  %v12618_v62 = vld [vmem:[#allocation2 + $0x8] sm:$0xff]   ;;  %v7813_v20 = vpop.f32.mrf.mxu3 }
0x1257   : > { %v7710_v52 = vpop.f32.mrf.mxu2  ;;  %v9804_v57 = vunpack.c.h.b16 %v12618_v62 }
0x1258   : > { %v7871_v28 = vpack.c.bf16 %v7844_v43, %v7844_v43  ;;  %v7729_v10 = vadd.f32 %v7710_v52, %v7628_v58  ;;  %v7566_v4 = vpop.f32.mrf.mxu0  ;;  %v7637_v52 = vpop.f32.mrf.mxu1 }
0x1259   : > { %v7631_v54 = vadd.f32 %v7630_v59, %v7566_v4  ;;  %v9816_v59 = vunpack.c.h.b16 %v9972_v14 }
0x125a   : > { %7879 = vst.msk [vmem:[#allocation2 + $0x10] sm:$0xf] %vm548_vm0, %v7871_v28  ;;  %v7824_v13 = vadd.f32 %v7805_v7, %v7729_v10  ;;  %v12978_v7 = vld [vmem:[#allocation13_spill] sm:$0xff] }
0x125c   : > { %v7837_v49 = vadd.f32 %v12604_v8, %v7824_v13 }
0x125e   : > { %v7845_v51 = vadd.f32 %v7837_v49, %v11474_v35  ;;  %v7815_v56 = vpop.f32.mrf.mxu3  ;;  %v12979_v49 = vld [vmem:[#allocation14_spill] sm:$0xff] }
0x125f   : > { %v7713_v15 = vpop.f32.mrf.mxu2 }
0x1260   : > { %v7872_v5 = vpack.c.bf16 %v7845_v51, %v7845_v51  ;;  %v7730_v16 = vadd.f32 %v7713_v15, %v7631_v54  ;;  %v7568_v46 = vpop.f32.mrf.mxu0 }
0x1261   : > { %v12622_v25 = vld [vmem:[#allocation2 + $0x10] sm:$0xff]   ;;  %v7633_v41 = vadd.f32 %v7632_v61, %v7568_v46 }
0x1262   : > { %7880 = vst.msk [vmem:[#allocation2 + $0x1c] sm:$0xf] %vm548_vm0, %v7872_v5  ;;  %v7825_v60 = vadd.f32 %v7808_v38, %v7730_v16  ;;  %v9807_v55 = vunpack.c.l.b16 %v12622_v25  ;;  %v9803_v16 = vunpack.c.l.b16 %v12618_v62 }
0x1264   : > { %v7838_v3 = vadd.f32 %v12604_v8, %v7825_v60  ;;  %v7958_v21 = vpack.c.b16 %v9807_v55, %v9807_v55  ;;  %v12627_v40 = vpack.c.b16 %v9807_v55, %v9804_v57 }
0x1266   : > { %v7846_v35 = vadd.f32 %v7838_v3, %v11484_v36  ;;  %v7974_v27 = vshrl.u32 %v7958_v21, 16  ;;  %v7977_v47 = vshll.u32 %v7958_v21, 16  ;;  %v9815_v36 = vunpack.c.l.b16 %v9972_v14  ;;  %v12980_v14 = vld [vmem:[#allocation15_spill] sm:$0xff] }
0x1267   : > { %v7715_v22 = vpop.f32.mrf.mxu2 }
0x1268   : > { %v7873_v50 = vpack.c.bf16 %v7846_v35, %v7846_v35  ;;  %v7731_v26 = vadd.f32 %v7715_v22, %v7633_v41  ;;  %v7571_v12 = vpop.f32.mrf.mxu0  ;;  %v7976_v39 = vrot.slane %v7974_v27, 4  ;;  %v7979_v17 = vrot.slane %v7977_v47, 5  ;;  %v7640_v47 = vpop.f32.mrf.mxu1 }
0x1269   : > { %v12630_v24 = vld [vmem:[#allocation2 + $0x18] sm:$0xff]   ;;  %v7636_v33 = vadd.f32 %v7635_v63, %v7571_v12  ;;  %v8061_v63 = vpack.c.b16 %v9803_v16, %v12609_v53 }
0x126a   : > { %7881 = vst.msk [vmem:[#allocation2 + $0x28] sm:$0xf] %vm548_vm0, %v7873_v50  ;;  %v7826_v48 = vadd.f32 %v7810_v6, %v7731_v26  ;;  %v7980_v2 = vor.u32 %v7979_v17, %v7976_v39  ;;  %v9812_v37 = vunpack.c.h.b16 %v12630_v24  ;;  %v9975_v17 = vld [vmem:[#allocation2 + $0x38] sm:$0xff]  }
0x126c   : > { %v7839_v42 = vadd.f32 %v12604_v8, %v7826_v48  ;;  %8031 = vrot.lane.b32.xlu0 %v7980_v2, %s12957_s24  ;;  %v7959_v31 = vpack.c.b16 %v9812_v37, %v9812_v37  ;;  %v8063_v9 = vpack.c.b16 %v9815_v36, %v9812_v37  ;;  %v7818_v48 = vpop.f32.mrf.mxu3  ;;  %v8069_v37 = vrot.slane %v8061_v63, 5 }
0x126d   : > { %v9828_v36 = vunpack.c.h.b16 %v9975_v17 }
0x126e   : > { %v7847_v19 = vadd.f32 %v7839_v42, %v12978_v7  ;;  %v7982_v18 = vshrl.u32 %v7959_v31, 16  ;;  %v7985_v11 = vshll.u32 %v7959_v31, 16  ;;  %v8071_v10 = vrot.slane %v8063_v9, 5 }
0x126f   : > { %v7718_v23 = vpop.f32.mrf.mxu2  ;;  %v9827_v7 = vunpack.c.l.b16 %v9975_v17 }
0x1270   : > { %v7874_v34 = vpack.c.bf16 %v7847_v19, %v7847_v19  ;;  %v7732_v32 = vadd.f32 %v7718_v23, %v7636_v33  ;;  %v7573_v43 = vpop.f32.mrf.mxu0  ;;  %v7984_v58 = vrot.slane %v7982_v18, 4  ;;  %v7987_v38 = vrot.slane %v7985_v11, 5 }
0x1271   : > { %v9973_v30 = vld [vmem:[#allocation2 + $0x28] sm:$0xff]   ;;  %v7638_v51 = vadd.f32 %v7637_v52, %v7573_v43  ;;  %v8070_v18 = vrot.slane %v12622_v25, 5  ;;  %v7642_v43 = vpop.f32.mrf.mxu1 }
0x1272   : > { %7882 = vst.msk [vmem:[#allocation2 + $0x34] sm:$0xf] %vm548_vm0, %v7874_v34  ;;  %v7827_v44 = vadd.f32 %v7813_v20, %v7732_v32  ;;  %v7988_v28 = vor.u32 %v7987_v38, %v7984_v58  ;;  %v9819_v4 = vunpack.c.l.b16 %v9973_v30  ;;  %v8072_v41 = vrot.slane %v9973_v30, 5  ;;  %v12981_v38 = vld [vmem:[#allocation16_spill] sm:$0xff] }
0x1274   : > { %v7840_v29 = vadd.f32 %v12604_v8, %v7827_v44  ;;  %8033 = vrot.lane.b32.xlu1 %v7988_v28, %s12957_s24  ;;  %8081 = vrot.lane.b32.xlu0 %v8071_v10, %s12958_s23  ;;  %v7960_v0 = vpack.c.b16 %v9819_v4, %v9819_v4  ;;  %v12641_v13 = vpack.c.b16 %v9819_v4, %v9816_v59  ;;  %v12663_v28 = vld [vmem:[#allocation2 + $0x70] sm:$0xff]  }
0x1276   : > { %v7848_v61 = vadd.f32 %v7840_v29, %v12979_v49  ;;  %v7990_v54 = vshrl.u32 %v7960_v0, 16  ;;  %v7993_v15 = vshll.u32 %v7960_v0, 16  ;;  %v9978_v49 = vld [vmem:[#allocation2 + $0x50] sm:$0xff]  }
0x1277   : > { %v7720_v5 = vpop.f32.mrf.mxu2 }
0x1278   : > { %v7875_v46 = vpack.c.bf16 %v7848_v61, %v7848_v61  ;;  %v7733_v57 = vadd.f32 %v7720_v5, %v7638_v51  ;;  %v7992_v6 = vrot.slane %v7990_v54, 4  ;;  %v7995_v60 = vrot.slane %v7993_v15, 5  ;;  %v7576_v55 = vpop.f32.mrf.mxu0  ;;  %v7820_v61 = vpop.f32.mrf.mxu3 }
0x1279   : > { %v12645_v3 = vld [vmem:[#allocation2 + $0x30] sm:$0xff]   ;;  %v7641_v26 = vadd.f32 %v7640_v47, %v7576_v55  ;;  %v12668_v54 = vunpack.c.l.b16 %v12663_v28 }
0x127a   : > { %7883 = vst.msk [vmem:[#allocation2 + $0x40] sm:$0xf] %vm548_vm0, %v7875_v46  ;;  %v7828_v21 = vadd.f32 %v7815_v56, %v7733_v57  ;;  %v7996_v35 = vor.u32 %v7995_v60, %v7992_v6  ;;  %v9824_v27 = vunpack.c.h.b16 %v12645_v3  ;;  %v9839_v6 = vunpack.c.l.b16 %v9978_v49 }
0x127c   : > { %v7841_v22 = vadd.f32 %v12604_v8, %v7828_v21  ;;  %8035 = vrot.lane.b32.xlu2 %v7996_v35, %s12957_s24  ;;  %8083 = vrot.lane.b32.xlu1 %v8072_v41, %s12958_s23  ;;  %v7961_v62 = vpack.c.b16 %v9824_v27, %v9824_v27  ;;  %v8065_v58 = vpack.c.b16 %v9827_v7, %v9824_v27  ;;  %v9315_v21 = vld [vmem:[%s12887_s15 + $0x40] sm:$0xff]  ;;  %v9312_v35 = vld [vmem:[%s12887_s15 + $0x28] sm:$0xff]  ;;  %v12982_v27 = vld [vmem:[#allocation17_spill] sm:$0xff] }
0x127d   : > { %v8462_v41 = vpack.c.b16 %v12668_v54, %v12668_v54  ;;  %8530 = vmatpush.bf16.msrb.mxu2 %v9315_v21  ;;  %8351 = vmatpush.bf16.msrb.mxu0 %v9312_v35 }
0x127e   : > { %v7849_v50 = vadd.f32 %v7841_v22, %v12980_v14  ;;  %v7998_v12 = vshrl.u32 %v7961_v62, 16  ;;  %v8001_v39 = vshll.u32 %v7961_v62, 16  ;;  %v8073_v16 = vrot.slane %v8065_v58, 5 }
0x127f   : > { %v7723_v2 = vpop.f32.mrf.mxu2  ;;  %v8464_v17 = vshrl.u32 %v8462_v41, 16 }
0x1280   : > { %v7876_v20 = vpack.c.bf16 %v7849_v50, %v7849_v50  ;;  %v7734_v42 = vadd.f32 %v7723_v2, %v7641_v26  ;;  %v8000_v53 = vrot.slane %v7998_v12, 4  ;;  %v8003_v31 = vrot.slane %v8001_v39, 5  ;;  %v7578_v23 = vpop.f32.mrf.mxu0 }
0x1281   : > { %v9976_v33 = vld [vmem:[#allocation2 + $0x40] sm:$0xff]   ;;  %v7643_v30 = vadd.f32 %v7642_v43, %v7578_v23  ;;  %v9840_v12 = vunpack.c.h.b16 %v9978_v49 }
0x1282   : > { %7884 = vst.msk [vmem:[#allocation2 + $0x4c] sm:$0xf] %vm548_vm0, %v7876_v20  ;;  %v7829_v19 = vadd.f32 %v7818_v48, %v7734_v42  ;;  %v8004_v11 = vor.u32 %v8003_v31, %v8000_v53  ;;  %v9831_v9 = vunpack.c.l.b16 %v9976_v33  ;;  %v8074_v57 = vrot.slane %v9976_v33, 5  ;;  %v9311_v49 = vld [vmem:[%s12887_s15 + $0x20] sm:$0xff] }
0x1283   : > { %v8467_v48 = vshll.u32 %v8462_v41, 16  ;;  %v8466_v53 = vrot.slane %v8464_v17, 4  ;;  %8352 = vmatpush.bf16.msrb.mxu0 %v9311_v49 }
0x1284   : > { %v7842_v59 = vadd.f32 %v12604_v8, %v7829_v19  ;;  %8077 = vrot.lane.b32.xlu1 %v8069_v37, %s12958_s23  ;;  %8079 = vrot.lane.b32.xlu2 %v8070_v18, %s12958_s23  ;;  %v7962_v34 = vpack.c.b16 %v9831_v9, %v9831_v9  ;;  %v12659_v32 = vpack.c.b16 %v9831_v9, %v9828_v36  ;;  %v12693_v19 = vld [vmem:[#allocation2 + $0x68] sm:$0xff]  }
0x1285   : > { %8037 = vrot.lane.b32.xlu0 %v8004_v11, %s12957_s24  ;;  %v8469_v31 = vrot.slane %v8467_v48, 5  ;;  %v9851_v58 = vunpack.c.l.b16 %v12693_v19 }
0x1286   : > { %v7850_v52 = vadd.f32 %v7842_v59, %v12981_v38  ;;  %v8006_v25 = vshrl.u32 %v7962_v34, 16  ;;  %v8009_v44 = vshll.u32 %v7962_v34, 16 }
0x1287   : > { %v7725_v10 = vpop.f32.mrf.mxu2  ;;  %v8470_v9 = vor.u32 %v8469_v31, %v8466_v53 }
0x1288   : > { %v7877_v4 = vpack.c.bf16 %v7850_v52, %v7850_v52  ;;  %v7735_v29 = vadd.f32 %v7725_v10, %v7643_v30  ;;  %v8008_v0 = vrot.slane %v8006_v25, 4  ;;  %v8011_v56 = vrot.slane %v8009_v44, 5 }
0x1289   : > { %v12665_v51 = vld [vmem:[#allocation2 + $0x48] sm:$0xff]  }
0x128a   : > { %7885 = vst.msk [vmem:[#allocation2 + $0x58] sm:$0xf] %vm548_vm0, %v7877_v4  ;;  %v7830_v15 = vadd.f32 %v7820_v61, %v7735_v29  ;;  %v8012_v5 = vor.u32 %v8011_v56, %v8008_v0  ;;  %v9836_v46 = vunpack.c.h.b16 %v12665_v51  ;;  %v8476_v0 = vrot.slane %v12663_v28, 5  ;;  %v9314_v56 = vld [vmem:[%s12887_s15 + $0x38] sm:$0xff]  ;;  %v9308_v61 = vld [vmem:[%s12887_s15 + $0x8] sm:$0xff]  ;;  %v9313_v28 = vld [vmem:[%s12887_s15 + $0x30] sm:$0xff] }
0x128b   : > { %8531 = vmatpush.bf16.msrb.mxu2 %v9314_v56 }
0x128c   : > { %v7843_v60 = vadd.f32 %v12604_v8, %v7830_v15  ;;  %8039 = vrot.lane.b32.xlu1 %v8012_v5, %s12957_s24  ;;  %8085 = vrot.lane.b32.xlu2 %v8073_v16, %s12958_s23  ;;  %v7963_v55 = vpack.c.b16 %v9836_v46, %v9836_v46  ;;  %v9309_v8 = vld [vmem:[%s12887_s15 + $0x10] sm:$0xff]  ;;  %v8067_v62 = vpack.c.b16 %v9839_v6, %v9836_v46  ;;  %v8030_v15 = vpop.permute.xlu2 %8029  ;;  %v9310_v16 = vld [vmem:[%s12887_s15 + $0x18] sm:$0xff] }
0x128d   : > { %8087 = vrot.lane.b32.xlu0 %v8074_v57, %s12958_s23  ;;  %8433 = vmatpush.bf16.msrb.mxu1 %v9309_v8  ;;  %v9307_v46 = vld [vmem:[%s12887_s15] sm:$0xff] }
0x128e   : > { %v7851_v47 = vadd.f32 %v7843_v60, %v12982_v27  ;;  %v8014_v63 = vshrl.u32 %v7963_v55, 16  ;;  %v8017_v22 = vshll.u32 %v7963_v55, 16  ;;  %v8075_v36 = vrot.slane %v8067_v62, 5  ;;  %8353 = vmatpush.bf16.msrb.mxu0 %v9310_v16 }
0x128f   : > { %8532 = vmatpush.bf16.msrb.mxu2 %v9313_v28 }
0x1290   : > { %v7878_v14 = vpack.c.bf16 %v7851_v47, %v7851_v47  ;;  %v8016_v50 = vrot.slane %v8014_v63, 4  ;;  %v8019_v26 = vrot.slane %v8017_v22, 5 }
0x1291   : > { %v9979_v39 = vld [vmem:[#allocation2 + $0x58] sm:$0xff]   ;;  %8434 = vmatpush.bf16.msrb.mxu1 %v9308_v61 }
0x1292   : > { %7886 = vst.msk [vmem:[#allocation2 + $0x64] sm:$0xf] %vm548_vm0, %v7878_v14  ;;  %v8020_v2 = vor.u32 %v8019_v26, %v8016_v50  ;;  %v9843_v37 = vunpack.c.l.b16 %v9979_v39  ;;  %v8076_v59 = vrot.slane %v9979_v39, 5 }
0x1294   : > { %8041 = vrot.lane.b32.xlu1 %v8020_v2, %s12957_s24  ;;  %v7964_v20 = vpack.c.b16 %v9843_v37, %v9843_v37  ;;  %v12690_v42 = vpack.c.b16 %v9843_v37, %v9840_v12 }
0x1295   : > { %8089 = vrot.lane.b32.xlu0 %v8075_v36, %s12958_s23  ;;  %8435 = vmatpush.bf16.msrb.mxu1 %v9307_v46 }
0x1296   : > { %v8022_v33 = vshrl.u32 %v7964_v20, 16  ;;  %v8025_v7 = vshll.u32 %v7964_v20, 16 }
0x1298   : > { %v8024_v18 = vrot.slane %v8022_v33, 4  ;;  %v8027_v11 = vrot.slane %v8025_v7, 5 }
0x1299   : > { %v12695_v23 = vld [vmem:[#allocation2 + $0x60] sm:$0xff]  }
0x129a   : > { %v8028_v34 = vor.u32 %v8027_v11, %v8024_v18  ;;  %v9848_v43 = vunpack.c.h.b16 %v12695_v23 }
0x129c   : > { %8091 = vrot.lane.b32.xlu1 %v8076_v59, %s12958_s23  ;;  %8043 = vrot.lane.b32.xlu2 %v8028_v34, %s12957_s24  ;;  %v8138_v38 = vpack.c.b16 %v9848_v43, %v9848_v43  ;;  %v8151_v52 = vpack.c.b16 %v9851_v58, %v9848_v43 }
0x129d   : > { %8471 = vrot.lane.b32.xlu0 %v8470_v9, %s12957_s24 }
0x129e   : > { %v8140_v30 = vshrl.u32 %v8138_v38, 16  ;;  %v8143_v25 = vshll.u32 %v8138_v38, 16  ;;  %v8152_v4 = vrot.slane %v8151_v52, 5 }
0x12a0   : > { %v8142_v44 = vrot.slane %v8140_v30, 4  ;;  %v8145_v10 = vrot.slane %v8143_v25, 5 }
0x12a2   : > { %v8146_v29 = vor.u32 %v8145_v10, %v8142_v44  ;;  %v8095_v44 = vsel %vm826_vm1, %v12606_v45, %v8030_v15 }
0x12a4   : > { %8153 = vrot.lane.b32.xlu1 %v8152_v4, %s12958_s23  ;;  %8147 = vrot.lane.b32.xlu2 %v8146_v29, %s12957_s24  ;;  %s10103_s24 = scalar_lea.hbm %s12889_s17, 128 }
0x12ac   : > { %8477 = vrot.lane.b32.xlu2 %v8476_v0, %s12958_s23  ;;  %s8601_s23 = scalar_lea.hbm %s12889_s17, %s9316_s21 }
0x12ad   : > { %s8604_s29 = sshll.u32 %s8601_s23, 4  ;;  %s8605_s29 = int_to_ptr.hbm [resolvable:$true] %s8604_s29 }
0x12ae   : > { %s10097_s0 = sshra.s32 %s8605_s29, 4  ;;  %s10098_s0 = int_to_ptr.hbm [resolvable:$true] %s10097_s0 }
0x12af   : > { %s10099_s19 = scalar_lea.hbm %s10098_s0, 64  ;;  %p10104_p0 = scmp.lt.s32.totalorder %s10098_s0, %s12889_s17 }
0x12b0   : > { %p10100_p11 = scmp.ne.s32.totalorder %s10098_s0, %s10099_s19  ;;  %p10105_p1 = scmp.lt.s32.totalorder %s10103_s24, %s10099_s19 }
0x12b2   : > { %p10101_p12 = pnand %p10100_p11, %p10286_p5  ;;  %p10106_p2 = por %p10105_p1, %p10104_p0 }
0x12b4   : > { %p10102_p13 = pneg %p10101_p12 }
0x12b6   : > { %p10107_p3 = pnand %p10106_p2, %p10102_p13 }
0x12d6   : > { %v8036_v5 = vpop.permute.xlu2 %8035 }
0x12d7   : > { %v8104_v36 = vsel %vm826_vm1, %v12641_v13, %v8036_v5 }
0x12de   : > { %v8080_v57 = vpop.permute.xlu2 %8079  ;;  %v8032_v6 = vpop.permute.xlu0 %8031 }
0x12df   : > { %v8098_v60 = vsel %vm826_vm1, %v12627_v40, %v8032_v6 }
0x12e0   : > { %v8120_v55 = vsel %vm851_vm2, %v8098_v60, %v8080_v57 }
0x12e1   : > { %v8169_v21 = vunpack.c.h.b16 %v8120_v55  ;;  %v8168_v35 = vunpack.c.l.b16 %v8120_v55 }
0x12e3   : > { %v8185_v41 = vpack.c.b16 %v8169_v21, %v8169_v21  ;;  %v8184_v47 = vpack.c.b16 %v8168_v35, %v8168_v35 }
0x12e5   : > { %v8206_v8 = vshrl.u32 %v8185_v41, 16  ;;  %v8201_v12 = vshrl.u32 %v8184_v47, 16  ;;  %v8209_v40 = vshll.u32 %v8185_v41, 16 }
0x12e6   : > { %v8034_v27 = vpop.permute.xlu1 %8033  ;;  %v8082_v22 = vpop.permute.xlu0 %8081 }
0x12e7   : > { %v8101_v63 = vsel %vm826_vm1, %v12630_v24, %v8034_v27  ;;  %v8208_v14 = vrot.slane %v8206_v8, 7  ;;  %v9187_v53 = vrot.slane %v8201_v12, 11  ;;  %v8086_v13 = vpop.permute.xlu2 %8085 }
0x12e8   : > { %v8122_v62 = vsel %vm851_vm2, %v8101_v63, %v8082_v22 }
0x12e9   : > { %v8170_v50 = vunpack.c.l.b16 %v8122_v62  ;;  %v8171_v26 = vunpack.c.h.b16 %v8122_v62  ;;  %v8211_v48 = vor.u32 %v8209_v40, %v8208_v14 }
0x12eb   : > { %v8186_v39 = vpack.c.b16 %v8170_v50, %v8170_v50  ;;  %v8187_v17 = vpack.c.b16 %v8171_v26, %v8171_v26  ;;  %v8212_v11 = vsel %vm10489_vm5, %v9187_v53, %v8211_v48 }
0x12ec   : > { %v12737_v38 = vunpack.c.l.b16 %v8212_v11 }
0x12ed   : > { %v8214_v2 = vshrl.u32 %v8186_v39, 16  ;;  %v8219_v37 = vshrl.u32 %v8187_v17, 16  ;;  %v8222_v24 = vshll.u32 %v8187_v17, 16 }
0x12ee   : > { %v8084_v20 = vpop.permute.xlu1 %8083 }
0x12ef   : > { %v8221_v31 = vrot.slane %v8219_v37, 7  ;;  %v8124_v33 = vsel %vm851_vm2, %v8104_v36, %v8084_v20  ;;  %v9188_v9 = vrot.slane %v8214_v2, 11 }
0x12f0   : > { %v8172_v7 = vunpack.c.l.b16 %v8124_v33  ;;  %v8173_v18 = vunpack.c.h.b16 %v8124_v33 }
0x12f1   : > { %v8224_v59 = vor.u32 %v8222_v24, %v8221_v31 }
0x12f2   : > { %v8188_v34 = vpack.c.b16 %v8172_v7, %v8172_v7  ;;  %v8189_v43 = vpack.c.b16 %v8173_v18, %v8173_v18 }
0x12f3   : > { %v8225_v58 = vsel %vm10489_vm5, %v9188_v9, %v8224_v59 }
0x12f4   : > { %v8305_v52 = vunpack.c.l.b16 %v8225_v58  ;;  %v8227_v30 = vshrl.u32 %v8188_v34, 16  ;;  %v8232_v25 = vshrl.u32 %v8189_v43, 16  ;;  %v8235_v29 = vshll.u32 %v8189_v43, 16 }
0x12f6   : > { %v8312_v10 = vpack.c.b16 %v8305_v52, %v12737_v38  ;;  %v8234_v4 = vrot.slane %v8232_v25, 7  ;;  %v8078_v0 = vpop.permute.xlu1 %8077  ;;  %v9189_v56 = vrot.slane %v8227_v30, 11  ;;  %v8044_v8 = vpop.permute.xlu2 %8043 }
0x12f7   : > { %v8118_v49 = vsel %vm851_vm2, %v8095_v44, %v8078_v0  ;;  %v8038_v61 = vpop.permute.xlu0 %8037 }
0x12f8   : > { %v8237_v5 = vor.u32 %v8235_v29, %v8234_v4  ;;  %v8376_v28 = vunpack.c.l.b16 %v8118_v49  ;;  %v8377_v16 = vunpack.c.h.b16 %v8118_v49  ;;  %v8107_v46 = vsel %vm826_vm1, %v12645_v3, %v8038_v61  ;;  %9207 = vmatmul.msk.bf16.vlgmr.msrb.gmra.mxu0 %vm1072_vm6, %v8312_v10 }
0x12f9   : > { %v8126_v57 = vsel %vm851_vm2, %v8107_v46, %v8086_v13  ;;  %v8116_v46 = vsel %vm826_vm1, %v12690_v42, %v8044_v8 }
0x12fa   : > { %v8238_v45 = vsel %vm10489_vm5, %v9189_v56, %v8237_v5  ;;  %v8378_v15 = vpack.c.b16 %v8376_v28, %v8376_v28  ;;  %v8379_v6 = vpack.c.b16 %v8377_v16, %v8377_v16  ;;  %v8174_v60 = vunpack.c.l.b16 %v8126_v57 }
0x12fb   : > { %v8306_v55 = vunpack.c.l.b16 %v8238_v45  ;;  %v8175_v21 = vunpack.c.h.b16 %v8126_v57 }
0x12fc   : > { %v8381_v35 = vshrl.u32 %v8378_v15, 16  ;;  %v8386_v41 = vshrl.u32 %v8379_v6, 16  ;;  %v8190_v27 = vpack.c.b16 %v8174_v60, %v8174_v60  ;;  %v8389_v22 = vshll.u32 %v8379_v6, 16 }
0x12fd   : > { %v12749_v47 = vpack.c.b16 %v8306_v55, %v8305_v52  ;;  %v8191_v63 = vpack.c.b16 %v8175_v21, %v8175_v21 }
0x12fe   : > { %v8388_v3 = vrot.slane %v8386_v41, 7  ;;  %v8040_v62 = vpop.permute.xlu1 %8039  ;;  %v9211_v12 = vrot.slane %v8381_v35, 11  ;;  %v8240_v39 = vshrl.u32 %v8190_v27, 16  ;;  %v8148_v9 = vpop.permute.xlu2 %8147 }
0x12ff   : > { %v8245_v14 = vshrl.u32 %v8191_v63, 16  ;;  %v8110_v50 = vsel %vm826_vm1, %v12659_v32, %v8040_v62  ;;  %v8088_v26 = vpop.permute.xlu0 %8087  ;;  %9241 = vmatmul.msk.bf16.vlgmr.msrb.gmra.mxu2 %vm1072_vm6, %v12749_v47  ;;  %v8248_v2 = vshll.u32 %v8191_v63, 16 }
0x1300   : > { %v8391_v40 = vor.u32 %v8389_v22, %v8388_v3  ;;  %v8128_v17 = vsel %vm851_vm2, %v8110_v50, %v8088_v26  ;;  %v9190_v33 = vrot.slane %v8240_v39, 11  ;;  %v8157_v26 = vsel %vm826_vm1, %v12695_v23, %v8148_v9 }
0x1301   : > { %v8247_v48 = vrot.slane %v8245_v14, 7  ;;  %v8176_v37 = vunpack.c.l.b16 %v8128_v17  ;;  %v8177_v36 = vunpack.c.h.b16 %v8128_v17 }
0x1302   : > { %v8392_v20 = vsel %vm10489_vm5, %v9211_v12, %v8391_v40 }
0x1303   : > { %v8393_v53 = vunpack.c.l.b16 %v8392_v20  ;;  %v8250_v31 = vor.u32 %v8248_v2, %v8247_v48  ;;  %v8192_v24 = vpack.c.b16 %v8176_v37, %v8176_v37  ;;  %v8193_v32 = vpack.c.b16 %v8177_v36, %v8177_v36 }
0x1305   : > { %v8394_v7 = vpack.c.b16 %v12737_v38, %v8393_v53  ;;  %v8253_v18 = vshrl.u32 %v8192_v24, 16  ;;  %v8258_v11 = vshrl.u32 %v8193_v32, 16  ;;  %v8251_v34 = vsel %vm10489_vm5, %v9190_v33, %v8250_v31 }
0x1306   : > { %v8042_v59 = vpop.permute.xlu1 %8041  ;;  %v8261_v58 = vshll.u32 %v8193_v32, 16  ;;  %v8307_v30 = vunpack.c.l.b16 %v8251_v34  ;;  %v9852_v38 = vunpack.c.h.b16 %v12693_v19  ;;  %v8478_v45 = vpop.permute.xlu2 %8477 }
0x1307   : > { %v8260_v43 = vrot.slane %v8258_v11, 7  ;;  %v8113_v13 = vsel %vm826_vm1, %v12665_v51, %v8042_v59  ;;  %v8090_v52 = vpop.permute.xlu0 %8089  ;;  %9224 = vmatmul.msk.bf16.vlgmr.msrb.gmra.mxu1 %vm1072_vm6, %v8394_v7  ;;  %v9191_v25 = vrot.slane %v8253_v18, 11 }
0x1308   : > { %v8130_v44 = vsel %vm851_vm2, %v8113_v13, %v8090_v52  ;;  %v8313_v0 = vpack.c.b16 %v8307_v30, %v8306_v55  ;;  %v8461_v5 = vpack.c.b16 %v12668_v54, %v9852_v38 }
0x1309   : > { %v8263_v10 = vor.u32 %v8261_v58, %v8260_v43  ;;  %v8178_v4 = vunpack.c.l.b16 %v8130_v44  ;;  %v8179_v29 = vunpack.c.h.b16 %v8130_v44 }
0x130a   : > { %9208 = vmatmul.msk.bf16.gmra.mxu0 %vm1072_vm6, %v8313_v0 }
0x130b   : > { %v8264_v56 = vsel %vm10489_vm5, %v9191_v25, %v8263_v10  ;;  %v8194_v49 = vpack.c.b16 %v8178_v4, %v8178_v4  ;;  %v8195_v61 = vpack.c.b16 %v8179_v29, %v8179_v29 }
0x130c   : > { %v8308_v51 = vunpack.c.l.b16 %v8264_v56 }
0x130d   : > { %v8266_v28 = vshrl.u32 %v8194_v49, 16  ;;  %v8271_v16 = vshrl.u32 %v8195_v61, 16  ;;  %v8274_v6 = vshll.u32 %v8195_v61, 16 }
0x130e   : > { %v8092_v19 = vpop.permute.xlu1 %8091  ;;  %v8396_v57 = vpack.c.b16 %v8308_v51, %v8307_v30 }
0x130f   : > { %v8273_v15 = vrot.slane %v8271_v16, 7  ;;  %v8132_v60 = vsel %vm851_vm2, %v8116_v46, %v8092_v19  ;;  %v8472_v55 = vpop.permute.xlu0 %8471  ;;  %v9192_v54 = vrot.slane %v8266_v28, 11  ;;  %v12799_v28 = vld [vmem:[%s12888_s16] ss:$0 sm:$0xff] }
0x1310   : > { %v8180_v21 = vunpack.c.l.b16 %v8132_v60  ;;  %v8181_v35 = vunpack.c.h.b16 %v8132_v60  ;;  %9242 = vmatmul.msk.bf16.gmra.mxu2 %vm1072_vm6, %v8396_v57  ;;  %v8481_v41 = vsel %vm826_vm1, %v8461_v5, %v8472_v55 }
0x1311   : > { %v8276_v27 = vor.u32 %v8274_v6, %v8273_v15  ;;  %v8483_v63 = vsel %vm851_vm2, %v8481_v41, %v8478_v45  ;;  %v10075_v45 = vld [vmem:[%s10305_s18] sm:$0xff] }
0x1312   : > { %v8196_v3 = vpack.c.b16 %v8180_v21, %v8180_v21  ;;  %v8197_v42 = vpack.c.b16 %v8181_v35, %v8181_v35  ;;  %v8486_v22 = vunpack.c.h.b16 %v8483_v63  ;;  %v8485_v48 = vunpack.c.l.b16 %v8483_v63  ;;  %v10076_v35 = vld [vmem:[%s10305_s18 + $0x8] sm:$0xff] }
0x1313   : > { %v8277_v8 = vsel %vm10489_vm5, %v9192_v54, %v8276_v27 }
0x1314   : > { %v8309_v62 = vunpack.c.l.b16 %v8277_v8  ;;  %v8279_v14 = vshrl.u32 %v8196_v3, 16  ;;  %v8284_v50 = vshrl.u32 %v8197_v42, 16  ;;  %v8287_v40 = vshll.u32 %v8197_v42, 16 }
0x1315   : > { %v8488_v2 = vpack.c.b16 %v8486_v22, %v8486_v22  ;;  %v8487_v7 = vpack.c.b16 %v8485_v48, %v8485_v48  ;;  %v10077_v22 = vld [vmem:[%s10305_s18 + $0x10] sm:$0xff] }
0x1316   : > { %v8286_v12 = vrot.slane %v8284_v50, 7  ;;  %v8154_v39 = vpop.permute.xlu1 %8153  ;;  %v8314_v37 = vpack.c.b16 %v8309_v62, %v8308_v51  ;;  %v9193_v36 = vrot.slane %v8279_v14, 11 }
0x1317   : > { %v8159_v17 = vsel %vm851_vm2, %v8157_v26, %v8154_v39  ;;  %9225 = vmatmul.msk.bf16.gmra.mxu1 %vm1072_vm6, %v12749_v47  ;;  %v8495_v18 = vshrl.u32 %v8488_v2, 16  ;;  %v8490_v43 = vshrl.u32 %v8487_v7, 16  ;;  %v8498_v13 = vshll.u32 %v8488_v2, 16 }
0x1318   : > { %v8289_v20 = vor.u32 %v8287_v40, %v8286_v12  ;;  %v8182_v53 = vunpack.c.l.b16 %v8159_v17  ;;  %v8183_v31 = vunpack.c.h.b16 %v8159_v17  ;;  %v10078_v17 = vld [vmem:[%s10305_s18 + $0x18] sm:$0xff] }
0x1319   : > { %v8497_v58 = vrot.slane %v8495_v18, 7  ;;  %v9228_v38 = vrot.slane %v8490_v43, 11 }
0x131a   : > { %v8290_v24 = vsel %vm10489_vm5, %v9193_v36, %v8289_v20  ;;  %v8198_v32 = vpack.c.b16 %v8182_v53, %v8182_v53  ;;  %v8199_v23 = vpack.c.b16 %v8183_v31, %v8183_v31  ;;  %9209 = vmatmul.msk.bf16.gmra.mxu0 %vm1072_vm6, %v8314_v37 }
0x131b   : > { %v8310_v33 = vunpack.c.l.b16 %v8290_v24  ;;  %v8500_v10 = vor.u32 %v8498_v13, %v8497_v58  ;;  %v10079_v24 = vld [vmem:[%s10305_s18 + $0x20] sm:$0xff] }
0x131c   : > { %v8292_v11 = vshrl.u32 %v8198_v32, 16  ;;  %v8297_v9 = vshrl.u32 %v8199_v23, 16  ;;  %v8300_v47 = vshll.u32 %v8199_v23, 16 }
0x131d   : > { %v8397_v59 = vpack.c.b16 %v8310_v33, %v8309_v62  ;;  %v8501_v4 = vsel %vm10489_vm5, %v9228_v38, %v8500_v10 }
0x131e   : > { %v8299_v34 = vrot.slane %v8297_v9, 7  ;;  %v9194_v52 = vrot.slane %v8292_v11, 11  ;;  %v8502_v0 = vunpack.c.l.b16 %v8501_v4 }
0x1320   : > { %v8302_v30 = vor.u32 %v8300_v47, %v8299_v34  ;;  %9243 = vmatmul.msk.bf16.gmra.mxu2 %vm1072_vm6, %v8397_v59 }
0x1322   : > { %v8303_v25 = vsel %vm10489_vm5, %v9194_v52, %v8302_v30  ;;  %v10081_v30 = vld [vmem:[%s10305_s18 + $0x30] sm:$0xff] }
0x1323   : > { %v8311_v44 = vunpack.c.l.b16 %v8303_v25 }
0x1325   : > { %v8315_v29 = vpack.c.b16 %v8311_v44, %v8310_v33  ;;  %v8503_v56 = vpack.c.b16 %v8502_v0, %v8311_v44 }
0x1327   : > { %9226 = vmatmul.msk.bf16.gmra.mxu1 %vm1072_vm6, %v8396_v57 }
0x132a   : > { %9210 = vmatmul.msk.bf16.gmra.mxu0 %vm1072_vm6, %v8315_v29 }
0x1330   : > { %9244 = vmatmul.msk.bf16.gmra.mxu2 %vm1072_vm6, %v8503_v56  ;;  %v10082_v56 = vld [vmem:[%s10305_s18 + $0x38] sm:$0xff] }
0x1337   : > { %9227 = vmatmul.msk.bf16.gmra.mxu1 %vm1072_vm6, %v8397_v59  ;;  %v10080_v59 = vld [vmem:[%s10305_s18 + $0x28] sm:$0xff] }
0x1375   : > { %v8355_v49 = vpop.f32.mrf.mxu0 }
0x137d   : > { %v8357_v61 = vpop.f32.mrf.mxu0 }
0x1382   : > { %v8534_v51 = vpop.f32.mrf.mxu2 }
0x1384   : > { %v8437_v5 = vpop.f32.mrf.mxu1 }
0x1385   : > { %v8438_v1 = vadd.f32 %v8437_v5, %v8355_v49 }
0x1387   : > { %v8554_v16 = vadd.f32 %v8534_v51, %v8438_v1  ;;  %v8360_v19 = vpop.f32.mrf.mxu0 }
0x1389   : > { %v8565_v46 = vadd.f32 %v12799_v28, %v8554_v16 }
0x138a   : > { %v8536_v57 = vpop.f32.mrf.mxu2 }
0x138b   : > { %v8573_v15 = vadd.f32 %v10075_v45, %v8565_v46 }
0x138c   : > { %v8439_v6 = vpop.f32.mrf.mxu1 }
0x138d   : > { %8581 = vst.msk [vmem:[%s12805_s1] sm:$0xff] %vm826_vm1, %v8573_v15  ;;  %v8440_v60 = vadd.f32 %v8439_v6, %v8357_v61 }
0x138f   : > { %v8555_v55 = vadd.f32 %v8536_v57, %v8440_v60  ;;  %v8362_v27 = vpop.f32.mrf.mxu0 }
0x1391   : > { %v8566_v21 = vadd.f32 %v12799_v28, %v8555_v55 }
0x1393   : > { %v8574_v41 = vadd.f32 %v10076_v35, %v8566_v21  ;;  %v8539_v54 = vpop.f32.mrf.mxu2 }
0x1394   : > { %v8442_v63 = vpop.f32.mrf.mxu1 }
0x1395   : > { %8582 = vst.msk [vmem:[%s12805_s1 + $0x8] sm:$0xff] %vm826_vm1, %v8574_v41  ;;  %v8443_v3 = vadd.f32 %v8442_v63, %v8360_v19 }
0x1397   : > { %v8556_v42 = vadd.f32 %v8539_v54, %v8443_v3  ;;  %v8365_v12 = vpop.f32.mrf.mxu0 }
0x1399   : > { %v8567_v8 = vadd.f32 %v12799_v28, %v8556_v42 }
0x139b   : > { %v8575_v62 = vadd.f32 %v10077_v22, %v8567_v8  ;;  %v8541_v14 = vpop.f32.mrf.mxu2 }
0x139c   : > { %v8444_v50 = vpop.f32.mrf.mxu1 }
0x139d   : > { %8583 = vst.msk [vmem:[%s12805_s1 + $0x10] sm:$0xff] %vm826_vm1, %v8575_v62  ;;  %v8445_v26 = vadd.f32 %v8444_v50, %v8362_v27 }
0x139f   : > { %v8557_v40 = vadd.f32 %v8541_v14, %v8445_v26  ;;  %v8367_v53 = vpop.f32.mrf.mxu0 }
0x13a1   : > { %v8568_v39 = vadd.f32 %v12799_v28, %v8557_v40 }
0x13a3   : > { %v8576_v48 = vadd.f32 %v10078_v17, %v8568_v39  ;;  %v8544_v2 = vpop.f32.mrf.mxu2 }
0x13a4   : > { %v8447_v37 = vpop.f32.mrf.mxu1 }
0x13a5   : > { %8584 = vst.msk [vmem:[%s12805_s1 + $0x18] sm:$0xff] %vm826_vm1, %v8576_v48  ;;  %v8448_v36 = vadd.f32 %v8447_v37, %v8365_v12 }
0x13a7   : > { %v8558_v20 = vadd.f32 %v8544_v2, %v8448_v36  ;;  %v8370_v9 = vpop.f32.mrf.mxu0 }
0x13a9   : > { %v8569_v31 = vadd.f32 %v12799_v28, %v8558_v20 }
0x13ab   : > { %v8577_v32 = vadd.f32 %v10079_v24, %v8569_v31  ;;  %v8546_v23 = vpop.f32.mrf.mxu2 }
0x13ac   : > { %v8449_v33 = vpop.f32.mrf.mxu1 }
0x13ad   : > { %8585 = vst.msk [vmem:[%s12805_s1 + $0x20] sm:$0xff] %vm826_vm1, %v8577_v32  ;;  %v8450_v7 = vadd.f32 %v8449_v33, %v8367_v53 }
0x13af   : > { %v8559_v18 = vadd.f32 %v8546_v23, %v8450_v7  ;;  %v8372_v44 = vpop.f32.mrf.mxu0 }
0x13b1   : > { %v8570_v11 = vadd.f32 %v12799_v28, %v8559_v18 }
0x13b3   : > { %v8578_v34 = vadd.f32 %v10080_v59, %v8570_v11  ;;  %v8549_v47 = vpop.f32.mrf.mxu2 }
0x13b4   : > { %v8452_v43 = vpop.f32.mrf.mxu1 }
0x13b5   : > { %8586 = vst.msk [vmem:[%s12805_s1 + $0x28] sm:$0xff] %vm826_vm1, %v8578_v34  ;;  %v8453_v58 = vadd.f32 %v8452_v43, %v8370_v9 }
0x13b7   : > { %v8560_v13 = vadd.f32 %v8549_v47, %v8453_v58 }
0x13b9   : > { %v8571_v52 = vadd.f32 %v12799_v28, %v8560_v13 }
0x13bb   : > { %v8579_v25 = vadd.f32 %v10081_v30, %v8571_v52  ;;  %v8551_v4 = vpop.f32.mrf.mxu2 }
0x13bc   : > { %v8454_v38 = vpop.f32.mrf.mxu1 }
0x13bd   : > { %8587 = vst.msk [vmem:[%s12805_s1 + $0x30] sm:$0xff] %vm826_vm1, %v8579_v25  ;;  %v8455_v10 = vadd.f32 %v8454_v38, %v8372_v44 }
0x13bf   : > { %v8561_v29 = vadd.f32 %v8551_v4, %v8455_v10 }
0x13c1   : > { %v8572_v0 = vadd.f32 %v12799_v28, %v8561_v29 }
0x13c3   : > { %v8580_v49 = vadd.f32 %v10082_v56, %v8572_v0 }
0x13c5   : > { %8588 = vst.msk [vmem:[%s12805_s1 + $0x38] sm:$0xff] %vm826_vm1, %v8580_v49 }
0x13c6   : > { %10110 = shalt.err (!%p10107_p3)
}
0x13c7   : > { %s10157_s18 = smov 128  }
0x13c8   : > { %9992 = dma.vmem_to_hbm [thread:$0]  (%p10286_p5), %s8603_s20, 1024, %s8605_s29, %s8590_s28, %s10157_s18, %s10157_s18, %s12969_s2  }
0x13c9 PF: > { %s12984_s26 = sld [smem:[#allocation8_spill]] }
0x13ca   : > { %s12985_s1 = sld [smem:[#allocation6_spill]] }
0x13cf   : > { %p9998_p4 = scmp.ge.s32.totalorder %s12984_s26, 2 }
0x13d0   : > { %s8619_s27 = sand.u32 1, %s12985_s1  }
0x13d1   : > { %p9995_p7 = pnand %p9998_p4, %p10290_p6  ;;  %s8620_s21 = scalar_lea.sflag [#allocation4], %s8619_s27 }
0x13d3   : > { %p9996_p8 = pneg %p9995_p7 }
0x13d5   : > { %10128 = dma.done.wait (%p9996_p8), %s8620_s21, 1024  }
0x13d6   : > { %10130 = vsyncadd (%p9996_p8), %s8620_s21, 4294966272  ;;  %s12987_s27 = sld [smem:[#allocation9_spill]]  ;;  %s12990_s24 = smov %s10137_s25 }
0x13d7   : > { %s12988_s0 = sld [smem:[#allocation7_spill]] }
0x13d8   : > { %s12989_s26 = sld [smem:[#allocation10_spill]] }
0x13dc   : > { %p27_p9 = scmp.ge.s32.totalorder %s12987_s27, 4  }
0x13dd   : > { %s12991_s25 = smov %s12988_s0 }
0x13de   :  { %29 = sbr.rel (!%p27_p9) target bundleno = 9 (0x9), region = 139 }
0x13e3   :  { %8626 = vsyncpa [#allocation4], 1 }
0x13e4   :  { %8628 = vsyncpa [#allocation4 + $0x1], 1 }

</bundles_post_ra>
